<compile_context>
chip_gen: v5e
topology: v5e:2x2
jax: 0.10.0
libtpu: 0.0.40
codegen_flags: <defaults>
</compile_context>

<pallas_src>
import functools

import numpy as np
import jax
import jax.numpy as jnp
from jax import lax
from jax.experimental import pallas as pl
from jax.experimental.pallas import tpu as pltpu

NCH = 85                       # channels per anchor: x, y, w, h, obj, 80 cls
MAX_TM = 1024                  # target rows per tile (multiple of 8)

ANCHOR_DICT = {
    76: [[28, 28], [46, 45], [64, 66]],
    38: [[102, 74], [78, 115], [132, 113]],
    19: [[149, 163], [174, 268], [257, 176]],
}


# ------------------------------ Pallas kernel --------------------------------

def _decode_kernel(x_ref, o_ref, *, size, stride, anchors, tm):
    """Fused decode + confidence multiply for one (TM, 85) tile of one image.

    Rows are ordered (grid_y, grid_x, anchor); the grid cell / anchor for every
    row is reconstructed from the global row index, so the only input stream is
    the raw logits.
    """
    x = x_ref[...]                                           # (TM, 85) logits
    i = pl.program_id(1)

    row = i * tm + lax.broadcasted_iota(jnp.int32, x.shape, 0)
    col = lax.broadcasted_iota(jnp.int32, x.shape, 1)
    rowf = row.astype(jnp.float32)

    # row = gy * (size*3) + gx * 3 + a   (float math; exact for these ranges)
    s3 = float(size * 3)
    gy = jnp.floor(rowf / s3)
    rem = rowf - gy * s3
    gx = jnp.floor(rem / 3.0)
    a = rem - gx * 3.0

    (aw0, ah0), (aw1, ah1), (aw2, ah2) = anchors
    anc_w = jnp.where(a < 0.5, aw0, jnp.where(a < 1.5, aw1, aw2))
    anc_h = jnp.where(a < 0.5, ah0, jnp.where(a < 1.5, ah1, ah2))

    grid_xy = jnp.where(col == 0, gx, gy)                    # col0->gx, col1->gy
    anc = jnp.where(col == 2, anc_w, anc_h)                  # col2->w,  col3->h

    sig = jax.nn.sigmoid(x)
    xy = (sig * 1.05 - 0.025 + grid_xy) * stride
    # mask logits before exp so non-box lanes cannot produce inf/NaN
    is_wh = (col == 2) | (col == 3)
    wh = jnp.exp(jnp.where(is_wh, x, 0.0)) * anc
    # fused `output[:, :, 5:] *= output[:, :, 4:5]`
    obj = sig[:, 4:5]
    rest = jnp.where(col >= 5, sig * obj, sig)

    o_ref[...] = jnp.where(col < 2, xy, jnp.where(col < 4, wh, rest))


def decode_pallas(x, *, size, stride, anchors, tm):
    """x: (batch, m_pad, 85) raw logits (rows ordered gy, gx, anchor)."""
    batch, m_pad, c = x.shape
    kern = functools.partial(_decode_kernel, size=size, stride=float(stride),
                             anchors=anchors, tm=tm)
    return pl.pallas_call(
        kern,
        out_shape=jax.ShapeDtypeStruct((batch, m_pad, c), jnp.float32),
        grid_spec=pltpu.PrefetchScalarGridSpec(
            num_scalar_prefetch=0,
            grid=(batch, m_pad // tm),
            in_specs=[pl.BlockSpec((None, tm, c), lambda b, i: (b, i, 0))],
            out_specs=pl.BlockSpec((None, tm, c), lambda b, i: (b, i, 0))),
        compiler_params=pltpu.CompilerParams(
            dimension_semantics=("parallel", "parallel")),
    )(x)


# ------------------------------ host-side NMS glue ---------------------------

def _nms_numpy(boxes, scores, conf_thresh, nms_thresh):
    """Exact numpy mirror of Yolo_Detector.NMS (greedy DIoU suppression)."""
    xy1 = boxes[:, :2] - boxes[:, 2:4] / 2.0
    xy2 = boxes[:, :2] + boxes[:, 2:4] / 2.0
    area = boxes[:, 2] * boxes[:, 3]
    order = np.argsort(-scores, kind="stable")
    confs = scores[order]
    order = order[confs > conf_thresh]
    keep = []
    while order.shape[0] > 0:
        a = order[0]
        keep.append(int(a))
        b = order
        inter = np.clip(np.minimum(xy2[a], xy2[b]) - np.maximum(xy1[a], xy1[b]),
                        0.0, None)
        outer = np.clip(np.maximum(xy2[a], xy2[b]) - np.minimum(xy1[a], xy1[b]),
                        0.0, None)
        area_i = inter[:, 0] * inter[:, 1]
        area_u = area[a] + area[b] - area_i
        r2 = np.sum((boxes[a, :2] - boxes[b, :2]) ** 2, axis=-1)
        c2 = np.sum(outer ** 2, axis=-1)
        with np.errstate(divide="ignore", invalid="ignore"):
            diou = area_i / area_u - r2 / c2
        order = order[diou < nms_thresh]
    return keep


# ------------------------------ module port ----------------------------------

class YoloDetectorPallas:
    """Port of PyTorch Yolo_Detector.forward."""

    def __init__(self, batch):
        self.batch = batch
        self.anchor_dict = ANCHOR_DICT

    @staticmethod
    def _tile_rows(m):
        """Rows per tile (multiple of 8, capped near MAX_TM, minimal padding)."""
        ntiles = -(-m // MAX_TM)
        tm = ((-(-m // ntiles)) + 7) // 8 * 8
        return tm, ntiles * tm

    def __call__(self, predict, conf_thresh=0.4, nms_thresh=0.6):
        decoded = []
        for output in predict:
            batch = output.shape[0]
            size = output.shape[2]
            stride = 608 // size
            m = size * size * 3
            tm, m_pad = self._tile_rows(m)
            anchors = tuple(tuple(float(v) for v in a)
                            for a in self.anchor_dict[size])

            # (b, 255, s, s) -> (b, s, s, 3, 85) -> rows, padded to tile mult.
            x = jnp.transpose(output.reshape(batch, 3, NCH, size, size),
                              (0, 3, 4, 1, 2)).reshape(batch, m, NCH)
            x = jnp.pad(x.astype(jnp.float32), ((0, 0), (0, m_pad - m), (0, 0)))
            dec = decode_pallas(x, size=size, stride=stride,
                                anchors=anchors, tm=tm)
            decoded.append(dec[:, :m, :])

        # (batch, total_boxes, 85); class scores already multiplied by obj.
        out_all = jnp.concatenate(decoded, axis=1)
        out_np = np.asarray(jax.device_get(out_all))

        detections = []
        for b in range(self.batch):
            boxes = out_np[b, :, :4]
            rows = []
            for c in range(80):
                scores = out_np[b, :, 5 + c]
                keep = _nms_numpy(boxes, scores, conf_thresh, nms_thresh)
                for k in keep:
                    rows.append([float(c),
                                 float(boxes[k, 0]), float(boxes[k, 1]),
                                 float(boxes[k, 2]), float(boxes[k, 3]),
                                 float(scores[k])])
            det = np.asarray(rows, dtype=np.float32).reshape(-1, 6)
            detections.append(jnp.asarray(det))
        return detections


# ------------------------------ demo ------------------------------------------

if __name__ == "__main__":
    batch = 2
    sizes = (38, 19)                       # small but module-consistent scales

    key = jax.random.PRNGKey(0)
    keys = jax.random.split(key, len(sizes))

    predict = []
    for k, s in zip(keys, sizes):
        p = 0.5 * jax.random.normal(k, (batch, 3 * NCH, s, s), dtype=jnp.float32)
        # push objectness logits down so random noise stays below conf_thresh
        obj_ch = jnp.asarray([a * NCH + 4 for a in range(3)])
        p = p.at[:, obj_ch, :, :].add(-4.0)
        predict.append(p)

    # plant a few confident detections to exercise the host-side NMS path
    # (batch, scale_idx, anchor, y, x, class)
    plants = [(0, 0, 0, 10, 12, 3), (0, 0, 1, 10, 13, 3), (1, 1, 2, 5, 7, 41)]
    for (b, si, a, y, xc, c) in plants:
        p = predict[si]
        p = p.at[b, a * NCH + 4, y, xc].set(6.0)       # objectness logit
        p = p.at[b, a * NCH + 5 + c, y, xc].set(6.0)   # class logit
        predict[si] = p

    detector = YoloDetectorPallas(batch)
    detections = detector(predict)
    jax.block_until_ready(detections)
    print("KERNEL_OK")
</pallas_src>

<mosaic_0001>
module attributes {stable_mosaic.version = 11 : i64} {
  func.func @_decode_kernel(%arg0: i32, %arg1: i32, %arg2: memref<1x872x85xf32, #tpu.memory_space<vmem>>, %arg3: memref<1x872x85xf32, #tpu.memory_space<vmem>>) attributes {dimension_semantics = [#tpu.dimension_semantics<parallel>, #tpu.dimension_semantics<parallel>], iteration_bounds = array<i64: 2, 5>, scalar_prefetch = 0 : i64, scratch_operands = 0 : i64, tpu.core_type = #tpu.core_type<tc>, window_params = [{transform_indices = @transform_0, window_bounds = array<i64: 1, 872, 85>}, {transform_indices = @transform_1, window_bounds = array<i64: 1, 872, 85>}]} {
    %c0 = arith.constant 0 : index
    %c0_0 = arith.constant 0 : index
    %c0_1 = arith.constant 0 : index
    %0 = vector.load %arg2[%c0, %c0_0, %c0_1] : memref<1x872x85xf32, #tpu.memory_space<vmem>>, vector<1x872x85xf32>
    %1 = vector.shape_cast %0 : vector<1x872x85xf32> to vector<872x85xf32>
    %c872_i32 = arith.constant 872 : i32
    %2 = arith.muli %arg1, %c872_i32 : i32
    %3 = tpu.iota {dimensions = array<i32: 0>} : vector<872x85xi32>
    %4 = vector.broadcast %2 : i32 to vector<872x85xi32>
    %5 = arith.addi %4, %3 : vector<872x85xi32>
    %6 = tpu.iota {dimensions = array<i32: 1>} : vector<872x85xi32>
    %7 = arith.sitofp %5 : vector<872x85xi32> to vector<872x85xf32>
    %cst = arith.constant 1.140000e+02 : f32
    %8 = vector.broadcast %cst : f32 to vector<872x85xf32>
    %9 = arith.divf %7, %8 : vector<872x85xf32>
    %10 = math.floor %9 : vector<872x85xf32>
    %cst_2 = arith.constant 1.140000e+02 : f32
    %11 = vector.broadcast %cst_2 : f32 to vector<872x85xf32>
    %12 = arith.mulf %10, %11 : vector<872x85xf32>
    %13 = arith.subf %7, %12 : vector<872x85xf32>
    %cst_3 = arith.constant 3.000000e+00 : f32
    %14 = vector.broadcast %cst_3 : f32 to vector<872x85xf32>
    %15 = arith.divf %13, %14 : vector<872x85xf32>
    %16 = math.floor %15 : vector<872x85xf32>
    %cst_4 = arith.constant 3.000000e+00 : f32
    %17 = vector.broadcast %cst_4 : f32 to vector<872x85xf32>
    %18 = arith.mulf %16, %17 : vector<872x85xf32>
    %19 = arith.subf %13, %18 : vector<872x85xf32>
    %cst_5 = arith.constant 5.000000e-01 : f32
    %20 = vector.broadcast %cst_5 : f32 to vector<872x85xf32>
    %21 = arith.cmpf olt, %19, %20 : vector<872x85xf32>
    %cst_6 = arith.constant 1.500000e+00 : f32
    %22 = vector.broadcast %cst_6 : f32 to vector<872x85xf32>
    %23 = arith.cmpf olt, %19, %22 : vector<872x85xf32>
    %cst_7 = arith.constant 7.800000e+01 : f32
    %cst_8 = arith.constant 1.320000e+02 : f32
    %24 = vector.broadcast %cst_7 : f32 to vector<872x85xf32>
    %25 = vector.broadcast %cst_8 : f32 to vector<872x85xf32>
    %26 = arith.select %23, %24, %25 : vector<872x85xi1>, vector<872x85xf32>
    %cst_9 = arith.constant 1.020000e+02 : f32
    %27 = vector.broadcast %cst_9 : f32 to vector<872x85xf32>
    %28 = arith.select %21, %27, %26 : vector<872x85xi1>, vector<872x85xf32>
    %cst_10 = arith.constant 5.000000e-01 : f32
    %29 = vector.broadcast %cst_10 : f32 to vector<872x85xf32>
    %30 = arith.cmpf olt, %19, %29 : vector<872x85xf32>
    %cst_11 = arith.constant 1.500000e+00 : f32
    %31 = vector.broadcast %cst_11 : f32 to vector<872x85xf32>
    %32 = arith.cmpf olt, %19, %31 : vector<872x85xf32>
    %cst_12 = arith.constant 1.150000e+02 : f32
    %cst_13 = arith.constant 1.130000e+02 : f32
    %33 = vector.broadcast %cst_12 : f32 to vector<872x85xf32>
    %34 = vector.broadcast %cst_13 : f32 to vector<872x85xf32>
    %35 = arith.select %32, %33, %34 : vector<872x85xi1>, vector<872x85xf32>
    %cst_14 = arith.constant 7.400000e+01 : f32
    %36 = vector.broadcast %cst_14 : f32 to vector<872x85xf32>
    %37 = arith.select %30, %36, %35 : vector<872x85xi1>, vector<872x85xf32>
    %c0_i32 = arith.constant 0 : i32
    %38 = vector.broadcast %c0_i32 : i32 to vector<872x85xi32>
    %39 = arith.cmpi eq, %6, %38 : vector<872x85xi32>
    %40 = arith.select %39, %16, %10 : vector<872x85xi1>, vector<872x85xf32>
    %c2_i32 = arith.constant 2 : i32
    %41 = vector.broadcast %c2_i32 : i32 to vector<872x85xi32>
    %42 = arith.cmpi eq, %6, %41 : vector<872x85xi32>
    %43 = arith.select %42, %28, %37 : vector<872x85xi1>, vector<872x85xf32>
    %44 = arith.negf %1 : vector<872x85xf32>
    %45 = math.exp %44 : vector<872x85xf32>
    %cst_15 = arith.constant 1.000000e+00 : f32
    %46 = vector.broadcast %cst_15 : f32 to vector<872x85xf32>
    %47 = arith.addf %46, %45 : vector<872x85xf32>
    %48 = arith.divf %46, %47 : vector<872x85xf32>
    %cst_16 = arith.constant 1.050000e+00 : f32
    %49 = vector.broadcast %cst_16 : f32 to vector<872x85xf32>
    %50 = arith.mulf %48, %49 : vector<872x85xf32>
    %cst_17 = arith.constant 2.500000e-02 : f32
    %51 = vector.broadcast %cst_17 : f32 to vector<872x85xf32>
    %52 = arith.subf %50, %51 : vector<872x85xf32>
    %53 = arith.addf %52, %40 : vector<872x85xf32>
    %cst_18 = arith.constant 1.600000e+01 : f32
    %54 = vector.broadcast %cst_18 : f32 to vector<872x85xf32>
    %55 = arith.mulf %53, %54 : vector<872x85xf32>
    %c2_i32_19 = arith.constant 2 : i32
    %56 = vector.broadcast %c2_i32_19 : i32 to vector<872x85xi32>
    %57 = arith.cmpi eq, %6, %56 : vector<872x85xi32>
    %c3_i32 = arith.constant 3 : i32
    %58 = vector.broadcast %c3_i32 : i32 to vector<872x85xi32>
    %59 = arith.cmpi eq, %6, %58 : vector<872x85xi32>
    %60 = arith.ori %57, %59 : vector<872x85xi1>
    %cst_20 = arith.constant 0.000000e+00 : f32
    %61 = vector.broadcast %cst_20 : f32 to vector<872x85xf32>
    %62 = arith.select %60, %1, %61 : vector<872x85xi1>, vector<872x85xf32>
    %63 = math.exp %62 : vector<872x85xf32>
    %64 = arith.mulf %63, %43 : vector<872x85xf32>
    %65 = vector.extract_strided_slice %48 {offsets = [0, 4], sizes = [872, 1], strides = [1, 1]} : vector<872x85xf32> to vector<872x1xf32>
    %c5_i32 = arith.constant 5 : i32
    %66 = vector.broadcast %c5_i32 : i32 to vector<872x85xi32>
    %67 = arith.cmpi sge, %6, %66 : vector<872x85xi32>
    %68 = vector.broadcast %65 : vector<872x1xf32> to vector<872x85xf32>
    %69 = arith.mulf %48, %68 : vector<872x85xf32>
    %70 = arith.select %67, %69, %48 : vector<872x85xi1>, vector<872x85xf32>
    %c2_i32_21 = arith.constant 2 : i32
    %71 = vector.broadcast %c2_i32_21 : i32 to vector<872x85xi32>
    %72 = arith.cmpi slt, %6, %71 : vector<872x85xi32>
    %c4_i32 = arith.constant 4 : i32
    %73 = vector.broadcast %c4_i32 : i32 to vector<872x85xi32>
    %74 = arith.cmpi slt, %6, %73 : vector<872x85xi32>
    %75 = arith.select %74, %64, %70 : vector<872x85xi1>, vector<872x85xf32>
    %76 = arith.select %72, %55, %75 : vector<872x85xi1>, vector<872x85xf32>
    %c0_22 = arith.constant 0 : index
    %c0_23 = arith.constant 0 : index
    %c0_24 = arith.constant 0 : index
    %77 = vector.load %arg3[%c0_22, %c0_23, %c0_24] : memref<1x872x85xf32, #tpu.memory_space<vmem>>, vector<1x872x85xf32>
    %78 = vector.shape_cast %77 : vector<1x872x85xf32> to vector<872x85xf32>
    %79 = vector.shape_cast %76 : vector<872x85xf32> to vector<1x872x85xf32>
    tpu.vector_store %arg3[%c0_22, %c0_23, %c0_24], %79 {strides = array<i32>} : memref<1x872x85xf32, #tpu.memory_space<vmem>>, vector<1x872x85xf32>,
    return
  }
  func.func @transform_0(%arg0: i32, %arg1: i32) -> (i32, i32, i32) {
    %c0_i32 = arith.constant 0 : i32
    %c0_i32_0 = arith.constant 0 : i32
    return %arg0, %arg1, %c0_i32 : i32, i32, i32
  }
  func.func @transform_1(%arg0: i32, %arg1: i32) -> (i32, i32, i32) {
    %c0_i32 = arith.constant 0 : i32
    %c0_i32_0 = arith.constant 0 : i32
    return %arg0, %arg1, %c0_i32 : i32, i32, i32
  }
}

</mosaic_0001>

<bundles_post_ra>
// kernel: tpu_custom_call.1
= control target key start
LH: loop header
LB: loop body
LE: loop exit
PB: predicated region body
PF: predicated region fallthrough
CT: control target
= control target key end

     0   :  { %s7584_s6 = smov 0   ;;  %s7586_s7 = smov 0   ;;  %s15094_s0 = inlined_call_operand.vmem [shape: f32[2,4360,85], index: 0, kind: input, shape index: {}]   ;;  %s15095_s1 = inlined_call_operand.vmem [shape: f32[2,4360,85], index: 1, kind: output, shape index: {}]  }
   0x1   :  { %s7588_s8 = smov 0   ;;  %s7590_s9 = smov 0  }
   0x2   :  { %s7592_s10 = smov 0  }
   0x3 LB: > { %s20_s11 = sadd.s32 1, %s7559_s8  ;;  %s23_s12 = sadd.s32 1, %s7563_s9  ;;  %s7567_s10 = sphi %s7592_s10, %s11_s10   ;;  %s7563_s9 = sphi %s7590_s9, %s17050_s9   ;;  %s7559_s8 = sphi %s7588_s8, %s17049_s8   ;;  %s7555_s7 = sphi %s7586_s7, %s17048_s7   ;;  %s7551_s6 = sphi %s7584_s6, %s17047_s6  }
   0x4   : > { %p21_p0 = scmp.ge.s32.totalorder %s20_s11, 5  ;;  %p6490_p1 = scmp.ge.s32.totalorder %s7567_s10, 1 }
   0x5   : > { %p108_p2 = scmp.lt.s32.totalorder %s7567_s10, 11 }
   0x6   : > { %s17052_s11 = smov (%p21_p0, %s20_s11), 0  ;;  %s17054_s12 = smov (!%p21_p0, %s23_s12), %s7563_s9 }
   0x7   : > { %p109_p3 = pnand %p6490_p1, %p108_p2  ;;  %p25_p4 = scmp.ge.s32.totalorder %s17054_s12, 2 }
   0x9   : > { %s17056_s12 = smov (%p25_p4, %s17054_s12), 0  ;;  %112 = sbr.rel (%p109_p3) target bundleno = 1359 (0x54f), region = 24 }
   0xe   : > { %s136_s13 = smul.u32 109, %s7551_s6  ;;  %p137_p5 = scmp.lt.s32.totalorder %s7555_s7, 1  ;;  %v266_v0 = vlaneseq  ;;  %v7569_v1 = vmov 4   ;;  %v7570_v2 = vmov 114.0   ;;  %v7571_v3 = vmov 3.0  }
   0xf   : > { %6761 = vset.pattern.permute.xlu2 %v7569_v1  ;;  %6760 = vset.pattern.permute.xlu1 %v7569_v1  ;;  %6762 = vrcp.f32 %v7570_v2  ;;  %s265_s14 = smul.u32 872, %s7551_s6 }
  0x10   : > { %6759 = vset.pattern.permute.xlu0 %v7569_v1  ;;  %s17058_s7 = smov (!%p137_p5, %s7555_s7), 1  ;;  %6764 = vrcp.f32 %v7571_v3  ;;  %p139_p6 = scmp.lt.s32.totalorder %s136_s13, 544  ;;  %v7619_v4 = vshrl.u32 %v266_v0, 7  ;;  %v7672_v53 = vand.u32 127, %v266_v0 }
  0x11   : > { %s6713_s15 = smul.u32 545, %s17058_s7  ;;  %v7625_v8 = vstv %s265_s14 }
  0x12   : > { %s17060_s13 = smov (!%p139_p6, %s136_s13), 544  ;;  %v271_v5 = vadd.s32 32, %v7619_v4  ;;  %v269_v24 = vadd.s32 16, %v7619_v4  ;;  %v7644_v27 = vadd.s32 %v7625_v8, %v7619_v4  ;;  %v272_v39 = vadd.s32 40, %v7619_v4 }
  0x13   : > { %s7622_s16 = sadd.s32 %s6713_s15, %s17060_s13  ;;  %vm2137_vm2 = vcmp.eq.s32.totalorder %v7672_v53, 0 }
  0x14   : > { %s6491_s17 = sshll.u32 %s7622_s16, 3  ;;  %v381_v10 = vadd.s32 %v7625_v8, %v271_v5  ;;  %v379_v30 = vadd.s32 %v7625_v8, %v269_v24  ;;  %v488_v33 = vcvt.s32.f32 %v7644_v27  ;;  %v7676_v54 = vadd.s32 %v7625_v8, %v272_v39 }
  0x15   : > { %v6763_v6 = vpop.eup %6762  ;;  %s7632_s20 = scalar_lea.vmem %s15094_s0, %s6491_s17  ;;  %s9279_s23 = scalar_lea.vmem %s15095_s1, %s6491_s17 }
  0x16   : > { %v6765_v7 = vpop.eup %6764  ;;  %v598_v9 = vmul.f32 114.0, %v6763_v6  ;;  %v160_v12 = vld [vmem:[%s7632_s20 + $0x20] sm:$0xff]  ;;  %v158_v14 = vld [vmem:[%s7632_s20 + $0x10] sm:$0xff]  ;;  %v161_v19 = vld [vmem:[%s7632_s20 + $0x28] sm:$0xff]  ;;  %v492_v23 = vcvt.s32.f32 %v381_v10  ;;  %vm602_vm0 = vweird.f32 %v6763_v6  ;;  %v490_v36 = vcvt.s32.f32 %v379_v30 }
  0x17   : > { %v1041_v11 = vmul.f32 3.0, %v6765_v7  ;;  %v156_v15 = vld [vmem:[%s7632_s20] sm:$0xff]  ;;  %v6497_v17 = vmul.f32 -1.442695, %v160_v12  ;;  %v6495_v18 = vmul.f32 -1.442695, %v158_v14  ;;  %vm1045_vm1 = vweird.f32 %v6765_v7 }
  0x18   : > { %v599_v13 = vsub.f32 1.0, %v598_v9  ;;  %v6493_v21 = vmul.f32 -1.442695, %v156_v15  ;;  %v159_v22 = vld [vmem:[%s7632_s20 + $0x18] sm:$0xff]  ;;  %v157_v25 = vld [vmem:[%s7632_s20 + $0x8] sm:$0xff]  ;;  %v164_v37 = vld [vmem:[%s7632_s20 + $0x40] sm:$0xff]  ;;  %v493_v9 = vcvt.s32.f32 %v7676_v54 }
  0x19   : > { %v1042_v16 = vsub.f32 1.0, %v1041_v11  ;;  %6766 = vpow2.f32 %v6497_v17  ;;  %v6498_v28 = vmul.f32 -1.442695, %v161_v19  ;;  %v6496_v31 = vmul.f32 -1.442695, %v159_v22  ;;  %v163_v44 = vld [vmem:[%s7632_s20 + $0x38] sm:$0xff] }
  0x1a   : > { %v600_v20 = vmul.f32 %v6763_v6, %v599_v13  ;;  %6768 = vpow2.f32 %v6495_v18  ;;  %v6494_v34 = vmul.f32 -1.442695, %v157_v25  ;;  %v6501_v47 = vmul.f32 -1.442695, %v164_v37  ;;  %v162_v59 = vld [vmem:[%s7632_s20 + $0x30] sm:$0xff] }
  0x1b   : > { %v1043_v29 = vmul.f32 %v6765_v7, %v1042_v16  ;;  %6770 = vpow2.f32 %v6493_v21  ;;  %v6500_v55 = vmul.f32 -1.442695, %v163_v44  ;;  %v7704_v10 = vmul.f32 -1.442695, %v162_v59 }
  0x1c   : > { %v601_v26 = vadd.f32 %v6763_v6, %v600_v20  ;;  %6772 = vpow2.f32 %v6498_v28 }
  0x1d   : > { %v1044_v42 = vadd.f32 %v6765_v7, %v1043_v29  ;;  %6774 = vpow2.f32 %v6496_v31 }
  0x1e   : > { %v7647_v32 = vsel %vm602_vm0, %v6763_v6, %v601_v26  ;;  %6776 = vpow2.f32 %v6494_v34 }
  0x1f   : > { %v7651_v35 = vmul.f32 %v7647_v32, %v492_v23  ;;  %v7655_v38 = vmul.f32 %v7647_v32, %v488_v33  ;;  %v6767_v40 = vpop.eup %6766  ;;  %v7660_v43 = vmul.f32 %v7647_v32, %v490_v36  ;;  %v7680_v57 = vsel %vm1045_vm1, %v6765_v7, %v1044_v42 }
  0x20   : > { %v6769_v45 = vpop.eup %6768  ;;  %v7663_v46 = vadd.f32 1.0, %v6767_v40  ;;  %v7716_v16 = vmul.f32 %v7647_v32, %v493_v9  ;;  %v268_v42 = vadd.s32 8, %v7619_v4 }
  0x21   : > { %v717_v41 = vfloor.f32 %v7651_v35  ;;  %v715_v49 = vfloor.f32 %v7660_v43  ;;  %v7668_v50 = vadd.f32 1.0, %v6769_v45  ;;  %v713_v51 = vfloor.f32 %v7655_v38  ;;  %v6771_v52 = vpop.eup %6770 }
  0x22   : > { %6778 = vrcp.f32 %v7663_v46  ;;  %v6773_v60 = vpop.eup %6772  ;;  %v2862_v61 = vand.u32 2147483647, %v7663_v46  ;;  %v2864_v62 = vand.u32 2147483648, %v7663_v46  ;;  %v7698_v5 = vadd.f32 1.0, %v6771_v52 }
  0x23   : > { %v826_v48 = vmul.f32 114.0, %v717_v41  ;;  %v824_v58 = vmul.f32 114.0, %v715_v49  ;;  %6780 = vrcp.f32 %v7668_v50  ;;  %v2832_v63 = vand.u32 2147483647, %v7668_v50  ;;  %v7689_v0 = vpop.eup %6774 }
  0x24   : > { %6782 = vpow2.f32 %v6501_v47  ;;  %v822_v3 = vmul.f32 114.0, %v713_v51  ;;  %v7700_v6 = vpop.eup %6776  ;;  %v2834_v7 = vand.u32 2147483648, %v7668_v50  ;;  %vm2858_vm3 = vweird.f32 %v7663_v46 }
  0x25   : > { %v7678_v56 = vsub.f32 %v492_v23, %v826_v48  ;;  %v7694_v2 = vsub.f32 %v490_v36, %v824_v58  ;;  %6784 = vpow2.f32 %v6500_v55  ;;  %vm2828_vm4 = vweird.f32 %v7668_v50 }
  0x26   : > { %6786 = vrcp.f32 %v7698_v5  ;;  %vm7711_vm5 = vcmp.eq.f32.partialorder %v2862_v61, 8.507059e+37  ;;  %v2865_v15 = vor.u32 1.1754944e-38, %v2864_v62  ;;  %vm7719_vm6 = vcmp.eq.f32.partialorder %v2832_v63, 8.507059e+37 }
  0x27   : > { %v1051_v1 = vmul.f32 %v7680_v57, %v7678_v56  ;;  %v1049_v11 = vmul.f32 %v7680_v57, %v7694_v2  ;;  %v7723_v20 = vsub.f32 %v488_v33, %v822_v3  ;;  %v7725_v21 = vadd.f32 1.0, %v6773_v60 }
  0x28   : > { %v6779_v12 = vpop.eup %6778  ;;  %v2835_v24 = vor.u32 1.1754944e-38, %v2834_v7  ;;  %v2802_v25 = vand.u32 2147483647, %v7698_v5  ;;  %v2804_v26 = vand.u32 2147483648, %v7698_v5  ;;  %v718_v29 = vfloor.f32 %v7716_v16 }
  0x29   : > { %v1160_v13 = vfloor.f32 %v1051_v1  ;;  %v6781_v17 = vpop.eup %6780  ;;  %v2854_v18 = vmul.f32 %v6779_v12, %v7663_v46  ;;  %vm2859_vm7 = vweird.f32 %v6779_v12  ;;  %v1158_v28 = vfloor.f32 %v1049_v11 }
  0x2a   : > { %v7727_v22 = vpop.eup %6782  ;;  %v2824_v23 = vmul.f32 %v6781_v17, %v7668_v50  ;;  %vm2829_vm8 = vweird.f32 %v6781_v17  ;;  %vm2798_vm9 = vweird.f32 %v7698_v5  ;;  %v1047_v37 = vmul.f32 %v7680_v57, %v7723_v20  ;;  %vm7749_vm10 = vmor %vm2858_vm3, %vm2859_vm7 }
  0x2b   : > { %v2855_v27 = vsub.f32 1.0, %v2854_v18  ;;  %v7733_v30 = vpop.eup %6784  ;;  %v7735_v31 = vmul.f32 3.0, %v1160_v13  ;;  %v827_v39 = vmul.f32 114.0, %v718_v29  ;;  %6788 = vrcp.f32 %v7725_v21  ;;  %vm7762_vm12 = vmor %vm2828_vm4, %vm2829_vm8 }
  0x2c   : > { %v2825_v33 = vsub.f32 1.0, %v2824_v23  ;;  %v6787_v34 = vpop.eup %6786  ;;  %v2142_v40 = vsel %vm2137_vm2, %v1160_v13, %v717_v41  ;;  %vm7754_vm11 = vcmp.eq.f32.partialorder %v2802_v25, 8.507059e+37  ;;  %v7758_v52 = vmul.f32 3.0, %v1158_v28 }
  0x2d   : > { %v2856_v36 = vmul.f32 %v6779_v12, %v2855_v27  ;;  %v2794_v45 = vmul.f32 %v6787_v34, %v7698_v5  ;;  %v2805_v41 = vor.u32 1.1754944e-38, %v2804_v26  ;;  %v7766_v46 = vsub.f32 %v493_v9, %v827_v39 }
  0x2e   : > { %v2826_v44 = vmul.f32 %v6781_v17, %v2825_v33  ;;  %vm2799_vm13 = vweird.f32 %v6787_v34  ;;  %v270_v58 = vadd.s32 24, %v7619_v4  ;;  %v2140_v50 = vsel %vm2137_vm2, %v1158_v28, %v715_v49 }
  0x2f   : > { %v2857_v48 = vadd.f32 %v6779_v12, %v2856_v36  ;;  %v2795_v55 = vsub.f32 1.0, %v2794_v45  ;;  %v1156_v60 = vfloor.f32 %v1047_v37  ;;  %v1052_v61 = vmul.f32 %v7680_v57, %v7766_v46  ;;  %vm7794_vm14 = vmor %vm2798_vm9, %vm2799_vm13 }
  0x30   : > { %v2827_v54 = vadd.f32 %v6781_v17, %v2826_v44  ;;  %v7784_v3 = vadd.f32 1.0, %v7689_v0  ;;  %v2877_v11 = vand.u32 2147483647, %v7725_v21  ;;  %v380_v0 = vadd.s32 %v7625_v8, %v270_v58 }
  0x31   : > { %v2861_v59 = vsel %vm7749_vm10, %v6779_v12, %v2857_v48  ;;  %v2796_v1 = vmul.f32 %v6787_v34, %v2795_v55  ;;  %v6789_v7 = vpop.eup %6788  ;;  %vm2873_vm15 = vweird.f32 %v7725_v21  ;;  %v7808_v25 = vmul.f32 3.0, %v1156_v60 }
  0x32   : > { %v7779_v62 = vsel %vm7711_vm5, %v2865_v15, %v2861_v59  ;;  %v2831_v63 = vsel %vm7762_vm12, %v6781_v17, %v2827_v54  ;;  %v2869_v14 = vmul.f32 %v6789_v7, %v7725_v21  ;;  %v2879_v15 = vand.u32 2147483648, %v7725_v21 }
  0x33   : > { %5325 = vperm.xlu2 %6761, %v7779_v62   ;;  %v4432_v43 = vmul.f32 1.05, %v7779_v62  ;;  %v7790_v49 = vsel %vm7719_vm6, %v2835_v24, %v2831_v63  ;;  %v2797_v13 = vadd.f32 %v6787_v34, %v2796_v1  ;;  %v1161_v17 = vfloor.f32 %v1052_v61 }
  0x34   : > { %5315 = vperm.xlu1 %6760, %v7790_v49   ;;  %v4430_v12 = vmul.f32 1.05, %v7790_v49  ;;  %vm2874_vm0 = vweird.f32 %v6789_v7  ;;  %v491_v5 = vcvt.s32.f32 %v380_v0  ;;  %v2870_v23 = vsub.f32 1.0, %v2869_v14 }
  0x35   : > { %v6606_v18 = vadd.f32 -0.025, %v4432_v43  ;;  %v2801_v19 = vsel %vm7794_vm14, %v6787_v34, %v2797_v13  ;;  %6790 = vrcp.f32 %v7784_v3  ;;  %v2138_v28 = vsel %vm2137_vm2, %v1156_v60, %v713_v51  ;;  %vm7833_vm3 = vmor %vm2873_vm15, %vm2874_vm0 }
  0x36   : > { %v6604_v24 = vadd.f32 -0.025, %v4430_v12  ;;  %v7812_v26 = vsel %vm7754_vm11, %v2805_v41, %v2801_v19  ;;  %v607_v27 = vmul.f32 %v7647_v32, %v491_v5  ;;  %v2871_v33 = vmul.f32 %v6789_v7, %v2870_v23 }
  0x37   : > { %5305 = vperm.xlu0 %6759, %v7812_v26   ;;  %vm7820_vm1 = vcmp.eq.f32.partialorder %v2877_v11, 8.507059e+37  ;;  %v2880_v36 = vor.u32 1.1754944e-38, %v2879_v15  ;;  %v7824_v37 = vmul.f32 3.0, %v1161_v17  ;;  %v2143_v39 = vsel %vm2137_vm2, %v1161_v17, %v718_v29 }
  0x38   : > { %v716_v51 = vfloor.f32 %v607_v27  ;;  %v4650_v44 = vadd.f32 %v6606_v18, %v2142_v40  ;;  %v4428_v45 = vmul.f32 1.05, %v7812_v26  ;;  %v2872_v47 = vadd.f32 %v6789_v7, %v2871_v33 }
  0x39   : > { %vm2843_vm4 = vweird.f32 %v7784_v3  ;;  %v7840_v16 = vadd.f32 %v6604_v24, %v2140_v50  ;;  %v378_v29 = vadd.s32 %v7625_v8, %v268_v42  ;;  %v7844_v21 = vadd.f32 1.0, %v7700_v6 }
  0x3a   : > { %v825_v48 = vmul.f32 114.0, %v716_v51  ;;  %v2876_v41 = vsel %vm7833_vm3, %v6789_v7, %v2872_v47  ;;  %v2847_v54 = vand.u32 2147483647, %v7784_v3  ;;  %v2849_v40 = vand.u32 2147483648, %v7784_v3 }
  0x3b   : > { %v6791_v35 = vpop.eup %6790  ;;  %v275_v55 = vadd.s32 64, %v7619_v4  ;;  %v7853_v58 = vsel %vm7820_vm1, %v2880_v36, %v2876_v41  ;;  %v7859_v6 = vadd.f32 1.0, %v7727_v22  ;;  %v6602_v60 = vadd.f32 -0.025, %v4428_v45 }
  0x3c   : > { %v7855_v59 = vsub.f32 %v491_v5, %v825_v48  ;;  %v2839_v50 = vmul.f32 %v6791_v35, %v7784_v3  ;;  %v4433_v61 = vmul.f32 1.05, %v7853_v58  ;;  %5330 = vperm.xlu2 %6761, %v7853_v58   ;;  %v489_v63 = vcvt.s32.f32 %v378_v29 }
  0x3d   : > { %6792 = vrcp.f32 %v7844_v21  ;;  %vm2844_vm5 = vweird.f32 %v6791_v35  ;;  %v2817_v43 = vand.u32 2147483647, %v7844_v21  ;;  %v2819_v22 = vand.u32 2147483648, %v7844_v21 }
  0x3e   : > { %15464 = vst [vmem:[#allocation2_spill] sm:$0xff] %v7855_v59  ;;  %v1050_v1 = vmul.f32 %v7680_v57, %v7855_v59  ;;  %v2840_v7 = vsub.f32 1.0, %v2839_v50  ;;  %v6607_v9 = vadd.f32 -0.025, %v4433_v61  ;;  %v7868_v11 = vmul.f32 %v7647_v32, %v489_v63  ;;  %vm7881_vm7 = vmor %vm2843_vm4, %vm2844_vm5 }
  0x3f   : > { %v385_v0 = vadd.s32 %v7625_v8, %v275_v55  ;;  %v7872_v12 = vmul.f32 16.0, %v4650_v44  ;;  %vm7874_vm6 = vcmp.eq.f32.partialorder %v2847_v54, 8.507059e+37  ;;  %6794 = vrcp.f32 %v7859_v6 }
  0x40   : > { %v2841_v13 = vmul.f32 %v6791_v35, %v2840_v7  ;;  %v4646_v15 = vadd.f32 %v6602_v60, %v2138_v28  ;;  %v2850_v5 = vor.u32 1.1754944e-38, %v2849_v40  ;;  %v714_v18 = vfloor.f32 %v7868_v11 }
  0x41   : > { %v496_v19 = vcvt.s32.f32 %v385_v0  ;;  %v1159_v23 = vfloor.f32 %v1050_v1  ;;  %vm2813_vm8 = vweird.f32 %v7844_v21  ;;  %vm7887_vm9 = vcmp.eq.f32.partialorder %v2817_v43, 8.507059e+37 }
  0x42   : > { %v2842_v24 = vadd.f32 %v6791_v35, %v2841_v13  ;;  %v4651_v28 = vadd.f32 %v6607_v9, %v2143_v39  ;;  %v823_v34 = vmul.f32 114.0, %v714_v18  ;;  %v2820_v3 = vor.u32 1.1754944e-38, %v2819_v22 }
  0x43   : > { %v6793_v33 = vpop.eup %6792  ;;  %v7892_v36 = vmul.f32 %v7647_v32, %v496_v19  ;;  %v2141_v38 = vsel %vm2137_vm2, %v1159_v23, %v716_v51  ;;  %vm2918_vm10 = vweird.f32 %v7859_v6  ;;  %v2922_v48 = vand.u32 2147483647, %v7859_v6 }
  0x44   : > { %v2846_v42 = vsel %vm7881_vm7, %v6791_v35, %v2842_v24  ;;  %v2809_v44 = vmul.f32 %v6793_v33, %v7844_v21  ;;  %v7904_v39 = vsub.f32 %v489_v63, %v823_v34  ;;  %vm2814_vm11 = vweird.f32 %v6793_v33 }
  0x45   : > { %v7902_v45 = vsel %vm7874_vm6, %v2850_v5, %v2846_v42  ;;  %v721_v47 = vfloor.f32 %v7892_v36  ;;  %v6795_v29 = vpop.eup %6794  ;;  %v274_v41 = vadd.s32 56, %v7619_v4  ;;  %v2924_v50 = vand.u32 2147483648, %v7859_v6  ;;  %vm7923_vm12 = vmor %vm2813_vm8, %vm2814_vm11 }
  0x46   : > { %15471 = vst [vmem:[#allocation3_spill] sm:$0xff] %v7902_v45  ;;  %v4431_v51 = vmul.f32 1.05, %v7902_v45  ;;  %5320 = vperm.xlu1 %6760, %v7902_v45   ;;  %v2810_v35 = vsub.f32 1.0, %v2809_v44  ;;  %v1048_v54 = vmul.f32 %v7680_v57, %v7904_v39  ;;  %v2914_v55 = vmul.f32 %v6795_v29, %v7859_v6 }
  0x47   : > { %15472 = vst [vmem:[#allocation4_spill] sm:$0xff] %v7904_v39  ;;  %v830_v40 = vmul.f32 114.0, %v721_v47  ;;  %v384_v63 = vadd.s32 %v7625_v8, %v274_v41  ;;  %v7919_v1 = vadd.f32 1.0, %v7733_v30  ;;  %vm2919_vm13 = vweird.f32 %v6795_v29 }
  0x48   : > { %v6605_v60 = vadd.f32 -0.025, %v4431_v51  ;;  %v2811_v61 = vmul.f32 %v6793_v33, %v2810_v35  ;;  %v1157_v7 = vfloor.f32 %v1048_v54  ;;  %v2915_v11 = vsub.f32 1.0, %v2914_v55  ;;  %vm7942_vm14 = vmor %vm2918_vm10, %vm2919_vm13 }
  0x49   : > { %v7927_v9 = vsub.f32 %v496_v19, %v830_v40  ;;  %v495_v0 = vcvt.s32.f32 %v384_v63  ;;  %6796 = vrcp.f32 %v7919_v1  ;;  %v273_v13 = vadd.s32 48, %v7619_v4  ;;  %v167_v40 = vld [vmem:[%s7632_s20 + $0x58] sm:$0xff] }
  0x4a   : > { %v2812_v22 = vadd.f32 %v6793_v33, %v2811_v61  ;;  %v7932_v30 = vmul.f32 16.0, %v7840_v16  ;;  %v7934_v14 = vmul.f32 16.0, %v4646_v15  ;;  %v4649_v21 = vadd.f32 %v6605_v60, %v2141_v38  ;;  %v166_v60 = vld [vmem:[%s7632_s20 + $0x50] sm:$0xff] }
  0x4b   : > { %v2916_v17 = vmul.f32 %v6795_v29, %v2915_v11  ;;  %v7936_v5 = vmul.f32 3.0, %v1159_v23  ;;  %v2925_v34 = vor.u32 1.1754944e-38, %v2924_v50  ;;  %v7947_v42 = vmul.f32 %v7647_v32, %v495_v0 }
  0x4c   : > { %15475 = vst [vmem:[#allocation5_spill] sm:$0xff] %v7934_v14  ;;  %v2816_v19 = vsel %vm7923_vm12, %v6793_v33, %v2812_v22  ;;  %v7955_v15 = vmul.f32 %v7680_v57, %v7927_v9  ;;  %vm2923_vm15 = vcmp.eq.f32.partialorder %v2922_v48, 8.507059e+37  ;;  %v7957_v6 = vmul.f32 16.0, %v4651_v28 }
  0x4d   : > { %15476 = vst [vmem:[#allocation6_spill] sm:$0xff] %v7936_v5  ;;  %v7951_v16 = vsel %vm7887_vm9, %v2820_v3, %v2816_v19  ;;  %v2917_v23 = vadd.f32 %v6795_v29, %v2916_v17  ;;  %v7959_v33 = vmul.f32 3.0, %v1157_v7  ;;  %v720_v38 = vfloor.f32 %v7947_v42 }
  0x4e   : > { %15479 = vst [vmem:[#allocation7_spill] sm:$0xff] %v7951_v16  ;;  %5310 = vperm.xlu0 %6759, %v7951_v16   ;;  %v383_v44 = vadd.s32 %v7625_v8, %v273_v13  ;;  %v7964_v27 = vmul.f32 16.0, %v4649_v21  ;;  %v2139_v3 = vsel %vm2137_vm2, %v1157_v7, %v714_v18  ;;  %vm2903_vm0 = vweird.f32 %v7919_v1 }
  0x4f   : > { %15480 = vst [vmem:[#allocation8_spill] sm:$0xff] %v7959_v33  ;;  %v2921_v51 = vsel %vm7942_vm14, %v6795_v29, %v2917_v23  ;;  %v6797_v28 = vpop.eup %6796  ;;  %v4429_v48 = vmul.f32 1.05, %v7951_v16  ;;  %v829_v41 = vmul.f32 114.0, %v720_v38  ;;  %v2909_v54 = vand.u32 2147483648, %v7919_v1 }
  0x50   : > { %15481 = vst [vmem:[#allocation9_spill] sm:$0xff] %v7964_v27  ;;  %v7972_v35 = vsel %vm2923_vm15, %v2925_v34, %v2921_v51  ;;  %v1164_v55 = vfloor.f32 %v7955_v15  ;;  %v2899_v18 = vmul.f32 %v6797_v28, %v7919_v1  ;;  %v2907_v50 = vand.u32 2147483647, %v7919_v1 }
  0x51   : > { %5345 = vperm.xlu2 %6761, %v7972_v35   ;;  %v494_v29 = vcvt.s32.f32 %v383_v44  ;;  %v4436_v61 = vmul.f32 1.05, %v7972_v35  ;;  %v7982_v63 = vsub.f32 %v495_v0, %v829_v41  ;;  %6798 = vpow2.f32 %v7704_v10  ;;  %v165_v10 = vld [vmem:[%s7632_s20 + $0x48] sm:$0xff] }
  0x52   : > { %v278_v7 = vadd.s32 88, %v7619_v4  ;;  %v2900_v43 = vsub.f32 1.0, %v2899_v18  ;;  %vm2904_vm1 = vweird.f32 %v6797_v28  ;;  %v6504_v22 = vmul.f32 -1.442695, %v167_v40 }
  0x53   : > { %15482 = vst [vmem:[#allocation10_spill] sm:$0xff] %v7982_v63  ;;  %v7987_v11 = vmul.f32 %v7647_v32, %v494_v29  ;;  %v6603_v13 = vadd.f32 -0.025, %v4429_v48  ;;  %v2910_v21 = vor.u32 1.1754944e-38, %v2909_v54  ;;  %v6503_v19 = vmul.f32 -1.442695, %v166_v60  ;;  %vm7996_vm3 = vmor %vm2903_vm0, %vm2904_vm1 }
  0x54   : > { %v388_v17 = vadd.s32 %v7625_v8, %v278_v7  ;;  %v1054_v24 = vmul.f32 %v7680_v57, %v7982_v63  ;;  %v2901_v0 = vmul.f32 %v6797_v28, %v2900_v43  ;;  %6800 = vpow2.f32 %v6504_v22 }
  0x55   : > { %v719_v34 = vfloor.f32 %v7987_v11  ;;  %v6610_v42 = vadd.f32 -0.025, %v4436_v61  ;;  %v277_v44 = vadd.s32 80, %v7619_v4  ;;  %6802 = vpow2.f32 %v6503_v19 }
  0x56   : > { %v499_v23 = vcvt.s32.f32 %v388_v17  ;;  %v2146_v51 = vsel %vm2137_vm2, %v1164_v55, %v721_v47  ;;  %v2902_v48 = vadd.f32 %v6797_v28, %v2901_v0  ;;  %vm2908_vm4 = vcmp.eq.f32.partialorder %v2907_v50, 8.507059e+37 }
  0x57   : > { %v828_v41 = vmul.f32 114.0, %v719_v34  ;;  %v6799_v54 = vpop.eup %6798  ;;  %v4647_v40 = vadd.f32 %v6603_v13, %v2139_v3  ;;  %v387_v18 = vadd.s32 %v7625_v8, %v277_v44  ;;  %v6502_v60 = vmul.f32 -1.442695, %v165_v10 }
  0x58   : > { %v8006_v1 = vmul.f32 %v7647_v32, %v499_v23  ;;  %v1163_v61 = vfloor.f32 %v1054_v24  ;;  %v2906_v7 = vsel %vm7996_vm3, %v6797_v28, %v2902_v48  ;;  %v2690_v36 = vadd.f32 1.0, %v6799_v54 }
  0x59   : > { %v8011_v43 = vsub.f32 %v494_v29, %v828_v41  ;;  %v4654_v11 = vadd.f32 %v6610_v42, %v2146_v51  ;;  %v8013_v47 = vsel %vm2908_vm4, %v2910_v21, %v2906_v7  ;;  %v498_v22 = vcvt.s32.f32 %v387_v18 }
  0x5a   : > { %15486 = vst [vmem:[#allocation12_spill] sm:$0xff] %v8013_v47  ;;  %v15096_v50 = vfloor.f32 %v8006_v1  ;;  %v6801_v3 = vpop.eup %6800  ;;  %v2145_v13 = vsel %vm2137_vm2, %v1163_v61, %v720_v38  ;;  %v4435_v17 = vmul.f32 1.05, %v8013_v47  ;;  %5340 = vperm.xlu1 %6760, %v8013_v47   ;;  %6804 = vrcp.f32 %v2690_v36 }
  0x5b   : > { %15485 = vst [vmem:[#allocation11_spill] sm:$0xff] %v8011_v43  ;;  %v1053_v28 = vmul.f32 %v7680_v57, %v8011_v43  ;;  %v6803_v29 = vpop.eup %6802  ;;  %v2892_v19 = vand.u32 2147483647, %v2690_v36  ;;  %v2695_v24 = vadd.f32 1.0, %v6801_v3  ;;  %6806 = vpow2.f32 %v6502_v60 }
  0x5c   : > { %v833_v21 = vmul.f32 114.0, %v15096_v50  ;;  %v6609_v0 = vadd.f32 -0.025, %v4435_v17  ;;  %v2894_v10 = vand.u32 2147483648, %v2690_v36  ;;  %v8025_v42 = vmul.f32 %v7647_v32, %v498_v22 }
  0x5d   : > { %v8027_v38 = vadd.f32 1.0, %v6803_v29  ;;  %v8029_v15 = vmul.f32 3.0, %v1164_v55  ;;  %v1162_v44 = vfloor.f32 %v1053_v28  ;;  %6808 = vrcp.f32 %v2695_v24 }
  0x5e   : > { %v8031_v51 = vsub.f32 %v499_v23, %v833_v21  ;;  %v8033_v48 = vmul.f32 16.0, %v4647_v40  ;;  %v8035_v41 = vmul.f32 16.0, %v4654_v11  ;;  %v8037_v54 = vmul.f32 3.0, %v1163_v61 }
  0x5f   : > { %v4653_v18 = vadd.f32 %v6609_v0, %v2145_v13  ;;  %vm2888_vm5 = vweird.f32 %v2690_v36  ;;  %vm8039_vm6 = vcmp.eq.f32.partialorder %v2892_v19, 8.507059e+37  ;;  %v15100_v7 = vfloor.f32 %v8025_v42 }
  0x60   : > { %15487 = vst [vmem:[#allocation13_spill] sm:$0xff] %v8033_v48  ;;  %v276_v55 = vadd.s32 72, %v7619_v4  ;;  %v6805_v3 = vpop.eup %6804  ;;  %v2895_v23 = vor.u32 1.1754944e-38, %v2894_v10  ;;  %v1058_v40 = vmul.f32 %v7680_v57, %v8031_v51  ;;  %v2967_v17 = vand.u32 2147483647, %v2695_v24 }
  0x61   : > { %15488 = vst [vmem:[#allocation14_spill] sm:$0xff] %v8037_v54  ;;  %6810 = vrcp.f32 %v8027_v38  ;;  %v6807_v61 = vpop.eup %6806  ;;  %v8048_v11 = vmul.f32 3.0, %v1162_v44  ;;  %v8052_v13 = vsel %vm2137_vm2, %v1162_v44, %v719_v34  ;;  %v2884_v28 = vmul.f32 %v6805_v3, %v2690_v36  ;;  %v170_v54 = vld [vmem:[%s7632_s20 + $0x70] sm:$0xff] }
  0x62   : > { %v2969_v29 = vand.u32 2147483648, %v2695_v24  ;;  %v8054_v19 = vmul.f32 16.0, %v4653_v18  ;;  %vm2963_vm7 = vweird.f32 %v2695_v24  ;;  %v832_v21 = vmul.f32 114.0, %v15100_v7 }
  0x63   : > { %15491 = vst [vmem:[#allocation15_spill] sm:$0xff] %v8048_v11  ;;  %v2952_v0 = vand.u32 2147483647, %v8027_v38  ;;  %v6809_v10 = vpop.eup %6808  ;;  %v2885_v50 = vsub.f32 1.0, %v2884_v28  ;;  %vm2889_vm8 = vweird.f32 %v6805_v3  ;;  %vm2948_vm9 = vweird.f32 %v8027_v38 }
  0x64   : > { %15492 = vst [vmem:[#allocation16_spill] sm:$0xff] %v8054_v19  ;;  %v386_v47 = vadd.s32 %v7625_v8, %v276_v55  ;;  %v1167_v34 = vfloor.f32 %v1058_v40  ;;  %v2959_v44 = vmul.f32 %v6809_v10, %v2695_v24  ;;  %vm8061_vm10 = vcmp.eq.f32.partialorder %v2967_v17, 8.507059e+37  ;;  %vm8071_vm11 = vmor %vm2888_vm5, %vm2889_vm8 }
  0x65   : > { %v8065_v18 = vsub.f32 %v498_v22, %v832_v21  ;;  %v2886_v19 = vmul.f32 %v6805_v3, %v2885_v50  ;;  %v2970_v11 = vor.u32 1.1754944e-38, %v2969_v29  ;;  %v8067_v63 = vadd.f32 1.0, %v6807_v61 }
  0x66   : > { %v497_v7 = vcvt.s32.f32 %v386_v47  ;;  %v2960_v55 = vsub.f32 1.0, %v2959_v44  ;;  %vm2964_vm12 = vweird.f32 %v6809_v10  ;;  %vm8075_vm13 = vcmp.eq.f32.partialorder %v2952_v0, 8.507059e+37 }
  0x67   : > { %15495 = vst [vmem:[#allocation17_spill] sm:$0xff] %v8065_v18  ;;  %v6811_v28 = vpop.eup %6810  ;;  %v2954_v22 = vand.u32 2147483648, %v8027_v38  ;;  %v2887_v50 = vadd.f32 %v6805_v3, %v2886_v19  ;;  %v281_v36 = vadd.s32 112, %v7619_v4  ;;  %v1057_v29 = vmul.f32 %v7680_v57, %v8065_v18  ;;  %vm8091_vm14 = vmor %vm2963_vm7, %vm2964_vm12 }
  0x68   : > { %v2944_v47 = vmul.f32 %v6811_v28, %v8027_v38  ;;  %v8082_v17 = vmul.f32 %v7647_v32, %v497_v7  ;;  %v2961_v61 = vmul.f32 %v6809_v10, %v2960_v55  ;;  %6812 = vrcp.f32 %v8067_v63 }
  0x69   : > { %v6507_v21 = vmul.f32 -1.442695, %v170_v54  ;;  %v2891_v0 = vsel %vm8071_vm11, %v6805_v3, %v2887_v50  ;;  %vm2949_vm15 = vweird.f32 %v6811_v28  ;;  %v8100_v18 = vmul.f32 3.0, %v1167_v34  ;;  %v169_v3 = vld [vmem:[%s7632_s20 + $0x68] sm:$0xff] }
  0x6a   : > { %v2945_v44 = vsub.f32 1.0, %v2944_v47  ;;  %v15105_v27 = vfloor.f32 %v8082_v17  ;;  %v8098_v55 = vsel %vm8039_vm6, %v2895_v23, %v2891_v0  ;;  %v15503_v54 = vfloor.f32 %v8006_v1  ;;  %vm8115_vm0 = vmor %vm2948_vm9, %vm2949_vm15 }
  0x6b   : > { %15502 = vst [vmem:[#allocation18_spill] sm:$0xff] %v8098_v55  ;;  %v2962_v24 = vadd.f32 %v6809_v10, %v2961_v61  ;;  %v4434_v50 = vmul.f32 1.05, %v8098_v55  ;;  %5335 = vperm.xlu0 %6759, %v8098_v55   ;;  %v2955_v16 = vor.u32 1.1754944e-38, %v2954_v22  ;;  %v1166_v0 = vfloor.f32 %v1057_v29 }
  0x6c   : > { %v2149_v48 = vsel %vm2137_vm2, %v1167_v34, %v15503_v54  ;;  %v2946_v47 = vmul.f32 %v6811_v28, %v2945_v44  ;;  %v831_v60 = vmul.f32 114.0, %v15105_v27  ;;  %v391_v34 = vadd.s32 %v7625_v8, %v281_v36 }
  0x6d   : > { %v2966_v23 = vsel %vm8091_vm14, %v6809_v10, %v2962_v24  ;;  %6814 = vpow2.f32 %v6507_v21  ;;  %v6608_v61 = vadd.f32 -0.025, %v4434_v50  ;;  %v6506_v54 = vmul.f32 -1.442695, %v169_v3 }
  0x6e   : > { %v8122_v22 = vsel %vm8061_vm10, %v2970_v11, %v2966_v23  ;;  %v2947_v44 = vadd.f32 %v6811_v28, %v2946_v47  ;;  %v6813_v27 = vpop.eup %6812  ;;  %v8125_v10 = vsub.f32 %v497_v7, %v831_v60  ;;  %vm2933_vm1 = vweird.f32 %v8067_v63 }
  0x6f   : > { %5360 = vperm.xlu2 %6761, %v8122_v22   ;;  %v502_v38 = vcvt.s32.f32 %v391_v34  ;;  %v280_v29 = vadd.s32 104, %v7619_v4  ;;  %v4439_v36 = vmul.f32 1.05, %v8122_v22  ;;  %v2929_v43 = vmul.f32 %v6813_v27, %v8067_v63 }
  0x70   : > { %15506 = vst [vmem:[#allocation19_spill] sm:$0xff] %v8125_v10  ;;  %v2951_v21 = vsel %vm8115_vm0, %v6811_v28, %v2947_v44  ;;  %v2937_v11 = vand.u32 2147483647, %v8067_v63  ;;  %v8134_v19 = vmul.f32 3.0, %v1166_v0  ;;  %v2939_v24 = vand.u32 2147483648, %v8067_v63 }
  0x71   : > { %v8138_v7 = vsel %vm8075_vm13, %v2955_v16, %v2951_v21  ;;  %v8142_v3 = vmul.f32 %v7647_v32, %v502_v38  ;;  %v4652_v50 = vadd.f32 %v6608_v61, %v8052_v13  ;;  %v2930_v47 = vsub.f32 1.0, %v2929_v43  ;;  %v168_v21 = vld [vmem:[%s7632_s20 + $0x60] sm:$0xff] }
  0x72   : > { %15507 = vst [vmem:[#allocation20_spill] sm:$0xff] %v8134_v19  ;;  %v4438_v28 = vmul.f32 1.05, %v8138_v7  ;;  %5355 = vperm.xlu1 %6760, %v8138_v7   ;;  %vm2934_vm3 = vweird.f32 %v6813_v27  ;;  %v1056_v40 = vmul.f32 %v7680_v57, %v8125_v10  ;;  %v390_v23 = vadd.s32 %v7625_v8, %v280_v29 }
  0x73   : > { %15508 = vst [vmem:[#allocation21_spill] sm:$0xff] %v8138_v7  ;;  %v6815_v60 = vpop.eup %6814  ;;  %v15109_v16 = vfloor.f32 %v8142_v3  ;;  %6816 = vpow2.f32 %v6506_v54  ;;  %v6613_v1 = vadd.f32 -0.025, %v4439_v36  ;;  %v15509_v34 = vfloor.f32 %v8025_v42  ;;  %vm8158_vm4 = vmor %vm2933_vm1, %vm2934_vm3 }
  0x74   : > { %v6612_v61 = vadd.f32 -0.025, %v4438_v28  ;;  %v2931_v44 = vmul.f32 %v6813_v27, %v2930_v47  ;;  %v2940_v7 = vor.u32 1.1754944e-38, %v2939_v24  ;;  %v2698_v54 = vadd.f32 1.0, %v6815_v60 }
  0x75   : > { %v2148_v13 = vsel %vm2137_vm2, %v1166_v0, %v15509_v34  ;;  %v836_v29 = vmul.f32 114.0, %v15109_v16  ;;  %v501_v36 = vcvt.s32.f32 %v390_v23  ;;  %v8164_v10 = vmul.f32 16.0, %v4652_v50 }
  0x76   : > { %v2932_v42 = vadd.f32 %v6813_v27, %v2931_v44  ;;  %vm2938_vm5 = vcmp.eq.f32.partialorder %v2937_v11, 8.507059e+37  ;;  %v279_v0 = vadd.s32 96, %v7619_v4  ;;  %v1165_v28 = vfloor.f32 %v1056_v40 }
  0x77   : > { %15512 = vst [vmem:[#allocation22_spill] sm:$0xff] %v8164_v10  ;;  %v8167_v47 = vsub.f32 %v502_v38, %v836_v29  ;;  %6818 = vrcp.f32 %v2698_v54  ;;  %v6505_v63 = vmul.f32 -1.442695, %v168_v21  ;;  %v4657_v34 = vadd.f32 %v6613_v1, %v2149_v48 }
  0x78   : > { %v4656_v19 = vadd.f32 %v6612_v61, %v2148_v13  ;;  %v2936_v24 = vsel %vm8158_vm4, %v6813_v27, %v2932_v42  ;;  %v8172_v16 = vmul.f32 %v7647_v32, %v501_v36  ;;  %v3012_v23 = vand.u32 2147483647, %v2698_v54 }
  0x79   : > { %15513 = vst [vmem:[#allocation23_spill] sm:$0xff] %v8167_v47  ;;  %v6817_v60 = vpop.eup %6816  ;;  %v8174_v50 = vsel %vm2938_vm5, %v2940_v7, %v2936_v24  ;;  %v1061_v11 = vmul.f32 %v7680_v57, %v8167_v47  ;;  %v389_v38 = vadd.s32 %v7625_v8, %v279_v0  ;;  %v3014_v48 = vand.u32 2147483648, %v2698_v54 }
  0x7a   : > { %15514 = vst [vmem:[#allocation24_spill] sm:$0xff] %v8174_v50  ;;  %v4437_v40 = vmul.f32 1.05, %v8174_v50  ;;  %5350 = vperm.xlu0 %6759, %v8174_v50   ;;  %v15110_v27 = vfloor.f32 %v8172_v16  ;;  %v8182_v1 = vadd.f32 1.0, %v6817_v60  ;;  %v8184_v13 = vmul.f32 3.0, %v1165_v28 }
  0x7b   : > { %v500_v7 = vcvt.s32.f32 %v389_v38  ;;  %6820 = vpow2.f32 %v6505_v63  ;;  %v284_v61 = vadd.s32 136, %v7619_v4  ;;  %v8187_v44 = vmul.f32 16.0, %v4657_v34  ;;  %v173_v34 = vld [vmem:[%s7632_s20 + $0x88] sm:$0xff] }
  0x7c   : > { %15515 = vst [vmem:[#allocation25_spill] sm:$0xff] %v8184_v13  ;;  %v15516_v21 = vfloor.f32 %v8082_v17  ;;  %v835_v29 = vmul.f32 114.0, %v15110_v27  ;;  %6822 = vrcp.f32 %v8182_v1  ;;  %v8196_v0 = vmul.f32 16.0, %v4656_v19 }
  0x7d   : > { %v6819_v42 = vpop.eup %6818  ;;  %v1170_v24 = vfloor.f32 %v1061_v11  ;;  %vm3008_vm6 = vweird.f32 %v2698_v54  ;;  %vm8198_vm7 = vcmp.eq.f32.partialorder %v3012_v23, 8.507059e+37  ;;  %v6611_v60 = vadd.f32 -0.025, %v4437_v40 }
  0x7e   : > { %v2147_v43 = vsel %vm2137_vm2, %v1165_v28, %v15516_v21  ;;  %15517 = vst [vmem:[#allocation26_spill] sm:$0xff] %v8196_v0  ;;  %v3004_v17 = vmul.f32 %v6819_v42, %v2698_v54  ;;  %v3015_v38 = vor.u32 1.1754944e-38, %v3014_v48  ;;  %vm2993_vm8 = vweird.f32 %v8182_v1 }
  0x7f   : > { %v2997_v28 = vand.u32 2147483647, %v8182_v1  ;;  %v2999_v21 = vand.u32 2147483648, %v8182_v1  ;;  %v8207_v27 = vmul.f32 %v7647_v32, %v500_v7  ;;  %v394_v19 = vadd.s32 %v7625_v8, %v284_v61 }
  0x80   : > { %v3005_v11 = vsub.f32 1.0, %v3004_v17  ;;  %vm3009_vm9 = vweird.f32 %v6819_v42  ;;  %v8210_v23 = vsub.f32 %v501_v36, %v835_v29  ;;  %v6510_v0 = vmul.f32 -1.442695, %v173_v34  ;;  %v172_v36 = vld [vmem:[%s7632_s20 + $0x80] sm:$0xff] }
  0x81   : > { %v6821_v40 = vpop.eup %6820  ;;  %v8212_v50 = vmul.f32 3.0, %v1170_v24  ;;  %v15521_v48 = vfloor.f32 %v8142_v3  ;;  %v15116_v10 = vfloor.f32 %v8207_v27  ;;  %v505_v55 = vcvt.s32.f32 %v394_v19  ;;  %vm8223_vm10 = vmor %vm3008_vm6, %vm3009_vm9  ;;  %v171_v19 = vld [vmem:[%s7632_s20 + $0x78] sm:$0xff] }
  0x82   : > { %15520 = vst [vmem:[#allocation27_spill] sm:$0xff] %v8210_v23  ;;  %v6823_v39 = vpop.eup %6822  ;;  %v4655_v33 = vadd.f32 %v6611_v60, %v2147_v43  ;;  %v3006_v61 = vmul.f32 %v6819_v42, %v3005_v11  ;;  %v8219_v17 = vadd.f32 1.0, %v6821_v40  ;;  %6824 = vpow2.f32 %v6510_v0 }
  0x83   : > { %v2152_v13 = vsel %vm2137_vm2, %v1170_v24, %v15521_v48  ;;  %v2989_v3 = vmul.f32 %v6823_v39, %v8182_v1  ;;  %vm8228_vm11 = vcmp.eq.f32.partialorder %v2997_v28, 8.507059e+37  ;;  %v834_v34 = vmul.f32 114.0, %v15116_v10 }
  0x84   : > { %v8235_v43 = vmul.f32 %v7647_v32, %v505_v55  ;;  %v3007_v60 = vadd.f32 %v6819_v42, %v3006_v61  ;;  %v1060_v54 = vmul.f32 %v7680_v57, %v8210_v23  ;;  %v3000_v0 = vor.u32 1.1754944e-38, %v2999_v21 }
  0x85   : > { %6826 = vrcp.f32 %v8219_v17  ;;  %v2990_v11 = vsub.f32 1.0, %v2989_v3  ;;  %vm2994_vm12 = vweird.f32 %v6823_v39  ;;  %v8241_v28 = vsub.f32 %v500_v7, %v834_v34 }
  0x86   : > { %v6509_v40 = vmul.f32 -1.442695, %v172_v36  ;;  %v8243_v48 = vmul.f32 16.0, %v4655_v33  ;;  %v3011_v10 = vsel %vm8223_vm10, %v6819_v42, %v3007_v60  ;;  %v15121_v45 = vfloor.f32 %v8235_v43  ;;  %vm8260_vm13 = vmor %vm2993_vm8, %vm2994_vm12 }
  0x87   : > { %15526 = vst [vmem:[#allocation28_spill] sm:$0xff] %v8241_v28  ;;  %v283_v61 = vadd.s32 128, %v7619_v4  ;;  %v8251_v21 = vsel %vm8198_vm7, %v3015_v38, %v3011_v10  ;;  %v2991_v23 = vmul.f32 %v6823_v39, %v2990_v11  ;;  %v1059_v3 = vmul.f32 %v7680_v57, %v8241_v28 }
  0x88   : > { %15527 = vst [vmem:[#allocation29_spill] sm:$0xff] %v8243_v48  ;;  %v6508_v7 = vmul.f32 -1.442695, %v171_v19  ;;  %v6825_v34 = vpop.eup %6824  ;;  %v4442_v33 = vmul.f32 1.05, %v8251_v21  ;;  %5375 = vperm.xlu2 %6761, %v8251_v21   ;;  %v1169_v36 = vfloor.f32 %v1060_v54  ;;  %v839_v10 = vmul.f32 114.0, %v15121_v45 }
  0x89   : > { %15528 = vst [vmem:[#allocation30_spill] sm:$0xff] %v8251_v21  ;;  %v393_v63 = vadd.s32 %v7625_v8, %v283_v61  ;;  %v2992_v38 = vadd.f32 %v6823_v39, %v2991_v23  ;;  %v2982_v29 = vand.u32 2147483647, %v8219_v17  ;;  %v8268_v60 = vadd.f32 1.0, %v6825_v34 }
  0x8a   : > { %6828 = vpow2.f32 %v6509_v40  ;;  %v6616_v54 = vadd.f32 -0.025, %v4442_v33  ;;  %v1168_v11 = vfloor.f32 %v1059_v3  ;;  %v2984_v1 = vand.u32 2147483648, %v8219_v17 }
  0x8b   : > { %v6827_v19 = vpop.eup %6826  ;;  %v8271_v28 = vsub.f32 %v505_v55, %v839_v10  ;;  %v2996_v48 = vsel %vm8260_vm13, %v6823_v39, %v2992_v38  ;;  %v504_v59 = vcvt.s32.f32 %v393_v63  ;;  %v282_v23 = vadd.s32 120, %v7619_v4  ;;  %v176_v38 = vld [vmem:[%s7632_s20 + $0xa0] sm:$0xff] }
  0x8c   : > { %v2974_v45 = vmul.f32 %v6827_v19, %v8219_v17  ;;  %v4660_v61 = vadd.f32 %v6616_v54, %v2152_v13  ;;  %v8279_v34 = vsel %vm8228_vm11, %v3000_v0, %v2996_v48  ;;  %vm2978_vm14 = vweird.f32 %v8219_v17  ;;  %v175_v17 = vld [vmem:[%s7632_s20 + $0x98] sm:$0xff] }
  0x8d   : > { %15531 = vst [vmem:[#allocation31_spill] sm:$0xff] %v8271_v28  ;;  %v1064_v55 = vmul.f32 %v7680_v57, %v8271_v28  ;;  %v4441_v40 = vmul.f32 1.05, %v8279_v34  ;;  %5370 = vperm.xlu1 %6760, %v8279_v34   ;;  %vm2979_vm15 = vweird.f32 %v6827_v19  ;;  %6830 = vrcp.f32 %v8268_v60 }
  0x8e   : > { %15532 = vst [vmem:[#allocation32_spill] sm:$0xff] %v8279_v34  ;;  %v2975_v39 = vsub.f32 1.0, %v2974_v45  ;;  %v8287_v3 = vmul.f32 3.0, %v1169_v36  ;;  %v15534_v13 = vfloor.f32 %v8172_v16  ;;  %vm8293_vm0 = vcmp.eq.f32.partialorder %v2982_v29, 8.507059e+37  ;;  %vm8310_vm1 = vmor %vm2978_vm14, %vm2979_vm15 }
  0x8f   : > { %v2985_v48 = vor.u32 1.1754944e-38, %v2984_v1  ;;  %v8297_v42 = vmul.f32 3.0, %v1168_v11  ;;  %v8300_v45 = vmul.f32 %v7647_v32, %v504_v59  ;;  %v392_v63 = vadd.s32 %v7625_v8, %v282_v23 }
  0x90   : > { %15533 = vst [vmem:[#allocation33_spill] sm:$0xff] %v8287_v3  ;;  %v2151_v24 = vsel %vm2137_vm2, %v1169_v36, %v15534_v13  ;;  %v6829_v33 = vpop.eup %6828  ;;  %v2976_v10 = vmul.f32 %v6827_v19, %v2975_v39  ;;  %v6615_v16 = vadd.f32 -0.025, %v4441_v40  ;;  %v15538_v54 = vfloor.f32 %v8207_v27 }
  0x91   : > { %15537 = vst [vmem:[#allocation34_spill] sm:$0xff] %v8297_v42  ;;  %v1173_v1 = vfloor.f32 %v1064_v55  ;;  %vm3053_vm3 = vweird.f32 %v8268_v60  ;;  %v8315_v39 = vmul.f32 16.0, %v4660_v61  ;;  %v15125_v23 = vfloor.f32 %v8300_v45 }
  0x92   : > { %v2150_v36 = vsel %vm2137_vm2, %v1168_v11, %v15538_v54  ;;  %v2977_v13 = vadd.f32 %v6827_v19, %v2976_v10  ;;  %v8318_v40 = vadd.f32 1.0, %v6829_v33  ;;  %v3057_v27 = vand.u32 2147483647, %v8268_v60 }
  0x93   : > { %15541 = vst [vmem:[#allocation35_spill] sm:$0xff] %v8315_v39  ;;  %v503_v42 = vcvt.s32.f32 %v392_v63  ;;  %6832 = vpow2.f32 %v6508_v7  ;;  %v6513_v11 = vmul.f32 -1.442695, %v176_v38  ;;  %v6831_v54 = vpop.eup %6830  ;;  %v3059_v55 = vand.u32 2147483648, %v8268_v60 }
  0x94   : > { %v2981_v34 = vsel %vm8310_vm1, %v6827_v19, %v2977_v13  ;;  %v838_v61 = vmul.f32 114.0, %v15125_v23  ;;  %6834 = vrcp.f32 %v8318_v40  ;;  %v4659_v10 = vadd.f32 %v6615_v16, %v2151_v24 }
  0x95   : > { %v8330_v33 = vsel %vm8293_vm0, %v2985_v48, %v2981_v34  ;;  %v8332_v63 = vmul.f32 3.0, %v1173_v1  ;;  %v3049_v7 = vmul.f32 %v6831_v54, %v8268_v60  ;;  %vm3054_vm4 = vweird.f32 %v6831_v54 }
  0x96   : > { %15542 = vst [vmem:[#allocation36_spill] sm:$0xff] %v8330_v33  ;;  %v4440_v38 = vmul.f32 1.05, %v8330_v33  ;;  %5365 = vperm.xlu0 %6759, %v8330_v33   ;;  %v8337_v19 = vsub.f32 %v504_v59, %v838_v61  ;;  %v6512_v29 = vmul.f32 -1.442695, %v175_v17  ;;  %v8340_v23 = vmul.f32 %v7647_v32, %v503_v42  ;;  %vm8358_vm7 = vmor %vm3053_vm3, %vm3054_vm4 }
  0x97   : > { %15543 = vst [vmem:[#allocation37_spill] sm:$0xff] %v8332_v63  ;;  %v3050_v13 = vsub.f32 1.0, %v3049_v7  ;;  %v287_v24 = vadd.s32 160, %v7619_v4  ;;  %6836 = vpow2.f32 %v6513_v11  ;;  %v15545_v0 = vfloor.f32 %v8235_v43 }
  0x98   : > { %15544 = vst [vmem:[#allocation38_spill] sm:$0xff] %v8337_v19  ;;  %v6614_v34 = vadd.f32 -0.025, %v4440_v38  ;;  %vm8347_vm5 = vcmp.eq.f32.partialorder %v3057_v27, 8.507059e+37  ;;  %v3060_v59 = vor.u32 1.1754944e-38, %v3059_v55  ;;  %v8351_v17 = vmul.f32 16.0, %v4659_v10 }
  0x99   : > { %v2155_v48 = vsel %vm2137_vm2, %v1173_v1, %v15545_v0  ;;  %v6833_v61 = vpop.eup %6832  ;;  %v3051_v7 = vmul.f32 %v6831_v54, %v3050_v13  ;;  %vm3038_vm6 = vweird.f32 %v8318_v40  ;;  %v15130_v33 = vfloor.f32 %v8340_v23 }
  0x9a   : > { %15548 = vst [vmem:[#allocation39_spill] sm:$0xff] %v8351_v17  ;;  %v6835_v11 = vpop.eup %6834  ;;  %v1063_v1 = vmul.f32 %v7680_v57, %v8337_v19  ;;  %v3042_v27 = vand.u32 2147483647, %v8318_v40  ;;  %v8365_v55 = vadd.f32 1.0, %v6833_v61  ;;  %v397_v10 = vadd.s32 %v7625_v8, %v287_v24 }
  0x9b   : > { %v3052_v38 = vadd.f32 %v6831_v54, %v3051_v7  ;;  %v3034_v13 = vmul.f32 %v6835_v11, %v8318_v40  ;;  %v837_v0 = vmul.f32 114.0, %v15130_v33  ;;  %6838 = vpow2.f32 %v6512_v29 }
  0x9c   : > { %v4658_v60 = vadd.f32 %v6614_v34, %v2150_v36  ;;  %v3044_v17 = vand.u32 2147483648, %v8318_v40  ;;  %6840 = vrcp.f32 %v8365_v55  ;;  %v286_v19 = vadd.s32 152, %v7619_v4 }
  0x9d   : > { %v6837_v3 = vpop.eup %6836  ;;  %v3056_v61 = vsel %vm8358_vm7, %v6831_v54, %v3052_v38  ;;  %v3035_v28 = vsub.f32 1.0, %v3034_v13  ;;  %vm3039_vm8 = vweird.f32 %v6835_v11  ;;  %v8376_v24 = vsub.f32 %v503_v42, %v837_v0 }
  0x9e   : > { %v8380_v7 = vsel %vm8347_vm5, %v3060_v59, %v3056_v61  ;;  %v1172_v29 = vfloor.f32 %v1063_v1  ;;  %v3027_v36 = vand.u32 2147483647, %v8365_v55  ;;  %v508_v34 = vcvt.s32.f32 %v397_v10  ;;  %vm8390_vm9 = vmor %vm3038_vm6, %vm3039_vm8 }
  0x9f   : > { %15551 = vst [vmem:[#allocation40_spill] sm:$0xff] %v8376_v24  ;;  %v4445_v33 = vmul.f32 1.05, %v8380_v7  ;;  %5390 = vperm.xlu2 %6761, %v8380_v7   ;;  %v3036_v63 = vmul.f32 %v6835_v11, %v3035_v28  ;;  %v3029_v43 = vand.u32 2147483648, %v8365_v55  ;;  %v8386_v54 = vadd.f32 1.0, %v6837_v3 }
  0xa0   : > { %15552 = vst [vmem:[#allocation41_spill] sm:$0xff] %v8380_v7  ;;  %vm8394_vm10 = vcmp.eq.f32.partialorder %v3042_v27, 8.507059e+37  ;;  %v3045_v59 = vor.u32 1.1754944e-38, %v3044_v17  ;;  %v1062_v1 = vmul.f32 %v7680_v57, %v8376_v24  ;;  %v8401_v28 = vmul.f32 %v7647_v32, %v508_v34 }
  0xa1   : > { %v6839_v10 = vpop.eup %6838  ;;  %v8403_v3 = vmul.f32 16.0, %v4658_v60  ;;  %v6619_v38 = vadd.f32 -0.025, %v4445_v33  ;;  %v3037_v40 = vadd.f32 %v6835_v11, %v3036_v63  ;;  %6842 = vrcp.f32 %v8386_v54 }
  0xa2   : > { %v6841_v13 = vpop.eup %6840  ;;  %v8406_v0 = vmul.f32 3.0, %v1172_v29  ;;  %v15559_v27 = vfloor.f32 %v8300_v45  ;;  %v15132_v61 = vfloor.f32 %v8401_v28  ;;  %v396_v24 = vadd.s32 %v7625_v8, %v286_v19 }
  0xa3   : > { %15557 = vst [vmem:[#allocation42_spill] sm:$0xff] %v8403_v3  ;;  %v3041_v60 = vsel %vm8390_vm9, %v6835_v11, %v3037_v40  ;;  %vm3023_vm11 = vweird.f32 %v8365_v55  ;;  %vm8417_vm12 = vcmp.eq.f32.partialorder %v3027_v36, 8.507059e+37  ;;  %v3030_v63 = vor.u32 1.1754944e-38, %v3029_v43 }
  0xa4   : > { %15558 = vst [vmem:[#allocation43_spill] sm:$0xff] %v8406_v0  ;;  %v2154_v17 = vsel %vm2137_vm2, %v1172_v29, %v15559_v27  ;;  %v8423_v45 = vsel %vm8394_vm10, %v3045_v59, %v3041_v60  ;;  %v1171_v29 = vfloor.f32 %v1062_v1  ;;  %v3019_v27 = vmul.f32 %v6841_v13, %v8365_v55  ;;  %v174_v1 = vld [vmem:[%s7632_s20 + $0x90] sm:$0xff] }
  0xa5   : > { %15562 = vst [vmem:[#allocation44_spill] sm:$0xff] %v8423_v45  ;;  %v842_v19 = vmul.f32 114.0, %v15132_v61  ;;  %v4663_v42 = vadd.f32 %v6619_v38, %v2155_v48  ;;  %v4444_v11 = vmul.f32 1.05, %v8423_v45  ;;  %5385 = vperm.xlu1 %6760, %v8423_v45   ;;  %vm3024_vm13 = vweird.f32 %v6841_v13 }
  0xa6   : > { %vm3098_vm14 = vweird.f32 %v8386_v54  ;;  %v3020_v36 = vsub.f32 1.0, %v3019_v27  ;;  %v507_v16 = vcvt.s32.f32 %v396_v24  ;;  %v8433_v59 = vadd.f32 1.0, %v6839_v10  ;;  %vm8451_vm15 = vmor %vm3023_vm11, %vm3024_vm13 }
  0xa7   : > { %v8431_v43 = vsub.f32 %v508_v34, %v842_v19  ;;  %v6843_v40 = vpop.eup %6842  ;;  %v6618_v60 = vadd.f32 -0.025, %v4444_v11  ;;  %v3102_v0 = vand.u32 2147483647, %v8386_v54  ;;  %v3104_v48 = vand.u32 2147483648, %v8386_v54 }
  0xa8   : > { %v285_v38 = vadd.s32 144, %v7619_v4  ;;  %v8439_v61 = vmul.f32 3.0, %v1171_v29  ;;  %v15565_v45 = vfloor.f32 %v8340_v23  ;;  %v3021_v27 = vmul.f32 %v6841_v13, %v3020_v36 }
  0xa9   : > { %15563 = vst [vmem:[#allocation45_spill] sm:$0xff] %v8431_v43  ;;  %v3094_v24 = vmul.f32 %v6843_v40, %v8386_v54  ;;  %v8446_v10 = vmul.f32 16.0, %v4663_v42  ;;  %v8457_v11 = vmul.f32 %v7680_v57, %v8431_v43  ;;  %v8460_v23 = vmul.f32 %v7647_v32, %v507_v16 }
  0xaa   : > { %15564 = vst [vmem:[#allocation46_spill] sm:$0xff] %v8439_v61  ;;  %v2153_v34 = vsel %vm2137_vm2, %v1171_v29, %v15565_v45  ;;  %6844 = vrcp.f32 %v8433_v59  ;;  %v3022_v45 = vadd.f32 %v6841_v13, %v3021_v27  ;;  %vm3099_vm0 = vweird.f32 %v6843_v40  ;;  %v179_v27 = vld [vmem:[%s7632_s20 + $0xb8] sm:$0xff] }
  0xab   : > { %15566 = vst [vmem:[#allocation47_spill] sm:$0xff] %v8446_v10  ;;  %v3095_v29 = vsub.f32 1.0, %v3094_v24  ;;  %v6511_v42 = vmul.f32 -1.442695, %v174_v1  ;;  %v4662_v55 = vadd.f32 %v6618_v60, %v2154_v17  ;;  %vm8463_vm1 = vcmp.eq.f32.partialorder %v3102_v0, 8.507059e+37  ;;  %vm8480_vm4 = vmor %vm3098_vm14, %vm3099_vm0 }
  0xac   : > { %v15138_v61 = vfloor.f32 %v8460_v23  ;;  %v395_v3 = vadd.s32 %v7625_v8, %v285_v38  ;;  %v3026_v43 = vsel %vm8451_vm15, %v6841_v13, %v3022_v45  ;;  %v3105_v7 = vor.u32 1.1754944e-38, %v3104_v48  ;;  %v178_v48 = vld [vmem:[%s7632_s20 + $0xb0] sm:$0xff] }
  0xad   : > { %v3096_v10 = vmul.f32 %v6843_v40, %v3095_v29  ;;  %vm3083_vm3 = vweird.f32 %v8433_v59  ;;  %v8475_v1 = vsel %vm8417_vm12, %v3030_v63, %v3026_v43  ;;  %v1176_v0 = vfloor.f32 %v8457_v11 }
  0xae   : > { %15571 = vst [vmem:[#allocation48_spill] sm:$0xff] %v8475_v1  ;;  %v841_v13 = vmul.f32 114.0, %v15138_v61  ;;  %v3087_v60 = vand.u32 2147483647, %v8433_v59  ;;  %v4443_v38 = vmul.f32 1.05, %v8475_v1  ;;  %5380 = vperm.xlu0 %6759, %v8475_v1   ;;  %v506_v63 = vcvt.s32.f32 %v395_v3 }
  0xaf   : > { %v3097_v33 = vadd.f32 %v6843_v40, %v3096_v10  ;;  %6846 = vpow2.f32 %v6511_v42  ;;  %v8490_v24 = vmul.f32 16.0, %v4662_v55  ;;  %v290_v19 = vadd.s32 184, %v7619_v4 }
  0xb0   : > { %v6845_v43 = vpop.eup %6844  ;;  %v8492_v54 = vsub.f32 %v507_v16, %v841_v13  ;;  %v6516_v11 = vmul.f32 -1.442695, %v179_v27  ;;  %v6617_v45 = vadd.f32 -0.025, %v4443_v38  ;;  %v6515_v39 = vmul.f32 -1.442695, %v178_v48 }
  0xb1   : > { %15574 = vst [vmem:[#allocation49_spill] sm:$0xff] %v8490_v24  ;;  %v3101_v29 = vsel %vm8480_vm4, %v6843_v40, %v3097_v33  ;;  %v3079_v61 = vmul.f32 %v6845_v43, %v8433_v59  ;;  %v3089_v3 = vand.u32 2147483648, %v8433_v59  ;;  %v8504_v42 = vmul.f32 %v7647_v32, %v506_v63 }
  0xb2   : > { %15575 = vst [vmem:[#allocation50_spill] sm:$0xff] %v8492_v54  ;;  %v8500_v10 = vsel %vm8463_vm1, %v3105_v7, %v3101_v29  ;;  %v400_v16 = vadd.s32 %v7625_v8, %v290_v19  ;;  %vm3084_vm5 = vweird.f32 %v6845_v43  ;;  %6848 = vpow2.f32 %v6516_v11 }
  0xb3   : > { %15576 = vst [vmem:[#allocation51_spill] sm:$0xff] %v8500_v10  ;;  %v4448_v55 = vmul.f32 1.05, %v8500_v10  ;;  %5405 = vperm.xlu2 %6761, %v8500_v10   ;;  %v3080_v27 = vsub.f32 1.0, %v3079_v61  ;;  %v1066_v40 = vmul.f32 %v7680_v57, %v8492_v54  ;;  %v731_v7 = vfloor.f32 %v8504_v42  ;;  %vm8519_vm6 = vmor %vm3083_vm3, %vm3084_vm5 }
  0xb4   : > { %v511_v36 = vcvt.s32.f32 %v400_v16  ;;  %v289_v17 = vadd.s32 176, %v7619_v4  ;;  %v4661_v48 = vadd.f32 %v6617_v45, %v2153_v34  ;;  %6850 = vpow2.f32 %v6515_v39 }
  0xb5   : > { %v6847_v13 = vpop.eup %6846  ;;  %v6622_v38 = vadd.f32 -0.025, %v4448_v55  ;;  %v3081_v33 = vmul.f32 %v6845_v43, %v3080_v27  ;;  %v15577_v19 = vfloor.f32 %v8401_v28  ;;  %v3090_v29 = vor.u32 1.1754944e-38, %v3089_v3 }
  0xb6   : > { %v840_v42 = vmul.f32 114.0, %v731_v7  ;;  %v2702_v16 = vadd.f32 1.0, %v6847_v13  ;;  %vm3088_vm7 = vcmp.eq.f32.partialorder %v3087_v60, 8.507059e+37  ;;  %v8524_v34 = vmul.f32 %v7647_v32, %v511_v36 }
  0xb7   : > { %v2158_v61 = vsel %vm2137_vm2, %v1176_v0, %v15577_v19  ;;  %v3082_v54 = vadd.f32 %v6845_v43, %v3081_v33  ;;  %v8527_v39 = vadd.s32 %v7625_v8, %v289_v17  ;;  %v8529_v28 = vmul.f32 3.0, %v1176_v0 }
  0xb8   : > { %v1175_v45 = vfloor.f32 %v1066_v40  ;;  %v8531_v55 = vsub.f32 %v506_v63, %v840_v42  ;;  %6852 = vrcp.f32 %v2702_v16  ;;  %v6849_v59 = vpop.eup %6848  ;;  %v8533_v27 = vmul.f32 16.0, %v4661_v48 }
  0xb9   : > { %15580 = vst [vmem:[#allocation52_spill] sm:$0xff] %v8529_v28  ;;  %v4666_v3 = vadd.f32 %v6622_v38, %v2158_v61  ;;  %v3086_v13 = vsel %vm8519_vm6, %v6845_v43, %v3082_v54  ;;  %v15140_v60 = vfloor.f32 %v8524_v34  ;;  %v3072_v0 = vand.u32 2147483647, %v2702_v16 }
  0xba   : > { %15581 = vst [vmem:[#allocation53_spill] sm:$0xff] %v8531_v55  ;;  %v8538_v33 = vsel %vm3088_vm7, %v3090_v29, %v3086_v13  ;;  %v1065_v17 = vmul.f32 %v7680_v57, %v8531_v55  ;;  %v8542_v19 = vadd.f32 1.0, %v6849_v59  ;;  %v6851_v63 = vpop.eup %6850  ;;  %v3074_v48 = vand.u32 2147483648, %v2702_v16 }
  0xbb   : > { %15582 = vst [vmem:[#allocation54_spill] sm:$0xff] %v8533_v27  ;;  %v4447_v40 = vmul.f32 1.05, %v8538_v33  ;;  %5400 = vperm.xlu1 %6760, %v8538_v33   ;;  %v845_v38 = vmul.f32 114.0, %v15140_v60  ;;  %v510_v43 = vcvt.s32.f32 %v8527_v39  ;;  %v8549_v54 = vmul.f32 3.0, %v1175_v45 }
  0xbc   : > { %15583 = vst [vmem:[#allocation55_spill] sm:$0xff] %v8538_v33  ;;  %v15585_v61 = vfloor.f32 %v8460_v23  ;;  %vm3068_vm8 = vweird.f32 %v2702_v16  ;;  %6854 = vrcp.f32 %v8542_v19  ;;  %v1174_v42 = vfloor.f32 %v1065_v17 }
  0xbd   : > { %15584 = vst [vmem:[#allocation56_spill] sm:$0xff] %v8549_v54  ;;  %v6621_v29 = vadd.f32 -0.025, %v4447_v40  ;;  %v8556_v59 = vsub.f32 %v511_v36, %v845_v38  ;;  %v8559_v13 = vmul.f32 %v7647_v32, %v510_v43  ;;  %v8561_v39 = vmul.f32 16.0, %v4666_v3  ;;  %v177_v40 = vld [vmem:[%s7632_s20 + $0xa8] sm:$0xff] }
  0xbe   : > { %v2157_v11 = vsel %vm2137_vm2, %v1175_v45, %v15585_v61  ;;  %v6853_v60 = vpop.eup %6852  ;;  %vm8563_vm9 = vcmp.eq.f32.partialorder %v3072_v0, 8.507059e+37  ;;  %v3147_v23 = vand.u32 2147483647, %v8542_v19  ;;  %v8568_v45 = vadd.f32 1.0, %v6851_v63 }
  0xbf   : > { %15586 = vst [vmem:[#allocation57_spill] sm:$0xff] %v8556_v59  ;;  %v3064_v61 = vmul.f32 %v6853_v60, %v2702_v16  ;;  %v3075_v55 = vor.u32 1.1754944e-38, %v3074_v48  ;;  %v8572_v36 = vmul.f32 %v7680_v57, %v8556_v59  ;;  %v3149_v17 = vand.u32 2147483648, %v8542_v19 }
  0xc0   : > { %15587 = vst [vmem:[#allocation58_spill] sm:$0xff] %v8561_v39  ;;  %v4665_v38 = vadd.f32 %v6621_v29, %v2157_v11  ;;  %vm3143_vm10 = vweird.f32 %v8542_v19  ;;  %v15147_v3 = vfloor.f32 %v8559_v13  ;;  %6856 = vrcp.f32 %v8568_v45 }
  0xc1   : > { %v8579_v0 = vmul.f32 3.0, %v1174_v42  ;;  %v8583_v63 = vsel %vm2137_vm2, %v1174_v42, %v731_v7  ;;  %v3065_v48 = vsub.f32 1.0, %v3064_v61  ;;  %vm3069_vm11 = vweird.f32 %v6853_v60  ;;  %v182_v42 = vld [vmem:[%s7632_s20 + $0xd0] sm:$0xff] }
  0xc2   : > { %v6855_v54 = vpop.eup %6854  ;;  %vm8585_vm12 = vcmp.eq.f32.partialorder %v3147_v23, 8.507059e+37  ;;  %v844_v11 = vmul.f32 114.0, %v15147_v3  ;;  %v288_v29 = vadd.s32 168, %v7619_v4  ;;  %v6514_v24 = vmul.f32 -1.442695, %v177_v40  ;;  %vm8598_vm13 = vmor %vm3068_vm8, %vm3069_vm11 }
  0xc3   : > { %15590 = vst [vmem:[#allocation59_spill] sm:$0xff] %v8579_v0  ;;  %v3066_v1 = vmul.f32 %v6853_v60, %v3065_v48  ;;  %v1179_v0 = vfloor.f32 %v8572_v36  ;;  %v3139_v59 = vmul.f32 %v6855_v54, %v8542_v19  ;;  %v3150_v7 = vor.u32 1.1754944e-38, %v3149_v17 }
  0xc4   : > { %v8595_v61 = vmul.f32 16.0, %v4665_v38  ;;  %vm3144_vm14 = vweird.f32 %v6855_v54  ;;  %vm3128_vm15 = vweird.f32 %v8568_v45  ;;  %v3132_v3 = vand.u32 2147483647, %v8568_v45 }
  0xc5   : > { %v3067_v40 = vadd.f32 %v6853_v60, %v3066_v1  ;;  %v3140_v48 = vsub.f32 1.0, %v3139_v59  ;;  %v398_v36 = vadd.s32 %v7625_v8, %v288_v29  ;;  %6858 = vpow2.f32 %v6514_v24  ;;  %vm8621_vm0 = vmor %vm3143_vm10, %vm3144_vm14 }
  0xc6   : > { %15593 = vst [vmem:[#allocation60_spill] sm:$0xff] %v8595_v61  ;;  %v6857_v39 = vpop.eup %6856  ;;  %v8605_v17 = vsub.f32 %v510_v43, %v844_v11  ;;  %v3134_v38 = vand.u32 2147483648, %v8568_v45  ;;  %v293_v16 = vadd.s32 208, %v7619_v4  ;;  %v6519_v61 = vmul.f32 -1.442695, %v182_v42 }
  0xc7   : > { %v3071_v10 = vsel %vm8598_vm13, %v6853_v60, %v3067_v40  ;;  %v8611_v28 = vmul.f32 3.0, %v1179_v0  ;;  %v3141_v5 = vmul.f32 %v6855_v54, %v3140_v48  ;;  %v3124_v1 = vmul.f32 %v6857_v39, %v8568_v45 }
  0xc8   : > { %15596 = vst [vmem:[#allocation61_spill] sm:$0xff] %v8605_v17  ;;  %v8616_v59 = vsel %vm8563_vm9, %v3075_v55, %v3071_v10  ;;  %vm3129_vm1 = vweird.f32 %v6857_v39  ;;  %v509_v43 = vcvt.s32.f32 %v398_v36  ;;  %v403_v60 = vadd.s32 %v7625_v8, %v293_v16  ;;  %v181_v16 = vld [vmem:[%s7632_s20 + $0xc8] sm:$0xff] }
  0xc9   : > { %15597 = vst [vmem:[#allocation62_spill] sm:$0xff] %v8611_v28  ;;  %v4446_v11 = vmul.f32 1.05, %v8616_v59  ;;  %5395 = vperm.xlu0 %6759, %v8616_v59   ;;  %v3142_v29 = vadd.f32 %v6855_v54, %v3141_v5  ;;  %v3125_v33 = vsub.f32 1.0, %v3124_v1  ;;  %6860 = vpow2.f32 %v6519_v61  ;;  %vm8644_vm3 = vmor %vm3128_vm15, %vm3129_vm1 }
  0xca   : > { %15598 = vst [vmem:[#allocation63_spill] sm:$0xff] %v8616_v59  ;;  %v1069_v10 = vmul.f32 %v7680_v57, %v8605_v17  ;;  %v3135_v55 = vor.u32 1.1754944e-38, %v3134_v38  ;;  %v8631_v19 = vmul.f32 %v7647_v32, %v509_v43  ;;  %v514_v42 = vcvt.s32.f32 %v403_v60 }
  0xcb   : > { %v6859_v23 = vpop.eup %6858  ;;  %v6620_v40 = vadd.f32 -0.025, %v4446_v11  ;;  %v3146_v48 = vsel %vm8621_vm0, %v6855_v54, %v3142_v29  ;;  %v3126_v36 = vmul.f32 %v6857_v39, %v3125_v33  ;;  %v292_v59 = vadd.s32 200, %v7619_v4 }
  0xcc   : > { %v8639_v5 = vsel %vm8585_vm12, %v3150_v7, %v3146_v48  ;;  %v734_v38 = vfloor.f32 %v8631_v19  ;;  %v8649_v1 = vadd.f32 1.0, %v6859_v23  ;;  %v8652_v54 = vmul.f32 %v7647_v32, %v514_v42 }
  0xcd   : > { %15601 = vst [vmem:[#allocation64_spill] sm:$0xff] %v8639_v5  ;;  %v15604_v24 = vfloor.f32 %v8524_v34  ;;  %v4451_v7 = vmul.f32 1.05, %v8639_v5  ;;  %5420 = vperm.xlu2 %6761, %v8639_v5   ;;  %v3127_v45 = vadd.f32 %v6857_v39, %v3126_v36  ;;  %vm3133_vm4 = vcmp.eq.f32.partialorder %v3132_v3, 8.507059e+37 }
  0xce   : > { %v843_v60 = vmul.f32 114.0, %v734_v38  ;;  %6862 = vrcp.f32 %v8649_v1  ;;  %v402_v11 = vadd.s32 %v7625_v8, %v292_v59  ;;  %v6518_v29 = vmul.f32 -1.442695, %v181_v16 }
  0xcf   : > { %v2161_v27 = vsel %vm2137_vm2, %v1179_v0, %v15604_v24  ;;  %v6861_v33 = vpop.eup %6860  ;;  %v4664_v19 = vadd.f32 %v6620_v40, %v8583_v63  ;;  %v6625_v23 = vadd.f32 -0.025, %v4451_v7  ;;  %v1178_v34 = vfloor.f32 %v1069_v10 }
  0xd0   : > { %v3131_v0 = vsel %vm8644_vm3, %v6857_v39, %v3127_v45  ;;  %v8667_v24 = vsub.f32 %v509_v43, %v843_v60  ;;  %v3117_v3 = vand.u32 2147483647, %v8649_v1  ;;  %v15153_v36 = vfloor.f32 %v8652_v54 }
  0xd1   : > { %v8665_v48 = vsel %vm3133_vm4, %v3135_v55, %v3131_v0  ;;  %v4669_v17 = vadd.f32 %v6625_v23, %v2161_v27  ;;  %v3119_v63 = vand.u32 2147483648, %v8649_v1  ;;  %v8674_v40 = vadd.f32 1.0, %v6861_v33 }
  0xd2   : > { %15605 = vst [vmem:[#allocation65_spill] sm:$0xff] %v8665_v48  ;;  %v4450_v59 = vmul.f32 1.05, %v8665_v48  ;;  %5415 = vperm.xlu1 %6760, %v8665_v48   ;;  %v1068_v39 = vmul.f32 %v7680_v57, %v8667_v24  ;;  %v848_v43 = vmul.f32 114.0, %v15153_v36  ;;  %v513_v10 = vcvt.s32.f32 %v402_v11 }
  0xd3   : > { %15606 = vst [vmem:[#allocation66_spill] sm:$0xff] %v8667_v24  ;;  %6864 = vpow2.f32 %v6518_v29  ;;  %v8680_v55 = vmul.f32 3.0, %v1178_v34  ;;  %v15608_v16 = vfloor.f32 %v8559_v13  ;;  %v8687_v45 = vmul.f32 16.0, %v4664_v19 }
  0xd4   : > { %v6624_v27 = vadd.f32 -0.025, %v4450_v59  ;;  %6866 = vrcp.f32 %v8674_v40  ;;  %v6863_v7 = vpop.eup %6862  ;;  %v1177_v60 = vfloor.f32 %v1068_v39  ;;  %vm3113_vm5 = vweird.f32 %v8649_v1  ;;  %v180_v59 = vld [vmem:[%s7632_s20 + $0xc0] sm:$0xff] }
  0xd5   : > { %15607 = vst [vmem:[#allocation67_spill] sm:$0xff] %v8680_v55  ;;  %v2160_v61 = vsel %vm2137_vm2, %v1178_v34, %v15608_v16  ;;  %v8690_v33 = vsub.f32 %v514_v42, %v848_v43  ;;  %v3109_v11 = vmul.f32 %v6863_v7, %v8649_v1  ;;  %vm8693_vm6 = vcmp.eq.f32.partialorder %v3117_v3, 8.507059e+37 }
  0xd6   : > { %15609 = vst [vmem:[#allocation68_spill] sm:$0xff] %v8687_v45  ;;  %v3120_v13 = vor.u32 1.1754944e-38, %v3119_v63  ;;  %v8698_v23 = vmul.f32 %v7647_v32, %v513_v10  ;;  %v8700_v34 = vmul.f32 16.0, %v4669_v17  ;;  %v4668_v19 = vadd.f32 %v6624_v27, %v2160_v61  ;;  %v185_v27 = vld [vmem:[%s7632_s20 + $0xe8] sm:$0xff] }
  0xd7   : > { %15610 = vst [vmem:[#allocation69_spill] sm:$0xff] %v8690_v33  ;;  %v1073_v0 = vmul.f32 %v7680_v57, %v8690_v33  ;;  %v3192_v42 = vand.u32 2147483647, %v8674_v40  ;;  %v3110_v39 = vsub.f32 1.0, %v3109_v11  ;;  %vm3114_vm7 = vweird.f32 %v6863_v7 }
  0xd8   : > { %15613 = vst [vmem:[#allocation70_spill] sm:$0xff] %v8700_v34  ;;  %vm3188_vm8 = vweird.f32 %v8674_v40  ;;  %v15157_v3 = vfloor.f32 %v8698_v23  ;;  %v8708_v43 = vmul.f32 3.0, %v1177_v60  ;;  %v8712_v17 = vsel %vm2137_vm2, %v1177_v60, %v734_v38  ;;  %vm8726_vm9 = vmor %vm3113_vm5, %vm3114_vm7 }
  0xd9   : > { %v6865_v63 = vpop.eup %6864  ;;  %v3194_v16 = vand.u32 2147483648, %v8674_v40  ;;  %v291_v61 = vadd.s32 192, %v7619_v4  ;;  %v3111_v11 = vmul.f32 %v6863_v7, %v3110_v39  ;;  %v6517_v55 = vmul.f32 -1.442695, %v180_v59  ;;  %v184_v59 = vld [vmem:[%s7632_s20 + $0xe0] sm:$0xff] }
  0xda   : > { %15614 = vst [vmem:[#allocation71_spill] sm:$0xff] %v8708_v43  ;;  %v6867_v36 = vpop.eup %6866  ;;  %v847_v48 = vmul.f32 114.0, %v15157_v3  ;;  %v8719_v24 = vadd.f32 1.0, %v6865_v63  ;;  %v8721_v45 = vmul.f32 16.0, %v4668_v19  ;;  %v1182_v60 = vfloor.f32 %v1073_v0 }
  0xdb   : > { %v3184_v43 = vmul.f32 %v6867_v36, %v8674_v40  ;;  %vm8731_vm10 = vcmp.eq.f32.partialorder %v3192_v42, 8.507059e+37  ;;  %v3112_v3 = vadd.f32 %v6863_v7, %v3111_v11  ;;  %v6522_v19 = vmul.f32 -1.442695, %v185_v27 }
  0xdc   : > { %15615 = vst [vmem:[#allocation72_spill] sm:$0xff] %v8721_v45  ;;  %v8735_v63 = vsub.f32 %v513_v10, %v847_v48  ;;  %6868 = vrcp.f32 %v8719_v24  ;;  %vm3189_vm11 = vweird.f32 %v6867_v36  ;;  %v3177_v1 = vand.u32 2147483647, %v8719_v24 }
  0xdd   : > { %v3185_v45 = vsub.f32 1.0, %v3184_v43  ;;  %v401_v33 = vadd.s32 %v7625_v8, %v291_v61  ;;  %v3116_v0 = vsel %vm8726_vm9, %v6863_v7, %v3112_v3  ;;  %6870 = vpow2.f32 %v6517_v55  ;;  %vm8756_vm12 = vmor %vm3188_vm8, %vm3189_vm11 }
  0xde   : > { %15620 = vst [vmem:[#allocation73_spill] sm:$0xff] %v8735_v63  ;;  %v1072_v42 = vmul.f32 %v7680_v57, %v8735_v63  ;;  %v296_v48 = vadd.s32 232, %v7619_v4  ;;  %v8748_v10 = vsel %vm8693_vm6, %v3120_v13, %v3116_v0  ;;  %v3195_v43 = vor.u32 1.1754944e-38, %v3194_v16 }
  0xdf   : > { %15621 = vst [vmem:[#allocation74_spill] sm:$0xff] %v8748_v10  ;;  %v3186_v27 = vmul.f32 %v6867_v36, %v3185_v45  ;;  %v6521_v11 = vmul.f32 -1.442695, %v184_v59  ;;  %v4449_v34 = vmul.f32 1.05, %v8748_v10  ;;  %5410 = vperm.xlu0 %6759, %v8748_v10   ;;  %v8752_v61 = vmul.f32 3.0, %v1182_v60 }
  0xe0   : > { %v512_v55 = vcvt.s32.f32 %v401_v33  ;;  %v406_v29 = vadd.s32 %v7625_v8, %v296_v48  ;;  %v15625_v13 = vfloor.f32 %v8652_v54  ;;  %vm3173_vm13 = vweird.f32 %v8719_v24 }
  0xe1   : > { %15622 = vst [vmem:[#allocation75_spill] sm:$0xff] %v8752_v61  ;;  %v3187_v3 = vadd.f32 %v6867_v36, %v3186_v27  ;;  %6872 = vpow2.f32 %v6522_v19  ;;  %v1181_v38 = vfloor.f32 %v1072_v42  ;;  %vm8766_vm14 = vcmp.eq.f32.partialorder %v3177_v1, 8.507059e+37 }
  0xe2   : > { %v2164_v45 = vsel %vm2137_vm2, %v1182_v60, %v15625_v13  ;;  %v6869_v16 = vpop.eup %6868  ;;  %v3179_v33 = vand.u32 2147483648, %v8719_v24  ;;  %v8772_v59 = vmul.f32 %v7647_v32, %v512_v55  ;;  %v6623_v54 = vadd.f32 -0.025, %v4449_v34  ;;  %v183_v13 = vld [vmem:[%s7632_s20 + $0xd8] sm:$0xff] }
  0xe3   : > { %v3191_v60 = vsel %vm8756_vm12, %v6867_v36, %v3187_v3  ;;  %v3169_v0 = vmul.f32 %v6869_v16, %v8719_v24  ;;  %v517_v48 = vcvt.s32.f32 %v406_v29  ;;  %v6871_v19 = vpop.eup %6870  ;;  %vm3174_vm15 = vweird.f32 %v6869_v16  ;;  %v188_v29 = vld [vmem:[%s7632_s20 + $0x100] sm:$0xff] }
  0xe4   : > { %v8779_v1 = vsel %vm8731_vm10, %v3195_v43, %v3191_v60  ;;  %v737_v42 = vfloor.f32 %v8772_v59  ;;  %v295_v27 = vadd.s32 224, %v7619_v4  ;;  %v2708_v36 = vadd.f32 1.0, %v6871_v19  ;;  %vm8797_vm0 = vmor %vm3173_vm13, %vm3174_vm15 }
  0xe5   : > { %15628 = vst [vmem:[#allocation76_spill] sm:$0xff] %v8779_v1  ;;  %v4454_v63 = vmul.f32 1.05, %v8779_v1  ;;  %5435 = vperm.xlu2 %6761, %v8779_v1   ;;  %v3170_v34 = vsub.f32 1.0, %v3169_v0  ;;  %v8787_v7 = vmul.f32 %v7647_v32, %v517_v48  ;;  %v3180_v3 = vor.u32 1.1754944e-38, %v3179_v33 }
  0xe6   : > { %v846_v39 = vmul.f32 114.0, %v737_v42  ;;  %v8791_v43 = vadd.s32 %v7625_v8, %v295_v27  ;;  %6874 = vpow2.f32 %v6521_v11  ;;  %v6520_v61 = vmul.f32 -1.442695, %v183_v13 }
  0xe7   : > { %v6873_v59 = vpop.eup %6872  ;;  %v6628_v60 = vadd.f32 -0.025, %v4454_v63  ;;  %v3171_v10 = vmul.f32 %v6869_v16, %v3170_v34  ;;  %6876 = vrcp.f32 %v2708_v36  ;;  %v4667_v5 = vadd.f32 %v6623_v54, %v8712_v17 }
  0xe8   : > { %v8801_v33 = vsub.f32 %v512_v55, %v846_v39  ;;  %v15165_v19 = vfloor.f32 %v8787_v7  ;;  %v6525_v27 = vmul.f32 -1.442695, %v188_v29  ;;  %v8804_v11 = vmul.f32 3.0, %v1181_v38 }
  0xe9   : > { %v3172_v63 = vadd.f32 %v6869_v16, %v3171_v10  ;;  %v8806_v34 = vadd.f32 1.0, %v6873_v59  ;;  %v516_v13 = vcvt.s32.f32 %v8791_v43  ;;  %v15633_v17 = vfloor.f32 %v8698_v23 }
  0xea   : > { %15631 = vst [vmem:[#allocation77_spill] sm:$0xff] %v8801_v33  ;;  %v1071_v54 = vmul.f32 %v7680_v57, %v8801_v33  ;;  %v3162_v55 = vand.u32 2147483647, %v2708_v36  ;;  %v851_v39 = vmul.f32 114.0, %v15165_v19  ;;  %v4672_v29 = vadd.f32 %v6628_v60, %v2164_v45 }
  0xeb   : > { %15632 = vst [vmem:[#allocation78_spill] sm:$0xff] %v8804_v11  ;;  %v2163_v24 = vsel %vm2137_vm2, %v1181_v38, %v15633_v17  ;;  %v3176_v10 = vsel %vm8797_vm0, %v6869_v16, %v3172_v63  ;;  %v3164_v59 = vand.u32 2147483648, %v2708_v36  ;;  %6878 = vrcp.f32 %v8806_v34 }
  0xec   : > { %v6875_v43 = vpop.eup %6874  ;;  %v8820_v11 = vmul.f32 16.0, %v4667_v5  ;;  %v8824_v23 = vsel %vm8766_vm14, %v3180_v3, %v3176_v10  ;;  %v1180_v38 = vfloor.f32 %v1071_v54  ;;  %v8826_v17 = vsub.f32 %v517_v48, %v851_v39 }
  0xed   : > { %15635 = vst [vmem:[#allocation80_spill] sm:$0xff] %v8824_v23  ;;  %v6877_v33 = vpop.eup %6876  ;;  %v4453_v19 = vmul.f32 1.05, %v8824_v23  ;;  %5430 = vperm.xlu1 %6760, %v8824_v23   ;;  %v3237_v45 = vand.u32 2147483647, %v8806_v34  ;;  %v8832_v16 = vmul.f32 %v7647_v32, %v516_v13  ;;  %v8834_v60 = vadd.f32 1.0, %v6875_v43 }
  0xee   : > { %15634 = vst [vmem:[#allocation79_spill] sm:$0xff] %v8820_v11  ;;  %v3154_v5 = vmul.f32 %v6877_v33, %v2708_v36  ;;  %vm3158_vm1 = vweird.f32 %v2708_v36  ;;  %vm8836_vm3 = vcmp.eq.f32.partialorder %v3162_v55, 8.507059e+37  ;;  %v3239_v48 = vand.u32 2147483648, %v8806_v34 }
  0xef   : > { %15636 = vst [vmem:[#allocation81_spill] sm:$0xff] %v8826_v17  ;;  %v8841_v3 = vmul.f32 16.0, %v4672_v29  ;;  %v6627_v0 = vadd.f32 -0.025, %v4453_v19  ;;  %v3165_v63 = vor.u32 1.1754944e-38, %v3164_v59  ;;  %v8845_v54 = vmul.f32 %v7680_v57, %v8826_v17 }
  0xf0   : > { %v3155_v39 = vsub.f32 1.0, %v3154_v5  ;;  %vm3159_vm4 = vweird.f32 %v6877_v33  ;;  %v15169_v10 = vfloor.f32 %v8832_v16  ;;  %6880 = vrcp.f32 %v8834_v60 }
  0xf1   : > { %15639 = vst [vmem:[#allocation82_spill] sm:$0xff] %v8841_v3  ;;  %v6879_v55 = vpop.eup %6878  ;;  %v8849_v43 = vmul.f32 3.0, %v1180_v38  ;;  %v2162_v29 = vsel %vm2137_vm2, %v1180_v38, %v737_v42  ;;  %vm3233_vm5 = vweird.f32 %v8806_v34  ;;  %vm8854_vm6 = vcmp.eq.f32.partialorder %v3237_v45, 8.507059e+37  ;;  %vm8862_vm7 = vmor %vm3158_vm1, %vm3159_vm4  ;;  %v187_v45 = vld [vmem:[%s7632_s20 + $0xf8] sm:$0xff] }
  0xf2   : > { %v3156_v59 = vmul.f32 %v6877_v33, %v3155_v39  ;;  %v3229_v5 = vmul.f32 %v6879_v55, %v8806_v34  ;;  %v3240_v23 = vor.u32 1.1754944e-38, %v3239_v48  ;;  %v850_v11 = vmul.f32 114.0, %v15169_v10 }
  0xf3   : > { %15640 = vst [vmem:[#allocation83_spill] sm:$0xff] %v8849_v43  ;;  %v4671_v17 = vadd.f32 %v6627_v0, %v2163_v24  ;;  %v1185_v42 = vfloor.f32 %v8845_v54  ;;  %vm3218_vm8 = vweird.f32 %v8834_v60  ;;  %v3222_v38 = vand.u32 2147483647, %v8834_v60 }
  0xf4   : > { %v3157_v39 = vadd.f32 %v6877_v33, %v3156_v59  ;;  %v3230_v3 = vsub.f32 1.0, %v3229_v5  ;;  %vm3234_vm9 = vweird.f32 %v6879_v55  ;;  %v8870_v48 = vsub.f32 %v516_v13, %v850_v11 }
  0xf5   : > { %v3224_v10 = vand.u32 2147483648, %v8834_v60  ;;  %v294_v36 = vadd.s32 216, %v7619_v4  ;;  %6882 = vpow2.f32 %v6520_v61  ;;  %v299_v24 = vadd.s32 256, %v7619_v4  ;;  %vm8885_vm10 = vmor %vm3233_vm5, %vm3234_vm9 }
  0xf6   : > { %15645 = vst [vmem:[#allocation84_spill] sm:$0xff] %v8870_v48  ;;  %v6881_v0 = vpop.eup %6880  ;;  %v3161_v54 = vsel %vm8862_vm7, %v6877_v33, %v3157_v39  ;;  %v3231_v1 = vmul.f32 %v6879_v55, %v3230_v3  ;;  %6884 = vpow2.f32 %v6525_v27  ;;  %v6524_v28 = vmul.f32 -1.442695, %v187_v45 }
  0xf7   : > { %v8877_v14 = vmul.f32 16.0, %v4671_v17  ;;  %v8881_v11 = vsel %vm8836_vm3, %v3165_v63, %v3161_v54  ;;  %v3214_v61 = vmul.f32 %v6881_v0, %v8834_v60  ;;  %v404_v43 = vadd.s32 %v7625_v8, %v294_v36 }
  0xf8   : > { %15647 = vst [vmem:[#allocation86_spill] sm:$0xff] %v8881_v11  ;;  %v4452_v33 = vmul.f32 1.05, %v8881_v11  ;;  %5425 = vperm.xlu0 %6759, %v8881_v11   ;;  %v3232_v27 = vadd.f32 %v6879_v55, %v3231_v1  ;;  %v1075_v17 = vmul.f32 %v7680_v57, %v8870_v48  ;;  %v409_v40 = vadd.s32 %v7625_v8, %v299_v24 }
  0xf9   : > { %15646 = vst [vmem:[#allocation85_spill] sm:$0xff] %v8877_v14  ;;  %v3215_v3 = vsub.f32 1.0, %v3214_v61  ;;  %vm3219_vm11 = vweird.f32 %v6881_v0  ;;  %vm8896_vm12 = vcmp.eq.f32.partialorder %v3222_v38, 8.507059e+37  ;;  %v515_v63 = vcvt.s32.f32 %v404_v43 }
  0xfa   : > { %v6626_v59 = vadd.f32 -0.025, %v4452_v33  ;;  %v3236_v5 = vsel %vm8885_vm10, %v6879_v55, %v3232_v27  ;;  %v298_v45 = vadd.s32 248, %v7619_v4  ;;  %6886 = vpow2.f32 %v6524_v28  ;;  %vm8915_vm13 = vmor %vm3218_vm8, %vm3219_vm11 }
  0xfb   : > { %v6883_v1 = vpop.eup %6882  ;;  %v8905_v39 = vsel %vm8854_vm6, %v3240_v23, %v3236_v5  ;;  %v3216_v36 = vmul.f32 %v6881_v0, %v3215_v3  ;;  %v8908_v24 = vmul.f32 %v7647_v32, %v515_v63  ;;  %v520_v38 = vcvt.s32.f32 %v409_v40 }
  0xfc   : > { %15652 = vst [vmem:[#allocation87_spill] sm:$0xff] %v8905_v39  ;;  %v6885_v54 = vpop.eup %6884  ;;  %v4457_v61 = vmul.f32 1.05, %v8905_v39  ;;  %5450 = vperm.xlu2 %6761, %v8905_v39   ;;  %v1184_v13 = vfloor.f32 %v1075_v17  ;;  %v3225_v23 = vor.u32 1.1754944e-38, %v3224_v10  ;;  %v2711_v55 = vadd.f32 1.0, %v6883_v1  ;;  %v190_v39 = vld [vmem:[%s7632_s20 + $0x110] sm:$0xff] }
  0xfd   : > { %v3217_v19 = vadd.f32 %v6881_v0, %v3216_v36  ;;  %v740_v43 = vfloor.f32 %v8908_v24  ;;  %v8921_v33 = vmul.f32 %v7647_v32, %v520_v38  ;;  %v8923_v27 = vadd.f32 1.0, %v6885_v54 }
  0xfe   : > { %v4670_v40 = vadd.f32 %v6626_v59, %v2162_v29  ;;  %v8925_v3 = vmul.f32 3.0, %v1185_v42  ;;  %v6631_v17 = vadd.f32 -0.025, %v4457_v61  ;;  %6888 = vrcp.f32 %v2711_v55 }
  0xff   : > { %v15656_v60 = vfloor.f32 %v8787_v7  ;;  %v3221_v10 = vsel %vm8915_vm13, %v6881_v0, %v3217_v19  ;;  %v849_v1 = vmul.f32 114.0, %v740_v43  ;;  %v8934_v36 = vadd.s32 %v7625_v8, %v298_v45 }
 0x100   : > { %15655 = vst [vmem:[#allocation88_spill] sm:$0xff] %v8925_v3  ;;  %v6887_v24 = vpop.eup %6886  ;;  %v8938_v29 = vsel %vm8896_vm12, %v3225_v23, %v3221_v10  ;;  %v3207_v59 = vand.u32 2147483647, %v2711_v55  ;;  %v15172_v54 = vfloor.f32 %v8921_v33  ;;  %6890 = vrcp.f32 %v8923_v27 }
 0x101   : > { %v2167_v5 = vsel %vm2137_vm2, %v1185_v42, %v15656_v60  ;;  %15657 = vst [vmem:[#allocation89_spill] sm:$0xff] %v8938_v29  ;;  %v8942_v7 = vmul.f32 3.0, %v1184_v13  ;;  %v15659_v42 = vfloor.f32 %v8832_v16  ;;  %v4456_v45 = vmul.f32 1.05, %v8938_v29  ;;  %5445 = vperm.xlu1 %6760, %v8938_v29  }
 0x102   : > { %v8950_v61 = vsub.f32 %v515_v63, %v849_v1  ;;  %v8952_v34 = vmul.f32 16.0, %v4670_v40  ;;  %v4675_v28 = vadd.f32 %v6631_v17, %v2167_v5  ;;  %v3209_v23 = vand.u32 2147483648, %v2711_v55 }
 0x103   : > { %15658 = vst [vmem:[#allocation90_spill] sm:$0xff] %v8942_v7  ;;  %v2166_v0 = vsel %vm2137_vm2, %v1184_v13, %v15659_v42  ;;  %v854_v19 = vmul.f32 114.0, %v15172_v54  ;;  %v6630_v60 = vadd.f32 -0.025, %v4456_v45  ;;  %vm3203_vm14 = vweird.f32 %v2711_v55  ;;  %v186_v7 = vld [vmem:[%s7632_s20 + $0xf0] sm:$0xff] }
 0x104   : > { %15660 = vst [vmem:[#allocation91_spill] sm:$0xff] %v8950_v61  ;;  %v1074_v16 = vmul.f32 %v7680_v57, %v8950_v61  ;;  %v519_v13 = vcvt.s32.f32 %v8934_v36  ;;  %v6889_v10 = vpop.eup %6888  ;;  %vm8959_vm15 = vcmp.eq.f32.partialorder %v3207_v59, 8.507059e+37  ;;  %v3282_v40 = vand.u32 2147483647, %v8923_v27 }
 0x105   : > { %15661 = vst [vmem:[#allocation92_spill] sm:$0xff] %v8952_v34  ;;  %v8963_v63 = vsub.f32 %v520_v38, %v854_v19  ;;  %v8966_v17 = vadd.f32 1.0, %v6887_v24  ;;  %v4674_v5 = vadd.f32 %v6630_v60, %v2166_v0  ;;  %v3199_v45 = vmul.f32 %v6889_v10, %v2711_v55  ;;  %v191_v34 = vld [vmem:[%s7632_s20 + $0x118] sm:$0xff] }
 0x106   : > { %v1183_v1 = vfloor.f32 %v1074_v16  ;;  %v3284_v54 = vand.u32 2147483648, %v8923_v27  ;;  %v6891_v29 = vpop.eup %6890  ;;  %v8969_v61 = vmul.f32 16.0, %v4675_v28  ;;  %v3210_v36 = vor.u32 1.1754944e-38, %v3209_v23 }
 0x107   : > { %15664 = vst [vmem:[#allocation93_spill] sm:$0xff] %v8963_v63  ;;  %v8972_v59 = vmul.f32 %v7647_v32, %v519_v13  ;;  %6892 = vrcp.f32 %v8966_v17  ;;  %v3200_v38 = vsub.f32 1.0, %v3199_v45  ;;  %vm3204_vm0 = vweird.f32 %v6889_v10 }
 0x108   : > { %15665 = vst [vmem:[#allocation94_spill] sm:$0xff] %v8969_v61  ;;  %vm3278_vm1 = vweird.f32 %v8923_v27  ;;  %v297_v24 = vadd.s32 240, %v7619_v4  ;;  %v8979_v0 = vmul.f32 %v7680_v57, %v8963_v63  ;;  %v3274_v28 = vmul.f32 %v6891_v29, %v8923_v27  ;;  %vm8996_vm4 = vmor %vm3203_vm14, %vm3204_vm0 }
 0x109   : > { %vm8982_vm3 = vcmp.eq.f32.partialorder %v3282_v40, 8.507059e+37  ;;  %v15180_v19 = vfloor.f32 %v8972_v59  ;;  %v8987_v60 = vmul.f32 16.0, %v4674_v5  ;;  %v8989_v16 = vmul.f32 3.0, %v1183_v1 }
 0x10a   : > { %v3201_v45 = vmul.f32 %v6889_v10, %v3200_v38  ;;  %v3285_v48 = vor.u32 1.1754944e-38, %v3284_v54  ;;  %v2165_v14 = vsel %vm2137_vm2, %v1183_v1, %v740_v43  ;;  %v3275_v40 = vsub.f32 1.0, %v3274_v28 }
 0x10b   : > { %15668 = vst [vmem:[#allocation95_spill] sm:$0xff] %v8987_v60  ;;  %vm3279_vm5 = vweird.f32 %v6891_v29  ;;  %v853_v5 = vmul.f32 114.0, %v15180_v19  ;;  %vm3263_vm6 = vweird.f32 %v8966_v17  ;;  %v3267_v54 = vand.u32 2147483647, %v8966_v17 }
 0x10c   : > { %15669 = vst [vmem:[#allocation96_spill] sm:$0xff] %v8989_v16  ;;  %v3202_v60 = vadd.f32 %v6889_v10, %v3201_v45  ;;  %v407_v38 = vadd.s32 %v7625_v8, %v297_v24  ;;  %v3276_v43 = vmul.f32 %v6891_v29, %v3275_v40  ;;  %v3269_v55 = vand.u32 2147483648, %v8966_v17  ;;  %vm9010_vm7 = vmor %vm3278_vm1, %vm3279_vm5 }
 0x10d   : > { %v6893_v16 = vpop.eup %6892  ;;  %v6523_v1 = vmul.f32 -1.442695, %v186_v7  ;;  %v6528_v63 = vmul.f32 -1.442695, %v191_v34  ;;  %v9014_v45 = vsub.f32 %v519_v13, %v853_v5  ;;  %v302_v13 = vadd.s32 280, %v7619_v4 }
 0x10e   : > { %v3206_v28 = vsel %vm8996_vm4, %v6889_v10, %v3202_v60  ;;  %v3259_v61 = vmul.f32 %v6893_v16, %v8966_v17  ;;  %v518_v24 = vcvt.s32.f32 %v407_v38  ;;  %v3277_v7 = vadd.f32 %v6891_v29, %v3276_v43 }
 0x10f   : > { %15674 = vst [vmem:[#allocation97_spill] sm:$0xff] %v9014_v45  ;;  %v9020_v40 = vsel %vm8959_vm15, %v3210_v36, %v3206_v28  ;;  %vm3264_vm8 = vweird.f32 %v6893_v16  ;;  %6894 = vpow2.f32 %v6523_v1  ;;  %v1188_v10 = vfloor.f32 %v8979_v0 }
 0x110   : > { %15675 = vst [vmem:[#allocation98_spill] sm:$0xff] %v9020_v40  ;;  %v4455_v11 = vmul.f32 1.05, %v9020_v40  ;;  %5440 = vperm.xlu0 %6759, %v9020_v40   ;;  %v3260_v27 = vsub.f32 1.0, %v3259_v61  ;;  %v9025_v34 = vmul.f32 %v7647_v32, %v518_v24  ;;  %v3281_v42 = vsel %vm9010_vm7, %v6891_v29, %v3277_v7  ;;  %vm9043_vm9 = vmor %vm3263_vm6, %vm3264_vm8 }
 0x111   : > { %6896 = vpow2.f32 %v6528_v63  ;;  %v6527_v36 = vmul.f32 -1.442695, %v190_v39  ;;  %v9033_v60 = vsel %vm8982_vm3, %v3285_v48, %v3281_v42  ;;  %v1078_v5 = vmul.f32 %v7680_v57, %v9014_v45 }
 0x112   : > { %15676 = vst [vmem:[#allocation99_spill] sm:$0xff] %v9033_v60  ;;  %v3261_v61 = vmul.f32 %v6893_v16, %v3260_v27  ;;  %v743_v38 = vfloor.f32 %v9025_v34  ;;  %v4460_v43 = vmul.f32 1.05, %v9033_v60  ;;  %5465 = vperm.xlu2 %6761, %v9033_v60   ;;  %vm9047_vm10 = vcmp.eq.f32.partialorder %v3267_v54, 8.507059e+37 }
 0x113   : > { %v3270_v39 = vor.u32 1.1754944e-38, %v3269_v55  ;;  %v412_v63 = vadd.s32 %v7625_v8, %v302_v13  ;;  %v6629_v0 = vadd.f32 -0.025, %v4455_v11  ;;  %v301_v1 = vadd.s32 272, %v7619_v4 }
 0x114   : > { %v3262_v23 = vadd.f32 %v6893_v16, %v3261_v61  ;;  %v852_v19 = vmul.f32 114.0, %v743_v38  ;;  %v15681_v7 = vfloor.f32 %v8921_v33  ;;  %v6634_v27 = vadd.f32 -0.025, %v4460_v43 }
 0x115   : > { %v6895_v28 = vpop.eup %6894  ;;  %v523_v34 = vcvt.s32.f32 %v412_v63  ;;  %6898 = vpow2.f32 %v6527_v36  ;;  %v1187_v54 = vfloor.f32 %v1078_v5  ;;  %v9061_v61 = vmul.f32 3.0, %v1188_v10 }
 0x116   : > { %v2170_v17 = vsel %vm2137_vm2, %v1188_v10, %v15681_v7  ;;  %v3266_v55 = vsel %vm9043_vm9, %v6893_v16, %v3262_v23  ;;  %v9059_v42 = vsub.f32 %v518_v24, %v852_v19  ;;  %v2714_v11 = vadd.f32 1.0, %v6895_v28 }
 0x117   : > { %v6897_v13 = vpop.eup %6896  ;;  %15683 = vst [vmem:[#allocation101_spill] sm:$0xff] %v9061_v61  ;;  %v9065_v33 = vsel %vm9047_vm10, %v3270_v39, %v3266_v55  ;;  %v9068_v7 = vmul.f32 %v7647_v32, %v523_v34  ;;  %v411_v36 = vadd.s32 %v7625_v8, %v301_v1  ;;  %v4673_v5 = vadd.f32 %v6629_v0, %v2165_v14  ;;  %v189_v39 = vld [vmem:[%s7632_s20 + $0x108] sm:$0xff] }
 0x118   : > { %15682 = vst [vmem:[#allocation100_spill] sm:$0xff] %v9059_v42  ;;  %v4459_v43 = vmul.f32 1.05, %v9065_v33  ;;  %5460 = vperm.xlu1 %6760, %v9065_v33   ;;  %v1077_v16 = vmul.f32 %v7680_v57, %v9059_v42  ;;  %6900 = vrcp.f32 %v2714_v11  ;;  %v4678_v24 = vadd.f32 %v6634_v27, %v2170_v17 }
 0x119   : > { %15684 = vst [vmem:[#allocation102_spill] sm:$0xff] %v9065_v33  ;;  %v3252_v10 = vand.u32 2147483647, %v2714_v11  ;;  %v3254_v29 = vand.u32 2147483648, %v2714_v11  ;;  %v748_v48 = vfloor.f32 %v9068_v7  ;;  %v9077_v63 = vmul.f32 3.0, %v1187_v54 }
 0x11a   : > { %v6633_v23 = vadd.f32 -0.025, %v4459_v43  ;;  %v2719_v19 = vadd.f32 1.0, %v6897_v13  ;;  %v522_v1 = vcvt.s32.f32 %v411_v36  ;;  %v15686_v0 = vfloor.f32 %v8972_v59 }
 0x11b   : > { %15685 = vst [vmem:[#allocation103_spill] sm:$0xff] %v9077_v63  ;;  %v6899_v14 = vpop.eup %6898  ;;  %v1186_v55 = vfloor.f32 %v1077_v16  ;;  %v857_v33 = vmul.f32 114.0, %v748_v48  ;;  %v300_v17 = vadd.s32 264, %v7619_v4  ;;  %v9084_v27 = vmul.f32 16.0, %v4673_v5 }
 0x11c   : > { %v2169_v28 = vsel %vm2137_vm2, %v1187_v54, %v15686_v0  ;;  %vm3248_vm11 = vweird.f32 %v2714_v11  ;;  %6902 = vrcp.f32 %v2719_v19  ;;  %v6526_v7 = vmul.f32 -1.442695, %v189_v39 }
 0x11d   : > { %15687 = vst [vmem:[#allocation104_spill] sm:$0xff] %v9084_v27  ;;  %v9086_v42 = vmul.f32 16.0, %v4678_v24  ;;  %vm9088_vm12 = vcmp.eq.f32.partialorder %v3252_v10, 8.507059e+37  ;;  %v3255_v36 = vor.u32 1.1754944e-38, %v3254_v29  ;;  %v9092_v59 = vsub.f32 %v523_v34, %v857_v33 }
 0x11e   : > { %v6901_v43 = vpop.eup %6900  ;;  %v4677_v54 = vadd.f32 %v6633_v23, %v2169_v28  ;;  %v9095_v16 = vmul.f32 %v7647_v32, %v522_v1  ;;  %v2718_v0 = vadd.f32 1.0, %v6899_v14  ;;  %v410_v5 = vadd.s32 %v7625_v8, %v300_v17 }
 0x11f   : > { %15688 = vst [vmem:[#allocation105_spill] sm:$0xff] %v9086_v42  ;;  %v9098_v45 = vmul.f32 3.0, %v1186_v55  ;;  %v3244_v39 = vmul.f32 %v6901_v43, %v2714_v11  ;;  %v1082_v24 = vmul.f32 %v7680_v57, %v9092_v59  ;;  %v3327_v10 = vand.u32 2147483647, %v2719_v19 }
 0x120   : > { %15691 = vst [vmem:[#allocation106_spill] sm:$0xff] %v9092_v59  ;;  %v9104_v29 = vsel %vm2137_vm2, %v1186_v55, %v743_v38  ;;  %v3329_v34 = vand.u32 2147483648, %v2719_v19  ;;  %v15190_v33 = vfloor.f32 %v9095_v16  ;;  %6904 = vrcp.f32 %v2718_v0 }
 0x121   : > { %15692 = vst [vmem:[#allocation107_spill] sm:$0xff] %v9098_v45  ;;  %v3245_v23 = vsub.f32 1.0, %v3244_v39  ;;  %vm3249_vm13 = vweird.f32 %v6901_v43  ;;  %v1191_v14 = vfloor.f32 %v1082_v24  ;;  %vm3323_vm14 = vweird.f32 %v2719_v19 }
 0x122   : > { %v6903_v28 = vpop.eup %6902  ;;  %v856_v17 = vmul.f32 114.0, %v15190_v33  ;;  %v3312_v45 = vand.u32 2147483647, %v2718_v0  ;;  %v521_v63 = vcvt.s32.f32 %v410_v5  ;;  %6906 = vpow2.f32 %v6526_v7  ;;  %vm9116_vm0 = vmor %vm3248_vm11, %vm3249_vm13 }
 0x123   : > { %v9109_v27 = vmul.f32 16.0, %v4677_v54  ;;  %v3246_v40 = vmul.f32 %v6901_v43, %v3245_v23  ;;  %v3319_v38 = vmul.f32 %v6903_v28, %v2719_v19  ;;  %vm9111_vm15 = vcmp.eq.f32.partialorder %v3327_v10, 8.507059e+37 }
 0x124   : > { %v3330_v24 = vor.u32 1.1754944e-38, %v3329_v34  ;;  %v9120_v59 = vsub.f32 %v522_v1, %v856_v17  ;;  %vm3308_vm1 = vweird.f32 %v2718_v0  ;;  %v1378_v7 = vsub.f32 %v7678_v56, %v7735_v31 }
 0x125   : > { %15693 = vst [vmem:[#allocation108_spill] sm:$0xff] %v9109_v27  ;;  %v3247_v54 = vadd.f32 %v6901_v43, %v3246_v40  ;;  %v3320_v5 = vsub.f32 1.0, %v3319_v38  ;;  %vm3324_vm3 = vweird.f32 %v6903_v28  ;;  %v9125_v10 = vmul.f32 %v7647_v32, %v521_v63 }
 0x126   : > { %15698 = vst [vmem:[#allocation109_spill] sm:$0xff] %v9120_v59  ;;  %v6905_v23 = vpop.eup %6904  ;;  %v9127_v33 = vmul.f32 3.0, %v1191_v14  ;;  %v2173_v11 = vsel %vm2137_vm2, %v1191_v14, %v748_v48  ;;  %vm9131_vm4 = vcmp.eq.f32.partialorder %v3312_v45, 8.507059e+37  ;;  %v3314_v1 = vand.u32 2147483648, %v2718_v0  ;;  %vm9144_vm5 = vmor %vm3323_vm14, %vm3324_vm3 }
 0x127   : > { %v3251_v56 = vsel %vm9116_vm0, %v6901_v43, %v3247_v54  ;;  %v3321_v31 = vmul.f32 %v6903_v28, %v3320_v5  ;;  %v1081_v40 = vmul.f32 %v7680_v57, %v9120_v59  ;;  %v3304_v17 = vmul.f32 %v6905_v23, %v2718_v0 }
 0x128   : > { %15699 = vst [vmem:[#allocation110_spill] sm:$0xff] %v9127_v33  ;;  %v6907_v38 = vpop.eup %6906  ;;  %v9141_v27 = vsel %vm9088_vm12, %v3255_v36, %v3251_v56  ;;  %vm3309_vm6 = vweird.f32 %v6905_v23  ;;  %v746_v48 = vfloor.f32 %v9125_v10  ;;  %vm1596_vm7 = vcmp.lt.f32.partialorder %v1378_v7, 1.5 }
 0x129   : > { %15702 = vst [vmem:[#allocation111_spill] sm:$0xff] %v9141_v27  ;;  %v4458_v43 = vmul.f32 1.05, %v9141_v27  ;;  %5455 = vperm.xlu0 %6759, %v9141_v27   ;;  %v3322_v14 = vadd.f32 %v6903_v28, %v3321_v31  ;;  %v3305_v39 = vsub.f32 1.0, %v3304_v17  ;;  %v9151_v54 = vadd.f32 1.0, %v6907_v38  ;;  %vm9162_vm9 = vmor %vm3308_vm1, %vm3309_vm6 }
 0x12a   : > { %v3315_v13 = vor.u32 1.1754944e-38, %v3314_v1  ;;  %v855_v36 = vmul.f32 114.0, %v746_v48  ;;  %vm1487_vm8 = vcmp.lt.f32.partialorder %v1378_v7, 0.5  ;;  %v15193_v17 = vmov 132.0  }
 0x12b   : > { %v6632_v19 = vadd.f32 -0.025, %v4458_v43  ;;  %v3326_v5 = vsel %vm9144_vm5, %v6903_v28, %v3322_v14  ;;  %v3306_v56 = vmul.f32 %v6905_v23, %v3305_v39  ;;  %6908 = vrcp.f32 %v9151_v54 }
 0x12c   : > { %v9158_v10 = vsel %vm9111_vm15, %v3330_v24, %v3326_v5  ;;  %v9166_v1 = vsub.f32 %v521_v63, %v855_v36  ;;  %v1705_v38 = vsel %vm1596_vm7, 78.0, %v15193_v17  ;;  %v1190_v45 = vfloor.f32 %v1081_v40 }
 0x12d   : > { %15705 = vst [vmem:[#allocation112_spill] sm:$0xff] %v9158_v10  ;;  %v4463_v28 = vmul.f32 1.05, %v9158_v10  ;;  %5480 = vperm.xlu2 %6761, %v9158_v10   ;;  %v3307_v55 = vadd.f32 %v6905_v23, %v3306_v56  ;;  %v3297_v24 = vand.u32 2147483647, %v9151_v54  ;;  %v4676_v0 = vadd.f32 %v6632_v19, %v9104_v29 }
 0x12e   : > { %15708 = vst [vmem:[#allocation113_spill] sm:$0xff] %v9166_v1  ;;  %v1080_v43 = vmul.f32 %v7680_v57, %v9166_v1  ;;  %v3299_v63 = vand.u32 2147483648, %v9151_v54  ;;  %v15191_v14 = vmov 113.0   ;;  %v1814_v40 = vsel %vm1487_vm8, 102.0, %v1705_v38 }
 0x12f   : > { %v1923_v39 = vsel %vm1596_vm7, 115.0, %v15191_v14  ;;  %v6637_v36 = vadd.f32 -0.025, %v4463_v28  ;;  %v3311_v5 = vsel %vm9162_vm9, %v6905_v23, %v3307_v55  ;;  %vm2247_vm10 = vcmp.eq.s32.totalorder %v7672_v53, 2 }
 0x130   : > { %v9185_v29 = vsel %vm9131_vm4, %v3315_v13, %v3311_v5  ;;  %v1189_v19 = vfloor.f32 %v1080_v43  ;;  %v2032_v56 = vsel %vm1487_vm8, 74.0, %v1923_v39  ;;  %vm4864_vm11 = vcmp.eq.s32.totalorder %v7672_v53, 3  ;;  %v7420_v43 = vld [vmem:[%s7632_s20 + $0x20] sm:$0xff] }
 0x131   : > { %15709 = vst [vmem:[#allocation114_spill] sm:$0xff] %v9185_v29  ;;  %v6909_v14 = vpop.eup %6908  ;;  %v4681_v28 = vadd.f32 %v6637_v36, %v2173_v11  ;;  %v9189_v31 = vmul.f32 3.0, %v1190_v45  ;;  %v15711_v23 = vfloor.f32 %v9095_v16  ;;  %5475 = vperm.xlu1 %6760, %v9185_v29   ;;  %vm3293_vm12 = vweird.f32 %v9151_v54  ;;  %vm9206_vm14 = vmor %vm2247_vm10, %vm4864_vm11  ;;  %v192_v39 = vld [vmem:[%s7632_s20 + $0x120] sm:$0xff] }
 0x132   : > { %v9197_v7 = vmul.f32 16.0, %v4676_v0  ;;  %v3289_v13 = vmul.f32 %v6909_v14, %v9151_v54  ;;  %vm9200_vm13 = vcmp.eq.f32.partialorder %v3297_v24, 8.507059e+37  ;;  %v3300_v11 = vor.u32 1.1754944e-38, %v3299_v63  ;;  %v193_v63 = vld [vmem:[%s7632_s20 + $0x128] sm:$0xff] }
 0x133   : > { %15710 = vst [vmem:[#allocation115_spill] sm:$0xff] %v9189_v31  ;;  %v2172_v34 = vsel %vm2137_vm2, %v1190_v45, %v15711_v23  ;;  %v194_v45 = vld [vmem:[%s7632_s20 + $0x130] sm:$0xff]  ;;  %v4462_v55 = vmul.f32 1.05, %v9185_v29  ;;  %v2252_v0 = vsel %vm2247_vm10, %v1814_v40, %v2032_v56  ;;  %v4870_v24 = vsel %vm9206_vm14, %v7420_v43, 0.0  ;;  %v197_v31 = vld [vmem:[%s7632_s20 + $0x148] sm:$0xff] }
 0x134   : > { %15712 = vst [vmem:[#allocation116_spill] sm:$0xff] %v9197_v7  ;;  %vm15242_vm15 = vcmp.ge.s32.totalorder %v7672_v53, 5  ;;  %v9220_v36 = vmul.f32 3.0, %v1189_v19  ;;  %v3290_v5 = vsub.f32 1.0, %v3289_v13  ;;  %vm3294_vm0 = vweird.f32 %v6909_v14 }
 0x135   : > { %v4983_v23 = vmul.f32 1.442695, %v4870_v24  ;;  %v9222_v17 = vmul.f32 16.0, %v4681_v28  ;;  %v2171_v40 = vsel %vm2137_vm2, %v1189_v19, %v746_v48  ;;  %v305_v56 = vadd.s32 304, %v7619_v4  ;;  %vm9230_vm1 = vmor %vm3293_vm12, %vm3294_vm0  ;;  %v5326_v28 = vpop.permute.xlu2 %5325  ;;  %v196_v19 = vld [vmem:[%s7632_s20 + $0x140] sm:$0xff] }
 0x136   : > { %15717 = vst [vmem:[#allocation117_spill] sm:$0xff] %v9220_v36  ;;  %v6531_v1 = vmul.f32 -1.442695, %v194_v45  ;;  %v3291_v43 = vmul.f32 %v6909_v14, %v3290_v5  ;;  %v6530_v29 = vmul.f32 -1.442695, %v193_v63  ;;  %vm15212_vm3 = vcmp.lt.s32.totalorder %v7672_v53, 2 }
 0x137   : > { %15718 = vst [vmem:[#allocation118_spill] sm:$0xff] %v9222_v17  ;;  %6910 = vpow2.f32 %v4983_v23  ;;  %v6529_v59 = vmul.f32 -1.442695, %v192_v39  ;;  %v6636_v7 = vadd.f32 -0.025, %v4462_v55  ;;  %v415_v48 = vadd.s32 %v7625_v8, %v305_v56  ;;  %v195_v55 = vld [vmem:[%s7632_s20 + $0x138] sm:$0xff] }
 0x138   : > { %6912 = vpow2.f32 %v6531_v1  ;;  %v3292_v45 = vadd.f32 %v6909_v14, %v3291_v43  ;;  %v5852_v24 = vmul.f32 %v5326_v28, %v7779_v62  ;;  %v304_v63 = vadd.s32 296, %v7619_v4 }
 0x139   : > { %6914 = vpow2.f32 %v6530_v29  ;;  %vm15241_vm4 = vcmp.lt.s32.totalorder %v7672_v53, 4  ;;  %v526_v54 = vcvt.s32.f32 %v415_v48  ;;  %v303_v39 = vadd.s32 288, %v7619_v4 }
 0x13a   : > { %v6534_v5 = vmul.f32 -1.442695, %v197_v31  ;;  %v3296_v23 = vsel %vm9230_vm1, %v6909_v14, %v3292_v45  ;;  %v414_v56 = vadd.s32 %v7625_v8, %v304_v63  ;;  %6916 = vpow2.f32 %v6529_v59 }
 0x13b   : > { %v6533_v1 = vmul.f32 -1.442695, %v196_v19  ;;  %v9247_v43 = vsel %vm9200_vm13, %v3300_v11, %v3296_v23  ;;  %v9250_v29 = vmul.f32 %v7647_v32, %v526_v54  ;;  %v9253_v28 = vadd.s32 %v7625_v8, %v303_v39 }
 0x13c   : > { %15721 = vst [vmem:[#allocation119_spill] sm:$0xff] %v9247_v43  ;;  %v6532_v48 = vmul.f32 -1.442695, %v195_v55  ;;  %v4680_v31 = vadd.f32 %v6636_v7, %v2172_v34  ;;  %v4461_v13 = vmul.f32 1.05, %v9247_v43  ;;  %5470 = vperm.xlu0 %6759, %v9247_v43   ;;  %v5961_v59 = vsel %vm15242_vm15, %v5852_v24, %v7779_v62 }
 0x13d   : > { %v6911_v36 = vpop.eup %6910  ;;  %v525_v14 = vcvt.s32.f32 %v414_v56  ;;  %v15200_v19 = vfloor.f32 %v9250_v29  ;;  %v524_v45 = vcvt.s32.f32 %v9253_v28  ;;  %6918 = vpow2.f32 %v6534_v5 }
 0x13e   : > { %v6913_v38 = vpop.eup %6912  ;;  %v5197_v11 = vmul.f32 %v6911_v36, %v2252_v0  ;;  %v6635_v34 = vadd.f32 -0.025, %v4461_v13  ;;  %6920 = vpow2.f32 %v6533_v1  ;;  %v200_v36 = vld [vmem:[%s7632_s20 + $0x160] sm:$0xff]  ;;  %vm15211_vm5 = vcmask 695296  }
 0x13f   : > { %v6915_v63 = vpop.eup %6914  ;;  %v9262_v7 = vadd.f32 1.0, %v6913_v38  ;;  %v9265_v55 = vmul.f32 %v7647_v32, %v525_v14  ;;  %v860_v24 = vmul.f32 114.0, %v15200_v19  ;;  %6922 = vpow2.f32 %v6532_v48 }
 0x140   : > { %v6072_v62 = vsel %vm15241_vm4, %v5197_v11, %v5961_v59  ;;  %v9271_v0 = vadd.f32 1.0, %v6915_v63  ;;  %v6917_v39 = vpop.eup %6916  ;;  %v9286_v23 = vmul.f32 %v7647_v32, %v524_v45  ;;  %v4679_v56 = vadd.f32 %v6635_v34, %v2171_v40 }
 0x141   : > { %v6181_v5 = vsel %vm15212_vm3, %v7872_v12, %v6072_v62  ;;  %6924 = vrcp.f32 %v9262_v7  ;;  %v9290_v1 = vsub.f32 %v526_v54, %v860_v24  ;;  %v3372_v28 = vand.u32 2147483647, %v9262_v7  ;;  %v7421_v24 = vld [vmem:[%s7632_s20 + $0x28] sm:$0xff] }
 0x142   : > { %6291 = vst.msk [vmem:[%s9279_s23 + $0x20] sm:$0xff] %vm15211_vm5, %v6181_v5  ;;  %v15199_v48 = vfloor.f32 %v9265_v55  ;;  %v9294_v13 = vmul.f32 16.0, %v4680_v31  ;;  %v3374_v59 = vand.u32 2147483648, %v9262_v7  ;;  %6926 = vrcp.f32 %v9271_v0 }
 0x143   : > { %15722 = vst [vmem:[#allocation120_spill] sm:$0xff] %v9290_v1  ;;  %v9298_v12 = vmul.f32 -1.442695, %v200_v36  ;;  %v9300_v38 = vpop.eup %6918  ;;  %v1085_v40 = vmul.f32 %v7680_v57, %v9290_v1  ;;  %v3357_v11 = vand.u32 2147483647, %v9271_v0  ;;  %v1379_v31 = vsub.f32 %v7766_v46, %v7824_v37 }
 0x144   : > { %15723 = vst [vmem:[#allocation121_spill] sm:$0xff] %v9294_v13  ;;  %v859_v54 = vmul.f32 114.0, %v15199_v48  ;;  %v9309_v63 = vpop.eup %6920  ;;  %vm3368_vm6 = vweird.f32 %v9262_v7  ;;  %v9313_v62 = vadd.f32 1.0, %v6917_v39  ;;  %v4871_v36 = vsel %vm9206_vm14, %v7421_v24, 0.0 }
 0x145   : > { %v9318_v5 = vpop.eup %6922  ;;  %v9320_v48 = vmul.f32 16.0, %v4679_v56  ;;  %vm9322_vm7 = vcmp.eq.f32.partialorder %v3372_v28, 8.507059e+37  ;;  %vm3353_vm8 = vweird.f32 %v9271_v0  ;;  %v3375_v34 = vor.u32 1.1754944e-38, %v3374_v59 }
 0x146   : > { %v9326_v46 = vsub.f32 %v525_v14, %v859_v54  ;;  %v3359_v39 = vand.u32 2147483648, %v9271_v0  ;;  %v15728_v13 = vfloor.f32 %v9286_v23  ;;  %6928 = vrcp.f32 %v9313_v62 }
 0x147   : > { %15724 = vst [vmem:[#allocation122_spill] sm:$0xff] %v9320_v48  ;;  %v6925_v37 = vpop.eup %6924  ;;  %v1194_v24 = vfloor.f32 %v1085_v40  ;;  %vm9334_vm9 = vcmp.eq.f32.partialorder %v3357_v11, 8.507059e+37  ;;  %vm1488_vm11 = vcmp.lt.f32.partialorder %v1379_v31, 0.5  ;;  %v3342_v48 = vand.u32 2147483647, %v9313_v62 }
 0x148   : > { %15727 = vst [vmem:[#allocation123_spill] sm:$0xff] %v9326_v46  ;;  %v858_v43 = vmul.f32 114.0, %v15728_v13  ;;  %v3364_v56 = vmul.f32 %v6925_v37, %v9262_v7  ;;  %v6927_v14 = vpop.eup %6926  ;;  %v1084_v54 = vmul.f32 %v7680_v57, %v9326_v46  ;;  %vm1597_vm12 = vcmp.lt.f32.partialorder %v1379_v31, 1.5 }
 0x149   : > { %vm3369_vm13 = vweird.f32 %v6925_v37  ;;  %v3349_v40 = vmul.f32 %v6927_v14, %v9271_v0  ;;  %v3344_v27 = vand.u32 2147483648, %v9313_v62  ;;  %vm3354_vm0 = vweird.f32 %v6927_v14  ;;  %v5331_v0 = vpop.permute.xlu2 %5330 }
 0x14a   : > { %v9340_v59 = vsub.f32 %v524_v45, %v858_v43  ;;  %v3365_v13 = vsub.f32 1.0, %v3364_v56  ;;  %v3360_v11 = vor.u32 1.1754944e-38, %v3359_v39  ;;  %vm3338_vm1 = vweird.f32 %v9313_v62  ;;  %vm9358_vm5 = vmor %vm3368_vm6, %vm3369_vm13 }
 0x14b   : > { %v3350_v46 = vsub.f32 1.0, %v3349_v40  ;;  %v15732_v43 = vmov 132.0   ;;  %v15733_v10 = vmov 113.0   ;;  %v9350_v56 = vmul.f32 3.0, %v1194_v24 }
 0x14c   : > { %15731 = vst [vmem:[#allocation124_spill] sm:$0xff] %v9340_v59  ;;  %v1083_v1 = vmul.f32 %v7680_v57, %v9340_v59  ;;  %v3366_v17 = vmul.f32 %v6925_v37, %v3365_v13  ;;  %v1706_v45 = vsel %vm1597_vm12, 78.0, %v15732_v43  ;;  %v1924_v33 = vsel %vm1597_vm12, 115.0, %v15733_v10  ;;  %v6929_v42 = vpop.eup %6928  ;;  %vm9370_vm12 = vmor %vm3353_vm8, %vm3354_vm0 }
 0x14d   : > { %15734 = vst [vmem:[#allocation125_spill] sm:$0xff] %v9350_v56  ;;  %v15735_v60 = vfloor.f32 %v9250_v29  ;;  %v1193_v13 = vfloor.f32 %v1084_v54  ;;  %vm9362_vm3 = vcmp.eq.f32.partialorder %v3342_v48, 8.507059e+37  ;;  %v3351_v3 = vmul.f32 %v6927_v14, %v3350_v46 }
 0x14e   : > { %v3367_v59 = vadd.f32 %v6925_v37, %v3366_v17  ;;  %v3334_v56 = vmul.f32 %v6929_v42, %v9313_v62  ;;  %v3345_v21 = vor.u32 1.1754944e-38, %v3344_v27  ;;  %v1192_v29 = vfloor.f32 %v1083_v1 }
 0x14f   : > { %v2176_v61 = vsel %vm2137_vm2, %v1194_v24, %v15735_v60  ;;  %v1815_v7 = vsel %vm1488_vm11, 102.0, %v1706_v45  ;;  %v2033_v48 = vsel %vm1488_vm11, 74.0, %v1924_v33  ;;  %v4985_v24 = vmul.f32 1.442695, %v4871_v36 }
 0x150   : > { %v3371_v17 = vsel %vm9358_vm5, %v6925_v37, %v3367_v59  ;;  %v3352_v46 = vadd.f32 %v6927_v14, %v3351_v3  ;;  %v3335_v54 = vsub.f32 1.0, %v3334_v56  ;;  %vm3339_vm6 = vweird.f32 %v6929_v42 }
 0x151   : > { %v9380_v27 = vsel %vm9322_vm7, %v3375_v34, %v3371_v17  ;;  %6930 = vpow2.f32 %v4985_v24  ;;  %v308_v47 = vadd.s32 328, %v7619_v4  ;;  %v2725_v1 = vadd.f32 1.0, %v9300_v38  ;;  %vm9397_vm5 = vmor %vm3338_vm1, %vm3339_vm6 }
 0x152   : > { %v4466_v31 = vmul.f32 1.05, %v9380_v27  ;;  %5495 = vperm.xlu2 %6761, %v9380_v27   ;;  %v3356_v33 = vsel %vm9370_vm12, %v6927_v14, %v3352_v46  ;;  %v3336_v3 = vmul.f32 %v6929_v42, %v3335_v54  ;;  %v5853_v36 = vmul.f32 %v5331_v0, %v7853_v58 }
 0x153   : > { %v9389_v37 = vmul.f32 3.0, %v1193_v13  ;;  %v9393_v19 = vsel %vm9334_vm9, %v3360_v11, %v3356_v33  ;;  %v418_v34 = vadd.s32 %v7625_v8, %v308_v47  ;;  %6932 = vrcp.f32 %v2725_v1 }
 0x154   : > { %v15744_v14 = vfloor.f32 %v9265_v55  ;;  %v4465_v45 = vmul.f32 1.05, %v9393_v19  ;;  %5490 = vperm.xlu1 %6760, %v9393_v19   ;;  %v9408_v28 = vmul.f32 3.0, %v1192_v29  ;;  %v3337_v11 = vadd.f32 %v6929_v42, %v3336_v3 }
 0x155   : > { %v2253_v62 = vsel %vm2247_vm10, %v1815_v7, %v2033_v48  ;;  %v529_v56 = vcvt.s32.f32 %v418_v34  ;;  %v307_v39 = vadd.s32 320, %v7619_v4  ;;  %v9414_v47 = vadd.f32 1.0, %v9309_v63 }
 0x156   : > { %v2175_v59 = vsel %vm2137_vm2, %v1193_v13, %v15744_v14  ;;  %v6640_v55 = vadd.f32 -0.025, %v4466_v31  ;;  %v15745_v60 = vfloor.f32 %v9286_v23  ;;  %v3341_v24 = vsel %vm9397_vm5, %v6929_v42, %v3337_v11 }
 0x157   : > { %v5962_v17 = vsel %vm15242_vm15, %v5853_v36, %v7853_v58  ;;  %v6931_v7 = vpop.eup %6930  ;;  %v9427_v48 = vsel %vm9362_vm3, %v3345_v21, %v3341_v24  ;;  %v9430_v63 = vmul.f32 %v7647_v32, %v529_v56  ;;  %v3417_v46 = vand.u32 2147483647, %v2725_v1 }
 0x158   : > { %v2174_v13 = vsel %vm2137_vm2, %v1192_v29, %v15745_v60  ;;  %v417_v23 = vadd.s32 %v7625_v8, %v307_v39  ;;  %v6639_v54 = vadd.f32 -0.025, %v4465_v45  ;;  %v4464_v29 = vmul.f32 1.05, %v9427_v48  ;;  %5485 = vperm.xlu0 %6759, %v9427_v48  }
 0x159   : > { %v5198_v42 = vmul.f32 %v6931_v7, %v2253_v62  ;;  %v3419_v0 = vand.u32 2147483648, %v2725_v1  ;;  %v6933_v58 = vpop.eup %6932  ;;  %v754_v31 = vfloor.f32 %v9430_v63  ;;  %vm3413_vm7 = vweird.f32 %v2725_v1 }
 0x15a   : > { %v528_v21 = vcvt.s32.f32 %v417_v23  ;;  %6934 = vrcp.f32 %v9414_v47  ;;  %v4684_v40 = vadd.f32 %v6640_v55, %v2176_v61  ;;  %v6638_v33 = vadd.f32 -0.025, %v4464_v29 }
 0x15b   : > { %v6073_v3 = vsel %vm15241_vm4, %v5198_v42, %v5962_v17  ;;  %v3409_v36 = vmul.f32 %v6933_v58, %v2725_v1  ;;  %vm15746_vm3 = vcmp.lt.s32.totalorder %v7672_v53, 2  ;;  %v863_v34 = vmul.f32 114.0, %v754_v31 }
 0x15c   : > { %v6182_v38 = vsel %vm15746_vm3, %v7957_v6, %v6073_v3  ;;  %vm9444_vm8 = vcmp.eq.f32.partialorder %v3417_v46, 8.507059e+37  ;;  %v9449_v45 = vmul.f32 %v7647_v32, %v528_v21  ;;  %v4683_v61 = vadd.f32 %v6639_v54, %v2175_v59 }
 0x15d   : > { %vm15749_vm9 = vcmask 695296   ;;  %v3410_v11 = vsub.f32 1.0, %v3409_v36  ;;  %vm3414_vm11 = vweird.f32 %v6933_v58  ;;  %v3420_v62 = vor.u32 1.1754944e-38, %v3419_v0 }
 0x15e   : > { %6292 = vst.msk [vmem:[%s9279_s23 + $0x28] sm:$0xff] %vm15749_vm9, %v6182_v38  ;;  %v9453_v39 = vsub.f32 %v529_v56, %v863_v34  ;;  %v753_v6 = vfloor.f32 %v9449_v45  ;;  %v306_v55 = vadd.s32 312, %v7619_v4  ;;  %v9458_v60 = vadd.f32 1.0, %v9318_v5  ;;  %vm9466_vm0 = vmor %vm3413_vm7, %vm3414_vm11 }
 0x15f   : > { %v9460_v24 = vmul.f32 16.0, %v4684_v40  ;;  %v4682_v17 = vadd.f32 %v6638_v33, %v2174_v13  ;;  %v3411_v7 = vmul.f32 %v6933_v58, %v3410_v11  ;;  %vm3398_vm13 = vweird.f32 %v9414_v47 }
 0x160   : > { %v6935_v59 = vpop.eup %6934  ;;  %v1088_v46 = vmul.f32 %v7680_v57, %v9453_v39  ;;  %v862_v23 = vmul.f32 114.0, %v753_v6  ;;  %v416_v5 = vadd.s32 %v7625_v8, %v306_v55  ;;  %6936 = vrcp.f32 %v9458_v60  ;;  %v199_v55 = vld [vmem:[%s7632_s20 + $0x158] sm:$0xff] }
 0x161   : > { %v3412_v13 = vadd.f32 %v6933_v58, %v3411_v7  ;;  %v3394_v54 = vmul.f32 %v6935_v59, %v9414_v47  ;;  %v3402_v29 = vand.u32 2147483647, %v9414_v47  ;;  %v3404_v42 = vand.u32 2147483648, %v9414_v47 }
 0x162   : > { %v9477_v0 = vmul.f32 16.0, %v4683_v61  ;;  %v1197_v1 = vfloor.f32 %v1088_v46  ;;  %v9479_v40 = vsub.f32 %v528_v21, %v862_v23  ;;  %v527_v33 = vcvt.s32.f32 %v416_v5 }
 0x163   : > { %v3416_v3 = vsel %vm9466_vm0, %v6933_v58, %v3412_v13  ;;  %v3395_v36 = vsub.f32 1.0, %v3394_v54  ;;  %vm3399_vm1 = vweird.f32 %v6935_v59  ;;  %v1382_v38 = vsub.f32 %v7927_v9, %v8029_v15 }
 0x164   : > { %15752 = vst [vmem:[#allocation126_spill] sm:$0xff] %v9479_v40  ;;  %v9485_v34 = vmul.f32 16.0, %v4682_v17  ;;  %v9489_v11 = vsel %vm9444_vm8, %v3420_v62, %v3416_v3  ;;  %v9493_v61 = vmul.f32 %v7680_v57, %v9479_v40  ;;  %v3387_v21 = vand.u32 2147483647, %v9458_v60  ;;  %vm9509_vm6 = vmor %vm3398_vm13, %vm3399_vm1 }
 0x165   : > { %5510 = vperm.xlu2 %6761, %v9489_v11   ;;  %v3396_v58 = vmul.f32 %v6935_v59, %v3395_v36  ;;  %vm9497_vm12 = vcmp.eq.f32.partialorder %v3402_v29, 8.507059e+37  ;;  %v3405_v9 = vor.u32 1.1754944e-38, %v3404_v42  ;;  %v9502_v15 = vmul.f32 %v7647_v32, %v527_v33 }
 0x166   : > { %15753 = vst [vmem:[#allocation127_spill] sm:$0xff] %v9485_v34  ;;  %v6937_v14 = vpop.eup %6936  ;;  %v9504_v62 = vmul.f32 3.0, %v1197_v1  ;;  %v4469_v17 = vmul.f32 1.05, %v9489_v11  ;;  %vm3383_vm5 = vweird.f32 %v9458_v60  ;;  %v3389_v46 = vand.u32 2147483648, %v9458_v60 }
 0x167   : > { %v3397_v56 = vadd.f32 %v6935_v59, %v3396_v58  ;;  %v752_v23 = vfloor.f32 %v9502_v15  ;;  %v3379_v5 = vmul.f32 %v6937_v14, %v9458_v60  ;;  %vm1600_vm7 = vcmp.lt.f32.partialorder %v1382_v38, 1.5  ;;  %v5346_v60 = vpop.permute.xlu2 %5345 }
 0x168   : > { %v2179_v47 = vsel %vm2137_vm2, %v1197_v1, %v754_v31  ;;  %v1196_v13 = vfloor.f32 %v9493_v61  ;;  %vm9522_vm3 = vcmp.eq.f32.partialorder %v3387_v21, 8.507059e+37  ;;  %vm1491_vm8 = vcmp.lt.f32.partialorder %v1382_v38, 0.5  ;;  %v7422_v1 = vld [vmem:[%s7632_s20 + $0x40] sm:$0xff] }
 0x169   : > { %v3401_v29 = vsel %vm9509_vm6, %v6935_v59, %v3397_v56  ;;  %v861_v42 = vmul.f32 114.0, %v752_v23  ;;  %v3380_v3 = vsub.f32 1.0, %v3379_v5  ;;  %vm3384_vm9 = vweird.f32 %v6937_v14 }
 0x16a   : > { %v6643_v36 = vadd.f32 -0.025, %v4469_v17  ;;  %v9530_v63 = vsel %vm9497_vm12, %v3405_v9, %v3401_v29  ;;  %v1709_v31 = vsel %vm1600_vm7, 78.0, %v15732_v43  ;;  %v4874_v61 = vsel %vm9206_vm14, %v7422_v1, 0.0  ;;  %vm9550_vm11 = vmor %vm3383_vm5, %vm3384_vm9 }
 0x16b   : > { %15760 = vst [vmem:[#allocation128_spill] sm:$0xff] %v9530_v63  ;;  %v4468_v21 = vmul.f32 1.05, %v9530_v63  ;;  %5505 = vperm.xlu1 %6760, %v9530_v63   ;;  %v9539_v59 = vsub.f32 %v527_v33, %v861_v42  ;;  %v3381_v58 = vmul.f32 %v6937_v14, %v3380_v3  ;;  %v1927_v15 = vsel %vm1600_vm7, 115.0, %v15733_v10 }
 0x16c   : > { %v2178_v9 = vsel %vm2137_vm2, %v1196_v13, %v753_v6  ;;  %v3390_v7 = vor.u32 1.1754944e-38, %v3389_v46  ;;  %v4991_v33 = vmul.f32 1.442695, %v4874_v61  ;;  %v311_v56 = vadd.s32 352, %v7619_v4 }
 0x16d   : > { %15761 = vst [vmem:[#allocation129_spill] sm:$0xff] %v9539_v59  ;;  %v6642_v5 = vadd.f32 -0.025, %v4468_v21  ;;  %v1086_v29 = vmul.f32 %v7680_v57, %v9539_v59  ;;  %v3382_v42 = vadd.f32 %v6937_v14, %v3381_v58  ;;  %v1818_v45 = vsel %vm1491_vm8, 102.0, %v1709_v31  ;;  %v198_v21 = vld [vmem:[%s7632_s20 + $0x150] sm:$0xff] }
 0x16e   : > { %v2036_v6 = vsel %vm1491_vm8, 74.0, %v1927_v15  ;;  %6938 = vpow2.f32 %v4991_v33  ;;  %v421_v3 = vadd.s32 %v7625_v8, %v311_v56  ;;  %v6536_v1 = vmul.f32 -1.442695, %v199_v55 }
 0x16f   : > { %v4687_v63 = vadd.f32 %v6643_v36, %v2179_v47  ;;  %v3386_v46 = vsel %vm9550_vm11, %v6937_v14, %v3382_v42  ;;  %v5856_v61 = vmul.f32 %v5346_v60, %v7972_v35  ;;  %6940 = vpow2.f32 %v9298_v12 }
 0x170   : > { %v9567_v58 = vsel %vm9522_vm3, %v3390_v7, %v3386_v46  ;;  %v532_v38 = vcvt.s32.f32 %v421_v3  ;;  %v310_v31 = vadd.s32 344, %v7619_v4  ;;  %6942 = vpow2.f32 %v6536_v1 }
 0x171   : > { %15764 = vst [vmem:[#allocation130_spill] sm:$0xff] %v9567_v58  ;;  %v4686_v15 = vadd.f32 %v6642_v5, %v2178_v9  ;;  %v1195_v33 = vfloor.f32 %v1086_v29  ;;  %v4467_v47 = vmul.f32 1.05, %v9567_v58  ;;  %5500 = vperm.xlu0 %6759, %v9567_v58   ;;  %v2256_v14 = vsel %vm2247_vm10, %v1818_v45, %v2036_v6 }
 0x172   : > { %v9575_v12 = vmul.f32 %v7647_v32, %v532_v38  ;;  %v420_v54 = vadd.s32 %v7625_v8, %v310_v31  ;;  %v309_v36 = vadd.s32 336, %v7619_v4  ;;  %v6535_v55 = vmul.f32 -1.442695, %v198_v21  ;;  %v7423_v21 = vld [vmem:[%s7632_s20 + $0x58] sm:$0xff] }
 0x173   : > { %v9579_v17 = vmul.f32 3.0, %v1196_v13  ;;  %v2177_v9 = vsel %vm2137_vm2, %v1195_v33, %v752_v23  ;;  %v6641_v7 = vadd.f32 -0.025, %v4467_v47  ;;  %v5965_v56 = vsel %vm15242_vm15, %v5856_v61, %v7972_v35 }
 0x174   : > { %v6939_v5 = vpop.eup %6938  ;;  %v757_v29 = vfloor.f32 %v9575_v12  ;;  %v531_v42 = vcvt.s32.f32 %v420_v54  ;;  %v9588_v45 = vadd.s32 %v7625_v8, %v309_v36  ;;  %6944 = vpow2.f32 %v6535_v55  ;;  %v9624_v55 = vld [vmem:[%s7632_s20 + $0x10] sm:$0xff] }
 0x175   : > { %15765 = vst [vmem:[#allocation131_spill] sm:$0xff] %v9579_v17  ;;  %v6941_v6 = vpop.eup %6940  ;;  %v9590_v13 = vmul.f32 16.0, %v4687_v63  ;;  %v9592_v60 = vmul.f32 16.0, %v4686_v15  ;;  %v9594_v23 = vmul.f32 3.0, %v1195_v33  ;;  %v5201_v3 = vmul.f32 %v6939_v5, %v2256_v14 }
 0x176   : > { %v6943_v1 = vpop.eup %6942  ;;  %v866_v46 = vmul.f32 114.0, %v757_v29  ;;  %v9596_v35 = vadd.f32 1.0, %v6941_v6  ;;  %v9599_v61 = vmul.f32 %v7647_v32, %v531_v42  ;;  %v4877_v31 = vsel %vm9206_vm14, %v7423_v21, 0.0 }
 0x177   : > { %15766 = vst [vmem:[#allocation132_spill] sm:$0xff] %v9592_v60  ;;  %v4685_v63 = vadd.f32 %v6641_v7, %v2177_v9  ;;  %v6076_v15 = vsel %vm15241_vm4, %v5201_v3, %v5965_v56  ;;  %v9606_v33 = vadd.f32 1.0, %v6943_v1  ;;  %v530_v47 = vcvt.s32.f32 %v9588_v45 }
 0x178   : > { %15767 = vst [vmem:[#allocation133_spill] sm:$0xff] %v9594_v23  ;;  %vm15768_vm13 = vcmp.lt.s32.totalorder %v7672_v53, 2  ;;  %v9612_v12 = vsub.f32 %v532_v38, %v866_v46  ;;  %6946 = vrcp.f32 %v9596_v35  ;;  %v9617_v54 = vsub.f32 %v8031_v51, %v8100_v18 }
 0x179   : > { %v6185_v14 = vsel %vm15768_vm13, %v8035_v41, %v6076_v15  ;;  %vm15769_vm0 = vcmask 695296   ;;  %v15219_v36 = vfloor.f32 %v9599_v61  ;;  %6948 = vrcp.f32 %v9606_v33 }
 0x17a   : > { %6295 = vst.msk [vmem:[%s9279_s23 + $0x40] sm:$0xff] %vm15769_vm0, %v6185_v14  ;;  %v9631_v38 = vsub.f32 %v7723_v20, %v7808_v25  ;;  %v6945_v9 = vpop.eup %6944  ;;  %v1091_v51 = vmul.f32 %v7680_v57, %v9612_v12  ;;  %v3462_v18 = vand.u32 2147483647, %v9596_v35  ;;  %v3464_v7 = vand.u32 2147483648, %v9596_v35 }
 0x17b   : > { %v3447_v56 = vand.u32 2147483647, %v9606_v33  ;;  %v9638_v5 = vmul.f32 16.0, %v4685_v63  ;;  %v865_v45 = vmul.f32 114.0, %v15219_v36  ;;  %v9643_v6 = vmul.f32 %v7647_v32, %v530_v47 }
 0x17c   : > { %v4997_v20 = vmul.f32 1.442695, %v4877_v31  ;;  %v1200_v25 = vfloor.f32 %v1091_v51  ;;  %v3449_v3 = vand.u32 2147483648, %v9606_v33  ;;  %v9646_v1 = vadd.f32 1.0, %v6945_v9 }
 0x17d   : > { %15770 = vst [vmem:[#allocation134_spill] sm:$0xff] %v9638_v5  ;;  %vm1494_vm1 = vcmp.lt.f32.partialorder %v9617_v54, 0.5  ;;  %vm3458_vm12 = vweird.f32 %v9596_v35  ;;  %v9650_v46 = vsub.f32 %v531_v42, %v865_v45  ;;  %vm3443_vm6 = vweird.f32 %v9606_v33 }
 0x17e   : > { %v15221_v21 = vfloor.f32 %v9643_v6  ;;  %v6947_v63 = vpop.eup %6946  ;;  %vm9654_vm5 = vcmp.eq.f32.partialorder %v3462_v18, 8.507059e+37  ;;  %v3465_v31 = vor.u32 1.1754944e-38, %v3464_v7  ;;  %vm9658_vm7 = vcmp.eq.f32.partialorder %v3447_v56, 8.507059e+37 }
 0x17f   : > { %15771 = vst [vmem:[#allocation135_spill] sm:$0xff] %v9650_v46  ;;  %6950 = vrcp.f32 %v9646_v1  ;;  %v6949_v9 = vpop.eup %6948  ;;  %v3454_v42 = vmul.f32 %v6947_v63, %v9596_v35  ;;  %v9666_v51 = vmul.f32 %v7680_v57, %v9650_v46  ;;  %vm1603_vm3 = vcmp.lt.f32.partialorder %v9617_v54, 1.5 }
 0x180   : > { %v864_v18 = vmul.f32 114.0, %v15221_v21  ;;  %v9671_v45 = vmul.f32 3.0, %v1200_v25  ;;  %v3439_v7 = vmul.f32 %v6949_v9, %v9606_v33  ;;  %v3450_v56 = vor.u32 1.1754944e-38, %v3449_v3 }
 0x181   : > { %6952 = vpow2.f32 %v4997_v20  ;;  %v9676_v36 = vsel %vm2137_vm2, %v1200_v25, %v757_v29  ;;  %v3455_v41 = vsub.f32 1.0, %v3454_v42  ;;  %vm3459_vm8 = vweird.f32 %v6947_v63  ;;  %v5361_v20 = vpop.permute.xlu2 %5360 }
 0x182   : > { %v3434_v46 = vand.u32 2147483648, %v9646_v1  ;;  %v3440_v5 = vsub.f32 1.0, %v3439_v7  ;;  %vm3444_vm9 = vweird.f32 %v6949_v9  ;;  %v9679_v60 = vsub.f32 %v530_v47, %v864_v18  ;;  %vm9689_vm13 = vmor %vm3458_vm12, %vm3459_vm8 }
 0x183   : > { %v1712_v21 = vsel %vm1603_vm3, 78.0, %v15732_v43  ;;  %v3456_v58 = vmul.f32 %v6947_v63, %v3455_v41  ;;  %v1199_v3 = vfloor.f32 %v9666_v51  ;;  %vm3428_vm11 = vweird.f32 %v9646_v1  ;;  %vm9702_vm0 = vmor %vm3443_vm6, %vm3444_vm9 }
 0x184   : > { %15776 = vst [vmem:[#allocation136_spill] sm:$0xff] %v9679_v60  ;;  %v3432_v29 = vand.u32 2147483647, %v9646_v1  ;;  %v3441_v47 = vmul.f32 %v6949_v9, %v3440_v5  ;;  %v1930_v18 = vsel %vm1603_vm3, 115.0, %v15733_v10  ;;  %v5859_v41 = vmul.f32 %v5361_v20, %v8122_v22 }
 0x185   : > { %v6951_v25 = vpop.eup %6950  ;;  %v1376_v51 = vsub.f32 %v7694_v2, %v7758_v52  ;;  %v3457_v7 = vadd.f32 %v6947_v63, %v3456_v58  ;;  %v3435_v5 = vor.u32 1.1754944e-38, %v3434_v46  ;;  %v1821_v23 = vsel %vm1494_vm1, 102.0, %v1712_v21 }
 0x186   : > { %v3424_v59 = vmul.f32 %v6951_v25, %v9646_v1  ;;  %v3442_v17 = vadd.f32 %v6949_v9, %v3441_v47  ;;  %v9711_v20 = vmul.f32 %v7680_v57, %v9679_v60  ;;  %vm3429_vm12 = vweird.f32 %v6951_v25 }
 0x187   : > { %v6953_v40 = vpop.eup %6952  ;;  %v2039_v2 = vsel %vm1494_vm1, 74.0, %v1930_v18  ;;  %v3461_v52 = vsel %vm9689_vm13, %v6947_v63, %v3457_v7  ;;  %v5968_v33 = vsel %vm15242_vm15, %v5859_v41, %v8122_v22  ;;  %vm1485_vm6 = vcmp.lt.f32.partialorder %v1376_v51, 0.5  ;;  %v5316_v7 = vpop.permute.xlu1 %5315 }
 0x188   : > { %v3425_v58 = vsub.f32 1.0, %v3424_v59  ;;  %v9722_v46 = vsel %vm9654_vm5, %v3465_v31, %v3461_v52  ;;  %v3446_v21 = vsel %vm9702_vm0, %v6949_v9, %v3442_v17  ;;  %v2259_v54 = vsel %vm2247_vm10, %v1821_v23, %v2039_v2  ;;  %vm9739_vm5 = vmor %vm3428_vm11, %vm3429_vm12 }
 0x189   : > { %vm1594_vm1 = vcmp.lt.f32.partialorder %v1376_v51, 1.5  ;;  %v4472_v42 = vmul.f32 1.05, %v9722_v46  ;;  %5525 = vperm.xlu2 %6761, %v9722_v46   ;;  %v9732_v59 = vsel %vm9658_vm7, %v3450_v56, %v3446_v21  ;;  %v5204_v63 = vmul.f32 %v6953_v40, %v2259_v54  ;;  %v203_v21 = vld [vmem:[%s7632_s20 + $0x178] sm:$0xff] }
 0x18a   : > { %15781 = vst [vmem:[#allocation137_spill] sm:$0xff] %v9732_v59  ;;  %v3426_v22 = vmul.f32 %v6951_v25, %v3425_v58  ;;  %v4471_v15 = vmul.f32 1.05, %v9732_v59  ;;  %5520 = vperm.xlu1 %6760, %v9732_v59   ;;  %v1703_v23 = vsel %vm1594_vm1, 78.0, %v15732_v43  ;;  %v1921_v31 = vsel %vm1594_vm1, 115.0, %v15733_v10 }
 0x18b   : > { %v15784_v40 = vsel %vm9206_vm14, %v9624_v55, 0.0  ;;  %v1198_v9 = vfloor.f32 %v9711_v20  ;;  %vm3433_vm7 = vcmp.eq.f32.partialorder %v3432_v29, 8.507059e+37  ;;  %v6079_v1 = vsel %vm15241_vm4, %v5204_v63, %v5968_v33  ;;  %v5306_v63 = vpop.permute.xlu0 %5305 }
 0x18c   : > { %v4979_v14 = vmul.f32 1.442695, %v15784_v40  ;;  %v3427_v56 = vadd.f32 %v6951_v25, %v3426_v22  ;;  %v6646_v47 = vadd.f32 -0.025, %v4472_v42  ;;  %vm15785_vm3 = vcmp.lt.s32.totalorder %v7672_v53, 2  ;;  %v7425_v42 = vld [vmem:[%s7632_s20] sm:$0xff] }
 0x18d   : > { %v6188_v18 = vsel %vm15785_vm3, %v8187_v44, %v6079_v1  ;;  %v1812_v41 = vsel %vm1485_vm6, 102.0, %v1703_v23  ;;  %v6645_v55 = vadd.f32 -0.025, %v4471_v15  ;;  %vm15786_vm8 = vcmask 695296   ;;  %v201_v40 = vld [vmem:[%s7632_s20 + $0x168] sm:$0xff]  ;;  %vm15792_vm13 = vmmov %vm15785_vm3 }
 0x18e   : > { %6954 = vpow2.f32 %v4979_v14  ;;  %v3431_v35 = vsel %vm9739_vm5, %v6951_v25, %v3427_v56  ;;  %6298 = vst.msk [vmem:[%s9279_s23 + $0x58] sm:$0xff] %vm15786_vm8, %v6188_v18  ;;  %v2030_v29 = vsel %vm1485_vm6, 74.0, %v1921_v31  ;;  %v5850_v20 = vmul.f32 %v5316_v7, %v7790_v49  ;;  %vm15793_vm0 = vmmov %vm15786_vm8 }
 0x18f   : > { %v9762_v2 = vmul.f32 3.0, %v1199_v3  ;;  %v15788_v44 = vfloor.f32 %v9599_v61  ;;  %v9768_v58 = vsel %vm3433_vm7, %v3435_v5, %v3431_v35  ;;  %vm1592_vm9 = vcmp.lt.f32.partialorder %v9631_v38, 1.5  ;;  %vm15799_vm1 = vmmov %vm15785_vm3 }
 0x190   : > { %15789 = vst [vmem:[#allocation139_spill] sm:$0xff] %v9768_v58  ;;  %v15790_v25 = vfloor.f32 %v9643_v6  ;;  %v4470_v33 = vmul.f32 1.05, %v9768_v58  ;;  %5515 = vperm.xlu0 %6759, %v9768_v58   ;;  %vm1483_vm11 = vcmp.lt.f32.partialorder %v9631_v38, 0.5  ;;  %v1701_v61 = vsel %vm1592_vm9, 78.0, %v15732_v43  ;;  %vm15800_vm5 = vmmov %vm15793_vm0 }
 0x191   : > { %15787 = vst [vmem:[#allocation138_spill] sm:$0xff] %v9762_v2  ;;  %v2181_v52 = vsel %vm2137_vm2, %v1199_v3, %v15788_v44  ;;  %v202_v3 = vld [vmem:[%s7632_s20 + $0x170] sm:$0xff]  ;;  %v4690_v5 = vadd.f32 %v6646_v47, %v9676_v36  ;;  %v2250_v54 = vsel %vm2247_vm10, %v1812_v41, %v2030_v29  ;;  %v1919_v6 = vsel %vm1592_vm9, 115.0, %v15733_v10 }
 0x192   : > { %v2180_v51 = vsel %vm2137_vm2, %v1198_v9, %v15790_v25  ;;  %v4866_v22 = vsel %vm9206_vm14, %v7425_v42, 0.0  ;;  %v4689_v15 = vadd.f32 %v6645_v55, %v2181_v52  ;;  %v6644_v17 = vadd.f32 -0.025, %v4470_v33  ;;  %v15898_v2 = vld [vmem:[#allocation20_spill] sm:$0xff] }
 0x193   : > { %v5959_v23 = vsel %vm15242_vm15, %v5850_v20, %v7790_v49  ;;  %v4975_v31 = vmul.f32 1.442695, %v4866_v22  ;;  %v1810_v36 = vsel %vm1483_vm11, 102.0, %v1701_v61  ;;  %v314_v56 = vadd.s32 376, %v7619_v4 }
 0x194   : > { %v6955_v14 = vpop.eup %6954  ;;  %v6540_v1 = vmul.f32 -1.442695, %v203_v21  ;;  %v6539_v47 = vmul.f32 -1.442695, %v202_v3  ;;  %v2028_v41 = vsel %vm1483_vm11, 74.0, %v1919_v6  ;;  %v5848_v7 = vmul.f32 %v5306_v63, %v7812_v26 }
 0x195   : > { %v5195_v18 = vmul.f32 %v6955_v14, %v2250_v54  ;;  %6956 = vpow2.f32 %v4975_v31  ;;  %v424_v49 = vadd.s32 %v7625_v8, %v314_v56  ;;  %v313_v55 = vadd.s32 368, %v7619_v4 }
 0x196   : > { %6958 = vpow2.f32 %v6540_v1  ;;  %v6538_v35 = vmul.f32 -1.442695, %v201_v40  ;;  %v4688_v29 = vadd.f32 %v6644_v17, %v2180_v51  ;;  %v312_v44 = vadd.s32 360, %v7619_v4 }
 0x197   : > { %v6070_v20 = vsel %vm15241_vm4, %v5195_v18, %v5959_v23  ;;  %6960 = vpow2.f32 %v6539_v47  ;;  %v9803_v52 = vmul.f32 3.0, %v1198_v9  ;;  %v535_v25 = vcvt.s32.f32 %v424_v49  ;;  %v15794_v9 = vld [vmem:[#allocation23_spill] sm:$0xff]  ;;  %v7426_v23 = vld [vmem:[%s7632_s20 + $0x70] sm:$0xff] }
 0x198   : > { %v6179_v38 = vsel %vm15792_vm13, %v7932_v30, %v6070_v20  ;;  %v423_v33 = vadd.s32 %v7625_v8, %v313_v55  ;;  %v9809_v61 = vmul.f32 16.0, %v4690_v5  ;;  %v2248_v51 = vsel %vm2247_vm10, %v1810_v36, %v2028_v41  ;;  %v5376_v5 = vpop.permute.xlu2 %5375  ;;  %v15798_v55 = vld [vmem:[#allocation5_spill] sm:$0xff] }
 0x199   : > { %15791 = vst [vmem:[#allocation140_spill] sm:$0xff] %v9803_v52  ;;  %v9816_v21 = vadd.s32 %v7625_v8, %v312_v44  ;;  %v1388_v3 = vsub.f32 %v15794_v9, %v8212_v50  ;;  %v9820_v54 = vmul.f32 16.0, %v4689_v15  ;;  %v9823_v30 = vmul.f32 %v7647_v32, %v535_v25 }
 0x19a   : > { %6289 = vst.msk [vmem:[%s9279_s23 + $0x10] sm:$0xff] %vm15793_vm0, %v6179_v38  ;;  %v534_v6 = vcvt.s32.f32 %v423_v33  ;;  %6962 = vpow2.f32 %v6538_v35  ;;  %v9825_v22 = vmul.f32 16.0, %v4688_v29  ;;  %v5957_v63 = vsel %vm15242_vm15, %v5848_v7, %v7812_v26  ;;  %v15797_v26 = vld [vmem:[#allocation30_spill] sm:$0xff] }
 0x19b   : > { %15795 = vst [vmem:[#allocation23_spill] sm:$0xff] %v9820_v54  ;;  %v6957_v42 = vpop.eup %6956  ;;  %v533_v17 = vcvt.s32.f32 %v9816_v21  ;;  %v4880_v50 = vsel %vm9206_vm14, %v7426_v23, 0.0  ;;  %v760_v40 = vfloor.f32 %v9823_v30  ;;  %vm1606_vm12 = vcmp.lt.f32.partialorder %v1388_v3, 1.5 }
 0x19c   : > { %15796 = vst [vmem:[#allocation141_spill] sm:$0xff] %v9825_v22  ;;  %v6959_v15 = vpop.eup %6958  ;;  %v5193_v31 = vmul.f32 %v6957_v42, %v2248_v51  ;;  %v9836_v14 = vmul.f32 %v7647_v32, %v534_v6  ;;  %vm1497_vm6 = vcmp.lt.f32.partialorder %v1388_v3, 0.5  ;;  %v5862_v47 = vmul.f32 %v5376_v5, %v15797_v26  ;;  %v15801_v5 = vld [vmem:[#allocation6_spill] sm:$0xff] }
 0x19d   : > { %v6961_v36 = vpop.eup %6960  ;;  %v2731_v56 = vadd.f32 1.0, %v6959_v15  ;;  %v9839_v1 = vmul.f32 %v7647_v32, %v533_v17  ;;  %v869_v41 = vmul.f32 114.0, %v760_v40  ;;  %v1715_v29 = vsel %vm1606_vm12, 78.0, %v15732_v43  ;;  %v15802_v42 = vld [vmem:[#allocation2_spill] sm:$0xff] }
 0x19e   : > { %v6068_v18 = vsel %vm15241_vm4, %v5193_v31, %v5957_v63  ;;  %v15227_v7 = vfloor.f32 %v9836_v14  ;;  %v2730_v49 = vadd.f32 1.0, %v6961_v36  ;;  %v1933_v20 = vsel %vm1606_vm12, 115.0, %v15733_v10 }
 0x19f   : > { %v6177_v35 = vsel %vm15799_vm1, %v15798_v55, %v6068_v18  ;;  %6964 = vrcp.f32 %v2731_v56  ;;  %v9852_v38 = vsub.f32 %v535_v25, %v869_v41  ;;  %v3507_v33 = vand.u32 2147483647, %v2731_v56 }
 0x1a0   : > { %v6963_v44 = vpop.eup %6962  ;;  %6287 = vst.msk [vmem:[%s9279_s23] sm:$0xff] %vm15800_vm5, %v6177_v35  ;;  %v868_v51 = vmul.f32 114.0, %v15227_v7  ;;  %6966 = vrcp.f32 %v2730_v49  ;;  %v3509_v21 = vand.u32 2147483648, %v2731_v56  ;;  %v3492_v9 = vand.u32 2147483647, %v2730_v49 }
 0x1a1   : > { %v5003_v30 = vmul.f32 1.442695, %v4880_v50  ;;  %v9858_v63 = vsub.f32 %v15802_v42, %v15801_v5  ;;  %v1094_v23 = vmul.f32 %v7680_v57, %v9852_v38  ;;  %v3494_v31 = vand.u32 2147483648, %v2730_v49 }
 0x1a2   : > { %v9862_v15 = vsub.f32 %v534_v6, %v868_v51  ;;  %v15226_v25 = vfloor.f32 %v9839_v1  ;;  %v9865_v36 = vadd.f32 1.0, %v6963_v44  ;;  %v1824_v18 = vsel %vm1497_vm6, 102.0, %v1715_v29 }
 0x1a3   : > { %v2042_v41 = vsel %vm1497_vm6, 74.0, %v1933_v20  ;;  %v9872_v50 = vsel %vm15242_vm15, %v5862_v47, %v15797_v26  ;;  %vm3503_vm7 = vweird.f32 %v2731_v56  ;;  %vm9874_vm3 = vcmp.eq.f32.partialorder %v3507_v33, 8.507059e+37 }
 0x1a4   : > { %15803 = vst [vmem:[#allocation30_spill] sm:$0xff] %v9862_v15  ;;  %vm3488_vm8 = vweird.f32 %v2730_v49  ;;  %v867_v6 = vmul.f32 114.0, %v15226_v25  ;;  %v1203_v44 = vfloor.f32 %v1094_v23  ;;  %v3510_v51 = vor.u32 1.1754944e-38, %v3509_v21 }
 0x1a5   : > { %v6965_v35 = vpop.eup %6964  ;;  %vm9880_vm9 = vcmp.eq.f32.partialorder %v3492_v9, 8.507059e+37  ;;  %6968 = vrcp.f32 %v9865_v36  ;;  %v1093_v29 = vmul.f32 %v7680_v57, %v9862_v15  ;;  %v3495_v20 = vor.u32 1.1754944e-38, %v3494_v31 }
 0x1a6   : > { %v6967_v26 = vpop.eup %6966  ;;  %v3499_v47 = vmul.f32 %v6965_v35, %v2731_v56  ;;  %v2262_v33 = vsel %vm2247_vm10, %v1824_v18, %v2042_v41  ;;  %v9889_v42 = vsub.f32 %v533_v17, %v867_v6  ;;  %vm3473_vm11 = vweird.f32 %v9865_v36 }
 0x1a7   : > { %v3484_v5 = vmul.f32 %v6967_v26, %v2730_v49  ;;  %v3477_v21 = vand.u32 2147483647, %v9865_v36  ;;  %vm3504_vm13 = vweird.f32 %v6965_v35  ;;  %v3479_v23 = vand.u32 2147483648, %v9865_v36 }
 0x1a8   : > { %15808 = vst [vmem:[#allocation5_spill] sm:$0xff] %v9889_v42  ;;  %v3500_v9 = vsub.f32 1.0, %v3499_v47  ;;  %6970 = vpow2.f32 %v5003_v30  ;;  %v9894_v25 = vmul.f32 3.0, %v1203_v44  ;;  %vm3489_vm0 = vweird.f32 %v6967_v26  ;;  %vm9906_vm6 = vmor %vm3503_vm7, %vm3504_vm13 }
 0x1a9   : > { %v3485_v7 = vsub.f32 1.0, %v3484_v5  ;;  %v9898_v31 = vmul.f32 %v7680_v57, %v9889_v42  ;;  %v9902_v17 = vsel %vm2137_vm2, %v1203_v44, %v760_v40  ;;  %v1202_v41 = vfloor.f32 %v1093_v29  ;;  %v7427_v42 = vld [vmem:[%s7632_s20 + $0x18] sm:$0xff]  ;;  %vm9916_vm5 = vmor %vm3488_vm8, %vm3489_vm0  ;;  %v15822_v29 = vld [vmem:[#allocation35_spill] sm:$0xff] }
 0x1aa   : > { %v3501_v18 = vmul.f32 %v6965_v35, %v3500_v9  ;;  %vm1595_vm12 = vcmp.lt.f32.partialorder %v9858_v63, 1.5  ;;  %vm1486_vm1 = vcmp.lt.f32.partialorder %v9858_v63, 0.5  ;;  %v4869_v40 = vsel %vm9206_vm14, %v7427_v42, 0.0  ;;  %v205_v63 = vld [vmem:[%s7632_s20 + $0x188] sm:$0xff] }
 0x1ab   : > { %v6969_v6 = vpop.eup %6968  ;;  %v3486_v47 = vmul.f32 %v6967_v26, %v3485_v7  ;;  %v1704_v5 = vsel %vm1595_vm12, 78.0, %v15732_v43  ;;  %vm9921_vm7 = vcmp.eq.f32.partialorder %v3477_v21, 8.507059e+37  ;;  %v1922_v7 = vsel %vm1595_vm12, 115.0, %v15733_v10  ;;  %v5321_v21 = vpop.permute.xlu1 %5320 }
 0x1ac   : > { %v3502_v44 = vadd.f32 %v6965_v35, %v3501_v18  ;;  %v3469_v56 = vmul.f32 %v6969_v6, %v9865_v36  ;;  %vm3474_vm13 = vweird.f32 %v6969_v6  ;;  %v3480_v54 = vor.u32 1.1754944e-38, %v3479_v23 }
 0x1ad   : > { %v3487_v15 = vadd.f32 %v6967_v26, %v3486_v47  ;;  %v1813_v58 = vsel %vm1486_vm1, 102.0, %v1704_v5  ;;  %v4981_v60 = vmul.f32 1.442695, %v4869_v40  ;;  %v2031_v23 = vsel %vm1486_vm1, 74.0, %v1922_v7 }
 0x1ae   : > { %v6971_v42 = vpop.eup %6970  ;;  %v3506_v49 = vsel %vm9906_vm6, %v6965_v35, %v3502_v44  ;;  %v3470_v18 = vsub.f32 1.0, %v3469_v56  ;;  %v9960_v40 = vmul.f32 3.0, %v1202_v41  ;;  %vm15823_vm8 = vcmp.lt.s32.totalorder %v7672_v53, 2 }
 0x1af   : > { %v9933_v52 = vsel %vm9874_vm3, %v3510_v51, %v3506_v49  ;;  %v3491_v47 = vsel %vm9916_vm5, %v6967_v26, %v3487_v15  ;;  %v5207_v22 = vmul.f32 %v6971_v42, %v2262_v33  ;;  %6972 = vpow2.f32 %v4981_v60  ;;  %vm9950_vm3 = vmor %vm3473_vm11, %vm3474_vm13  ;;  %v15818_v51 = vld [vmem:[#allocation3_spill] sm:$0xff]  ;;  %v15819_v26 = vld [vmem:[#allocation8_spill] sm:$0xff]  ;;  %v5311_v49 = vpop.permute.xlu0 %5310 }
 0x1b0   : > { %v4475_v30 = vmul.f32 1.05, %v9933_v52  ;;  %5540 = vperm.xlu2 %6761, %v9933_v52   ;;  %v9943_v35 = vsel %vm9880_vm9, %v3495_v20, %v3491_v47  ;;  %v3471_v5 = vmul.f32 %v6969_v6, %v3470_v18  ;;  %v5851_v3 = vmul.f32 %v5321_v21, %v15818_v51  ;;  %v15820_v20 = vld [vmem:[#allocation4_spill] sm:$0xff]  ;;  %15821 = vst [vmem:[#allocation2_spill] sm:$0xff] %v9960_v40  ;;  %vm15833_vm12 = vmmov %vm15823_vm8  ;;  %v7430_v40 = vld [vmem:[%s7632_s20 + $0x38] sm:$0xff] }
 0x1b1   : > { %15815 = vst [vmem:[#allocation6_spill] sm:$0xff] %v9943_v35  ;;  %v4474_v55 = vmul.f32 1.05, %v9943_v35  ;;  %5535 = vperm.xlu1 %6760, %v9943_v35   ;;  %v6082_v15 = vsel %vm15241_vm4, %v5207_v22, %v9872_v50  ;;  %v1375_v60 = vsub.f32 %v15820_v20, %v15819_v26  ;;  %v15824_v56 = vfloor.f32 %v9836_v14  ;;  %v7428_v50 = vld [vmem:[%s7632_s20 + $0x8] sm:$0xff] }
 0x1b2   : > { %v6649_v33 = vadd.f32 -0.025, %v4475_v30  ;;  %v3472_v44 = vadd.f32 %v6969_v6, %v3471_v5  ;;  %v6191_v36 = vsel %vm15823_vm8, %v15822_v29, %v6082_v15  ;;  %vm15825_vm9 = vcmask 695296   ;;  %v15829_v20 = vld [vmem:[#allocation7_spill] sm:$0xff] }
 0x1b3   : > { %v2184_v7 = vsel %vm2137_vm2, %v1202_v41, %v15824_v56  ;;  %v6648_v22 = vadd.f32 -0.025, %v4474_v55  ;;  %6301 = vst.msk [vmem:[%s9279_s23 + $0x70] sm:$0xff] %vm15825_vm9, %v6191_v36  ;;  %vm1593_vm11 = vcmp.lt.f32.partialorder %v1375_v60, 1.5  ;;  %v4867_v42 = vsel %vm9206_vm14, %v7428_v50, 0.0  ;;  %v206_v55 = vld [vmem:[%s7632_s20 + $0x190] sm:$0xff]  ;;  %vm15836_vm6 = vmmov %vm15825_vm9 }
 0x1b4   : > { %v3476_v18 = vsel %vm9950_vm3, %v6969_v6, %v3472_v44  ;;  %v2251_v14 = vsel %vm2247_vm10, %v1813_v58, %v2031_v23  ;;  %vm1484_vm0 = vcmp.lt.f32.partialorder %v1375_v60, 0.5  ;;  %v1702_v41 = vsel %vm1593_vm11, 78.0, %v15732_v43  ;;  %vm15841_vm13 = vmmov %vm15836_vm6 }
 0x1b5   : > { %v15826_v21 = vfloor.f32 %v9898_v31  ;;  %v9985_v30 = vsel %vm9921_vm7, %v3480_v54, %v3476_v18  ;;  %v5960_v5 = vsel %vm15242_vm15, %v5851_v3, %v15818_v51  ;;  %v1920_v6 = vsel %vm1593_vm11, 115.0, %v15733_v10  ;;  %v6973_v58 = vpop.eup %6972  ;;  %v204_v54 = vld [vmem:[%s7632_s20 + $0x180] sm:$0xff]  ;;  %v15831_v18 = vld [vmem:[#allocation31_spill] sm:$0xff]  ;;  %vm15839_vm7 = vmmov %vm15823_vm8 }
 0x1b6   : > { %15828 = vst [vmem:[#allocation8_spill] sm:$0xff] %v9985_v30  ;;  %v4693_v23 = vadd.f32 %v6649_v33, %v9902_v17  ;;  %v4473_v15 = vmul.f32 1.05, %v9985_v30  ;;  %5530 = vperm.xlu0 %6759, %v9985_v30   ;;  %v4977_v26 = vmul.f32 1.442695, %v4867_v42  ;;  %v5849_v9 = vmul.f32 %v5311_v49, %v15829_v20  ;;  %v15830_v49 = vld [vmem:[#allocation37_spill] sm:$0xff] }
 0x1b7   : > { %v9981_v47 = vmul.f32 3.0, %v15826_v21  ;;  %v4692_v44 = vadd.f32 %v6648_v22, %v2184_v7  ;;  %v5196_v29 = vmul.f32 %v6973_v58, %v2251_v14  ;;  %v1811_v51 = vsel %vm1484_vm0, 102.0, %v1702_v41  ;;  %v15832_v14 = vld [vmem:[#allocation9_spill] sm:$0xff] }
 0x1b8   : > { %v317_v3 = vadd.s32 400, %v7619_v4  ;;  %v2029_v36 = vsel %vm1484_vm0, 74.0, %v1920_v6  ;;  %6974 = vpow2.f32 %v4977_v26  ;;  %v6543_v56 = vmul.f32 -1.442695, %v206_v55 }
 0x1b9   : > { %15827 = vst [vmem:[#allocation3_spill] sm:$0xff] %v9981_v47  ;;  %v6542_v17 = vmul.f32 -1.442695, %v205_v63  ;;  %v6071_v33 = vsel %vm15241_vm4, %v5196_v29, %v5960_v5  ;;  %v6541_v42 = vmul.f32 -1.442695, %v204_v54  ;;  %v1391_v7 = vsub.f32 %v15831_v18, %v15830_v49 }
 0x1ba   : > { %v427_v50 = vadd.s32 %v7625_v8, %v317_v3  ;;  %v6647_v22 = vadd.f32 -0.025, %v4473_v15  ;;  %v6180_v41 = vsel %vm15833_vm12, %v15832_v14, %v6071_v33  ;;  %6976 = vpow2.f32 %v6543_v56  ;;  %v7429_v56 = vld [vmem:[%s7632_s20 + $0x88] sm:$0xff] }
 0x1bb   : > { %v316_v60 = vadd.s32 392, %v7619_v4  ;;  %v15834_v21 = vfloor.f32 %v9839_v1  ;;  %v15835_v6 = vfloor.f32 %v9898_v31  ;;  %6290 = vst.msk [vmem:[%s9279_s23 + $0x18] sm:$0xff] %vm15836_vm6, %v6180_v41  ;;  %6978 = vpow2.f32 %v6542_v17 }
 0x1bc   : > { %v538_v55 = vcvt.s32.f32 %v427_v50  ;;  %v315_v63 = vadd.s32 384, %v7619_v4  ;;  %v10019_v58 = vmul.f32 16.0, %v4693_v23  ;;  %v10021_v15 = vmul.f32 16.0, %v4692_v44 }
 0x1bd   : > { %v2183_v5 = vsel %vm2137_vm2, %v15835_v6, %v15834_v21  ;;  %v2249_v26 = vsel %vm2247_vm10, %v1811_v51, %v2029_v36  ;;  %v426_v1 = vadd.s32 %v7625_v8, %v316_v60  ;;  %6980 = vpow2.f32 %v6541_v42  ;;  %v15838_v21 = vld [vmem:[#allocation13_spill] sm:$0xff] }
 0x1be   : > { %15837 = vst [vmem:[#allocation4_spill] sm:$0xff] %v10021_v15  ;;  %v10027_v31 = vmul.f32 %v7647_v32, %v538_v55  ;;  %v10030_v54 = vadd.s32 %v7625_v8, %v315_v63  ;;  %vm1609_vm1 = vcmp.lt.f32.partialorder %v1391_v7, 1.5  ;;  %v6975_v29 = vpop.eup %6974  ;;  %v4691_v3 = vadd.f32 %v6647_v22, %v2183_v5 }
 0x1bf   : > { %v5958_v23 = vsel %vm15242_vm15, %v5849_v9, %v15829_v20  ;;  %v537_v44 = vcvt.s32.f32 %v426_v1  ;;  %v4883_v51 = vsel %vm9206_vm14, %v7429_v56, 0.0  ;;  %v5194_v36 = vmul.f32 %v6975_v29, %v2249_v26  ;;  %v5391_v29 = vpop.permute.xlu2 %5390 }
 0x1c0   : > { %v763_v17 = vfloor.f32 %v10027_v31  ;;  %v536_v33 = vcvt.s32.f32 %v10030_v54  ;;  %vm1500_vm5 = vcmp.lt.f32.partialorder %v1391_v7, 0.5  ;;  %v6977_v50 = vpop.eup %6976  ;;  %v1718_v49 = vsel %vm1609_vm1, 78.0, %v15732_v43 }
 0x1c1   : > { %v10041_v42 = vmul.f32 %v7647_v32, %v537_v44  ;;  %v1936_v20 = vsel %vm1609_vm1, 115.0, %v15733_v10  ;;  %v5009_v9 = vmul.f32 1.442695, %v4883_v51  ;;  %v6979_v18 = vpop.eup %6978  ;;  %v6069_v22 = vsel %vm15241_vm4, %v5194_v36, %v5958_v23 }
 0x1c2   : > { %v872_v14 = vmul.f32 114.0, %v763_v17  ;;  %v2734_v41 = vadd.f32 1.0, %v6977_v50  ;;  %v10048_v60 = vmul.f32 %v7647_v32, %v536_v33  ;;  %v6178_v6 = vsel %vm15839_vm7, %v15838_v21, %v6069_v22  ;;  %v15844_v22 = vld [vmem:[#allocation41_spill] sm:$0xff] }
 0x1c3   : > { %v15233_v5 = vfloor.f32 %v10041_v42  ;;  %v10054_v63 = vadd.f32 1.0, %v6979_v18  ;;  %6982 = vpow2.f32 %v5009_v9  ;;  %v6981_v26 = vpop.eup %6980  ;;  %v10056_v1 = vmul.f32 16.0, %v4691_v3  ;;  %6288 = vst.msk [vmem:[%s9279_s23 + $0x8] sm:$0xff] %vm15841_vm13, %v6178_v6  ;;  %v15846_v6 = vld [vmem:[#allocation10_spill] sm:$0xff] }
 0x1c4   : > { %v10060_v31 = vsub.f32 %v538_v55, %v872_v14  ;;  %6984 = vrcp.f32 %v2734_v41  ;;  %v1827_v54 = vsel %vm1500_vm5, 102.0, %v1718_v49  ;;  %v3552_v23 = vand.u32 2147483647, %v2734_v41 }
 0x1c5   : > { %15840 = vst [vmem:[#allocation35_spill] sm:$0xff] %v10056_v1  ;;  %v871_v56 = vmul.f32 114.0, %v15233_v5  ;;  %6986 = vrcp.f32 %v10054_v63  ;;  %v2045_v51 = vsel %vm1500_vm5, 74.0, %v1936_v20  ;;  %v3554_v36 = vand.u32 2147483648, %v2734_v41  ;;  %v15845_v20 = vld [vmem:[#allocation14_spill] sm:$0xff] }
 0x1c6   : > { %15842 = vst [vmem:[#allocation7_spill] sm:$0xff] %v10060_v31  ;;  %v1097_v3 = vmul.f32 %v7680_v57, %v10060_v31  ;;  %v3537_v50 = vand.u32 2147483647, %v10054_v63  ;;  %v3539_v55 = vand.u32 2147483648, %v10054_v63  ;;  %v15235_v49 = vfloor.f32 %v10048_v60 }
 0x1c7   : > { %v10071_v9 = vsub.f32 %v537_v44, %v871_v56  ;;  %v10074_v18 = vadd.f32 1.0, %v6981_v26  ;;  %v5865_v14 = vmul.f32 %v5391_v29, %v15844_v22  ;;  %vm3548_vm3 = vweird.f32 %v2734_v41 }
 0x1c8   : > { %v1206_v21 = vfloor.f32 %v1097_v3  ;;  %v2265_v7 = vsel %vm2247_vm10, %v1827_v54, %v2045_v51  ;;  %v10081_v5 = vsub.f32 %v15846_v6, %v15845_v20  ;;  %vm3533_vm8 = vweird.f32 %v10054_v63  ;;  %v15868_v51 = vld [vmem:[#allocation12_spill] sm:$0xff] }
 0x1c9   : > { %15843 = vst [vmem:[#allocation37_spill] sm:$0xff] %v10071_v9  ;;  %v6983_v1 = vpop.eup %6982  ;;  %v10085_v44 = vmul.f32 %v7680_v57, %v10071_v9  ;;  %v870_v26 = vmul.f32 114.0, %v15235_v49  ;;  %6988 = vrcp.f32 %v10074_v18  ;;  %vm10091_vm9 = vcmp.eq.f32.partialorder %v3552_v23, 8.507059e+37 }
 0x1ca   : > { %v6985_v29 = vpop.eup %6984  ;;  %v3555_v54 = vor.u32 1.1754944e-38, %v3554_v36  ;;  %vm10095_vm11 = vcmp.eq.f32.partialorder %v3537_v50, 8.507059e+37  ;;  %v3540_v3 = vor.u32 1.1754944e-38, %v3539_v55  ;;  %v3522_v15 = vand.u32 2147483647, %v10074_v18 }
 0x1cb   : > { %v6987_v20 = vpop.eup %6986  ;;  %v3544_v6 = vmul.f32 %v6985_v29, %v2734_v41  ;;  %v10099_v9 = vsub.f32 %v536_v33, %v870_v26  ;;  %v5974_v49 = vsel %vm15242_vm15, %v5865_v14, %v15844_v22  ;;  %v10105_v23 = vmul.f32 3.0, %v1206_v21  ;;  %v7431_v41 = vld [vmem:[%s7632_s20 + $0x30] sm:$0xff] }
 0x1cc   : > { %v10109_v36 = vsel %vm2137_vm2, %v1206_v21, %v763_v17  ;;  %v3529_v50 = vmul.f32 %v6987_v20, %v10054_v63  ;;  %vm3518_vm0 = vweird.f32 %v10074_v18  ;;  %vm3549_vm12 = vweird.f32 %v6985_v29 }
 0x1cd   : > { %15851 = vst [vmem:[#allocation31_spill] sm:$0xff] %v10099_v9  ;;  %v3545_v55 = vsub.f32 1.0, %v3544_v6  ;;  %v1205_v33 = vfloor.f32 %v10085_v44  ;;  %v3524_v26 = vand.u32 2147483648, %v10074_v18  ;;  %vm3534_vm6 = vweird.f32 %v6987_v20  ;;  %vm10124_vm13 = vmor %vm3548_vm3, %vm3549_vm12 }
 0x1ce   : > { %v3530_v30 = vsub.f32 1.0, %v3529_v50  ;;  %v5210_v35 = vmul.f32 %v6983_v1, %v2265_v7  ;;  %vm1599_vm1 = vcmp.lt.f32.partialorder %v10081_v5, 1.5  ;;  %v1095_v17 = vmul.f32 %v7680_v57, %v10099_v9  ;;  %vm10139_vm3 = vmor %vm3533_vm8, %vm3534_vm6  ;;  %v15859_v9 = vld [vmem:[#allocation47_spill] sm:$0xff] }
 0x1cf   : > { %v6989_v22 = vpop.eup %6988  ;;  %v3546_v14 = vmul.f32 %v6985_v29, %v3545_v55  ;;  %vm10118_vm5 = vcmp.eq.f32.partialorder %v3522_v15, 8.507059e+37  ;;  %vm1490_vm7 = vcmp.lt.f32.partialorder %v10081_v5, 0.5  ;;  %v1708_v15 = vsel %vm1599_vm1, 78.0, %v15732_v43 }
 0x1d0   : > { %v3531_v1 = vmul.f32 %v6987_v20, %v3530_v30  ;;  %v3514_v7 = vmul.f32 %v6989_v22, %v10074_v18  ;;  %v6085_v6 = vsel %vm15241_vm4, %v5210_v35, %v5974_v49  ;;  %v10134_v55 = vmul.f32 3.0, %v1205_v33 }
 0x1d1   : > { %v3547_v50 = vadd.f32 %v6985_v29, %v3546_v14  ;;  %v3525_v30 = vor.u32 1.1754944e-38, %v3524_v26  ;;  %vm15860_vm12 = vcmp.lt.s32.totalorder %v7672_v53, 2  ;;  %vm3519_vm4 = vweird.f32 %v6989_v22 }
 0x1d2   : > { %15856 = vst [vmem:[#allocation9_spill] sm:$0xff] %v10134_v55  ;;  %v6194_v47 = vsel %vm15860_vm12, %v15859_v9, %v6085_v6  ;;  %v3532_v35 = vadd.f32 %v6987_v20, %v3531_v1  ;;  %v3515_v49 = vsub.f32 1.0, %v3514_v7  ;;  %vm15861_vm15 = vcmask 695296   ;;  %v5341_v1 = vpop.permute.xlu1 %5340 }
 0x1d3   : > { %6304 = vst.msk [vmem:[%s9279_s23 + $0x88] sm:$0xff] %vm15861_vm15, %v6194_v47  ;;  %v1926_v14 = vsel %vm1599_vm1, 115.0, %v15733_v10  ;;  %v3551_v63 = vsel %vm10124_vm13, %v6985_v29, %v3547_v50  ;;  %v1204_v55 = vfloor.f32 %v1095_v17  ;;  %v1817_v26 = vsel %vm1490_vm7, 102.0, %v1708_v15  ;;  %vm10173_vm15 = vmor %vm3518_vm0, %vm3519_vm4 }
 0x1d4   : > { %v4873_v9 = vsel %vm9206_vm14, %v7430_v40, 0.0  ;;  %v10160_v47 = vsel %vm10091_vm9, %v3555_v54, %v3551_v63  ;;  %v3536_v7 = vsel %vm10139_vm3, %v6987_v20, %v3532_v35  ;;  %v3516_v6 = vmul.f32 %v6989_v22, %v3515_v49  ;;  %v15866_v54 = vld [vmem:[#allocation15_spill] sm:$0xff]  ;;  %v5336_v40 = vpop.permute.xlu0 %5335  ;;  %vm15879_vm0 = vmmov %vm15860_vm12 }
 0x1d5   : > { %15862 = vst [vmem:[#allocation13_spill] sm:$0xff] %v10160_v47  ;;  %v4989_v44 = vmul.f32 1.442695, %v4873_v9  ;;  %v4478_v29 = vmul.f32 1.05, %v10160_v47  ;;  %5555 = vperm.xlu2 %6761, %v10160_v47   ;;  %v10168_v17 = vsel %vm10095_vm11, %v3540_v3, %v3536_v7  ;;  %v2035_v56 = vsel %vm1490_vm7, 74.0, %v1926_v14  ;;  %vm15884_vm3 = vmmov %vm15879_vm0 }
 0x1d6   : > { %15863 = vst [vmem:[#allocation41_spill] sm:$0xff] %v10168_v17  ;;  %v15867_v20 = vld [vmem:[#allocation11_spill] sm:$0xff]  ;;  %5550 = vperm.xlu1 %6760, %v10168_v17   ;;  %v3517_v50 = vadd.f32 %v6989_v22, %v3516_v6  ;;  %v5855_v3 = vmul.f32 %v5341_v1, %v15868_v51  ;;  %v4872_v18 = vsel %vm9206_vm14, %v7431_v41, 0.0  ;;  %v4477_v35 = vmul.f32 1.05, %v10168_v17 }
 0x1d7   : > { %v1380_v15 = vsub.f32 %v15867_v20, %v15866_v54  ;;  %6990 = vpow2.f32 %v4989_v44  ;;  %v4987_v5 = vmul.f32 1.442695, %v4872_v18  ;;  %v6652_v49 = vadd.f32 -0.025, %v4478_v29  ;;  %v209_v7 = vld [vmem:[%s7632_s20 + $0x1a8] sm:$0xff]  ;;  %v208_v20 = vld [vmem:[%s7632_s20 + $0x1a0] sm:$0xff] }
 0x1d8   : > { %v3521_v14 = vsel %vm10173_vm15, %v6989_v22, %v3517_v50  ;;  %v15869_v1 = vfloor.f32 %v10041_v42  ;;  %v10196_v44 = vmul.f32 3.0, %v1204_v55  ;;  %v15871_v54 = vfloor.f32 %v10048_v60 }
 0x1d9   : > { %vm1489_vm4 = vcmp.lt.f32.partialorder %v1380_v15, 0.5  ;;  %vm1598_vm8 = vcmp.lt.f32.partialorder %v1380_v15, 1.5  ;;  %v10204_v22 = vsel %vm10118_vm5, %v3525_v30, %v3521_v14  ;;  %v2255_v42 = vsel %vm2247_vm10, %v1817_v26, %v2035_v56 }
 0x1da   : > { %v1707_v63 = vsel %vm1598_vm8, 78.0, %v15732_v43  ;;  %v1925_v9 = vsel %vm1598_vm8, 115.0, %v15733_v10  ;;  %v2187_v6 = vsel %vm2137_vm2, %v1205_v33, %v15869_v1  ;;  %15870 = vst [vmem:[#allocation14_spill] sm:$0xff] %v10196_v44  ;;  %v2186_v29 = vsel %vm2137_vm2, %v1204_v55, %v15871_v54  ;;  %5545 = vperm.xlu0 %6759, %v10204_v22   ;;  %v15874_v1 = vld [vmem:[#allocation18_spill] sm:$0xff]  ;;  %v207_v54 = vld [vmem:[%s7632_s20 + $0x198] sm:$0xff] }
 0x1db   : > { %15872 = vst [vmem:[#allocation10_spill] sm:$0xff] %v10204_v22  ;;  %vm15873_vm9 = vcmp.ge.s32.totalorder %v7672_v53, 5  ;;  %v1816_v60 = vsel %vm1489_vm4, 102.0, %v1707_v63  ;;  %6992 = vpow2.f32 %v4987_v5  ;;  %v4476_v55 = vmul.f32 1.05, %v10204_v22  ;;  %v15876_v5 = vld [vmem:[#allocation45_spill] sm:$0xff] }
 0x1dc   : > { %v5964_v33 = vsel %vm15873_vm9, %v5855_v3, %v15868_v51  ;;  %v2034_v21 = vsel %vm1489_vm4, 74.0, %v1925_v9  ;;  %v320_v30 = vadd.s32 424, %v7619_v4  ;;  %v6546_v50 = vmul.f32 -1.442695, %v209_v7  ;;  %v15875_v3 = vld [vmem:[#allocation52_spill] sm:$0xff]  ;;  %vm15880_vm6 = vmmov %vm15873_vm9 }
 0x1dd   : > { %v6991_v41 = vpop.eup %6990  ;;  %v4696_v18 = vadd.f32 %v6652_v49, %v10109_v36  ;;  %v6651_v14 = vadd.f32 -0.025, %v4477_v35  ;;  %v5854_v26 = vmul.f32 %v5336_v40, %v15874_v1  ;;  %v6545_v56 = vmul.f32 -1.442695, %v208_v20 }
 0x1de   : > { %v5200_v44 = vmul.f32 %v6991_v41, %v2255_v42  ;;  %v430_v51 = vadd.s32 %v7625_v8, %v320_v30  ;;  %6994 = vpow2.f32 %v6546_v50  ;;  %v1394_v15 = vsub.f32 %v15876_v5, %v15875_v3  ;;  %v15878_v42 = vld [vmem:[#allocation16_spill] sm:$0xff] }
 0x1df   : > { %v2254_v63 = vsel %vm2247_vm10, %v1816_v60, %v2034_v21  ;;  %v319_v9 = vadd.s32 416, %v7619_v4  ;;  %6996 = vpow2.f32 %v6545_v56  ;;  %v318_v36 = vadd.s32 408, %v7619_v4 }
 0x1e0   : > { %v6650_v35 = vadd.f32 -0.025, %v4476_v55  ;;  %vm15877_vm11 = vcmp.lt.s32.totalorder %v7672_v53, 4  ;;  %v541_v7 = vcvt.s32.f32 %v430_v51  ;;  %v6544_v40 = vmul.f32 -1.442695, %v207_v54 }
 0x1e1   : > { %v6075_v49 = vsel %vm15877_vm11, %v5200_v44, %v5964_v33  ;;  %v6993_v20 = vpop.eup %6992  ;;  %v5963_v60 = vsel %vm15880_vm6, %v5854_v26, %v15874_v1  ;;  %v429_v21 = vadd.s32 %v7625_v8, %v319_v9  ;;  %v10237_v50 = vadd.s32 %v7625_v8, %v318_v36  ;;  %vm15882_vm13 = vmmov %vm15877_vm11  ;;  %v15883_v9 = vld [vmem:[#allocation22_spill] sm:$0xff] }
 0x1e2   : > { %v6184_v30 = vsel %vm15879_vm0, %v15878_v42, %v6075_v49  ;;  %vm15881_vm1 = vcmask 695296   ;;  %v5199_v55 = vmul.f32 %v6993_v20, %v2254_v63  ;;  %v10242_v44 = vmul.f32 %v7647_v32, %v541_v7 }
 0x1e3   : > { %6294 = vst.msk [vmem:[%s9279_s23 + $0x38] sm:$0xff] %vm15881_vm1, %v6184_v30  ;;  %6998 = vpow2.f32 %v6544_v40  ;;  %vm1612_vm5 = vcmp.lt.f32.partialorder %v1394_v15, 1.5  ;;  %v4695_v33 = vadd.f32 %v6651_v14, %v2187_v6  ;;  %v540_v41 = vcvt.s32.f32 %v429_v21  ;;  %vm15886_vm12 = vmmov %vm15881_vm1 }
 0x1e4   : > { %v539_v56 = vcvt.s32.f32 %v10237_v50  ;;  %vm1503_vm7 = vcmp.lt.f32.partialorder %v1394_v15, 0.5  ;;  %v6995_v1 = vpop.eup %6994  ;;  %v6074_v26 = vsel %vm15882_vm13, %v5199_v55, %v5963_v60  ;;  %v15244_v54 = vfloor.f32 %v10242_v44  ;;  %v7432_v50 = vld [vmem:[%s7632_s20 + $0xa0] sm:$0xff] }
 0x1e5   : > { %v1721_v51 = vsel %vm1612_vm5, 78.0, %v15732_v43  ;;  %v1939_v3 = vsel %vm1612_vm5, 115.0, %v15733_v10  ;;  %v6997_v5 = vpop.eup %6996  ;;  %v4694_v63 = vadd.f32 %v6650_v35, %v2186_v29  ;;  %v6183_v6 = vsel %vm15884_vm3, %v15883_v9, %v6074_v26 }
 0x1e6   : > { %v2737_v14 = vadd.f32 1.0, %v6995_v1  ;;  %v10254_v36 = vmul.f32 %v7647_v32, %v540_v41  ;;  %v10256_v49 = vmul.f32 16.0, %v4696_v18  ;;  %6293 = vst.msk [vmem:[%s9279_s23 + $0x30] sm:$0xff] %vm15886_vm12, %v6183_v6  ;;  %v875_v40 = vmul.f32 114.0, %v15244_v54 }
 0x1e7   : > { %v10262_v20 = vadd.f32 1.0, %v6997_v5  ;;  %v10265_v29 = vmul.f32 %v7647_v32, %v539_v56  ;;  %v10267_v35 = vmul.f32 16.0, %v4695_v33  ;;  %v1830_v42 = vsel %vm1503_vm7, 102.0, %v1721_v51 }
 0x1e8   : > { %15885 = vst [vmem:[#allocation47_spill] sm:$0xff] %v10256_v49  ;;  %7000 = vrcp.f32 %v2737_v14  ;;  %v2048_v30 = vsel %vm1503_vm7, 74.0, %v1939_v3  ;;  %v10271_v18 = vsub.f32 %v541_v7, %v875_v40  ;;  %v15243_v21 = vfloor.f32 %v10254_v36 }
 0x1e9   : > { %15887 = vst [vmem:[#allocation15_spill] sm:$0xff] %v10267_v35  ;;  %v6999_v60 = vpop.eup %6998  ;;  %7002 = vrcp.f32 %v10262_v20  ;;  %v4886_v55 = vsel %vm9206_vm14, %v7432_v50, 0.0  ;;  %v10278_v1 = vmul.f32 16.0, %v4694_v63  ;;  %v3597_v33 = vand.u32 2147483647, %v2737_v14 }
 0x1ea   : > { %15888 = vst [vmem:[#allocation11_spill] sm:$0xff] %v10271_v18  ;;  %v3599_v26 = vand.u32 2147483648, %v2737_v14  ;;  %v3582_v5 = vand.u32 2147483647, %v10262_v20  ;;  %v1100_v15 = vmul.f32 %v7680_v57, %v10271_v18  ;;  %v874_v7 = vmul.f32 114.0, %v15243_v21  ;;  %v5406_v21 = vpop.permute.xlu2 %5405  ;;  %v15899_v18 = vld [vmem:[#allocation17_spill] sm:$0xff] }
 0x1eb   : > { %15889 = vst [vmem:[#allocation12_spill] sm:$0xff] %v10278_v1  ;;  %v15245_v51 = vfloor.f32 %v10265_v29  ;;  %v10286_v3 = vadd.f32 1.0, %v6999_v60  ;;  %vm3593_vm15 = vweird.f32 %v2737_v14  ;;  %vm3578_vm4 = vweird.f32 %v10262_v20 }
 0x1ec   : > { %v2268_v63 = vsel %vm2247_vm10, %v1830_v42, %v2048_v30  ;;  %v5015_v9 = vmul.f32 1.442695, %v4886_v55  ;;  %v10291_v6 = vsub.f32 %v540_v41, %v874_v7  ;;  %v3584_v40 = vand.u32 2147483648, %v10262_v20 }
 0x1ed   : > { %v873_v50 = vmul.f32 114.0, %v15245_v51  ;;  %7004 = vrcp.f32 %v10286_v3  ;;  %v1209_v60 = vfloor.f32 %v1100_v15  ;;  %vm10297_vm8 = vcmp.eq.f32.partialorder %v3597_v33, 8.507059e+37 }
 0x1ee   : > { %15890 = vst [vmem:[#allocation18_spill] sm:$0xff] %v10291_v6  ;;  %v7001_v54 = vpop.eup %7000  ;;  %v3600_v35 = vor.u32 1.1754944e-38, %v3599_v26  ;;  %7006 = vpow2.f32 %v5015_v9  ;;  %vm10301_vm9 = vcmp.eq.f32.partialorder %v3582_v5, 8.507059e+37  ;;  %v3567_v55 = vand.u32 2147483647, %v10286_v3  ;;  %v15896_v26 = vld [vmem:[#allocation51_spill] sm:$0xff] }
 0x1ef   : > { %v7003_v42 = vpop.eup %7002  ;;  %v3589_v30 = vmul.f32 %v7001_v54, %v2737_v14  ;;  %v3569_v7 = vand.u32 2147483648, %v10286_v3  ;;  %v10309_v51 = vmul.f32 %v7680_v57, %v10291_v6  ;;  %v10312_v15 = vsub.f32 %v539_v56, %v873_v50  ;;  %v7434_v50 = vld [vmem:[%s7632_s20 + $0x48] sm:$0xff] }
 0x1f0   : > { %v3574_v33 = vmul.f32 %v7003_v42, %v10262_v20  ;;  %v5868_v9 = vmul.f32 %v5406_v21, %v15896_v26  ;;  %vm3594_vm11 = vweird.f32 %v7001_v54  ;;  %v3585_v5 = vor.u32 1.1754944e-38, %v3584_v40 }
 0x1f1   : > { %15895 = vst [vmem:[#allocation52_spill] sm:$0xff] %v10312_v15  ;;  %v3590_v22 = vsub.f32 1.0, %v3589_v30  ;;  %vm3563_vm0 = vweird.f32 %v10286_v3  ;;  %v10316_v17 = vmul.f32 3.0, %v1209_v60  ;;  %vm3579_vm6 = vweird.f32 %v7003_v42  ;;  %vm10329_vm5 = vmor %vm3593_vm15, %vm3594_vm11 }
 0x1f2   : > { %v3575_v59 = vsub.f32 1.0, %v3574_v33  ;;  %v1384_v49 = vsub.f32 %v15899_v18, %v15898_v2  ;;  %v15900_v47 = vfloor.f32 %v10242_v44  ;;  %vm10324_vm1 = vcmp.eq.f32.partialorder %v3567_v55, 8.507059e+37  ;;  %vm10341_vm13 = vmor %vm3578_vm4, %vm3579_vm6 }
 0x1f3   : > { %15897 = vst [vmem:[#allocation45_spill] sm:$0xff] %v10316_v17  ;;  %v7005_v6 = vpop.eup %7004  ;;  %v3591_v21 = vmul.f32 %v7001_v54, %v3590_v22  ;;  %v3570_v40 = vor.u32 1.1754944e-38, %v3569_v7  ;;  %v1208_v2 = vfloor.f32 %v10309_v51  ;;  %v1098_v44 = vmul.f32 %v7680_v57, %v10312_v15  ;;  %v7433_v7 = vld [vmem:[%s7632_s20 + $0x50] sm:$0xff]  ;;  %v15908_v15 = vld [vmem:[#allocation25_spill] sm:$0xff]  ;;  %v15909_v17 = vld [vmem:[#allocation19_spill] sm:$0xff] }
 0x1f4   : > { %v2191_v56 = vsel %vm2137_vm2, %v1209_v60, %v15900_v47  ;;  %v7007_v30 = vpop.eup %7006  ;;  %v3576_v18 = vmul.f32 %v7003_v42, %v3575_v59  ;;  %vm15905_vm7 = vcmp.ge.s32.totalorder %v7672_v53, 5  ;;  %v3559_v14 = vmul.f32 %v7005_v6, %v10286_v3 }
 0x1f5   : > { %v5977_v47 = vsel %vm15905_vm7, %v5868_v9, %v15896_v26  ;;  %v3592_v22 = vadd.f32 %v7001_v54, %v3591_v21  ;;  %v5213_v55 = vmul.f32 %v7007_v30, %v2268_v63  ;;  %v4876_v59 = vsel %vm9206_vm14, %v7433_v7, 0.0  ;;  %v5356_v63 = vpop.permute.xlu1 %5355  ;;  %v15912_v7 = vld [vmem:[#allocation58_spill] sm:$0xff] }
 0x1f6   : > { %v3577_v51 = vadd.f32 %v7003_v42, %v3576_v18  ;;  %vm3564_vm3 = vweird.f32 %v7005_v6  ;;  %vm1493_vm12 = vcmp.lt.f32.partialorder %v1384_v49, 0.5  ;;  %v1383_v26 = vsub.f32 %v15909_v17, %v15908_v15 }
 0x1f7   : > { %v3596_v20 = vsel %vm10329_vm5, %v7001_v54, %v3592_v22  ;;  %v3560_v9 = vsub.f32 1.0, %v3559_v14  ;;  %vm15910_vm15 = vcmp.lt.s32.totalorder %v7672_v53, 4  ;;  %vm1602_vm4 = vcmp.lt.f32.partialorder %v1384_v49, 1.5  ;;  %vm10379_vm6 = vmor %vm3563_vm0, %vm3564_vm3  ;;  %v15918_v22 = vld [vmem:[#allocation21_spill] sm:$0xff] }
 0x1f8   : > { %v6088_v21 = vsel %vm15910_vm15, %v5213_v55, %v5977_v47  ;;  %v10357_v30 = vsel %vm10297_vm8, %v3600_v35, %v3596_v20  ;;  %v3581_v18 = vsel %vm10341_vm13, %v7003_v42, %v3577_v51  ;;  %vm15913_vm11 = vcmp.lt.s32.totalorder %v7672_v53, 2  ;;  %vm15924_vm5 = vmmov %vm15905_vm7 }
 0x1f9   : > { %15911 = vst [vmem:[#allocation16_spill] sm:$0xff] %v10357_v30  ;;  %v6197_v17 = vsel %vm15913_vm11, %v15912_v7, %v6088_v21  ;;  %v1711_v54 = vsel %vm1602_vm4, 78.0, %v15732_v43  ;;  %v4481_v15 = vmul.f32 1.05, %v10357_v30  ;;  %5570 = vperm.xlu2 %6761, %v10357_v30   ;;  %v10370_v33 = vsel %vm10301_vm9, %v3585_v5, %v3581_v18  ;;  %vm15931_vm7 = vmmov %vm15913_vm11 }
 0x1fa   : > { %15914 = vst [vmem:[#allocation22_spill] sm:$0xff] %v10370_v33  ;;  %v1207_v35 = vfloor.f32 %v1098_v44  ;;  %v3561_v1 = vmul.f32 %v7005_v6, %v3560_v9  ;;  %vm15915_vm8 = vcmask 695296   ;;  %v4480_v42 = vmul.f32 1.05, %v10370_v33  ;;  %5565 = vperm.xlu1 %6760, %v10370_v33   ;;  %vm15936_vm11 = vmmov %vm15931_vm7 }
 0x1fb   : > { %6307 = vst.msk [vmem:[%s9279_s23 + $0xa0] sm:$0xff] %vm15915_vm8, %v6197_v17  ;;  %v1929_v41 = vsel %vm1602_vm4, 115.0, %v15733_v10  ;;  %v4995_v5 = vmul.f32 1.442695, %v4876_v59  ;;  %v5858_v44 = vmul.f32 %v5356_v63, %v15918_v22  ;;  %v6655_v60 = vadd.f32 -0.025, %v4481_v15  ;;  %vm15932_vm3 = vmmov %vm15915_vm8 }
 0x1fc   : > { %v10386_v14 = vmul.f32 3.0, %v1208_v2  ;;  %v3562_v55 = vadd.f32 %v7005_v6, %v3561_v1  ;;  %v1820_v51 = vsel %vm1493_vm12, 102.0, %v1711_v54  ;;  %v6654_v20 = vadd.f32 -0.025, %v4480_v42  ;;  %v212_v17 = vld [vmem:[%s7632_s20 + $0x1c0] sm:$0xff]  ;;  %v211_v54 = vld [vmem:[%s7632_s20 + $0x1b8] sm:$0xff]  ;;  %vm15938_vm8 = vmmov %vm15932_vm3 }
 0x1fd   : > { %v2038_v3 = vsel %vm1493_vm12, 74.0, %v1929_v41  ;;  %7008 = vpow2.f32 %v4995_v5  ;;  %vm1601_vm9 = vcmp.lt.f32.partialorder %v1383_v26, 1.5  ;;  %v15920_v9 = vfloor.f32 %v10254_v36  ;;  %v210_v41 = vld [vmem:[%s7632_s20 + $0x1b0] sm:$0xff]  ;;  %vm15933_vm12 = vmmov %vm15924_vm5 }
 0x1fe   : > { %15919 = vst [vmem:[#allocation51_spill] sm:$0xff] %v10386_v14  ;;  %v10394_v21 = vmul.f32 3.0, %v1207_v35  ;;  %v15922_v63 = vfloor.f32 %v10265_v29  ;;  %v3566_v7 = vsel %vm10379_vm6, %v7005_v6, %v3562_v55  ;;  %vm1492_vm0 = vcmp.lt.f32.partialorder %v1383_v26, 0.5 }
 0x1ff   : > { %v2190_v59 = vsel %vm2137_vm2, %v1208_v2, %v15920_v9  ;;  %v10404_v49 = vsel %vm10324_vm1, %v3570_v40, %v3566_v7  ;;  %v1710_v36 = vsel %vm1601_vm9, 78.0, %v15732_v43  ;;  %v1928_v2 = vsel %vm1601_vm9, 115.0, %v15733_v10  ;;  %vm15929_vm1 = vmmov %vm15910_vm15 }
 0x200   : > { %15921 = vst [vmem:[#allocation20_spill] sm:$0xff] %v10394_v21  ;;  %v2189_v18 = vsel %vm2137_vm2, %v1207_v35, %v15922_v63  ;;  %v4699_v15 = vadd.f32 %v6655_v60, %v2191_v56  ;;  %5560 = vperm.xlu0 %6759, %v10404_v49   ;;  %v2258_v29 = vsel %vm2247_vm10, %v1820_v51, %v2038_v3  ;;  %v4875_v40 = vsel %vm9206_vm14, %v7434_v50, 0.0  ;;  %v5351_v35 = vpop.permute.xlu0 %5350  ;;  %vm15934_vm4 = vmmov %vm15929_vm1 }
 0x201   : > { %15923 = vst [vmem:[#allocation17_spill] sm:$0xff] %v10404_v49  ;;  %v5967_v6 = vsel %vm15924_vm5, %v5858_v44, %v15918_v22  ;;  %v10419_v1 = vadd.f32 %v6654_v20, %v2190_v59  ;;  %v4479_v42 = vmul.f32 1.05, %v10404_v49  ;;  %v4993_v47 = vmul.f32 1.442695, %v4875_v40  ;;  %v15925_v44 = vld [vmem:[#allocation24_spill] sm:$0xff] }
 0x202   : > { %v323_v56 = vadd.s32 448, %v7619_v4  ;;  %v1819_v5 = vsel %vm1492_vm0, 102.0, %v1710_v36  ;;  %v2037_v60 = vsel %vm1492_vm0, 74.0, %v1928_v2  ;;  %v6549_v55 = vmul.f32 -1.442695, %v212_v17  ;;  %v15926_v20 = vld [vmem:[#allocation62_spill] sm:$0xff] }
 0x203   : > { %v6548_v51 = vmul.f32 -1.442695, %v211_v54  ;;  %v7009_v22 = vpop.eup %7008  ;;  %7010 = vpow2.f32 %v4993_v47  ;;  %v5857_v3 = vmul.f32 %v5351_v35, %v15925_v44  ;;  %v15927_v59 = vld [vmem:[#allocation57_spill] sm:$0xff]  ;;  %v322_v50 = vadd.s32 440, %v7619_v4  ;;  %v15930_v47 = vld [vmem:[#allocation26_spill] sm:$0xff] }
 0x204   : > { %v433_v9 = vadd.s32 %v7625_v8, %v323_v56  ;;  %v1397_v63 = vsub.f32 %v15927_v59, %v15926_v20  ;;  %v5203_v7 = vmul.f32 %v7009_v22, %v2258_v29  ;;  %7012 = vpow2.f32 %v6549_v55 }
 0x205   : > { %v6547_v40 = vmul.f32 -1.442695, %v210_v41  ;;  %v6653_v36 = vadd.f32 -0.025, %v4479_v42  ;;  %7014 = vpow2.f32 %v6548_v51  ;;  %v321_v2 = vadd.s32 432, %v7619_v4 }
 0x206   : > { %v544_v26 = vcvt.s32.f32 %v433_v9  ;;  %v10432_v17 = vmul.f32 16.0, %v4699_v15  ;;  %v6078_v54 = vsel %vm15929_vm1, %v5203_v7, %v5967_v6  ;;  %v2257_v35 = vsel %vm2247_vm10, %v1819_v5, %v2037_v60  ;;  %v7435_v5 = vld [vmem:[%s7632_s20 + $0xb8] sm:$0xff]  ;;  %vm15950_vm1 = vmmov %vm15933_vm12 }
 0x207   : > { %v432_v29 = vadd.s32 %v7625_v8, %v322_v50  ;;  %v6187_v56 = vsel %vm15931_vm7, %v15930_v47, %v6078_v54  ;;  %v10446_v41 = vadd.s32 %v7625_v8, %v321_v2  ;;  %vm1615_vm13 = vcmp.lt.f32.partialorder %v1397_v63, 1.5  ;;  %v15935_v47 = vld [vmem:[#allocation29_spill] sm:$0xff] }
 0x208   : > { %15928 = vst [vmem:[#allocation25_spill] sm:$0xff] %v10432_v17  ;;  %v10443_v42 = vmul.f32 %v7647_v32, %v544_v26  ;;  %v5966_v15 = vsel %vm15933_vm12, %v5857_v3, %v15925_v44  ;;  %7016 = vpow2.f32 %v6547_v40  ;;  %v4889_v60 = vsel %vm9206_vm14, %v7435_v5, 0.0 }
 0x209   : > { %6297 = vst.msk [vmem:[%s9279_s23 + $0x50] sm:$0xff] %vm15932_vm3, %v6187_v56  ;;  %v543_v6 = vcvt.s32.f32 %v432_v29  ;;  %v7011_v55 = vpop.eup %7010  ;;  %v4697_v51 = vadd.f32 %v6653_v36, %v2189_v18  ;;  %v542_v9 = vcvt.s32.f32 %v10446_v41  ;;  %vm1506_vm15 = vcmp.lt.f32.partialorder %v1397_v63, 0.5 }
 0x20a   : > { %v769_v22 = vfloor.f32 %v10443_v42  ;;  %v7013_v20 = vpop.eup %7012  ;;  %v5202_v59 = vmul.f32 %v7011_v55, %v2257_v35  ;;  %v1724_v44 = vsel %vm1615_vm13, 78.0, %v15732_v43  ;;  %v5021_v3 = vmul.f32 1.442695, %v4889_v60 }
 0x20b   : > { %v10459_v7 = vmul.f32 %v7647_v32, %v543_v6  ;;  %v7015_v50 = vpop.eup %7014  ;;  %v2740_v2 = vadd.f32 1.0, %v7013_v20  ;;  %v10464_v18 = vmul.f32 %v7647_v32, %v542_v9  ;;  %v1942_v36 = vsel %vm1615_vm13, 115.0, %v15733_v10  ;;  %v5421_v20 = vpop.permute.xlu2 %5420 }
 0x20c   : > { %v878_v40 = vmul.f32 114.0, %v769_v22  ;;  %v6077_v54 = vsel %vm15934_vm4, %v5202_v59, %v5966_v15  ;;  %v10471_v29 = vadd.f32 1.0, %v7015_v50  ;;  %7018 = vpow2.f32 %v5021_v3 }
 0x20d   : > { %v15257_v35 = vfloor.f32 %v10459_v7  ;;  %v6186_v56 = vsel %vm15936_vm11, %v15935_v47, %v6077_v54  ;;  %7020 = vrcp.f32 %v2740_v2  ;;  %v1833_v41 = vsel %vm1506_vm15, 102.0, %v1724_v44 }
 0x20e   : > { %v10476_v42 = vsub.f32 %v544_v26, %v878_v40  ;;  %v7017_v5 = vpop.eup %7016  ;;  %6296 = vst.msk [vmem:[%s9279_s23 + $0x48] sm:$0xff] %vm15938_vm8, %v6186_v56  ;;  %v3642_v60 = vand.u32 2147483647, %v2740_v2  ;;  %7022 = vrcp.f32 %v10471_v29  ;;  %v2051_v55 = vsel %vm1506_vm15, 74.0, %v1942_v36  ;;  %v15942_v56 = vld [vmem:[#allocation64_spill] sm:$0xff] }
 0x20f   : > { %v877_v15 = vmul.f32 114.0, %v15257_v35  ;;  %v3644_v26 = vand.u32 2147483648, %v2740_v2  ;;  %v3627_v3 = vand.u32 2147483647, %v10471_v29  ;;  %v3629_v44 = vand.u32 2147483648, %v10471_v29 }
 0x210   : > { %15937 = vst [vmem:[#allocation19_spill] sm:$0xff] %v10476_v42  ;;  %v1103_v59 = vmul.f32 %v7680_v57, %v10476_v42  ;;  %v10490_v50 = vmul.f32 16.0, %v10419_v1  ;;  %v10492_v40 = vmul.f32 16.0, %v4697_v51  ;;  %v15262_v47 = vfloor.f32 %v10464_v18 }
 0x211   : > { %v10494_v54 = vsub.f32 %v543_v6, %v877_v15  ;;  %vm3638_vm6 = vweird.f32 %v2740_v2  ;;  %v10497_v63 = vadd.f32 1.0, %v7017_v5  ;;  %v2271_v36 = vsel %vm2247_vm10, %v1833_v41, %v2051_v55 }
 0x212   : > { %15939 = vst [vmem:[#allocation58_spill] sm:$0xff] %v10490_v50  ;;  %v5871_v35 = vmul.f32 %v5421_v20, %v15942_v56  ;;  %v7019_v49 = vpop.eup %7018  ;;  %v1212_v33 = vfloor.f32 %v1103_v59  ;;  %vm10502_vm9 = vcmp.eq.f32.partialorder %v3642_v60, 8.507059e+37  ;;  %vm3623_vm0 = vweird.f32 %v10471_v29  ;;  %v15948_v59 = vld [vmem:[#allocation33_spill] sm:$0xff] }
 0x213   : > { %15940 = vst [vmem:[#allocation21_spill] sm:$0xff] %v10492_v40  ;;  %v876_v1 = vmul.f32 114.0, %v15262_v47  ;;  %v7021_v6 = vpop.eup %7020  ;;  %v3645_v51 = vor.u32 1.1754944e-38, %v3644_v26  ;;  %vm10509_vm5 = vcmp.eq.f32.partialorder %v3627_v3, 8.507059e+37  ;;  %v3630_v41 = vor.u32 1.1754944e-38, %v3629_v44  ;;  %v15949_v40 = vld [vmem:[#allocation27_spill] sm:$0xff] }
 0x214   : > { %15941 = vst [vmem:[#allocation24_spill] sm:$0xff] %v10494_v54  ;;  %7024 = vrcp.f32 %v10497_v63  ;;  %v7023_v15 = vpop.eup %7022  ;;  %v3634_v55 = vmul.f32 %v7021_v6, %v2740_v2  ;;  %v10516_v60 = vmul.f32 %v7680_v57, %v10494_v54  ;;  %v1387_v47 = vsub.f32 %v15949_v40, %v15948_v59  ;;  %v15968_v2 = vld [vmem:[#allocation28_spill] sm:$0xff] }
 0x215   : > { %v10518_v20 = vsub.f32 %v542_v9, %v876_v1  ;;  %v3619_v26 = vmul.f32 %v7023_v15, %v10471_v29  ;;  %v3612_v3 = vand.u32 2147483647, %v10497_v63  ;;  %v3614_v50 = vand.u32 2147483648, %v10497_v63 }
 0x216   : > { %v5980_v44 = vsel %vm15950_vm1, %v5871_v35, %v15942_v56  ;;  %v10528_v14 = vmul.f32 3.0, %v1212_v33  ;;  %v10532_v54 = vsel %vm2137_vm2, %v1212_v33, %v769_v22  ;;  %v3635_v9 = vsub.f32 1.0, %v3634_v55 }
 0x217   : > { %15947 = vst [vmem:[#allocation62_spill] sm:$0xff] %v10518_v20  ;;  %vm3639_vm7 = vweird.f32 %v7021_v6  ;;  %v3620_v1 = vsub.f32 1.0, %v3619_v26  ;;  %vm3624_vm13 = vweird.f32 %v7023_v15  ;;  %v1101_v40 = vmul.f32 %v7680_v57, %v10518_v20 }
 0x218   : > { %15951 = vst [vmem:[#allocation57_spill] sm:$0xff] %v10528_v14  ;;  %v5216_v59 = vmul.f32 %v7019_v49, %v2271_v36  ;;  %v3636_v42 = vmul.f32 %v7021_v6, %v3635_v9  ;;  %v1211_v17 = vfloor.f32 %v10516_v60  ;;  %vm3608_vm3 = vweird.f32 %v10497_v63  ;;  %vm10539_vm15 = vmor %vm3638_vm6, %vm3639_vm7 }
 0x219   : > { %vm1605_vm12 = vcmp.lt.f32.partialorder %v1387_v47, 1.5  ;;  %v3621_v33 = vmul.f32 %v7023_v15, %v3620_v1  ;;  %vm10543_vm4 = vcmp.eq.f32.partialorder %v3612_v3, 8.507059e+37  ;;  %v3615_v49 = vor.u32 1.1754944e-38, %v3614_v50  ;;  %vm10551_vm8 = vmor %vm3623_vm0, %vm3624_vm13  ;;  %v15959_v1 = vld [vmem:[#allocation70_spill] sm:$0xff] }
 0x21a   : > { %v7025_v35 = vpop.eup %7024  ;;  %vm15956_vm11 = vcmp.lt.s32.totalorder %v7672_v53, 4  ;;  %v3637_v55 = vadd.f32 %v7021_v6, %v3636_v42  ;;  %vm1496_vm6 = vcmp.lt.f32.partialorder %v1387_v47, 0.5  ;;  %v1714_v26 = vsel %vm1605_vm12, 78.0, %v15732_v43 }
 0x21b   : > { %v6091_v36 = vsel %vm15956_vm11, %v5216_v59, %v5980_v44  ;;  %v3604_v60 = vmul.f32 %v7025_v35, %v10497_v63  ;;  %v3622_v3 = vadd.f32 %v7023_v15, %v3621_v33  ;;  %v1210_v9 = vfloor.f32 %v1101_v40  ;;  %v7436_v59 = vld [vmem:[%s7632_s20 + $0x68] sm:$0xff]  ;;  %v5371_v33 = vpop.permute.xlu1 %5370 }
 0x21c   : > { %vm15960_vm1 = vcmp.lt.s32.totalorder %v7672_v53, 2  ;;  %v1932_v44 = vsel %vm1605_vm12, 115.0, %v15733_v10  ;;  %v3641_v29 = vsel %vm10539_vm15, %v7021_v6, %v3637_v55  ;;  %vm3609_vm0 = vweird.f32 %v7025_v35  ;;  %vm15978_vm12 = vmmov %vm15956_vm11 }
 0x21d   : > { %v6200_v50 = vsel %vm15960_vm1, %v15959_v1, %v6091_v36  ;;  %v3605_v42 = vsub.f32 1.0, %v3604_v60  ;;  %vm15961_vm7 = vcmask 695296   ;;  %v4879_v20 = vsel %vm9206_vm14, %v7436_v59, 0.0  ;;  %vm15980_vm15 = vmmov %vm15960_vm1 }
 0x21e   : > { %6310 = vst.msk [vmem:[%s9279_s23 + $0xb8] sm:$0xff] %vm15961_vm7, %v6200_v50  ;;  %v10570_v40 = vsel %vm10502_vm9, %v3645_v51, %v3641_v29  ;;  %v3626_v36 = vsel %vm10551_vm8, %v7023_v15, %v3622_v3  ;;  %v1823_v56 = vsel %vm1496_vm6, 102.0, %v1714_v26  ;;  %v5001_v6 = vmul.f32 1.442695, %v4879_v20  ;;  %vm10586_vm9 = vmor %vm3608_vm3, %vm3609_vm0  ;;  %v15966_v51 = vld [vmem:[#allocation32_spill] sm:$0xff]  ;;  %v15967_v20 = vld [vmem:[#allocation34_spill] sm:$0xff] }
 0x21f   : > { %15962 = vst [vmem:[#allocation26_spill] sm:$0xff] %v10570_v40  ;;  %v4484_v55 = vmul.f32 1.05, %v10570_v40  ;;  %5585 = vperm.xlu2 %6761, %v10570_v40   ;;  %v10579_v60 = vsel %vm10509_vm5, %v3630_v41, %v3626_v36  ;;  %v3606_v1 = vmul.f32 %v7025_v35, %v3605_v42  ;;  %v2041_v50 = vsel %vm1496_vm6, 74.0, %v1932_v44  ;;  %v7437_v41 = vld [vmem:[%s7632_s20 + $0x60] sm:$0xff]  ;;  %v5366_v36 = vpop.permute.xlu0 %5365  ;;  %vm15984_vm1 = vmmov %vm15978_vm12 }
 0x220   : > { %15963 = vst [vmem:[#allocation29_spill] sm:$0xff] %v10579_v60  ;;  %5580 = vperm.xlu1 %6760, %v10579_v60   ;;  %7026 = vpow2.f32 %v5001_v6  ;;  %v5861_v15 = vmul.f32 %v5371_v33, %v15966_v51  ;;  %v1386_v5 = vsub.f32 %v15968_v2, %v15967_v20  ;;  %v4878_v47 = vsel %vm9206_vm14, %v7437_v41, 0.0  ;;  %v215_v20 = vld [vmem:[%s7632_s20 + $0x1d8] sm:$0xff]  ;;  %v214_v41 = vld [vmem:[%s7632_s20 + $0x1d0] sm:$0xff]  ;;  %vm15987_vm0 = vmmov %vm15980_vm15 }
 0x221   : > { %v6658_v26 = vadd.f32 -0.025, %v4484_v55  ;;  %v4483_v3 = vmul.f32 1.05, %v10579_v60  ;;  %v3607_v44 = vadd.f32 %v7025_v35, %v3606_v1  ;;  %v4999_v63 = vmul.f32 1.442695, %v4878_v47 }
 0x222   : > { %v10597_v29 = vmul.f32 3.0, %v1211_v17  ;;  %v15970_v42 = vfloor.f32 %v10459_v7  ;;  %v10603_v33 = vmul.f32 3.0, %v1210_v9  ;;  %vm1604_vm5 = vcmp.lt.f32.partialorder %v1386_v5, 1.5  ;;  %v213_v47 = vld [vmem:[%s7632_s20 + $0x1c8] sm:$0xff] }
 0x223   : > { %v3611_v6 = vsel %vm10586_vm9, %v7025_v35, %v3607_v44  ;;  %vm1495_vm13 = vcmp.lt.f32.partialorder %v1386_v5, 0.5  ;;  %v1713_v55 = vsel %vm1604_vm5, 78.0, %v15732_v43  ;;  %v1931_v1 = vsel %vm1604_vm5, 115.0, %v15733_v10 }
 0x224   : > { %15969 = vst [vmem:[#allocation64_spill] sm:$0xff] %v10597_v29  ;;  %v2193_v59 = vsel %vm2137_vm2, %v1211_v17, %v15970_v42  ;;  %v15972_v2 = vfloor.f32 %v10464_v18  ;;  %v10618_v17 = vsel %vm10543_vm4, %v3615_v49, %v3611_v6  ;;  %v2261_v21 = vsel %vm2247_vm10, %v1823_v56, %v2041_v50  ;;  %vm15981_vm4 = vmmov %vm15961_vm7  ;;  %v15998_v29 = vld [vmem:[#allocation43_spill] sm:$0xff] }
 0x225   : > { %15971 = vst [vmem:[#allocation33_spill] sm:$0xff] %v10603_v33  ;;  %vm15974_vm3 = vcmp.ge.s32.totalorder %v7672_v53, 5  ;;  %v4702_v44 = vadd.f32 %v6658_v26, %v10532_v54  ;;  %v6657_v18 = vadd.f32 -0.025, %v4483_v3  ;;  %5575 = vperm.xlu0 %6759, %v10618_v17   ;;  %7028 = vpow2.f32 %v4999_v63  ;;  %v15976_v63 = vld [vmem:[#allocation75_spill] sm:$0xff]  ;;  %vm15988_vm7 = vmmov %vm15981_vm4 }
 0x226   : > { %v10614_v7 = vsel %vm2137_vm2, %v1210_v9, %v15972_v2  ;;  %15973 = vst [vmem:[#allocation27_spill] sm:$0xff] %v10618_v17  ;;  %v5970_v35 = vsel %vm15974_vm3, %v5861_v15, %v15966_v51  ;;  %v15975_v9 = vld [vmem:[#allocation36_spill] sm:$0xff]  ;;  %v7027_v22 = vpop.eup %7026  ;;  %v1822_v49 = vsel %vm1495_vm13, 102.0, %v1713_v55  ;;  %v2040_v6 = vsel %vm1495_vm13, 74.0, %v1931_v1  ;;  %vm15982_vm11 = vmmov %vm15974_vm3 }
 0x227   : > { %v5860_v42 = vmul.f32 %v5366_v36, %v15975_v9  ;;  %v326_v56 = vadd.s32 472, %v7619_v4  ;;  %v6552_v50 = vmul.f32 -1.442695, %v215_v20  ;;  %v4482_v51 = vmul.f32 1.05, %v10618_v17  ;;  %v15977_v36 = vld [vmem:[#allocation69_spill] sm:$0xff] }
 0x228   : > { %v5206_v15 = vmul.f32 %v7027_v22, %v2261_v21  ;;  %v6551_v2 = vmul.f32 -1.442695, %v214_v41  ;;  %v6550_v54 = vmul.f32 -1.442695, %v213_v47  ;;  %v325_v3 = vadd.s32 464, %v7619_v4  ;;  %v15979_v21 = vld [vmem:[#allocation39_spill] sm:$0xff] }
 0x229   : > { %v436_v26 = vadd.s32 %v7625_v8, %v326_v56  ;;  %7030 = vpow2.f32 %v6552_v50  ;;  %v1400_v33 = vsub.f32 %v15977_v36, %v15976_v63  ;;  %v2260_v55 = vsel %vm2247_vm10, %v1822_v49, %v2040_v6 }
 0x22a   : > { %v6081_v5 = vsel %vm15978_vm12, %v5206_v15, %v5970_v35  ;;  %7032 = vpow2.f32 %v6551_v2  ;;  %v324_v1 = vadd.s32 456, %v7619_v4  ;;  %v4701_v20 = vadd.f32 %v6657_v18, %v2193_v59 }
 0x22b   : > { %v6190_v41 = vsel %vm15980_vm15, %v15979_v21, %v6081_v5  ;;  %v547_v47 = vcvt.s32.f32 %v436_v26  ;;  %v435_v22 = vadd.s32 %v7625_v8, %v325_v3  ;;  %v7029_v56 = vpop.eup %7028  ;;  %v5969_v35 = vsel %vm15982_vm11, %v5860_v42, %v15975_v9  ;;  %v7438_v3 = vld [vmem:[%s7632_s20 + $0xd0] sm:$0xff]  ;;  %v15986_v5 = vld [vmem:[#allocation42_spill] sm:$0xff] }
 0x22c   : > { %6300 = vst.msk [vmem:[%s9279_s23 + $0x68] sm:$0xff] %vm15981_vm4, %v6190_v41  ;;  %v10653_v49 = vadd.s32 %v7625_v8, %v324_v1  ;;  %7034 = vpow2.f32 %v6550_v54  ;;  %vm1618_vm8 = vcmp.lt.f32.partialorder %v1400_v33, 1.5  ;;  %v10655_v59 = vmul.f32 16.0, %v4702_v44 }
 0x22d   : > { %v5205_v18 = vmul.f32 %v7029_v56, %v2260_v55  ;;  %v10658_v6 = vmul.f32 %v7647_v32, %v547_v47  ;;  %v546_v50 = vcvt.s32.f32 %v435_v22  ;;  %v6656_v15 = vadd.f32 -0.025, %v4482_v51 }
 0x22e   : > { %15983 = vst [vmem:[#allocation70_spill] sm:$0xff] %v10655_v59  ;;  %v545_v2 = vcvt.s32.f32 %v10653_v49  ;;  %vm1509_vm6 = vcmp.lt.f32.partialorder %v1400_v33, 0.5  ;;  %v1727_v9 = vsel %vm1618_vm8, 78.0, %v15732_v43  ;;  %v4892_v63 = vsel %vm9206_vm14, %v7438_v3, 0.0 }
 0x22f   : > { %v7031_v42 = vpop.eup %7030  ;;  %v6080_v54 = vsel %vm15984_vm1, %v5205_v18, %v5969_v35  ;;  %v15266_v44 = vfloor.f32 %v10658_v6  ;;  %v10667_v26 = vmul.f32 %v7647_v32, %v546_v50  ;;  %v10672_v36 = vmul.f32 16.0, %v4701_v20 }
 0x230   : > { %v7033_v51 = vpop.eup %7032  ;;  %v6189_v55 = vsel %vm15987_vm0, %v15986_v5, %v6080_v54  ;;  %v2743_v1 = vadd.f32 1.0, %v7031_v42  ;;  %v1945_v21 = vsel %vm1618_vm8, 115.0, %v15733_v10  ;;  %v10687_v20 = vmul.f32 %v7647_v32, %v545_v2 }
 0x231   : > { %15985 = vst [vmem:[#allocation32_spill] sm:$0xff] %v10672_v36  ;;  %v881_v41 = vmul.f32 114.0, %v15266_v44  ;;  %v15267_v22 = vfloor.f32 %v10667_v26  ;;  %v10684_v56 = vadd.f32 1.0, %v7033_v51  ;;  %v4700_v49 = vadd.f32 %v6656_v15, %v10614_v7 }
 0x232   : > { %6299 = vst.msk [vmem:[%s9279_s23 + $0x60] sm:$0xff] %vm15988_vm7, %v6189_v55  ;;  %v7035_v35 = vpop.eup %7034  ;;  %7036 = vrcp.f32 %v2743_v1  ;;  %v1836_v18 = vsel %vm1509_vm6, 102.0, %v1727_v9  ;;  %v5027_v42 = vmul.f32 1.442695, %v4892_v63  ;;  %v2054_v51 = vsel %vm1509_vm6, 74.0, %v1945_v21  ;;  %v5436_v63 = vpop.permute.xlu2 %5435 }
 0x233   : > { %v10691_v54 = vsub.f32 %v547_v47, %v881_v41  ;;  %v880_v3 = vmul.f32 114.0, %v15267_v22  ;;  %7038 = vrcp.f32 %v10684_v56  ;;  %v3687_v5 = vand.u32 2147483647, %v2743_v1 }
 0x234   : > { %v3689_v55 = vand.u32 2147483648, %v2743_v1  ;;  %v3672_v44 = vand.u32 2147483647, %v10684_v56  ;;  %v3674_v36 = vand.u32 2147483648, %v10684_v56  ;;  %v15271_v47 = vfloor.f32 %v10687_v20 }
 0x235   : > { %15989 = vst [vmem:[#allocation34_spill] sm:$0xff] %v10691_v54  ;;  %v1106_v7 = vmul.f32 %v7680_v57, %v10691_v54  ;;  %v10701_v15 = vsub.f32 %v546_v50, %v880_v3  ;;  %v10704_v9 = vadd.f32 1.0, %v7035_v35  ;;  %v10706_v41 = vmul.f32 16.0, %v4700_v49  ;;  %v15999_v54 = vld [vmem:[#allocation38_spill] sm:$0xff] }
 0x236   : > { %vm3683_vm9 = vweird.f32 %v2743_v1  ;;  %v2274_v33 = vsel %vm2247_vm10, %v1836_v18, %v2054_v51  ;;  %7040 = vpow2.f32 %v5027_v42  ;;  %vm3668_vm5 = vweird.f32 %v10684_v56 }
 0x237   : > { %15990 = vst [vmem:[#allocation28_spill] sm:$0xff] %v10701_v15  ;;  %v1105_v21 = vmul.f32 %v7680_v57, %v10701_v15  ;;  %v879_v50 = vmul.f32 114.0, %v15271_v47  ;;  %7042 = vrcp.f32 %v10704_v9  ;;  %v1215_v3 = vfloor.f32 %v1106_v7 }
 0x238   : > { %15991 = vst [vmem:[#allocation36_spill] sm:$0xff] %v10706_v41  ;;  %v7037_v35 = vpop.eup %7036  ;;  %vm10716_vm13 = vcmp.eq.f32.partialorder %v3687_v5, 8.507059e+37  ;;  %v3690_v22 = vor.u32 1.1754944e-38, %v3689_v55  ;;  %v15994_v41 = vld [vmem:[#allocation76_spill] sm:$0xff]  ;;  %vm10721_vm3 = vcmp.eq.f32.partialorder %v3672_v44, 8.507059e+37  ;;  %v3675_v17 = vor.u32 1.1754944e-38, %v3674_v36 }
 0x239   : > { %v5874_v18 = vmul.f32 %v5436_v63, %v15994_v41  ;;  %v7039_v42 = vpop.eup %7038  ;;  %v3679_v51 = vmul.f32 %v7037_v35, %v2743_v1  ;;  %vm3653_vm12 = vweird.f32 %v10704_v9  ;;  %v10727_v60 = vsub.f32 %v545_v2, %v879_v50 }
 0x23a   : > { %v3664_v47 = vmul.f32 %v7039_v42, %v10684_v56  ;;  %v3657_v5 = vand.u32 2147483647, %v10704_v9  ;;  %v3659_v7 = vand.u32 2147483648, %v10704_v9  ;;  %vm3684_vm15 = vweird.f32 %v7037_v35 }
 0x23b   : > { %15997 = vst [vmem:[#allocation75_spill] sm:$0xff] %v10727_v60  ;;  %v3680_v55 = vsub.f32 1.0, %v3679_v51  ;;  %v1214_v63 = vfloor.f32 %v1105_v21  ;;  %v1390_v44 = vsub.f32 %v15999_v54, %v15998_v29  ;;  %v10733_v40 = vmul.f32 3.0, %v1215_v3  ;;  %vm10747_vm8 = vmor %vm3683_vm9, %vm3684_vm15 }
 0x23c   : > { %v7041_v59 = vpop.eup %7040  ;;  %v3665_v36 = vsub.f32 1.0, %v3664_v47  ;;  %vm3669_vm4 = vweird.f32 %v7039_v42  ;;  %v5983_v2 = vsel %vm15982_vm11, %v5874_v18, %v15994_v41  ;;  %v16001_v14 = vfloor.f32 %v10658_v6 }
 0x23d   : > { %16000 = vst [vmem:[#allocation69_spill] sm:$0xff] %v10733_v40  ;;  %v7043_v50 = vpop.eup %7042  ;;  %v3681_v21 = vmul.f32 %v7037_v35, %v3680_v55  ;;  %v1104_v29 = vmul.f32 %v7680_v57, %v10727_v60  ;;  %v5219_v54 = vmul.f32 %v7041_v59, %v2274_v33  ;;  %vm10752_vm6 = vcmp.eq.f32.partialorder %v3657_v5, 8.507059e+37  ;;  %vm10760_vm1 = vmor %vm3668_vm5, %vm3669_vm4 }
 0x23e   : > { %v10742_v51 = vsel %vm2137_vm2, %v1215_v3, %v16001_v14  ;;  %v3666_v40 = vmul.f32 %v7039_v42, %v3665_v36  ;;  %v3649_v41 = vmul.f32 %v7043_v50, %v10704_v9  ;;  %v3660_v6 = vor.u32 1.1754944e-38, %v3659_v7 }
 0x23f   : > { %v3682_v14 = vadd.f32 %v7037_v35, %v3681_v21  ;;  %v10756_v3 = vmul.f32 3.0, %v1214_v63  ;;  %vm16009_vm0 = vcmp.lt.s32.totalorder %v7672_v53, 4  ;;  %vm1608_vm7 = vcmp.lt.f32.partialorder %v1390_v44, 1.5  ;;  %v16011_v21 = vld [vmem:[#allocation82_spill] sm:$0xff] }
 0x240   : > { %v6094_v1 = vsel %vm16009_vm0, %v5219_v54, %v5983_v2  ;;  %v16010_v33 = vfloor.f32 %v10667_v26  ;;  %v3667_v7 = vadd.f32 %v7039_v42, %v3666_v40  ;;  %v3650_v55 = vsub.f32 1.0, %v3649_v41  ;;  %v16018_v41 = vld [vmem:[#allocation46_spill] sm:$0xff] }
 0x241   : > { %16006 = vst [vmem:[#allocation39_spill] sm:$0xff] %v10756_v3  ;;  %vm3654_vm9 = vweird.f32 %v7043_v50  ;;  %v3686_v56 = vsel %vm10747_vm8, %v7037_v35, %v3682_v14  ;;  %v1213_v36 = vfloor.f32 %v1104_v29  ;;  %vm16012_vm5 = vcmp.lt.s32.totalorder %v7672_v53, 2  ;;  %v5386_v35 = vpop.permute.xlu1 %5385  ;;  %v16019_v14 = vld [vmem:[#allocation40_spill] sm:$0xff]  ;;  %vm16027_vm8 = vmmov %vm15982_vm11 }
 0x242   : > { %v2196_v5 = vsel %vm2137_vm2, %v1214_v63, %v16010_v33  ;;  %v6203_v60 = vsel %vm16012_vm5, %v16011_v21, %v6094_v1  ;;  %vm1499_vm15 = vcmp.lt.f32.partialorder %v1390_v44, 0.5  ;;  %v10777_v2 = vsel %vm10716_vm13, %v3690_v22, %v3686_v56  ;;  %vm10793_vm13 = vmor %vm3653_vm12, %vm3654_vm9  ;;  %v16021_v33 = vld [vmem:[#allocation44_spill] sm:$0xff] }
 0x243   : > { %16013 = vst [vmem:[#allocation42_spill] sm:$0xff] %v10777_v2  ;;  %v3671_v26 = vsel %vm10760_vm1, %v7039_v42, %v3667_v7  ;;  %v3651_v40 = vmul.f32 %v7043_v50, %v3650_v55  ;;  %vm16014_vm4 = vcmask 695296   ;;  %v1717_v63 = vsel %vm1608_vm7, 78.0, %v15732_v43  ;;  %5600 = vperm.xlu2 %6761, %v10777_v2   ;;  %v7439_v42 = vld [vmem:[%s7632_s20 + $0x80] sm:$0xff]  ;;  %v7440_v55 = vld [vmem:[%s7632_s20 + $0x78] sm:$0xff]  ;;  %vm16028_vm1 = vmmov %vm16009_vm0 }
 0x244   : > { %6313 = vst.msk [vmem:[%s9279_s23 + $0xd0] sm:$0xff] %vm16014_vm4, %v6203_v60  ;;  %v4487_v29 = vmul.f32 1.05, %v10777_v2  ;;  %v10789_v49 = vsel %vm10721_vm3, %v3675_v17, %v3671_v26  ;;  %v1935_v60 = vsel %vm1608_vm7, 115.0, %v15733_v10  ;;  %v4882_v54 = vsel %vm9206_vm14, %v7439_v42, 0.0  ;;  %vm16030_vm0 = vmmov %vm16012_vm5 }
 0x245   : > { %16015 = vst [vmem:[#allocation76_spill] sm:$0xff] %v10789_v49  ;;  %v4486_v47 = vmul.f32 1.05, %v10789_v49  ;;  %5595 = vperm.xlu1 %6760, %v10789_v49   ;;  %v3652_v15 = vadd.f32 %v7043_v50, %v3651_v40  ;;  %v5007_v17 = vmul.f32 1.442695, %v4882_v54  ;;  %v1389_v9 = vsub.f32 %v16019_v14, %v16018_v41  ;;  %v218_v54 = vld [vmem:[%s7632_s20 + $0x1f0] sm:$0xff]  ;;  %vm16031_vm9 = vmmov %vm16014_vm4 }
 0x246   : > { %v10806_v59 = vmul.f32 3.0, %v1213_v36  ;;  %v1826_v1 = vsel %vm1499_vm15, 102.0, %v1717_v63  ;;  %v5864_v7 = vmul.f32 %v5386_v35, %v16021_v33  ;;  %v4881_v56 = vsel %vm9206_vm14, %v7440_v55, 0.0  ;;  %v5381_v35 = vpop.permute.xlu0 %5380  ;;  %v217_v41 = vld [vmem:[%s7632_s20 + $0x1e8] sm:$0xff]  ;;  %v16024_v55 = vld [vmem:[#allocation48_spill] sm:$0xff]  ;;  %vm16033_vm5 = vmmov %vm16028_vm1 }
 0x247   : > { %v6661_v21 = vadd.f32 -0.025, %v4487_v29  ;;  %v3656_v26 = vsel %vm10793_vm13, %v7043_v50, %v3652_v15  ;;  %7044 = vpow2.f32 %v5007_v17  ;;  %vm1498_vm3 = vcmp.lt.f32.partialorder %v1389_v9, 0.5  ;;  %v216_v15 = vld [vmem:[%s7632_s20 + $0x1e0] sm:$0xff] }
 0x248   : > { %16020 = vst [vmem:[#allocation43_spill] sm:$0xff] %v10806_v59  ;;  %v10817_v40 = vsel %vm10752_vm6, %v3660_v6, %v3656_v26  ;;  %v2044_v42 = vsel %vm1499_vm15, 74.0, %v1935_v60  ;;  %vm1607_vm12 = vcmp.lt.f32.partialorder %v1389_v9, 1.5  ;;  %v5005_v63 = vmul.f32 1.442695, %v4881_v56  ;;  %vm16035_vm15 = vmmov %vm16030_vm0 }
 0x249   : > { %16022 = vst [vmem:[#allocation38_spill] sm:$0xff] %v10817_v40  ;;  %v6660_v14 = vadd.f32 -0.025, %v4486_v47  ;;  %v4485_v29 = vmul.f32 1.05, %v10817_v40  ;;  %5590 = vperm.xlu0 %6759, %v10817_v40   ;;  %v1716_v50 = vsel %vm1607_vm12, 78.0, %v15732_v43  ;;  %v16023_v18 = vfloor.f32 %v10687_v20  ;;  %v5401_v34 = vpop.permute.xlu1 %5400 }
 0x24a   : > { %v1934_v22 = vsel %vm1607_vm12, 115.0, %v15733_v10  ;;  %v1825_v6 = vsel %vm1498_vm3, 102.0, %v1716_v50  ;;  %7046 = vpow2.f32 %v5005_v63  ;;  %v4705_v17 = vadd.f32 %v6661_v21, %v10742_v51  ;;  %v16026_v50 = vld [vmem:[#allocation81_spill] sm:$0xff] }
 0x24b   : > { %v2195_v44 = vsel %vm2137_vm2, %v1213_v36, %v16023_v18  ;;  %v2043_v60 = vsel %vm1498_vm3, 74.0, %v1934_v22  ;;  %v2264_v47 = vsel %vm2247_vm10, %v1826_v1, %v2044_v42  ;;  %v5973_v9 = vsel %vm15982_vm11, %v5864_v7, %v16021_v33  ;;  %v16025_v36 = vld [vmem:[#allocation88_spill] sm:$0xff] }
 0x24c   : > { %v5863_v56 = vmul.f32 %v5381_v35, %v16024_v55  ;;  %v329_v20 = vadd.s32 496, %v7619_v4  ;;  %v6555_v26 = vmul.f32 -1.442695, %v218_v54  ;;  %v6554_v40 = vmul.f32 -1.442695, %v217_v41 }
 0x24d   : > { %v1403_v22 = vsub.f32 %v16026_v50, %v16025_v36  ;;  %v7045_v63 = vpop.eup %7044  ;;  %v4704_v18 = vadd.f32 %v6660_v14, %v2196_v5  ;;  %v6659_v49 = vadd.f32 -0.025, %v4485_v29  ;;  %v2263_v51 = vsel %vm2247_vm10, %v1825_v6, %v2043_v60  ;;  %v16029_v29 = vld [vmem:[#allocation49_spill] sm:$0xff] }
 0x24e   : > { %v6553_v1 = vmul.f32 -1.442695, %v216_v15  ;;  %v5209_v21 = vmul.f32 %v7045_v63, %v2264_v47  ;;  %v439_v42 = vadd.s32 %v7625_v8, %v329_v20  ;;  %7048 = vpow2.f32 %v6555_v26  ;;  %v16034_v63 = vld [vmem:[#allocation54_spill] sm:$0xff] }
 0x24f   : > { %v328_v33 = vadd.s32 488, %v7619_v4  ;;  %v5972_v7 = vsel %vm16027_vm8, %v5863_v56, %v16024_v55  ;;  %7050 = vpow2.f32 %v6554_v40  ;;  %v327_v35 = vadd.s32 480, %v7619_v4 }
 0x250   : > { %vm1512_vm6 = vcmp.lt.f32.partialorder %v1403_v22, 0.5  ;;  %v7047_v5 = vpop.eup %7046  ;;  %v6084_v54 = vsel %vm16028_vm1, %v5209_v21, %v5973_v9  ;;  %v550_v41 = vcvt.s32.f32 %v439_v42  ;;  %7052 = vpow2.f32 %v6553_v1  ;;  %v7441_v42 = vld [vmem:[%s7632_s20 + $0xe8] sm:$0xff] }
 0x251   : > { %v438_v14 = vadd.s32 %v7625_v8, %v328_v33  ;;  %v6193_v6 = vsel %vm16030_vm0, %v16029_v29, %v6084_v54  ;;  %v5208_v60 = vmul.f32 %v7047_v5, %v2263_v51  ;;  %v10856_v15 = vadd.s32 %v7625_v8, %v327_v35 }
 0x252   : > { %vm1621_vm7 = vcmp.lt.f32.partialorder %v1403_v22, 1.5  ;;  %6303 = vst.msk [vmem:[%s9279_s23 + $0x80] sm:$0xff] %vm16031_vm9, %v6193_v6  ;;  %v10861_v40 = vmul.f32 %v7647_v32, %v550_v41  ;;  %v10865_v56 = vmul.f32 16.0, %v4705_v17  ;;  %v4703_v20 = vadd.f32 %v6659_v49, %v2195_v44 }
 0x253   : > { %v549_v47 = vcvt.s32.f32 %v438_v14  ;;  %v1730_v9 = vsel %vm1621_vm7, 78.0, %v15732_v43  ;;  %v1948_v55 = vsel %vm1621_vm7, 115.0, %v15733_v10  ;;  %v6083_v26 = vsel %vm16033_vm5, %v5208_v60, %v5972_v7 }
 0x254   : > { %16032 = vst [vmem:[#allocation82_spill] sm:$0xff] %v10865_v56  ;;  %v15282_v36 = vcvt.s32.f32 %v10856_v15  ;;  %v7049_v50 = vpop.eup %7048  ;;  %v6192_v51 = vsel %vm16035_vm15, %v16034_v63, %v6083_v26  ;;  %v775_v1 = vfloor.f32 %v10861_v40  ;;  %v4895_v17 = vsel %vm9206_vm14, %v7441_v42, 0.0  ;;  %v16038_v40 = vld [vmem:[#allocation56_spill] sm:$0xff]  ;;  %v16039_v26 = vld [vmem:[#allocation50_spill] sm:$0xff]  ;;  %v5451_v63 = vpop.permute.xlu2 %5450 }
 0x255   : > { %v10875_v21 = vmul.f32 %v7647_v32, %v549_v47  ;;  %v7051_v49 = vpop.eup %7050  ;;  %v10880_v44 = vmul.f32 16.0, %v4704_v18  ;;  %6302 = vst.msk [vmem:[%s9279_s23 + $0x78] sm:$0xff] %vm16014_vm4, %v6192_v51  ;;  %v2746_v33 = vadd.f32 1.0, %v7049_v50  ;;  %v1839_v7 = vsel %vm1512_vm6, 102.0, %v1730_v9 }
 0x256   : > { %v2057_v35 = vsel %vm1512_vm6, 74.0, %v1948_v55  ;;  %v7053_v5 = vpop.eup %7052  ;;  %v884_v54 = vmul.f32 114.0, %v775_v1  ;;  %v2745_v29 = vadd.f32 1.0, %v7051_v49  ;;  %v10890_v6 = vmul.f32 %v7647_v32, %v15282_v36 }
 0x257   : > { %16036 = vst [vmem:[#allocation46_spill] sm:$0xff] %v10880_v44  ;;  %v15283_v14 = vfloor.f32 %v10875_v21  ;;  %v10892_v60 = vmul.f32 16.0, %v4703_v20  ;;  %7054 = vrcp.f32 %v2746_v33  ;;  %v5033_v18 = vmul.f32 1.442695, %v4895_v17 }
 0x258   : > { %v10896_v50 = vsub.f32 %v16039_v26, %v16038_v40  ;;  %v10898_v22 = vsub.f32 %v550_v41, %v884_v54  ;;  %7056 = vrcp.f32 %v2745_v29  ;;  %v2277_v55 = vsel %vm2247_vm10, %v1839_v7, %v2057_v35  ;;  %v16042_v40 = vld [vmem:[#allocation87_spill] sm:$0xff] }
 0x259   : > { %16037 = vst [vmem:[#allocation40_spill] sm:$0xff] %v10892_v60  ;;  %v883_v9 = vmul.f32 114.0, %v15283_v14  ;;  %v3732_v51 = vand.u32 2147483647, %v2746_v33  ;;  %v3734_v42 = vand.u32 2147483648, %v2746_v33  ;;  %v3719_v49 = vand.u32 2147483648, %v2745_v29 }
 0x25a   : > { %16040 = vst [vmem:[#allocation44_spill] sm:$0xff] %v10898_v22  ;;  %v3717_v20 = vand.u32 2147483647, %v2745_v29  ;;  %v1109_v17 = vmul.f32 %v7680_v57, %v10898_v22  ;;  %v15285_v41 = vfloor.f32 %v10890_v6  ;;  %v10909_v54 = vadd.f32 1.0, %v7053_v5 }
 0x25b   : > { %v10906_v36 = vsub.f32 %v549_v47, %v883_v9  ;;  %vm3728_vm13 = vweird.f32 %v2746_v33  ;;  %7058 = vpow2.f32 %v5033_v18  ;;  %v5877_v26 = vmul.f32 %v5451_v63, %v16042_v40  ;;  %v220_v9 = vld [vmem:[%s7632_s20 + $0x200] sm:$0xff] }
 0x25c   : > { %vm1502_vm3 = vcmp.lt.f32.partialorder %v10896_v50, 0.5  ;;  %v1218_v7 = vfloor.f32 %v1109_v17  ;;  %vm3713_vm12 = vweird.f32 %v2745_v29  ;;  %7060 = vrcp.f32 %v10909_v54 }
 0x25d   : > { %16041 = vst [vmem:[#allocation48_spill] sm:$0xff] %v10906_v36  ;;  %v10915_v35 = vmul.f32 %v7680_v57, %v10906_v36  ;;  %v7055_v47 = vpop.eup %7054  ;;  %vm10918_vm11 = vcmp.eq.f32.partialorder %v3732_v51, 8.507059e+37  ;;  %v3735_v5 = vor.u32 1.1754944e-38, %v3734_v42  ;;  %vm10922_vm8 = vcmp.eq.f32.partialorder %v3717_v20, 8.507059e+37 }
 0x25e   : > { %v882_v63 = vmul.f32 114.0, %v15285_v41  ;;  %v7057_v17 = vpop.eup %7056  ;;  %v3724_v14 = vmul.f32 %v7055_v47, %v2746_v33  ;;  %v3720_v36 = vor.u32 1.1754944e-38, %v3719_v49  ;;  %v3702_v60 = vand.u32 2147483647, %v10909_v54 }
 0x25f   : > { %v3704_v44 = vand.u32 2147483648, %v10909_v54  ;;  %v3709_v59 = vmul.f32 %v7057_v17, %v2745_v29  ;;  %vm3698_vm6 = vweird.f32 %v10909_v54  ;;  %vm16047_vm1 = vcmp.ge.s32.totalorder %v7672_v53, 5 }
 0x260   : > { %v5986_v42 = vsel %vm16047_vm1, %v5877_v26, %v16042_v40  ;;  %v10935_v20 = vmul.f32 3.0, %v1218_v7  ;;  %v3725_v3 = vsub.f32 1.0, %v3724_v14  ;;  %vm3729_vm0 = vweird.f32 %v7055_v47 }
 0x261   : > { %vm1611_vm7 = vcmp.lt.f32.partialorder %v10896_v50, 1.5  ;;  %v7059_v49 = vpop.eup %7058  ;;  %v2200_v41 = vsel %vm2137_vm2, %v1218_v7, %v775_v1  ;;  %v3710_v22 = vsub.f32 1.0, %v3709_v59  ;;  %vm3714_vm9 = vweird.f32 %v7057_v17  ;;  %vm10949_vm15 = vmor %vm3728_vm13, %vm3729_vm0 }
 0x262   : > { %16048 = vst [vmem:[#allocation88_spill] sm:$0xff] %v10935_v20  ;;  %v16049_v51 = vcvt.s32.f32 %v10856_v15  ;;  %v7061_v2 = vpop.eup %7060  ;;  %v3726_v30 = vmul.f32 %v7055_v47, %v3725_v3  ;;  %vm10944_vm5 = vcmp.eq.f32.partialorder %v3702_v60, 8.507059e+37  ;;  %v3705_v14 = vor.u32 1.1754944e-38, %v3704_v44  ;;  %vm10962_vm4 = vmor %vm3713_vm12, %vm3714_vm9 }
 0x263   : > { %v5222_v26 = vmul.f32 %v7059_v49, %v2277_v55  ;;  %v16055_v59 = vfloor.f32 %v10915_v35  ;;  %v3711_v15 = vmul.f32 %v7057_v17, %v3710_v22  ;;  %v3694_v7 = vmul.f32 %v7061_v2, %v10909_v54  ;;  %v7442_v55 = vld [vmem:[%s7632_s20 + $0x98] sm:$0xff] }
 0x264   : > { %v10942_v56 = vsub.f32 %v16049_v51, %v882_v63  ;;  %v1720_v3 = vsel %vm1611_vm7, 78.0, %v15732_v43  ;;  %v3727_v60 = vadd.f32 %v7055_v47, %v3726_v30  ;;  %vm16059_vm13 = vcmp.lt.s32.totalorder %v7672_v53, 4 }
 0x265   : > { %v10955_v1 = vmul.f32 3.0, %v16055_v59  ;;  %v6097_v33 = vsel %vm16059_vm13, %v5222_v26, %v5986_v42  ;;  %v1938_v22 = vsel %vm1611_vm7, 115.0, %v15733_v10  ;;  %v4885_v63 = vsel %vm9206_vm14, %v7442_v55, 0.0  ;;  %v16060_v42 = vld [vmem:[#allocation94_spill] sm:$0xff]  ;;  %vm16076_vm7 = vmmov %vm16059_vm13 }
 0x266   : > { %16050 = vst [vmem:[#allocation81_spill] sm:$0xff] %v10942_v56  ;;  %v3712_v51 = vadd.f32 %v7057_v17, %v3711_v15  ;;  %v10976_v30 = vmul.f32 %v7680_v57, %v10942_v56  ;;  %v3695_v29 = vsub.f32 1.0, %v3694_v7  ;;  %vm3699_vm12 = vweird.f32 %v7061_v2 }
 0x267   : > { %16056 = vst [vmem:[#allocation49_spill] sm:$0xff] %v10955_v1  ;;  %v3731_v49 = vsel %vm10949_vm15, %v7055_v47, %v3727_v60  ;;  %vm16061_vm1 = vcmp.lt.s32.totalorder %v7672_v53, 2  ;;  %v1829_v59 = vsel %vm1502_vm3, 102.0, %v1720_v3  ;;  %v5013_v1 = vmul.f32 1.442695, %v4885_v63 }
 0x268   : > { %v6206_v26 = vsel %vm16061_vm1, %v16060_v42, %v6097_v33  ;;  %v10987_v15 = vsel %vm10918_vm11, %v3735_v5, %v3731_v49  ;;  %v3716_v7 = vsel %vm10962_vm4, %v7057_v17, %v3712_v51  ;;  %v3696_v55 = vmul.f32 %v7061_v2, %v3695_v29  ;;  %vm11003_vm11 = vmor %vm3698_vm6, %vm3699_vm12  ;;  %v16067_v5 = vld [vmem:[#allocation59_spill] sm:$0xff]  ;;  %v16068_v17 = vld [vmem:[#allocation53_spill] sm:$0xff] }
 0x269   : > { %16062 = vst [vmem:[#allocation54_spill] sm:$0xff] %v10987_v15  ;;  %vm16063_vm0 = vcmask 695296   ;;  %v2047_v47 = vsel %vm1502_vm3, 74.0, %v1938_v22  ;;  %v4490_v20 = vmul.f32 1.05, %v10987_v15  ;;  %5615 = vperm.xlu2 %6761, %v10987_v15   ;;  %v10999_v3 = vsel %vm10922_vm8, %v3720_v36, %v3716_v7  ;;  %v16069_v33 = vld [vmem:[#allocation55_spill] sm:$0xff]  ;;  %vm16078_vm9 = vmmov %vm16061_vm1 }
 0x26a   : > { %6316 = vst.msk [vmem:[%s9279_s23 + $0xe8] sm:$0xff] %vm16063_vm0, %v6206_v26  ;;  %7062 = vpow2.f32 %v5013_v1  ;;  %v1392_v50 = vsub.f32 %v16068_v17, %v16067_v5  ;;  %v4489_v60 = vmul.f32 1.05, %v10999_v3  ;;  %5610 = vperm.xlu1 %6760, %v10999_v3   ;;  %v3697_v44 = vadd.f32 %v7061_v2, %v3696_v55  ;;  %v7443_v36 = vld [vmem:[%s7632_s20 + $0x90] sm:$0xff]  ;;  %v221_v42 = vld [vmem:[%s7632_s20 + $0x208] sm:$0xff]  ;;  %vm16085_vm4 = vmmov %vm16076_vm7 }
 0x26b   : > { %16064 = vst [vmem:[#allocation56_spill] sm:$0xff] %v10999_v3  ;;  %v5867_v18 = vmul.f32 %v5401_v34, %v16069_v33  ;;  %v4884_v54 = vsel %vm9206_vm14, %v7443_v36, 0.0  ;;  %v6664_v22 = vadd.f32 -0.025, %v4490_v20  ;;  %v1216_v63 = vfloor.f32 %v10976_v30  ;;  %v5396_v20 = vpop.permute.xlu0 %5395  ;;  %vm16088_vm12 = vmmov %vm16061_vm1 }
 0x26c   : > { %vm1610_vm3 = vcmp.lt.f32.partialorder %v1392_v50, 1.5  ;;  %v5011_v1 = vmul.f32 1.442695, %v4884_v54  ;;  %v3701_v51 = vsel %vm11003_vm11, %v7061_v2, %v3697_v44  ;;  %vm1501_vm8 = vcmp.lt.f32.partialorder %v1392_v50, 0.5  ;;  %v16075_v44 = vld [vmem:[#allocation63_spill] sm:$0xff]  ;;  %vm16089_vm1 = vmmov %vm16063_vm0 }
 0x26d   : > { %v1719_v29 = vsel %vm1610_vm3, 78.0, %v15732_v43  ;;  %v1937_v49 = vsel %vm1610_vm3, 115.0, %v15733_v10  ;;  %v16070_v34 = vfloor.f32 %v10875_v21  ;;  %v16071_v26 = vfloor.f32 %v10915_v35 }
 0x26e   : > { %v6663_v55 = vadd.f32 -0.025, %v4489_v60  ;;  %v11029_v30 = vsel %vm10944_vm5, %v3705_v14, %v3701_v51  ;;  %v2267_v2 = vsel %vm2247_vm10, %v1829_v59, %v2047_v47  ;;  %v4708_v5 = vadd.f32 %v6664_v22, %v2200_v41  ;;  %v219_v22 = vld [vmem:[%s7632_s20 + $0x1f8] sm:$0xff]  ;;  %vm16079_vm5 = vmmov %vm16063_vm0 }
 0x26f   : > { %v2199_v7 = vsel %vm2137_vm2, %v16071_v26, %v16070_v34  ;;  %16072 = vst [vmem:[#allocation50_spill] sm:$0xff] %v11029_v30  ;;  %v16073_v17 = vfloor.f32 %v10890_v6  ;;  %5605 = vperm.xlu0 %6759, %v11029_v30   ;;  %vm16074_vm6 = vcmp.ge.s32.totalorder %v7672_v53, 5  ;;  %7064 = vpow2.f32 %v5011_v1 }
 0x270   : > { %v5976_v35 = vsel %vm16074_vm6, %v5867_v18, %v16069_v33  ;;  %v7063_v40 = vpop.eup %7062  ;;  %v1828_v14 = vsel %vm1501_vm8, 102.0, %v1719_v29  ;;  %v2046_v59 = vsel %vm1501_vm8, 74.0, %v1937_v49  ;;  %v332_v47 = vadd.s32 520, %v7619_v4  ;;  %v16077_v49 = vld [vmem:[#allocation60_spill] sm:$0xff]  ;;  %vm16080_vm15 = vmmov %vm16074_vm6 }
 0x271   : > { %v2198_v21 = vsel %vm2137_vm2, %v1216_v63, %v16073_v17  ;;  %v6558_v41 = vmul.f32 -1.442695, %v221_v42  ;;  %v4488_v6 = vmul.f32 1.05, %v11029_v30  ;;  %v5212_v60 = vmul.f32 %v7063_v40, %v2267_v2  ;;  %v16081_v17 = vld [vmem:[#allocation101_spill] sm:$0xff]  ;;  %v16098_v30 = vld [vmem:[#allocation99_spill] sm:$0xff] }
 0x272   : > { %v5866_v36 = vmul.f32 %v5396_v20, %v16075_v44  ;;  %v6557_v54 = vmul.f32 -1.442695, %v220_v9  ;;  %v4707_v51 = vadd.f32 %v6663_v55, %v2199_v7  ;;  %v442_v33 = vadd.s32 %v7625_v8, %v332_v47 }
 0x273   : > { %7066 = vpow2.f32 %v6558_v41  ;;  %v331_v18 = vadd.s32 512, %v7619_v4  ;;  %v6087_v50 = vsel %vm16076_vm7, %v5212_v60, %v5976_v35  ;;  %v2266_v1 = vsel %vm2247_vm10, %v1828_v14, %v2046_v59  ;;  %v16082_v35 = vld [vmem:[#allocation93_spill] sm:$0xff] }
 0x274   : > { %7068 = vpow2.f32 %v6557_v54  ;;  %v330_v29 = vadd.s32 504, %v7619_v4  ;;  %v6196_v42 = vsel %vm16078_vm9, %v16077_v49, %v6087_v50  ;;  %v553_v34 = vcvt.s32.f32 %v442_v33 }
 0x275   : > { %v441_v26 = vadd.s32 %v7625_v8, %v331_v18  ;;  %v6556_v7 = vmul.f32 -1.442695, %v219_v22  ;;  %v7065_v55 = vpop.eup %7064  ;;  %v6662_v2 = vadd.f32 -0.025, %v4488_v6  ;;  %6306 = vst.msk [vmem:[%s9279_s23 + $0x98] sm:$0xff] %vm16079_vm5, %v6196_v42  ;;  %v5975_v20 = vsel %vm16080_vm15, %v5866_v36, %v16075_v44  ;;  %v7444_v44 = vld [vmem:[%s7632_s20 + $0x100] sm:$0xff] }
 0x276   : > { %v11065_v9 = vadd.s32 %v7625_v8, %v330_v29  ;;  %v1406_v40 = vsub.f32 %v16082_v35, %v16081_v17  ;;  %v5211_v14 = vmul.f32 %v7065_v55, %v2266_v1  ;;  %v11070_v59 = vmul.f32 %v7647_v32, %v553_v34  ;;  %v16087_v1 = vld [vmem:[#allocation68_spill] sm:$0xff] }
 0x277   : > { %v552_v47 = vcvt.s32.f32 %v441_v26  ;;  %7070 = vpow2.f32 %v6556_v7  ;;  %v11072_v41 = vmul.f32 16.0, %v4708_v5  ;;  %v11074_v6 = vmul.f32 3.0, %v1216_v63 }
 0x278   : > { %v15293_v60 = vcvt.s32.f32 %v11065_v9  ;;  %v4898_v36 = vsel %vm9206_vm14, %v7444_v44, 0.0  ;;  %v6086_v22 = vsel %vm16085_vm4, %v5211_v14, %v5975_v20  ;;  %v15292_v33 = vfloor.f32 %v11070_v59 }
 0x279   : > { %16083 = vst [vmem:[#allocation87_spill] sm:$0xff] %v11072_v41  ;;  %v7067_v54 = vpop.eup %7066  ;;  %v11084_v18 = vmul.f32 %v7647_v32, %v552_v47  ;;  %vm1624_vm13 = vcmp.lt.f32.partialorder %v1406_v40, 1.5  ;;  %v11086_v50 = vmul.f32 16.0, %v4707_v51  ;;  %v4706_v63 = vadd.f32 %v6662_v2, %v2198_v21 }
 0x27a   : > { %16084 = vst [vmem:[#allocation94_spill] sm:$0xff] %v11074_v6  ;;  %v7069_v5 = vpop.eup %7068  ;;  %v6195_v29 = vsel %vm16088_vm12, %v16087_v1, %v6086_v22  ;;  %v2749_v49 = vadd.f32 1.0, %v7067_v54  ;;  %v887_v42 = vmul.f32 114.0, %v15292_v33  ;;  %v11099_v55 = vmul.f32 %v7647_v32, %v15293_v60 }
 0x27b   : > { %16086 = vst [vmem:[#allocation59_spill] sm:$0xff] %v11086_v50  ;;  %v15291_v26 = vfloor.f32 %v11084_v18  ;;  %v2748_v7 = vadd.f32 1.0, %v7069_v5  ;;  %vm1515_vm0 = vcmp.lt.f32.partialorder %v1406_v40, 0.5  ;;  %v1733_v21 = vsel %vm1624_vm13, 78.0, %v15732_v43 }
 0x27c   : > { %6305 = vst.msk [vmem:[%s9279_s23 + $0x90] sm:$0xff] %vm16089_vm1, %v6195_v29  ;;  %7072 = vrcp.f32 %v2749_v49  ;;  %v5039_v51 = vmul.f32 1.442695, %v4898_v36  ;;  %v11103_v20 = vsub.f32 %v553_v34, %v887_v42  ;;  %v1951_v35 = vsel %vm1624_vm13, 115.0, %v15733_v10 }
 0x27d   : > { %v7071_v2 = vpop.eup %7070  ;;  %v886_v17 = vmul.f32 114.0, %v15291_v26  ;;  %7074 = vrcp.f32 %v2748_v7  ;;  %v3777_v14 = vand.u32 2147483647, %v2749_v49  ;;  %v3779_v44 = vand.u32 2147483648, %v2749_v49 }
 0x27e   : > { %16090 = vst [vmem:[#allocation53_spill] sm:$0xff] %v11103_v20  ;;  %v3762_v54 = vand.u32 2147483647, %v2748_v7  ;;  %v3764_v22 = vand.u32 2147483648, %v2748_v7  ;;  %v1112_v5 = vmul.f32 %v7680_v57, %v11103_v20  ;;  %v15295_v36 = vfloor.f32 %v11099_v55 }
 0x27f   : > { %v11111_v1 = vsub.f32 %v552_v47, %v886_v17  ;;  %v11114_v34 = vadd.f32 1.0, %v7071_v2  ;;  %v11116_v29 = vmul.f32 16.0, %v4706_v63  ;;  %vm3773_vm11 = vweird.f32 %v2749_v49  ;;  %v224_v47 = vld [vmem:[%s7632_s20 + $0x220] sm:$0xff] }
 0x280   : > { %v1842_v42 = vsel %vm1515_vm0, 102.0, %v1733_v21  ;;  %7076 = vpow2.f32 %v5039_v51  ;;  %v1221_v26 = vfloor.f32 %v1112_v5  ;;  %vm3758_vm3 = vweird.f32 %v2748_v7  ;;  %v5466_v51 = vpop.permute.xlu2 %5465 }
 0x281   : > { %16091 = vst [vmem:[#allocation55_spill] sm:$0xff] %v11111_v1  ;;  %7078 = vrcp.f32 %v11114_v34  ;;  %v2060_v33 = vsel %vm1515_vm0, 74.0, %v1951_v35  ;;  %vm11121_vm8 = vcmp.eq.f32.partialorder %v3777_v14, 8.507059e+37  ;;  %v3780_v17 = vor.u32 1.1754944e-38, %v3779_v44 }
 0x282   : > { %16092 = vst [vmem:[#allocation63_spill] sm:$0xff] %v11116_v29  ;;  %v7073_v60 = vpop.eup %7072  ;;  %v11127_v63 = vmul.f32 %v7680_v57, %v11111_v1  ;;  %v885_v21 = vmul.f32 114.0, %v15295_v36  ;;  %vm11131_vm6 = vcmp.eq.f32.partialorder %v3762_v54, 8.507059e+37  ;;  %v3765_v40 = vor.u32 1.1754944e-38, %v3764_v22 }
 0x283   : > { %v7075_v2 = vpop.eup %7074  ;;  %v3769_v5 = vmul.f32 %v7073_v60, %v2749_v49  ;;  %vm3743_vm7 = vweird.f32 %v11114_v34  ;;  %v3747_v14 = vand.u32 2147483647, %v11114_v34  ;;  %v3749_v44 = vand.u32 2147483648, %v11114_v34 }
 0x284   : > { %v3754_v35 = vmul.f32 %v7075_v2, %v2748_v7  ;;  %v2280_v1 = vsel %vm2247_vm10, %v1842_v42, %v2060_v33  ;;  %v11140_v50 = vmul.f32 3.0, %v1221_v26  ;;  %vm3774_vm9 = vweird.f32 %v7073_v60  ;;  %v16101_v42 = vld [vmem:[#allocation67_spill] sm:$0xff] }
 0x285   : > { %v3770_v36 = vsub.f32 1.0, %v3769_v5  ;;  %v5880_v54 = vmul.f32 %v5466_v51, %v16098_v30  ;;  %v1220_v6 = vfloor.f32 %v11127_v63  ;;  %vm3759_vm5 = vweird.f32 %v7075_v2  ;;  %v16102_v5 = vld [vmem:[#allocation61_spill] sm:$0xff]  ;;  %vm11158_vm4 = vmor %vm3773_vm11, %vm3774_vm9 }
 0x286   : > { %16097 = vst [vmem:[#allocation60_spill] sm:$0xff] %v11140_v50  ;;  %v7077_v56 = vpop.eup %7076  ;;  %v3755_v22 = vsub.f32 1.0, %v3754_v35  ;;  %v16099_v3 = vcvt.s32.f32 %v11065_v9  ;;  %v1396_v50 = vsub.f32 %v16102_v5, %v16101_v42  ;;  %v16103_v51 = vfloor.f32 %v11070_v59  ;;  %vm11168_vm12 = vmor %vm3758_vm3, %vm3759_vm5  ;;  %v16119_v59 = vld [vmem:[#allocation66_spill] sm:$0xff] }
 0x287   : > { %v7079_v41 = vpop.eup %7078  ;;  %v3771_v15 = vmul.f32 %v7073_v60, %v3770_v36  ;;  %v5225_v31 = vmul.f32 %v7077_v56, %v2280_v1  ;;  %v5989_v33 = vsel %vm16080_vm15, %v5880_v54, %v16098_v30  ;;  %vm11163_vm13 = vcmp.eq.f32.partialorder %v3747_v14, 8.507059e+37  ;;  %v16112_v14 = vld [vmem:[#allocation105_spill] sm:$0xff] }
 0x288   : > { %v11146_v20 = vsub.f32 %v16099_v3, %v885_v21  ;;  %v2203_v63 = vsel %vm2137_vm2, %v1221_v26, %v16103_v51  ;;  %v3756_v3 = vmul.f32 %v7075_v2, %v3755_v22  ;;  %v3739_v56 = vmul.f32 %v7079_v41, %v11114_v34  ;;  %v5416_v34 = vpop.permute.xlu1 %5415 }
 0x289   : > { %v3772_v30 = vadd.f32 %v7073_v60, %v3771_v15  ;;  %v3750_v26 = vor.u32 1.1754944e-38, %v3749_v44  ;;  %vm16110_vm1 = vcmp.lt.s32.totalorder %v7672_v53, 4  ;;  %vm1614_vm0 = vcmp.lt.f32.partialorder %v1396_v50, 1.5 }
 0x28a   : > { %16100 = vst [vmem:[#allocation101_spill] sm:$0xff] %v11146_v20  ;;  %v6100_v49 = vsel %vm16110_vm1, %v5225_v31, %v5989_v33  ;;  %v3757_v36 = vadd.f32 %v7075_v2, %v3756_v3  ;;  %v11176_v21 = vmul.f32 %v7680_v57, %v11146_v20  ;;  %v3740_v35 = vsub.f32 1.0, %v3739_v56 }
 0x28b   : > { %vm3744_vm11 = vweird.f32 %v7079_v41  ;;  %v3776_v15 = vsel %vm11158_vm4, %v7073_v60, %v3772_v30  ;;  %v11180_v7 = vmul.f32 3.0, %v1220_v6  ;;  %vm16113_vm3 = vcmp.lt.s32.totalorder %v7672_v53, 2  ;;  %v16118_v30 = vld [vmem:[#allocation71_spill] sm:$0xff]  ;;  %vm16127_vm4 = vmmov %vm16080_vm15 }
 0x28c   : > { %v6209_v44 = vsel %vm16113_vm3, %v16112_v14, %v6100_v49  ;;  %vm1505_vm9 = vcmp.lt.f32.partialorder %v1396_v50, 0.5  ;;  %v11187_v31 = vsel %vm11121_vm8, %v3780_v17, %v3776_v15  ;;  %v3761_v54 = vsel %vm11168_vm12, %v7075_v2, %v3757_v36  ;;  %vm11203_vm8 = vmor %vm3743_vm7, %vm3744_vm11  ;;  %v7445_v2 = vld [vmem:[%s7632_s20 + $0xb0] sm:$0xff]  ;;  %v7446_v36 = vld [vmem:[%s7632_s20 + $0xa8] sm:$0xff] }
 0x28d   : > { %16111 = vst [vmem:[#allocation93_spill] sm:$0xff] %v11180_v7  ;;  %v3741_v22 = vmul.f32 %v7079_v41, %v3740_v35  ;;  %vm16114_vm5 = vcmask 695296   ;;  %v1723_v60 = vsel %vm1614_vm0, 78.0, %v15732_v43  ;;  %v4493_v33 = vmul.f32 1.05, %v11187_v31  ;;  %5630 = vperm.xlu2 %6761, %v11187_v31   ;;  %vm16130_vm12 = vmmov %vm16113_vm3 }
 0x28e   : > { %6319 = vst.msk [vmem:[%s9279_s23 + $0x100] sm:$0xff] %vm16114_vm5, %v6209_v44  ;;  %v11199_v42 = vsel %vm11131_vm6, %v3765_v40, %v3761_v54  ;;  %v1941_v17 = vsel %vm1614_vm0, 115.0, %v15733_v10  ;;  %v4888_v5 = vsel %vm9206_vm14, %v7445_v2, 0.0  ;;  %v1219_v29 = vfloor.f32 %v11176_v21  ;;  %vm16132_vm0 = vmmov %vm16114_vm5 }
 0x28f   : > { %16115 = vst [vmem:[#allocation68_spill] sm:$0xff] %v11199_v42  ;;  %v4492_v51 = vmul.f32 1.05, %v11199_v42  ;;  %5625 = vperm.xlu1 %6760, %v11199_v42   ;;  %v3742_v40 = vadd.f32 %v7079_v41, %v3741_v22  ;;  %v5019_v9 = vmul.f32 1.442695, %v4888_v5  ;;  %v1832_v56 = vsel %vm1505_vm9, 102.0, %v1723_v60  ;;  %vm16135_vm5 = vmmov %vm16132_vm0 }
 0x290   : > { %v6667_v3 = vadd.f32 -0.025, %v4493_v33  ;;  %v1395_v49 = vsub.f32 %v16119_v59, %v16118_v30  ;;  %v4887_v35 = vsel %vm9206_vm14, %v7446_v36, 0.0  ;;  %v2050_v14 = vsel %vm1505_vm9, 74.0, %v1941_v17  ;;  %v16121_v22 = vld [vmem:[#allocation65_spill] sm:$0xff]  ;;  %v5411_v33 = vpop.permute.xlu0 %5410 }
 0x291   : > { %v3746_v15 = vsel %vm11203_vm8, %v7079_v41, %v3742_v40  ;;  %7080 = vpow2.f32 %v5019_v9  ;;  %v5017_v21 = vmul.f32 1.442695, %v4887_v35  ;;  %v6666_v44 = vadd.f32 -0.025, %v4492_v51  ;;  %v223_v51 = vld [vmem:[%s7632_s20 + $0x218] sm:$0xff] }
 0x292   : > { %v11226_v54 = vsel %vm11163_vm13, %v3750_v26, %v3746_v15  ;;  %v5870_v60 = vmul.f32 %v5416_v34, %v16121_v22  ;;  %vm1504_vm6 = vcmp.lt.f32.partialorder %v1395_v49, 0.5  ;;  %v16122_v2 = vfloor.f32 %v11084_v18  ;;  %v222_v18 = vld [vmem:[%s7632_s20 + $0x210] sm:$0xff]  ;;  %v16124_v34 = vld [vmem:[#allocation74_spill] sm:$0xff]  ;;  %vm16128_vm13 = vmmov %vm16110_vm1 }
 0x293   : > { %16120 = vst [vmem:[#allocation99_spill] sm:$0xff] %v11226_v54  ;;  %v11233_v50 = vmul.f32 3.0, %v1219_v29  ;;  %5620 = vperm.xlu0 %6759, %v11226_v54   ;;  %vm1613_vm7 = vcmp.lt.f32.partialorder %v1395_v49, 1.5  ;;  %7082 = vpow2.f32 %v5017_v21  ;;  %v4711_v1 = vadd.f32 %v6667_v3, %v2203_v63  ;;  %v16125_v21 = vld [vmem:[#allocation110_spill] sm:$0xff]  ;;  %vm16133_vm11 = vmmov %vm16128_vm13 }
 0x294   : > { %v2202_v41 = vsel %vm2137_vm2, %v1220_v6, %v16122_v2  ;;  %v2270_v26 = vsel %vm2247_vm10, %v1832_v56, %v2050_v14  ;;  %v1722_v17 = vsel %vm1613_vm7, 78.0, %v15732_v43  ;;  %v1940_v5 = vsel %vm1613_vm7, 115.0, %v15733_v10  ;;  %v16126_v2 = vld [vmem:[#allocation106_spill] sm:$0xff] }
 0x295   : > { %16123 = vst [vmem:[#allocation67_spill] sm:$0xff] %v11233_v50  ;;  %v4491_v40 = vmul.f32 1.05, %v11226_v54  ;;  %v1831_v6 = vsel %vm1504_vm6, 102.0, %v1722_v17  ;;  %v2049_v9 = vsel %vm1504_vm6, 74.0, %v1940_v5  ;;  %v5869_v30 = vmul.f32 %v5411_v33, %v16124_v34 }
 0x296   : > { %v4710_v59 = vadd.f32 %v6666_v44, %v2202_v41  ;;  %v5979_v63 = vsel %vm16080_vm15, %v5870_v60, %v16121_v22  ;;  %v335_v3 = vadd.s32 544, %v7619_v4  ;;  %v6561_v56 = vmul.f32 -1.442695, %v224_v47 }
 0x297   : > { %v7081_v36 = vpop.eup %7080  ;;  %v2269_v35 = vsel %vm2247_vm10, %v1831_v6, %v2049_v9  ;;  %v6560_v15 = vmul.f32 -1.442695, %v223_v51  ;;  %v6559_v14 = vmul.f32 -1.442695, %v222_v18  ;;  %v1409_v49 = vsub.f32 %v16126_v2, %v16125_v21  ;;  %v16129_v6 = vld [vmem:[#allocation72_spill] sm:$0xff] }
 0x298   : > { %v5215_v17 = vmul.f32 %v7081_v36, %v2270_v26  ;;  %v445_v33 = vadd.s32 %v7625_v8, %v335_v3  ;;  %7084 = vpow2.f32 %v6561_v56  ;;  %v334_v44 = vadd.s32 536, %v7619_v4  ;;  %v16134_v36 = vld [vmem:[#allocation79_spill] sm:$0xff] }
 0x299   : > { %v7083_v22 = vpop.eup %7082  ;;  %v6665_v60 = vadd.f32 -0.025, %v4491_v40  ;;  %v5978_v41 = vsel %vm16127_vm4, %v5869_v30, %v16124_v34  ;;  %7086 = vpow2.f32 %v6560_v15  ;;  %v333_v47 = vadd.s32 528, %v7619_v4 }
 0x29a   : > { %v6090_v5 = vsel %vm16128_vm13, %v5215_v17, %v5979_v63  ;;  %v5214_v51 = vmul.f32 %v7083_v22, %v2269_v35  ;;  %v556_v26 = vcvt.s32.f32 %v445_v33  ;;  %v444_v18 = vadd.s32 %v7625_v8, %v334_v44  ;;  %v7447_v17 = vld [vmem:[%s7632_s20 + $0x118] sm:$0xff] }
 0x29b   : > { %v6199_v9 = vsel %vm16130_vm12, %v16129_v6, %v6090_v5  ;;  %v11268_v40 = vadd.s32 %v7625_v8, %v333_v47  ;;  %7088 = vpow2.f32 %v6559_v14  ;;  %vm1627_vm1 = vcmp.lt.f32.partialorder %v1409_v49, 1.5 }
 0x29c   : > { %v16131_v34 = vfloor.f32 %v11099_v55  ;;  %6309 = vst.msk [vmem:[%s9279_s23 + $0xb0] sm:$0xff] %vm16132_vm0, %v6199_v9  ;;  %v6089_v63 = vsel %vm16133_vm11, %v5214_v51, %v5978_v41  ;;  %v11279_v3 = vmul.f32 %v7647_v32, %v556_v26  ;;  %v555_v56 = vcvt.s32.f32 %v444_v18  ;;  %v5481_v51 = vpop.permute.xlu2 %5480 }
 0x29d   : > { %v6198_v35 = vsel %vm16113_vm3, %v16134_v36, %v6089_v63  ;;  %v554_v15 = vcvt.s32.f32 %v11268_v40  ;;  %vm1518_vm9 = vcmp.lt.f32.partialorder %v1409_v49, 0.5  ;;  %v1736_v55 = vsel %vm1627_vm1, 78.0, %v15732_v43 }
 0x29e   : > { %v2201_v30 = vsel %vm2137_vm2, %v1219_v29, %v16131_v34  ;;  %v7085_v14 = vpop.eup %7084  ;;  %6308 = vst.msk [vmem:[%s9279_s23 + $0xa8] sm:$0xff] %vm16135_vm5, %v6198_v35  ;;  %v781_v29 = vfloor.f32 %v11279_v3  ;;  %v11290_v21 = vmul.f32 %v7647_v32, %v555_v56  ;;  %v1954_v2 = vsel %vm1627_vm1, 115.0, %v15733_v10 }
 0x29f   : > { %v4901_v33 = vsel %vm9206_vm14, %v7447_v17, 0.0  ;;  %v7087_v44 = vpop.eup %7086  ;;  %v11296_v22 = vmul.f32 16.0, %v4711_v1  ;;  %v11298_v41 = vmul.f32 16.0, %v4710_v59  ;;  %v4709_v47 = vadd.f32 %v6665_v60, %v2201_v30  ;;  %v16138_v60 = vld [vmem:[#allocation112_spill] sm:$0xff] }
 0x2a0   : > { %v2752_v5 = vadd.f32 1.0, %v7085_v14  ;;  %v890_v18 = vmul.f32 114.0, %v781_v29  ;;  %v15308_v6 = vfloor.f32 %v11290_v21  ;;  %v2751_v9 = vadd.f32 1.0, %v7087_v44 }
 0x2a1   : > { %16136 = vst [vmem:[#allocation61_spill] sm:$0xff] %v11298_v41  ;;  %v11302_v40 = vmul.f32 %v7647_v32, %v554_v15  ;;  %v7089_v34 = vpop.eup %7088  ;;  %v1845_v63 = vsel %vm1518_vm9, 102.0, %v1736_v55  ;;  %v2063_v3 = vsel %vm1518_vm9, 74.0, %v1954_v2  ;;  %v5045_v1 = vmul.f32 1.442695, %v4901_v33 }
 0x2a2   : > { %7090 = vrcp.f32 %v2752_v5  ;;  %v11306_v36 = vsub.f32 %v556_v26, %v890_v18  ;;  %v889_v59 = vmul.f32 114.0, %v15308_v6  ;;  %v5883_v30 = vmul.f32 %v5481_v51, %v16138_v60 }
 0x2a3   : > { %7092 = vrcp.f32 %v2751_v9  ;;  %v3822_v35 = vand.u32 2147483647, %v2752_v5  ;;  %v3824_v14 = vand.u32 2147483648, %v2752_v5  ;;  %v3807_v17 = vand.u32 2147483647, %v2751_v9 }
 0x2a4   : > { %16137 = vst [vmem:[#allocation105_spill] sm:$0xff] %v11306_v36  ;;  %v3809_v44 = vand.u32 2147483648, %v2751_v9  ;;  %v1115_v41 = vmul.f32 %v7680_v57, %v11306_v36  ;;  %v11313_v54 = vsub.f32 %v555_v56, %v889_v59  ;;  %v15307_v49 = vfloor.f32 %v11302_v40 }
 0x2a5   : > { %v11316_v55 = vadd.f32 1.0, %v7089_v34  ;;  %v11318_v26 = vmul.f32 16.0, %v4709_v47  ;;  %vm3818_vm8 = vweird.f32 %v2752_v5  ;;  %v2283_v2 = vsel %vm2247_vm10, %v1845_v63, %v2063_v3 }
 0x2a6   : > { %16139 = vst [vmem:[#allocation71_spill] sm:$0xff] %v11313_v54  ;;  %7094 = vpow2.f32 %v5045_v1  ;;  %v1224_v33 = vfloor.f32 %v1115_v41  ;;  %vm3803_vm6 = vweird.f32 %v2751_v9  ;;  %v888_v51 = vmul.f32 114.0, %v15307_v49  ;;  %v16146_v49 = vld [vmem:[#allocation73_spill] sm:$0xff] }
 0x2a7   : > { %16140 = vst [vmem:[#allocation66_spill] sm:$0xff] %v11318_v26  ;;  %7096 = vrcp.f32 %v11316_v55  ;;  %vm11325_vm7 = vcmp.eq.f32.partialorder %v3822_v35, 8.507059e+37  ;;  %v3825_v34 = vor.u32 1.1754944e-38, %v3824_v14  ;;  %v11331_v47 = vmul.f32 %v7680_v57, %v11313_v54  ;;  %v16145_v35 = vld [vmem:[#allocation78_spill] sm:$0xff] }
 0x2a8   : > { %v7091_v56 = vpop.eup %7090  ;;  %vm11333_vm15 = vcmp.eq.f32.partialorder %v3807_v17, 8.507059e+37  ;;  %v3810_v1 = vor.u32 1.1754944e-38, %v3809_v44  ;;  %v5992_v59 = vsel %vm16127_vm4, %v5883_v30, %v16138_v60  ;;  %v1399_v6 = vsub.f32 %v16146_v49, %v16145_v35 }
 0x2a9   : > { %v7093_v41 = vpop.eup %7092  ;;  %v3814_v3 = vmul.f32 %v7091_v56, %v2752_v5  ;;  %v11342_v14 = vsub.f32 %v554_v15, %v888_v51  ;;  %vm3788_vm13 = vweird.f32 %v11316_v55  ;;  %v3792_v17 = vand.u32 2147483647, %v11316_v55 }
 0x2aa   : > { %v3799_v26 = vmul.f32 %v7093_v41, %v2751_v9  ;;  %v11346_v54 = vmul.f32 3.0, %v1224_v33  ;;  %vm3819_vm12 = vweird.f32 %v7091_v56  ;;  %v3794_v44 = vand.u32 2147483648, %v11316_v55 }
 0x2ab   : > { %16147 = vst [vmem:[#allocation65_spill] sm:$0xff] %v11342_v14  ;;  %v3815_v42 = vsub.f32 1.0, %v3814_v3  ;;  %v11351_v60 = vsel %vm2137_vm2, %v1224_v33, %v781_v29  ;;  %v1223_v30 = vfloor.f32 %v11331_v47  ;;  %vm3804_vm1 = vweird.f32 %v7093_v41  ;;  %vm11357_vm11 = vmor %vm3818_vm8, %vm3819_vm12 }
 0x2ac   : > { %16148 = vst [vmem:[#allocation74_spill] sm:$0xff] %v11346_v54  ;;  %v7095_v20 = vpop.eup %7094  ;;  %v3800_v49 = vsub.f32 1.0, %v3799_v26  ;;  %v1113_v35 = vmul.f32 %v7680_v57, %v11342_v14  ;;  %vm1617_vm0 = vcmp.lt.f32.partialorder %v1399_v6, 1.5  ;;  %vm11362_vm3 = vcmp.eq.f32.partialorder %v3792_v17, 8.507059e+37  ;;  %vm11367_vm5 = vmor %vm3803_vm6, %vm3804_vm1  ;;  %v16156_v54 = vld [vmem:[#allocation118_spill] sm:$0xff] }
 0x2ad   : > { %v7097_v15 = vpop.eup %7096  ;;  %v3816_v51 = vmul.f32 %v7091_v56, %v3815_v42  ;;  %v5228_v50 = vmul.f32 %v7095_v20, %v2283_v2  ;;  %vm1508_vm9 = vcmp.lt.f32.partialorder %v1399_v6, 0.5  ;;  %vm16155_vm4 = vcmp.lt.s32.totalorder %v7672_v53, 4  ;;  %v7448_v2 = vld [vmem:[%s7632_s20 + $0xc8] sm:$0xff] }
 0x2ae   : > { %v3801_v7 = vmul.f32 %v7093_v41, %v3800_v49  ;;  %v3784_v29 = vmul.f32 %v7097_v15, %v11316_v55  ;;  %v1726_v5 = vsel %vm1617_vm0, 78.0, %v15732_v43  ;;  %v4891_v47 = vsel %vm9206_vm14, %v7448_v2, 0.0  ;;  %v16162_v42 = vld [vmem:[#allocation83_spill] sm:$0xff]  ;;  %v16164_v2 = vld [vmem:[#allocation80_spill] sm:$0xff] }
 0x2af   : > { %v3817_v26 = vadd.f32 %v7091_v56, %v3816_v51  ;;  %v6103_v20 = vsel %vm16155_vm4, %v5228_v50, %v5992_v59  ;;  %vm3789_vm8 = vweird.f32 %v7097_v15  ;;  %v1944_v51 = vsel %vm1617_vm0, 115.0, %v15733_v10  ;;  %vm16174_vm0 = vmmov %vm16155_vm4 }
 0x2b0   : > { %v3802_v17 = vadd.f32 %v7093_v41, %v3801_v7  ;;  %v3785_v49 = vsub.f32 1.0, %v3784_v29  ;;  %v1222_v14 = vfloor.f32 %v1113_v35  ;;  %v3795_v36 = vor.u32 1.1754944e-38, %v3794_v44 }
 0x2b1   : > { %v3821_v9 = vsel %vm11357_vm11, %v7091_v56, %v3817_v26  ;;  %vm16157_vm6 = vcmp.lt.s32.totalorder %v7672_v53, 2  ;;  %vm16158_vm12 = vcmask 695296   ;;  %v1835_v3 = vsel %vm1508_vm9, 102.0, %v1726_v5  ;;  %v5431_v56 = vpop.permute.xlu1 %5430 }
 0x2b2   : > { %v6212_v50 = vsel %vm16157_vm6, %v16156_v54, %v6103_v20  ;;  %v11385_v59 = vsel %vm11325_vm7, %v3825_v34, %v3821_v9  ;;  %v3806_v7 = vsel %vm11367_vm5, %v7093_v41, %v3802_v17  ;;  %v3786_v29 = vmul.f32 %v7097_v15, %v3785_v49  ;;  %vm11401_vm7 = vmor %vm3788_vm13, %vm3789_vm8  ;;  %v16163_v20 = vld [vmem:[#allocation77_spill] sm:$0xff] }
 0x2b3   : > { %6322 = vst.msk [vmem:[%s9279_s23 + $0x118] sm:$0xff] %vm16158_vm12, %v6212_v50  ;;  %v4496_v44 = vmul.f32 1.05, %v11385_v59  ;;  %5645 = vperm.xlu2 %6761, %v11385_v59   ;;  %v11396_v54 = vsel %vm11333_vm15, %v3810_v1, %v3806_v7  ;;  %v2053_v34 = vsel %vm1508_vm9, 74.0, %v1944_v51  ;;  %v5025_v41 = vmul.f32 1.442695, %v4891_v47  ;;  %vm16178_vm5 = vmmov %vm16158_vm12 }
 0x2b4   : > { %16159 = vst [vmem:[#allocation110_spill] sm:$0xff] %v11396_v54  ;;  %v4495_v35 = vmul.f32 1.05, %v11396_v54  ;;  %5640 = vperm.xlu1 %6760, %v11396_v54   ;;  %v3787_v26 = vadd.f32 %v7097_v15, %v3786_v29  ;;  %v1398_v63 = vsub.f32 %v16163_v20, %v16162_v42  ;;  %v7449_v1 = vld [vmem:[%s7632_s20 + $0xc0] sm:$0xff]  ;;  %v5873_v17 = vmul.f32 %v5431_v56, %v16164_v2  ;;  %v5426_v29 = vpop.permute.xlu0 %5425  ;;  %v227_v56 = vld [vmem:[%s7632_s20 + $0x238] sm:$0xff]  ;;  %vm16179_vm8 = vmmov %vm16174_vm0 }
 0x2b5   : > { %v4890_v55 = vsel %vm9206_vm14, %v7449_v1, 0.0  ;;  %v6670_v5 = vadd.f32 -0.025, %v4496_v44  ;;  %7098 = vpow2.f32 %v5025_v41  ;;  %v11414_v47 = vmul.f32 3.0, %v1223_v30  ;;  %v16171_v20 = vld [vmem:[#allocation86_spill] sm:$0xff]  ;;  %vm16183_vm12 = vmmov %vm16178_vm5 }
 0x2b6   : > { %v5023_v6 = vmul.f32 1.442695, %v4890_v55  ;;  %v3791_v49 = vsel %vm11401_vm7, %v7097_v15, %v3787_v26  ;;  %vm1507_vm15 = vcmp.lt.f32.partialorder %v1398_v63, 0.5  ;;  %vm1616_vm13 = vcmp.lt.f32.partialorder %v1398_v63, 1.5  ;;  %v225_v26 = vld [vmem:[%s7632_s20 + $0x228] sm:$0xff] }
 0x2b7   : > { %16165 = vst [vmem:[#allocation106_spill] sm:$0xff] %v11414_v47  ;;  %v6669_v51 = vadd.f32 -0.025, %v4495_v35  ;;  %v11420_v9 = vsel %vm11362_vm3, %v3795_v36, %v3791_v49  ;;  %v1725_v50 = vsel %vm1616_vm13, 78.0, %v15732_v43  ;;  %v1943_v7 = vsel %vm1616_vm13, 115.0, %v15733_v10  ;;  %v226_v35 = vld [vmem:[%s7632_s20 + $0x230] sm:$0xff]  ;;  %vm16177_vm3 = vmmov %vm16157_vm6 }
 0x2b8   : > { %16166 = vst [vmem:[#allocation72_spill] sm:$0xff] %v11420_v9  ;;  %v16167_v44 = vfloor.f32 %v11290_v21  ;;  %v11429_v41 = vmul.f32 3.0, %v1222_v14  ;;  %v16169_v15 = vfloor.f32 %v11302_v40  ;;  %5635 = vperm.xlu0 %6759, %v11420_v9   ;;  %v2273_v36 = vsel %vm2247_vm10, %v1835_v3, %v2053_v34  ;;  %vm16182_vm6 = vmmov %vm16177_vm3 }
 0x2b9   : > { %v4714_v42 = vadd.f32 %v6670_v5, %v11351_v60  ;;  %vm16170_vm1 = vcmp.ge.s32.totalorder %v7672_v53, 5  ;;  %7100 = vpow2.f32 %v5023_v6  ;;  %v2052_v40 = vsel %vm1507_vm15, 74.0, %v1943_v7  ;;  %v16173_v60 = vld [vmem:[#allocation120_spill] sm:$0xff] }
 0x2ba   : > { %v2205_v18 = vsel %vm2137_vm2, %v1223_v30, %v16167_v44  ;;  %16168 = vst [vmem:[#allocation79_spill] sm:$0xff] %v11429_v41  ;;  %v2204_v33 = vsel %vm2137_vm2, %v1222_v14, %v16169_v15  ;;  %v5982_v21 = vsel %vm16170_vm1, %v5873_v17, %v16164_v2  ;;  %v1834_v30 = vsel %vm1507_vm15, 102.0, %v1725_v50  ;;  %v16172_v15 = vld [vmem:[#allocation125_spill] sm:$0xff]  ;;  %vm16175_vm11 = vmmov %vm16170_vm1 }
 0x2bb   : > { %v5872_v14 = vmul.f32 %v5426_v29, %v16171_v20  ;;  %v338_v1 = vadd.s32 568, %v7619_v4  ;;  %v6564_v55 = vmul.f32 -1.442695, %v227_v56  ;;  %v7099_v49 = vpop.eup %7098  ;;  %v4713_v3 = vadd.f32 %v6669_v51, %v2205_v18  ;;  %v16176_v18 = vld [vmem:[#allocation85_spill] sm:$0xff] }
 0x2bc   : > { %v6563_v34 = vmul.f32 -1.442695, %v226_v35  ;;  %v6562_v44 = vmul.f32 -1.442695, %v225_v26  ;;  %v1412_v5 = vsub.f32 %v16173_v60, %v16172_v15  ;;  %v4494_v41 = vmul.f32 1.05, %v11420_v9 }
 0x2bd   : > { %v5218_v2 = vmul.f32 %v7099_v49, %v2273_v36  ;;  %v448_v17 = vadd.s32 %v7625_v8, %v338_v1  ;;  %7102 = vpow2.f32 %v6564_v55  ;;  %v2272_v63 = vsel %vm2247_vm10, %v1834_v30, %v2052_v40 }
 0x2be   : > { %v337_v6 = vadd.s32 560, %v7619_v4  ;;  %7104 = vpow2.f32 %v6563_v34  ;;  %v336_v51 = vadd.s32 552, %v7619_v4  ;;  %v5981_v7 = vsel %vm16175_vm11, %v5872_v14, %v16171_v20 }
 0x2bf   : > { %v6093_v50 = vsel %vm16174_vm0, %v5218_v2, %v5982_v21  ;;  %v559_v29 = vcvt.s32.f32 %v448_v17  ;;  %7106 = vpow2.f32 %v6562_v44  ;;  %v7101_v56 = vpop.eup %7100  ;;  %vm1630_vm9 = vcmp.lt.f32.partialorder %v1412_v5, 1.5  ;;  %v7450_v44 = vld [vmem:[%s7632_s20 + $0x130] sm:$0xff]  ;;  %vm16193_vm0 = vmmov %vm16175_vm11 }
 0x2c0   : > { %v6202_v36 = vsel %vm16177_vm3, %v16176_v18, %v6093_v50  ;;  %v447_v35 = vadd.s32 %v7625_v8, %v337_v6  ;;  %v11466_v26 = vadd.s32 %v7625_v8, %v336_v51  ;;  %v11468_v30 = vmul.f32 16.0, %v4714_v42  ;;  %v16181_v17 = vld [vmem:[#allocation92_spill] sm:$0xff]  ;;  %v5496_v50 = vpop.permute.xlu2 %5495 }
 0x2c1   : > { %v6668_v21 = vadd.f32 -0.025, %v4494_v41  ;;  %6312 = vst.msk [vmem:[%s9279_s23 + $0xc8] sm:$0xff] %vm16178_vm5, %v6202_v36  ;;  %v5217_v40 = vmul.f32 %v7101_v56, %v2272_v63  ;;  %v11473_v20 = vmul.f32 %v7647_v32, %v559_v29  ;;  %vm1521_vm4 = vcmp.lt.f32.partialorder %v1412_v5, 0.5 }
 0x2c2   : > { %v558_v14 = vcvt.s32.f32 %v447_v35  ;;  %v557_v1 = vcvt.s32.f32 %v11466_v26  ;;  %v1739_v55 = vsel %vm1630_vm9, 78.0, %v15732_v43  ;;  %v1957_v41 = vsel %vm1630_vm9, 115.0, %v15733_v10 }
 0x2c3   : > { %v7103_v49 = vpop.eup %7102  ;;  %v6092_v34 = vsel %vm16179_vm8, %v5217_v40, %v5981_v7  ;;  %v15315_v42 = vfloor.f32 %v11473_v20  ;;  %v4904_v15 = vsel %vm9206_vm14, %v7450_v44, 0.0  ;;  %v11484_v2 = vmul.f32 16.0, %v4713_v3 }
 0x2c4   : > { %v7105_v60 = vpop.eup %7104  ;;  %v6201_v63 = vsel %vm16182_vm6, %v16181_v17, %v6092_v34  ;;  %v2755_v6 = vadd.f32 1.0, %v7103_v49  ;;  %v11490_v51 = vmul.f32 %v7647_v32, %v558_v14  ;;  %v4712_v56 = vadd.f32 %v6668_v21, %v2204_v33 }
 0x2c5   : > { %16180 = vst [vmem:[#allocation112_spill] sm:$0xff] %v11484_v2  ;;  %v7107_v7 = vpop.eup %7106  ;;  %v893_v18 = vmul.f32 114.0, %v15315_v42  ;;  %v2754_v36 = vadd.f32 1.0, %v7105_v60  ;;  %v11497_v3 = vmul.f32 %v7647_v32, %v557_v1  ;;  %v1848_v35 = vsel %vm1521_vm4, 102.0, %v1739_v55  ;;  %v16190_v2 = vld [vmem:[#allocation84_spill] sm:$0xff] }
 0x2c6   : > { %6311 = vst.msk [vmem:[%s9279_s23 + $0xc0] sm:$0xff] %vm16183_vm12, %v6201_v63  ;;  %7108 = vrcp.f32 %v2755_v6  ;;  %v2066_v26 = vsel %vm1521_vm4, 74.0, %v1957_v41  ;;  %v5051_v40 = vmul.f32 1.442695, %v4904_v15  ;;  %v15316_v34 = vfloor.f32 %v11490_v51 }
 0x2c7   : > { %v11501_v49 = vsub.f32 %v559_v29, %v893_v18  ;;  %7110 = vrcp.f32 %v2754_v36  ;;  %v5886_v33 = vmul.f32 %v5496_v50, %v9380_v27  ;;  %v3867_v21 = vand.u32 2147483647, %v2755_v6 }
 0x2c8   : > { %v3869_v44 = vand.u32 2147483648, %v2755_v6  ;;  %v3852_v17 = vand.u32 2147483647, %v2754_v36  ;;  %v3854_v60 = vand.u32 2147483648, %v2754_v36  ;;  %v892_v55 = vmul.f32 114.0, %v15316_v34 }
 0x2c9   : > { %16184 = vst [vmem:[#allocation78_spill] sm:$0xff] %v11501_v49  ;;  %v1118_v63 = vmul.f32 %v7680_v57, %v11501_v49  ;;  %v15319_v5 = vfloor.f32 %v11497_v3  ;;  %v11510_v41 = vadd.f32 1.0, %v7107_v7  ;;  %v11512_v29 = vmul.f32 16.0, %v4712_v56 }
 0x2ca   : > { %vm3863_vm7 = vweird.f32 %v2755_v6  ;;  %v2286_v15 = vsel %vm2247_vm10, %v1848_v35, %v2066_v26  ;;  %7112 = vpow2.f32 %v5051_v40  ;;  %vm3848_vm15 = vweird.f32 %v2754_v36 }
 0x2cb   : > { %16185 = vst [vmem:[#allocation73_spill] sm:$0xff] %v11512_v29  ;;  %v1227_v50 = vfloor.f32 %v1118_v63  ;;  %v891_v18 = vmul.f32 114.0, %v15319_v5  ;;  %7114 = vrcp.f32 %v11510_v41  ;;  %vm11519_vm13 = vcmp.eq.f32.partialorder %v3867_v21, 8.507059e+37  ;;  %v16189_v29 = vld [vmem:[#allocation90_spill] sm:$0xff] }
 0x2cc   : > { %v7109_v42 = vpop.eup %7108  ;;  %v3870_v7 = vor.u32 1.1754944e-38, %v3869_v44  ;;  %v11523_v56 = vsub.f32 %v558_v14, %v892_v55  ;;  %v1402_v9 = vsub.f32 %v16190_v2, %v16189_v29  ;;  %vm11527_vm1 = vcmp.eq.f32.partialorder %v3852_v17, 8.507059e+37 }
 0x2cd   : > { %v7111_v35 = vpop.eup %7110  ;;  %v3859_v26 = vmul.f32 %v7109_v42, %v2755_v6  ;;  %v3855_v63 = vor.u32 1.1754944e-38, %v3854_v60  ;;  %v5995_v21 = vsel %vm16193_vm0, %v5886_v33, %v9380_v27  ;;  %v11534_v54 = vsub.f32 %v557_v1, %v891_v18 }
 0x2ce   : > { %16188 = vst [vmem:[#allocation118_spill] sm:$0xff] %v11523_v56  ;;  %v3844_v5 = vmul.f32 %v7111_v35, %v2754_v36  ;;  %v3837_v14 = vand.u32 2147483647, %v11510_v41  ;;  %v3839_v44 = vand.u32 2147483648, %v11510_v41  ;;  %v11538_v55 = vmul.f32 3.0, %v1227_v50 }
 0x2cf   : > { %16194 = vst [vmem:[#allocation83_spill] sm:$0xff] %v11534_v54  ;;  %v3860_v2 = vsub.f32 1.0, %v3859_v26  ;;  %vm3864_vm11 = vweird.f32 %v7109_v42  ;;  %vm3833_vm3 = vweird.f32 %v11510_v41  ;;  %v1117_v60 = vmul.f32 %v7680_v57, %v11523_v56  ;;  %v16217_v56 = vld [vmem:[#allocation98_spill] sm:$0xff] }
 0x2d0   : > { %v7113_v17 = vpop.eup %7112  ;;  %v3845_v29 = vsub.f32 1.0, %v3844_v5  ;;  %vm3849_vm9 = vweird.f32 %v7111_v35  ;;  %vm1620_vm5 = vcmp.lt.f32.partialorder %v1402_v9, 1.5  ;;  %v16195_v1 = vfloor.f32 %v11473_v20  ;;  %vm11552_vm4 = vmor %vm3863_vm7, %vm3864_vm11 }
 0x2d1   : > { %v7115_v27 = vpop.eup %7114  ;;  %v3861_v18 = vmul.f32 %v7109_v42, %v3860_v2  ;;  %v1116_v26 = vmul.f32 %v7680_v57, %v11534_v54  ;;  %v5231_v47 = vmul.f32 %v7113_v17, %v2286_v15  ;;  %vm11556_vm8 = vcmp.eq.f32.partialorder %v3837_v14, 8.507059e+37  ;;  %vm11561_vm12 = vmor %vm3848_vm15, %vm3849_vm9 }
 0x2d2   : > { %v11547_v33 = vsel %vm2137_vm2, %v1227_v50, %v16195_v1  ;;  %v3846_v5 = vmul.f32 %v7111_v35, %v3845_v29  ;;  %v3840_v20 = vor.u32 1.1754944e-38, %v3839_v44  ;;  %vm1511_vm6 = vcmp.lt.f32.partialorder %v1402_v9, 0.5 }
 0x2d3   : > { %v3862_v50 = vadd.f32 %v7109_v42, %v3861_v18  ;;  %v3829_v6 = vmul.f32 %v7115_v27, %v11510_v41  ;;  %vm16202_vm7 = vcmp.lt.s32.totalorder %v7672_v53, 4  ;;  %v1729_v14 = vsel %vm1620_vm5, 78.0, %v15732_v43 }
 0x2d4   : > { %v6106_v15 = vsel %vm16202_vm7, %v5231_v47, %v5995_v21  ;;  %v1226_v17 = vfloor.f32 %v1117_v60  ;;  %v3847_v29 = vadd.f32 %v7111_v35, %v3846_v5  ;;  %vm16203_vm0 = vcmp.lt.s32.totalorder %v7672_v53, 2  ;;  %v7451_v60 = vld [vmem:[%s7632_s20 + $0xe0] sm:$0xff] }
 0x2d5   : > { %v6215_v44 = vsel %vm16203_vm0, %v9460_v24, %v6106_v15  ;;  %v1947_v36 = vsel %vm1620_vm5, 115.0, %v15733_v10  ;;  %v3866_v1 = vsel %vm11552_vm4, %v7109_v42, %v3862_v50  ;;  %v1225_v18 = vfloor.f32 %v1116_v26  ;;  %v5446_v42 = vpop.permute.xlu1 %5445  ;;  %v16209_v15 = vld [vmem:[#allocation91_spill] sm:$0xff]  ;;  %vm16218_vm5 = vmmov %vm16202_vm7 }
 0x2d6   : > { %v3830_v54 = vsub.f32 1.0, %v3829_v6  ;;  %vm3834_vm15 = vweird.f32 %v7115_v27  ;;  %vm16204_vm11 = vcmask 695296   ;;  %v11581_v47 = vsel %vm11519_vm13, %v3870_v7, %v3866_v1  ;;  %v16208_v6 = vld [vmem:[#allocation96_spill] sm:$0xff] }
 0x2d7   : > { %6325 = vst.msk [vmem:[%s9279_s23 + $0x130] sm:$0xff] %vm16204_vm11, %v6215_v44  ;;  %v3851_v21 = vsel %vm11561_vm12, %v7111_v35, %v3847_v29  ;;  %v1838_v24 = vsel %vm1511_vm6, 102.0, %v1729_v14  ;;  %v4894_v49 = vsel %vm9206_vm14, %v7451_v60, 0.0  ;;  %v4499_v26 = vmul.f32 1.05, %v11581_v47  ;;  %5660 = vperm.xlu2 %6761, %v11581_v47   ;;  %vm11600_vm13 = vmor %vm3833_vm3, %vm3834_vm15  ;;  %v16210_v29 = vld [vmem:[#allocation89_spill] sm:$0xff] }
 0x2d8   : > { %v11593_v34 = vsel %vm11527_vm1, %v3855_v63, %v3851_v21  ;;  %v3831_v7 = vmul.f32 %v7115_v27, %v3830_v54  ;;  %v5031_v5 = vmul.f32 1.442695, %v4894_v49  ;;  %v2056_v2 = vsel %vm1511_vm6, 74.0, %v1947_v36  ;;  %v7452_v63 = vld [vmem:[%s7632_s20 + $0xd8] sm:$0xff]  ;;  %v228_v35 = vld [vmem:[%s7632_s20 + $0x240] sm:$0xff]  ;;  %vm16222_vm6 = vmmov %vm16204_vm11 }
 0x2d9   : > { %16205 = vst [vmem:[#allocation77_spill] sm:$0xff] %v11593_v34  ;;  %v4498_v50 = vmul.f32 1.05, %v11593_v34  ;;  %5655 = vperm.xlu1 %6760, %v11593_v34   ;;  %v1401_v40 = vsub.f32 %v16209_v15, %v16208_v6  ;;  %v4893_v54 = vsel %vm9206_vm14, %v7452_v63, 0.0  ;;  %v5876_v44 = vmul.f32 %v5446_v42, %v16210_v29  ;;  %vm16227_vm11 = vmmov %vm16222_vm6 }
 0x2da   : > { %v3832_v14 = vadd.f32 %v7115_v27, %v3831_v7  ;;  %7116 = vpow2.f32 %v5031_v5  ;;  %v5029_v41 = vmul.f32 1.442695, %v4893_v54  ;;  %v11611_v1 = vmul.f32 3.0, %v1226_v17  ;;  %v5441_v7 = vpop.permute.xlu0 %5440  ;;  %v230_v5 = vld [vmem:[%s7632_s20 + $0x250] sm:$0xff] }
 0x2db   : > { %v16212_v9 = vfloor.f32 %v11490_v51  ;;  %vm1510_vm1 = vcmp.lt.f32.partialorder %v1401_v40, 0.5  ;;  %vm1619_vm3 = vcmp.lt.f32.partialorder %v1401_v40, 1.5  ;;  %v6673_v21 = vadd.f32 -0.025, %v4499_v26  ;;  %v229_v26 = vld [vmem:[%s7632_s20 + $0x248] sm:$0xff] }
 0x2dc   : > { %16211 = vst [vmem:[#allocation80_spill] sm:$0xff] %v11611_v1  ;;  %v3836_v60 = vsel %vm11600_vm13, %v7115_v27, %v3832_v14  ;;  %v1728_v49 = vsel %vm1619_vm3, 78.0, %v15732_v43  ;;  %v1946_v42 = vsel %vm1619_vm3, 115.0, %v15733_v10  ;;  %v11622_v6 = vmul.f32 3.0, %v1225_v18 }
 0x2dd   : > { %v2208_v36 = vsel %vm2137_vm2, %v1226_v17, %v16212_v9  ;;  %v16214_v15 = vfloor.f32 %v11497_v3  ;;  %v11630_v17 = vsel %vm11556_vm8, %v3840_v20, %v3836_v60  ;;  %v2276_v27 = vsel %vm2247_vm10, %v1838_v24, %v2056_v2  ;;  %vm16221_vm8 = vmmov %vm16203_vm0 }
 0x2de   : > { %16213 = vst [vmem:[#allocation86_spill] sm:$0xff] %v11622_v6  ;;  %v6672_v63 = vadd.f32 -0.025, %v4498_v50  ;;  %5650 = vperm.xlu0 %6759, %v11630_v17   ;;  %vm16216_vm9 = vcmp.ge.s32.totalorder %v7672_v53, 5  ;;  %v1837_v3 = vsel %vm1510_vm1, 102.0, %v1728_v49  ;;  %7118 = vpow2.f32 %v5029_v41  ;;  %vm16223_vm0 = vmmov %vm16218_vm5 }
 0x2df   : > { %v2207_v51 = vsel %vm2137_vm2, %v1225_v18, %v16214_v15  ;;  %16215 = vst [vmem:[#allocation125_spill] sm:$0xff] %v11630_v17  ;;  %v5985_v54 = vsel %vm16216_vm9, %v5876_v44, %v16210_v29  ;;  %v2055_v18 = vsel %vm1510_vm1, 74.0, %v1946_v42  ;;  %v5875_v20 = vmul.f32 %v5441_v7, %v16217_v56  ;;  %vm16219_vm4 = vmmov %vm16216_vm9 }
 0x2e0   : > { %v341_v14 = vadd.s32 592, %v7619_v4  ;;  %v6567_v9 = vmul.f32 -1.442695, %v230_v5  ;;  %v7117_v24 = vpop.eup %7116  ;;  %v4717_v2 = vadd.f32 %v6673_v21, %v11547_v33  ;;  %v4497_v50 = vmul.f32 1.05, %v11630_v17  ;;  %vm16225_vm15 = vmmov %vm16221_vm8 }
 0x2e1   : > { %v6566_v60 = vmul.f32 -1.442695, %v229_v26  ;;  %v6565_v15 = vmul.f32 -1.442695, %v228_v35  ;;  %v5221_v34 = vmul.f32 %v7117_v24, %v2276_v27  ;;  %v1415_v40 = vsub.f32 %v9453_v39, %v9504_v62  ;;  %v16220_v27 = vld [vmem:[#allocation95_spill] sm:$0xff] }
 0x2e2   : > { %v451_v29 = vadd.s32 %v7625_v8, %v341_v14  ;;  %7120 = vpow2.f32 %v6567_v9  ;;  %v2275_v44 = vsel %vm2247_vm10, %v1837_v3, %v2055_v18  ;;  %v340_v41 = vadd.s32 584, %v7619_v4  ;;  %v7453_v9 = vld [vmem:[%s7632_s20 + $0x148] sm:$0xff] }
 0x2e3   : > { %7122 = vpow2.f32 %v6566_v60  ;;  %v339_v33 = vadd.s32 576, %v7619_v4  ;;  %v4716_v21 = vadd.f32 %v6672_v63, %v2208_v36  ;;  %v6096_v49 = vsel %vm16218_vm5, %v5221_v34, %v5985_v54  ;;  %v16224_v60 = vld [vmem:[#allocation104_spill] sm:$0xff] }
 0x2e4   : > { %v5984_v42 = vsel %vm16219_vm4, %v5875_v20, %v16217_v56  ;;  %v562_v7 = vcvt.s32.f32 %v451_v29  ;;  %v7119_v5 = vpop.eup %7118  ;;  %v6205_v39 = vsel %vm16221_vm8, %v16220_v27, %v6096_v49  ;;  %v450_v62 = vadd.s32 %v7625_v8, %v340_v41 }
 0x2e5   : > { %v11663_v26 = vadd.s32 %v7625_v8, %v339_v33  ;;  %7124 = vpow2.f32 %v6565_v15  ;;  %v11665_v36 = vmul.f32 16.0, %v4717_v2  ;;  %6315 = vst.msk [vmem:[%s9279_s23 + $0xe0] sm:$0xff] %vm16222_vm6, %v6205_v39  ;;  %v5220_v34 = vmul.f32 %v7119_v5, %v2275_v44 }
 0x2e6   : > { %v11670_v35 = vmul.f32 %v7647_v32, %v562_v7  ;;  %vm1633_vm12 = vcmp.lt.f32.partialorder %v1415_v40, 1.5  ;;  %v6671_v63 = vadd.f32 -0.025, %v4497_v50  ;;  %v561_v54 = vcvt.s32.f32 %v450_v62 }
 0x2e7   : > { %v560_v3 = vcvt.s32.f32 %v11663_v26  ;;  %vm1524_vm7 = vcmp.lt.f32.partialorder %v1415_v40, 0.5  ;;  %v6095_v56 = vsel %vm16223_vm0, %v5220_v34, %v5984_v42  ;;  %v1742_v14 = vsel %vm1633_vm12, 78.0, %v15732_v43 }
 0x2e8   : > { %v7121_v18 = vpop.eup %7120  ;;  %v15328_v20 = vfloor.f32 %v11670_v35  ;;  %v4907_v24 = vsel %vm9206_vm14, %v7453_v9, 0.0  ;;  %v6204_v50 = vsel %vm16225_vm15, %v16224_v60, %v6095_v56  ;;  %v11684_v29 = vmul.f32 %v7647_v32, %v561_v54 }
 0x2e9   : > { %v7123_v2 = vpop.eup %7122  ;;  %v2758_v15 = vadd.f32 1.0, %v7121_v18  ;;  %v1960_v44 = vsel %vm1633_vm12, 115.0, %v15733_v10  ;;  %v11687_v41 = vmul.f32 16.0, %v4716_v21  ;;  %6314 = vst.msk [vmem:[%s9279_s23 + $0xd8] sm:$0xff] %vm16227_vm11, %v6204_v50  ;;  %v11694_v42 = vmul.f32 %v7647_v32, %v560_v3 }
 0x2ea   : > { %v896_v33 = vmul.f32 114.0, %v15328_v20  ;;  %v2757_v49 = vadd.f32 1.0, %v7123_v2  ;;  %v4715_v27 = vadd.f32 %v6671_v63, %v2207_v51  ;;  %v1851_v39 = vsel %vm1524_vm7, 102.0, %v1742_v14 }
 0x2eb   : > { %16226 = vst [vmem:[#allocation120_spill] sm:$0xff] %v11687_v41  ;;  %v7125_v5 = vpop.eup %7124  ;;  %7126 = vrcp.f32 %v2758_v15  ;;  %v5057_v62 = vmul.f32 1.442695, %v4907_v24  ;;  %v15327_v21 = vfloor.f32 %v11684_v29  ;;  %v2069_v34 = vsel %vm1524_vm7, 74.0, %v1960_v44 }
 0x2ec   : > { %v11697_v26 = vsub.f32 %v562_v7, %v896_v33  ;;  %7128 = vrcp.f32 %v2757_v49  ;;  %v3912_v18 = vand.u32 2147483647, %v2758_v15  ;;  %v3914_v56 = vand.u32 2147483648, %v2758_v15  ;;  %v5511_v7 = vpop.permute.xlu2 %5510 }
 0x2ed   : > { %v3897_v9 = vand.u32 2147483647, %v2757_v49  ;;  %v3899_v2 = vand.u32 2147483648, %v2757_v49  ;;  %v895_v51 = vmul.f32 114.0, %v15327_v21  ;;  %v15329_v63 = vfloor.f32 %v11694_v42 }
 0x2ee   : > { %16228 = vst [vmem:[#allocation85_spill] sm:$0xff] %v11697_v26  ;;  %v1121_v60 = vmul.f32 %v7680_v57, %v11697_v26  ;;  %v11706_v14 = vadd.f32 1.0, %v7125_v5  ;;  %v11708_v24 = vmul.f32 16.0, %v4715_v27  ;;  %vm3908_vm13 = vweird.f32 %v2758_v15 }
 0x2ef   : > { %v2289_v40 = vsel %vm2247_vm10, %v1851_v39, %v2069_v34  ;;  %7130 = vpow2.f32 %v5057_v62  ;;  %v11712_v50 = vsub.f32 %v561_v54, %v895_v51  ;;  %vm3893_vm1 = vweird.f32 %v2757_v49 }
 0x2f0   : > { %16229 = vst [vmem:[#allocation92_spill] sm:$0xff] %v11708_v24  ;;  %v894_v44 = vmul.f32 114.0, %v15329_v63  ;;  %7132 = vrcp.f32 %v11706_v14  ;;  %v1230_v21 = vfloor.f32 %v1121_v60  ;;  %vm11717_vm3 = vcmp.eq.f32.partialorder %v3912_v18, 8.507059e+37 }
 0x2f1   : > { %16230 = vst [vmem:[#allocation90_spill] sm:$0xff] %v11712_v50  ;;  %v7127_v33 = vpop.eup %7126  ;;  %v3915_v27 = vor.u32 1.1754944e-38, %v3914_v56  ;;  %v5889_v20 = vmul.f32 %v5511_v7, %v9489_v11  ;;  %vm11722_vm9 = vcmp.eq.f32.partialorder %v3897_v9, 8.507059e+37  ;;  %v3900_v62 = vor.u32 1.1754944e-38, %v3899_v2  ;;  %v16236_v7 = vld [vmem:[#allocation103_spill] sm:$0xff]  ;;  %v16237_v9 = vld [vmem:[#allocation97_spill] sm:$0xff] }
 0x2f2   : > { %v7129_v24 = vpop.eup %7128  ;;  %v3904_v39 = vmul.f32 %v7127_v33, %v2758_v15  ;;  %v3882_v34 = vand.u32 2147483647, %v11706_v14  ;;  %v1120_v51 = vmul.f32 %v7680_v57, %v11712_v50  ;;  %v11729_v18 = vsub.f32 %v560_v3, %v894_v44 }
 0x2f3   : > { %v3889_v60 = vmul.f32 %v7129_v24, %v2757_v49  ;;  %v3884_v63 = vand.u32 2147483648, %v11706_v14  ;;  %vm3909_vm5 = vweird.f32 %v7127_v33  ;;  %vm3878_vm4 = vweird.f32 %v11706_v14 }
 0x2f4   : > { %16235 = vst [vmem:[#allocation84_spill] sm:$0xff] %v11729_v18  ;;  %v3905_v56 = vsub.f32 1.0, %v3904_v39  ;;  %v1405_v41 = vsub.f32 %v16237_v9, %v16236_v7  ;;  %v11735_v6 = vmul.f32 3.0, %v1230_v21  ;;  %vm3894_vm8 = vweird.f32 %v7129_v24  ;;  %vm11747_vm12 = vmor %vm3908_vm13, %vm3909_vm5 }
 0x2f5   : > { %v7131_v17 = vpop.eup %7130  ;;  %v3890_v2 = vsub.f32 1.0, %v3889_v60  ;;  %vm16238_vm6 = vcmp.ge.s32.totalorder %v7672_v53, 5  ;;  %v16239_v44 = vfloor.f32 %v11670_v35  ;;  %v1229_v26 = vfloor.f32 %v1120_v51  ;;  %vm11758_vm0 = vmor %vm3893_vm1, %vm3894_vm8 }
 0x2f6   : > { %v5998_v50 = vsel %vm16238_vm6, %v5889_v20, %v9489_v11  ;;  %v7133_v3 = vpop.eup %7132  ;;  %v3906_v1 = vmul.f32 %v7127_v33, %v3905_v56  ;;  %v5234_v7 = vmul.f32 %v7131_v17, %v2289_v40  ;;  %v1119_v11 = vmul.f32 %v7680_v57, %v11729_v18  ;;  %v7454_v56 = vld [vmem:[%s7632_s20 + $0xf8] sm:$0xff]  ;;  %v232_v20 = vld [vmem:[%s7632_s20 + $0x260] sm:$0xff] }
 0x2f7   : > { %v11744_v39 = vsel %vm2137_vm2, %v1230_v21, %v16239_v44  ;;  %v3891_v60 = vmul.f32 %v7129_v24, %v3890_v2  ;;  %vm11753_vm7 = vcmp.eq.f32.partialorder %v3882_v34, 8.507059e+37  ;;  %v3885_v35 = vor.u32 1.1754944e-38, %v3884_v63  ;;  %v16289_v18 = vld [vmem:[#allocation114_spill] sm:$0xff] }
 0x2f8   : > { %v3907_v21 = vadd.f32 %v7127_v33, %v3906_v1  ;;  %v3874_v17 = vmul.f32 %v7133_v3, %v11706_v14  ;;  %vm16246_vm15 = vcmp.lt.s32.totalorder %v7672_v53, 4  ;;  %vm1623_vm11 = vcmp.lt.f32.partialorder %v1405_v41, 1.5  ;;  %v16256_v14 = vld [vmem:[#allocation102_spill] sm:$0xff] }
 0x2f9   : > { %v6109_v15 = vsel %vm16246_vm15, %v5234_v7, %v5998_v50  ;;  %v3892_v40 = vadd.f32 %v7129_v24, %v3891_v60  ;;  %vm16247_vm13 = vcmp.lt.s32.totalorder %v7672_v53, 2  ;;  %vm1514_vm5 = vcmp.lt.f32.partialorder %v1405_v41, 0.5 }
 0x2fa   : > { %v6218_v34 = vsel %vm16247_vm13, %v9590_v13, %v6109_v15  ;;  %v4897_v1 = vsel %vm9206_vm14, %v7454_v56, 0.0  ;;  %v3911_v49 = vsel %vm11747_vm12, %v7127_v33, %v3907_v21  ;;  %v11773_v63 = vmul.f32 3.0, %v1229_v26  ;;  %v16255_v15 = vld [vmem:[#allocation100_spill] sm:$0xff]  ;;  %vm16261_vm12 = vmmov %vm16238_vm6 }
 0x2fb   : > { %v3875_v2 = vsub.f32 1.0, %v3874_v17  ;;  %vm3879_vm1 = vweird.f32 %v7133_v3  ;;  %vm16249_vm8 = vcmask 695296   ;;  %v11779_v50 = vsel %vm11717_vm3, %v3915_v27, %v3911_v49  ;;  %v7455_v56 = vld [vmem:[%s7632_s20 + $0xf0] sm:$0xff] }
 0x2fc   : > { %16248 = vst [vmem:[#allocation96_spill] sm:$0xff] %v11773_v63  ;;  %v3896_v13 = vsel %vm11758_vm0, %v7129_v24, %v3892_v40  ;;  %v1732_v44 = vsel %vm1623_vm11, 78.0, %v15732_v43  ;;  %v1950_v7 = vsel %vm1623_vm11, 115.0, %v15733_v10  ;;  %v4502_v33 = vmul.f32 1.05, %v11779_v50  ;;  %5675 = vperm.xlu2 %6761, %v11779_v50   ;;  %v5461_v24 = vpop.permute.xlu1 %5460  ;;  %vm11800_vm3 = vmor %vm3878_vm4, %vm3879_vm1 }
 0x2fd   : > { %6328 = vst.msk [vmem:[%s9279_s23 + $0x148] sm:$0xff] %vm16249_vm8, %v6218_v34  ;;  %v16250_v9 = vfloor.f32 %v11684_v29  ;;  %v11793_v5 = vsel %vm11722_vm9, %v3900_v62, %v3896_v13  ;;  %v3876_v27 = vmul.f32 %v7133_v3, %v3875_v2  ;;  %v1228_v51 = vfloor.f32 %v1119_v11 }
 0x2fe   : > { %16251 = vst [vmem:[#allocation91_spill] sm:$0xff] %v11793_v5  ;;  %v4501_v21 = vmul.f32 1.05, %v11793_v5  ;;  %5670 = vperm.xlu1 %6760, %v11793_v5   ;;  %v5037_v29 = vmul.f32 1.442695, %v4897_v1  ;;  %v1841_v40 = vsel %vm1514_vm5, 102.0, %v1732_v44  ;;  %v5879_v2 = vmul.f32 %v5461_v24, %v16256_v14  ;;  %v5456_v1 = vpop.permute.xlu0 %5455 }
 0x2ff   : > { %v2211_v60 = vsel %vm2137_vm2, %v1229_v26, %v16250_v9  ;;  %v16254_v26 = vld [vmem:[#allocation107_spill] sm:$0xff]  ;;  %v3877_v62 = vadd.f32 %v7133_v3, %v3876_v27  ;;  %v2059_v34 = vsel %vm1514_vm5, 74.0, %v1950_v7  ;;  %v4896_v11 = vsel %vm9206_vm14, %v7455_v56, 0.0 }
 0x300   : > { %v1404_v54 = vsub.f32 %v16255_v15, %v16254_v26  ;;  %v6676_v49 = vadd.f32 -0.025, %v4502_v33  ;;  %7134 = vpow2.f32 %v5037_v29  ;;  %v6675_v13 = vadd.f32 -0.025, %v4501_v21  ;;  %v233_v24 = vld [vmem:[%s7632_s20 + $0x268] sm:$0xff] }
 0x301   : > { %v3881_v9 = vsel %vm11800_vm3, %v7133_v3, %v3877_v62  ;;  %v5035_v41 = vmul.f32 1.442695, %v4896_v11  ;;  %v11814_v44 = vmul.f32 3.0, %v1228_v51  ;;  %v16259_v29 = vfloor.f32 %v11694_v42  ;;  %v16260_v26 = vld [vmem:[#allocation111_spill] sm:$0xff] }
 0x302   : > { %vm1513_vm9 = vcmp.lt.f32.partialorder %v1404_v54, 0.5  ;;  %vm1622_vm4 = vcmp.lt.f32.partialorder %v1404_v54, 1.5  ;;  %v11818_v7 = vsel %vm11753_vm7, %v3885_v35, %v3881_v9  ;;  %v5878_v15 = vmul.f32 %v5456_v1, %v16260_v26  ;;  %v231_v35 = vld [vmem:[%s7632_s20 + $0x258] sm:$0xff]  ;;  %vm16262_vm7 = vmmov %vm16246_vm15 }
 0x303   : > { %16257 = vst [vmem:[#allocation89_spill] sm:$0xff] %v11814_v44  ;;  %v1731_v33 = vsel %vm1622_vm4, 78.0, %v15732_v43  ;;  %v1949_v27 = vsel %vm1622_vm4, 115.0, %v15733_v10  ;;  %v11827_v21 = vsel %vm2137_vm2, %v1228_v51, %v16259_v29  ;;  %5665 = vperm.xlu0 %6759, %v11818_v7   ;;  %v4720_v54 = vadd.f32 %v6676_v49, %v11744_v39  ;;  %v16263_v29 = vld [vmem:[#allocation108_spill] sm:$0xff]  ;;  %vm16264_vm15 = vmmov %vm16247_vm13 }
 0x304   : > { %16258 = vst [vmem:[#allocation98_spill] sm:$0xff] %v11818_v7  ;;  %v1840_v3 = vsel %vm1513_vm9, 102.0, %v1731_v33  ;;  %v2058_v17 = vsel %vm1513_vm9, 74.0, %v1949_v27  ;;  %v2279_v62 = vsel %vm2247_vm10, %v1841_v40, %v2059_v34  ;;  %v5988_v42 = vsel %vm16238_vm6, %v5879_v2, %v16256_v14  ;;  %vm16265_vm13 = vmmov %vm16249_vm8 }
 0x305   : > { %7136 = vpow2.f32 %v5035_v41  ;;  %v11839_v51 = vadd.f32 %v6675_v13, %v2211_v60  ;;  %v344_v56 = vadd.s32 616, %v7619_v4  ;;  %v6570_v11 = vmul.f32 -1.442695, %v233_v24  ;;  %vm16266_vm5 = vmmov %vm16262_vm7 }
 0x306   : > { %v1418_v1 = vsub.f32 %v9612_v12, %v9671_v45  ;;  %v7135_v9 = vpop.eup %7134  ;;  %v4500_v39 = vmul.f32 1.05, %v11818_v7  ;;  %v2278_v40 = vsel %vm2247_vm10, %v1840_v3, %v2058_v17  ;;  %v6569_v34 = vmul.f32 -1.442695, %v232_v20  ;;  %v7456_v45 = vld [vmem:[%s7632_s20 + $0x160] sm:$0xff]  ;;  %vm16268_vm1 = vmmov %vm16264_vm15 }
 0x307   : > { %v6568_v49 = vmul.f32 -1.442695, %v231_v35  ;;  %v5224_v33 = vmul.f32 %v7135_v9, %v2279_v62  ;;  %v5987_v60 = vsel %vm16261_vm12, %v5878_v15, %v16260_v26  ;;  %v454_v14 = vadd.s32 %v7625_v8, %v344_v56 }
 0x308   : > { %7138 = vpow2.f32 %v6570_v11  ;;  %v343_v2 = vadd.s32 608, %v7619_v4  ;;  %v342_v12 = vadd.s32 600, %v7619_v4  ;;  %v4910_v13 = vsel %vm9206_vm14, %v7456_v45, 0.0  ;;  %v16267_v45 = vld [vmem:[#allocation116_spill] sm:$0xff] }
 0x309   : > { %7140 = vpow2.f32 %v6569_v34  ;;  %v6099_v41 = vsel %vm16262_vm7, %v5224_v33, %v5988_v42  ;;  %v565_v27 = vcvt.s32.f32 %v454_v14  ;;  %vm1527_vm0 = vcmp.lt.f32.partialorder %v1418_v1, 0.5 }
 0x30a   : > { %7142 = vpow2.f32 %v6568_v49  ;;  %v6208_v3 = vsel %vm16264_vm15, %v16263_v29, %v6099_v41  ;;  %v453_v17 = vadd.s32 %v7625_v8, %v343_v2  ;;  %v11863_v26 = vadd.s32 %v7625_v8, %v342_v12  ;;  %vm16279_vm15 = vmmov %vm16266_vm5 }
 0x30b   : > { %v7137_v24 = vpop.eup %7136  ;;  %vm1636_vm11 = vcmp.lt.f32.partialorder %v1418_v1, 1.5  ;;  %6318 = vst.msk [vmem:[%s9279_s23 + $0xf8] sm:$0xff] %vm16265_vm13, %v6208_v3  ;;  %v11868_v20 = vmul.f32 %v7647_v32, %v565_v27  ;;  %v6674_v42 = vadd.f32 -0.025, %v4500_v39  ;;  %v5063_v14 = vmul.f32 1.442695, %v4910_v13  ;;  %v5526_v13 = vpop.permute.xlu2 %5525  ;;  %vm16280_vm13 = vmmov %vm16268_vm1 }
 0x30c   : > { %v5223_v15 = vmul.f32 %v7137_v24, %v2278_v40  ;;  %v1745_v35 = vsel %vm1636_vm11, 78.0, %v15732_v43  ;;  %v1963_v62 = vsel %vm1636_vm11, 115.0, %v15733_v10  ;;  %v564_v56 = vcvt.s32.f32 %v453_v17 }
 0x30d   : > { %v563_v11 = vcvt.s32.f32 %v11863_v26  ;;  %v1854_v9 = vsel %vm1527_vm0, 102.0, %v1745_v35  ;;  %v15335_v40 = vfloor.f32 %v11868_v20  ;;  %v2072_v33 = vsel %vm1527_vm0, 74.0, %v1963_v62  ;;  %v16269_v26 = vld [vmem:[#allocation115_spill] sm:$0xff] }
 0x30e   : > { %v7139_v34 = vpop.eup %7138  ;;  %v6098_v49 = vsel %vm16266_vm5, %v5223_v15, %v5987_v60  ;;  %v11878_v12 = vmul.f32 16.0, %v4720_v54  ;;  %v11886_v24 = vmul.f32 %v7647_v32, %v564_v56  ;;  %7144 = vpow2.f32 %v5063_v14  ;;  %v16270_v15 = vld [vmem:[#allocation109_spill] sm:$0xff] }
 0x30f   : > { %v7141_v2 = vpop.eup %7140  ;;  %v6207_v39 = vsel %vm16268_vm1, %v16267_v45, %v6098_v49  ;;  %v11883_v41 = vadd.f32 1.0, %v7139_v34  ;;  %v899_v1 = vmul.f32 114.0, %v15335_v40  ;;  %v11895_v54 = vmul.f32 %v7647_v32, %v563_v11  ;;  %vm16282_vm1 = vmmov %vm16249_vm8 }
 0x310   : > { %v7143_v29 = vpop.eup %7142  ;;  %6317 = vst.msk [vmem:[%s9279_s23 + $0xf0] sm:$0xff] %vm16249_vm8, %v6207_v39  ;;  %v11892_v60 = vadd.f32 1.0, %v7141_v2  ;;  %v4718_v3 = vadd.f32 %v6674_v42, %v11827_v21  ;;  %v2292_v17 = vsel %vm2247_vm10, %v1854_v9, %v2072_v33  ;;  %v11903_v35 = vsub.f32 %v16270_v15, %v16269_v26 }
 0x311   : > { %7146 = vrcp.f32 %v11883_v41  ;;  %v11905_v62 = vsub.f32 %v565_v27, %v899_v1  ;;  %v3957_v34 = vand.u32 2147483647, %v11883_v41  ;;  %v15334_v49 = vfloor.f32 %v11886_v24 }
 0x312   : > { %7148 = vrcp.f32 %v11892_v60  ;;  %v3959_v14 = vand.u32 2147483648, %v11883_v41  ;;  %v3942_v21 = vand.u32 2147483647, %v11892_v60  ;;  %v3944_v42 = vand.u32 2147483648, %v11892_v60 }
 0x313   : > { %v5892_v9 = vmul.f32 %v5526_v13, %v9722_v46  ;;  %v1124_v33 = vmul.f32 %v7680_v57, %v11905_v62  ;;  %v898_v27 = vmul.f32 114.0, %v15334_v49  ;;  %v15336_v2 = vfloor.f32 %v11895_v54 }
 0x314   : > { %v11919_v45 = vadd.f32 1.0, %v7143_v29  ;;  %v11922_v39 = vmul.f32 16.0, %v11839_v51  ;;  %v11924_v1 = vmul.f32 16.0, %v4718_v3  ;;  %vm3953_vm3 = vweird.f32 %v11883_v41  ;;  %v7145_v13 = vpop.eup %7144  ;;  %v16297_v3 = vld [vmem:[#allocation113_spill] sm:$0xff] }
 0x315   : > { %vm3938_vm9 = vweird.f32 %v11892_v60  ;;  %vm11928_vm4 = vcmp.eq.f32.partialorder %v3957_v34, 8.507059e+37  ;;  %v11932_v15 = vsub.f32 %v564_v56, %v898_v27  ;;  %v897_v29 = vmul.f32 114.0, %v15336_v2 }
 0x316   : > { %16271 = vst [vmem:[#allocation95_spill] sm:$0xff] %v11922_v39  ;;  %7150 = vrcp.f32 %v11919_v45  ;;  %v3960_v49 = vor.u32 1.1754944e-38, %v3959_v14  ;;  %vm11937_vm6 = vcmp.eq.f32.partialorder %v3942_v21, 8.507059e+37  ;;  %v5237_v40 = vmul.f32 %v7145_v13, %v2292_v17 }
 0x317   : > { %16272 = vst [vmem:[#allocation104_spill] sm:$0xff] %v11924_v1  ;;  %v7147_v51 = vpop.eup %7146  ;;  %v6001_v34 = vsel %vm16261_vm12, %v5892_v9, %v9722_v46  ;;  %v1233_v39 = vfloor.f32 %v1124_v33  ;;  %v3945_v27 = vor.u32 1.1754944e-38, %v3944_v42  ;;  %vm1517_vm7 = vcmp.lt.f32.partialorder %v11903_v35, 0.5 }
 0x318   : > { %16275 = vst [vmem:[#allocation103_spill] sm:$0xff] %v11932_v15  ;;  %v7149_v1 = vpop.eup %7148  ;;  %v3949_v56 = vmul.f32 %v7147_v51, %v11883_v41  ;;  %v1123_v2 = vmul.f32 %v7680_v57, %v11932_v15  ;;  %v11949_v21 = vsub.f32 %v563_v11, %v897_v29  ;;  %v3927_v17 = vand.u32 2147483647, %v11919_v45 }
 0x319   : > { %v3934_v14 = vmul.f32 %v7149_v1, %v11892_v60  ;;  %vm3954_vm0 = vweird.f32 %v7147_v51  ;;  %v3929_v46 = vand.u32 2147483648, %v11919_v45  ;;  %v6112_v9 = vsel %vm16279_vm15, %v5237_v40, %v6001_v34  ;;  %v5476_v34 = vpop.permute.xlu1 %5475 }
 0x31a   : > { %16278 = vst [vmem:[#allocation97_spill] sm:$0xff] %v11949_v21  ;;  %v3950_v13 = vsub.f32 1.0, %v3949_v56  ;;  %vm3939_vm11 = vweird.f32 %v7149_v1  ;;  %v1122_v33 = vmul.f32 %v7680_v57, %v11949_v21  ;;  %v6221_v11 = vsel %vm16280_vm13, %v9809_v61, %v6112_v9  ;;  %vm11973_vm8 = vmor %vm3953_vm3, %vm3954_vm0 }
 0x31b   : > { %v3935_v42 = vsub.f32 1.0, %v3934_v14  ;;  %v11960_v15 = vmul.f32 3.0, %v1233_v39  ;;  %v16281_v56 = vfloor.f32 %v11868_v20  ;;  %vm3923_vm5 = vweird.f32 %v11919_v45  ;;  %6331 = vst.msk [vmem:[%s9279_s23 + $0x160] sm:$0xff] %vm16282_vm1, %v6221_v11  ;;  %v7457_v20 = vld [vmem:[%s7632_s20 + $0x110] sm:$0xff]  ;;  %vm11984_vm15 = vmor %vm3938_vm9, %vm3939_vm11 }
 0x31c   : > { %v7151_v29 = vpop.eup %7150  ;;  %v3951_v40 = vmul.f32 %v7147_v51, %v3950_v13  ;;  %v1232_v61 = vfloor.f32 %v1123_v2  ;;  %vm1626_vm12 = vcmp.lt.f32.partialorder %v11903_v35, 1.5  ;;  %v1231_v41 = vfloor.f32 %v1122_v33 }
 0x31d   : > { %v11966_v7 = vsel %vm2137_vm2, %v1233_v39, %v16281_v56  ;;  %v3936_v9 = vmul.f32 %v7149_v1, %v3935_v42  ;;  %v4900_v39 = vsel %vm9206_vm14, %v7457_v20, 0.0  ;;  %v3919_v56 = vmul.f32 %v7151_v29, %v11919_v45 }
 0x31e   : > { %v3952_v13 = vadd.f32 %v7147_v51, %v3951_v40  ;;  %vm11989_vm3 = vcmp.eq.f32.partialorder %v3927_v17, 8.507059e+37  ;;  %vm3924_vm0 = vweird.f32 %v7151_v29  ;;  %v3930_v21 = vor.u32 1.1754944e-38, %v3929_v46 }
 0x31f   : > { %v3937_v42 = vadd.f32 %v7149_v1, %v3936_v9  ;;  %v5882_v20 = vmul.f32 %v5476_v34, %v16289_v18  ;;  %v3920_v60 = vsub.f32 1.0, %v3919_v56  ;;  %v1735_v44 = vsel %vm1626_vm12, 78.0, %v15732_v43  ;;  %vm12027_vm9 = vmor %vm3923_vm5, %vm3924_vm0 }
 0x320   : > { %v3956_v40 = vsel %vm11973_vm8, %v7147_v51, %v3952_v13  ;;  %v5043_v33 = vmul.f32 1.442695, %v4900_v39  ;;  %v12003_v5 = vmul.f32 3.0, %v1232_v61  ;;  %v1953_v51 = vsel %vm1626_vm12, 115.0, %v15733_v10  ;;  %v7458_v39 = vld [vmem:[%s7632_s20 + $0x108] sm:$0xff]  ;;  %vm16309_vm0 = vmmov %vm16282_vm1 }
 0x321   : > { %v12001_v17 = vsel %vm11928_vm4, %v3960_v49, %v3956_v40  ;;  %v3941_v46 = vsel %vm11984_vm15, %v7149_v1, %v3937_v42  ;;  %v16291_v34 = vfloor.f32 %v11886_v24  ;;  %v12021_v26 = vmul.f32 3.0, %v1231_v41  ;;  %v5471_v40 = vpop.permute.xlu0 %5470  ;;  %v16301_v1 = vld [vmem:[#allocation119_spill] sm:$0xff] }
 0x322   : > { %16290 = vst [vmem:[#allocation107_spill] sm:$0xff] %v12003_v5  ;;  %5690 = vperm.xlu2 %6761, %v12001_v17   ;;  %v12019_v49 = vsel %vm11937_vm6, %v3945_v27, %v3941_v46  ;;  %v3921_v9 = vmul.f32 %v7151_v29, %v3920_v60  ;;  %v1844_v24 = vsel %vm1517_vm7, 102.0, %v1735_v44  ;;  %7152 = vpow2.f32 %v5043_v33 }
 0x323   : > { %v12015_v14 = vsel %vm2137_vm2, %v1232_v61, %v16291_v34  ;;  %16292 = vst [vmem:[#allocation100_spill] sm:$0xff] %v12019_v49  ;;  %5685 = vperm.xlu1 %6760, %v12019_v49   ;;  %v16296_v61 = vld [vmem:[#allocation117_spill] sm:$0xff]  ;;  %v4899_v13 = vsel %vm9206_vm14, %v7458_v39, 0.0  ;;  %v4505_v11 = vmul.f32 1.05, %v12001_v17  ;;  %v2062_v45 = vsel %vm1517_vm7, 74.0, %v1953_v51 }
 0x324   : > { %16293 = vst [vmem:[#allocation102_spill] sm:$0xff] %v12021_v26  ;;  %v1407_v27 = vsub.f32 %v16297_v3, %v16296_v61  ;;  %v3922_v56 = vadd.f32 %v7151_v29, %v3921_v9  ;;  %v5041_v42 = vmul.f32 1.442695, %v4899_v13  ;;  %v4504_v44 = vmul.f32 1.05, %v12019_v49  ;;  %v236_v9 = vld [vmem:[%s7632_s20 + $0x280] sm:$0xff] }
 0x325   : > { %v347_v60 = vadd.s32 640, %v7619_v4  ;;  %v16298_v33 = vfloor.f32 %v11895_v54  ;;  %v2282_v3 = vsel %vm2247_vm10, %v1844_v24, %v2062_v45  ;;  %v235_v39 = vld [vmem:[%s7632_s20 + $0x278] sm:$0xff]  ;;  %v234_v13 = vld [vmem:[%s7632_s20 + $0x270] sm:$0xff]  ;;  %vm16300_vm7 = vcmp.ge.s32.totalorder %v7672_v53, 5 }
 0x326   : > { %vm1516_vm4 = vcmp.lt.f32.partialorder %v1407_v27, 0.5  ;;  %vm1625_vm6 = vcmp.lt.f32.partialorder %v1407_v27, 1.5  ;;  %v3926_v34 = vsel %vm12027_vm9, %v7151_v29, %v3922_v56  ;;  %v5991_v29 = vsel %vm16300_vm7, %v5882_v20, %v16289_v18  ;;  %vm16303_vm13 = vmmov %vm16300_vm7 }
 0x327   : > { %v2213_v46 = vsel %vm2137_vm2, %v1231_v41, %v16298_v33  ;;  %v1734_v35 = vsel %vm1625_vm6, 78.0, %v15732_v43  ;;  %v1952_v51 = vsel %vm1625_vm6, 115.0, %v15733_v10  ;;  %v12054_v61 = vsel %vm11989_vm3, %v3930_v21, %v3926_v34 }
 0x328   : > { %16299 = vst [vmem:[#allocation111_spill] sm:$0xff] %v12054_v61  ;;  %v1843_v27 = vsel %vm1516_vm4, 102.0, %v1734_v35  ;;  %v2061_v54 = vsel %vm1516_vm4, 74.0, %v1952_v51  ;;  %v6679_v41 = vadd.f32 -0.025, %v4505_v11  ;;  %5680 = vperm.xlu0 %6759, %v12054_v61   ;;  %7154 = vpow2.f32 %v5041_v42  ;;  %v7153_v2 = vpop.eup %7152 }
 0x329   : > { %v5881_v56 = vmul.f32 %v5471_v40, %v16301_v1  ;;  %v6678_v21 = vadd.f32 -0.025, %v4504_v44  ;;  %v4503_v33 = vmul.f32 1.05, %v12054_v61  ;;  %v457_v24 = vadd.s32 %v7625_v8, %v347_v60 }
 0x32a   : > { %v6573_v45 = vmul.f32 -1.442695, %v236_v9  ;;  %v5227_v34 = vmul.f32 %v7153_v2, %v2282_v3  ;;  %v2281_v11 = vsel %vm2247_vm10, %v1843_v27, %v2061_v54  ;;  %v6572_v35 = vmul.f32 -1.442695, %v235_v39  ;;  %v16304_v9 = vld [vmem:[#allocation121_spill] sm:$0xff] }
 0x32b   : > { %v6571_v51 = vmul.f32 -1.442695, %v234_v13  ;;  %v568_v26 = vcvt.s32.f32 %v457_v24  ;;  %v346_v18 = vadd.s32 632, %v7619_v4  ;;  %v1421_v20 = vsub.f32 %v9852_v38, %v9894_v25 }
 0x32c   : > { %7156 = vpow2.f32 %v6573_v45  ;;  %vm16302_vm11 = vcmp.lt.s32.totalorder %v7672_v53, 4  ;;  %v5990_v44 = vsel %vm16303_vm13, %v5881_v56, %v16301_v1  ;;  %v345_v40 = vadd.s32 624, %v7619_v4 }
 0x32d   : > { %v6102_v42 = vsel %vm16302_vm11, %v5227_v34, %v5991_v29  ;;  %7158 = vpow2.f32 %v6572_v35  ;;  %v6677_v60 = vadd.f32 -0.025, %v4503_v33  ;;  %vm16305_vm5 = vcmp.lt.s32.totalorder %v7672_v53, 2  ;;  %vm16306_vm15 = vmmov %vm16302_vm11 }
 0x32e   : > { %v6211_v3 = vsel %vm16305_vm5, %v16304_v9, %v6102_v42  ;;  %v12082_v27 = vmul.f32 %v7647_v32, %v568_v26  ;;  %v456_v38 = vadd.s32 %v7625_v8, %v346_v18  ;;  %v7155_v25 = vpop.eup %7154  ;;  %v12088_v54 = vadd.s32 %v7625_v8, %v345_v40  ;;  %vm16308_vm3 = vmmov %vm16305_vm5 }
 0x32f   : > { %6321 = vst.msk [vmem:[%s9279_s23 + $0x110] sm:$0xff] %vm16282_vm1, %v6211_v3  ;;  %7160 = vpow2.f32 %v6571_v51  ;;  %vm1530_vm8 = vcmp.lt.f32.partialorder %v1421_v20, 0.5  ;;  %vm1639_vm12 = vcmp.lt.f32.partialorder %v1421_v20, 1.5  ;;  %v5226_v39 = vmul.f32 %v7155_v25, %v2281_v11  ;;  %v7459_v51 = vld [vmem:[%s7632_s20 + $0x178] sm:$0xff] }
 0x330   : > { %v793_v13 = vfloor.f32 %v12082_v27  ;;  %v567_v29 = vcvt.s32.f32 %v456_v38  ;;  %v1748_v1 = vsel %vm1639_vm12, 78.0, %v15732_v43  ;;  %v4723_v56 = vadd.f32 %v6679_v41, %v11966_v7  ;;  %v16307_v41 = vld [vmem:[#allocation122_spill] sm:$0xff] }
 0x331   : > { %v4722_v2 = vadd.f32 %v6678_v21, %v12015_v14  ;;  %v566_v33 = vcvt.s32.f32 %v12088_v54  ;;  %v1966_v24 = vsel %vm1639_vm12, 115.0, %v15733_v10  ;;  %v6101_v34 = vsel %vm16306_vm15, %v5226_v39, %v5990_v44 }
 0x332   : > { %v7157_v45 = vpop.eup %7156  ;;  %v902_v35 = vmul.f32 114.0, %v793_v13  ;;  %v12099_v11 = vmul.f32 %v7647_v32, %v567_v29  ;;  %v4913_v18 = vsel %vm9206_vm14, %v7459_v51, 0.0  ;;  %v4721_v7 = vadd.f32 %v6677_v60, %v2213_v46 }
 0x333   : > { %v7159_v42 = vpop.eup %7158  ;;  %v6210_v14 = vsel %vm16308_vm3, %v16307_v41, %v6101_v34  ;;  %v2764_v21 = vadd.f32 1.0, %v7157_v45  ;;  %v1857_v40 = vsel %vm1530_vm8, 102.0, %v1748_v1  ;;  %v12116_v27 = vmul.f32 %v7647_v32, %v566_v33 }
 0x334   : > { %6320 = vst.msk [vmem:[%s9279_s23 + $0x108] sm:$0xff] %vm16309_vm0, %v6210_v14  ;;  %v12110_v44 = vsub.f32 %v568_v26, %v902_v35  ;;  %v15345_v9 = vfloor.f32 %v12099_v11  ;;  %v12113_v3 = vadd.f32 1.0, %v7159_v42  ;;  %v2075_v60 = vsel %vm1530_vm8, 74.0, %v1966_v24  ;;  %v5541_v42 = vpop.permute.xlu2 %5540 }
 0x335   : > { %v7161_v38 = vpop.eup %7160  ;;  %7162 = vrcp.f32 %v2764_v21  ;;  %v4002_v46 = vand.u32 2147483647, %v2764_v21  ;;  %v5069_v25 = vmul.f32 1.442695, %v4913_v18  ;;  %v4004_v39 = vand.u32 2147483648, %v2764_v21 }
 0x336   : > { %v1127_v54 = vmul.f32 %v7680_v57, %v12110_v44  ;;  %v901_v26 = vmul.f32 114.0, %v15345_v9  ;;  %7164 = vrcp.f32 %v12113_v3  ;;  %v12124_v1 = vmul.f32 16.0, %v4723_v56 }
 0x337   : > { %v12126_v45 = vmul.f32 16.0, %v4722_v2  ;;  %v3987_v34 = vand.u32 2147483647, %v12113_v3  ;;  %v3989_v35 = vand.u32 2147483648, %v12113_v3  ;;  %v15344_v51 = vfloor.f32 %v12116_v27 }
 0x338   : > { %v1236_v20 = vfloor.f32 %v1127_v54  ;;  %v12130_v24 = vsub.f32 %v567_v29, %v901_v26  ;;  %v12133_v18 = vadd.f32 1.0, %v7161_v38  ;;  %v12135_v41 = vmul.f32 16.0, %v4721_v7 }
 0x339   : > { %16310 = vst [vmem:[#allocation108_spill] sm:$0xff] %v12126_v45  ;;  %vm3998_vm9 = vweird.f32 %v2764_v21  ;;  %v2295_v56 = vsel %vm2247_vm10, %v1857_v40, %v2075_v60  ;;  %7166 = vpow2.f32 %v5069_v25  ;;  %vm12139_vm4 = vcmp.eq.f32.partialorder %v4002_v46, 8.507059e+37  ;;  %v7460_v45 = vld [vmem:[%s7632_s20 + $0x128] sm:$0xff] }
 0x33a   : > { %16311 = vst [vmem:[#allocation116_spill] sm:$0xff] %v12130_v24  ;;  %v4005_v14 = vor.u32 1.1754944e-38, %v4004_v39  ;;  %vm3983_vm6 = vweird.f32 %v12113_v3  ;;  %v900_v29 = vmul.f32 114.0, %v15344_v51  ;;  %vm12146_vm7 = vcmp.eq.f32.partialorder %v3987_v34, 8.507059e+37 }
 0x33b   : > { %16312 = vst [vmem:[#allocation115_spill] sm:$0xff] %v12135_v41  ;;  %v7163_v38 = vpop.eup %7162  ;;  %v3990_v7 = vor.u32 1.1754944e-38, %v3989_v35  ;;  %7168 = vrcp.f32 %v12133_v18  ;;  %v5895_v40 = vmul.f32 %v5541_v42, %v9933_v52  ;;  %v12152_v60 = vmul.f32 3.0, %v1236_v20 }
 0x33c   : > { %v7165_v46 = vpop.eup %7164  ;;  %v3994_v25 = vmul.f32 %v7163_v38, %v2764_v21  ;;  %v1126_v39 = vmul.f32 %v7680_v57, %v12130_v24  ;;  %v12156_v26 = vsub.f32 %v566_v33, %v900_v29  ;;  %v12160_v34 = vsel %vm2137_vm2, %v1236_v20, %v793_v13  ;;  %v16318_v13 = vld [vmem:[#allocation123_spill] sm:$0xff] }
 0x33d   : > { %v3979_v35 = vmul.f32 %v7165_v46, %v12113_v3  ;;  %vm3968_vm11 = vweird.f32 %v12133_v18  ;;  %v3972_v42 = vand.u32 2147483647, %v12133_v18  ;;  %vm3999_vm13 = vweird.f32 %v7163_v38 }
 0x33e   : > { %16317 = vst [vmem:[#allocation109_spill] sm:$0xff] %v12156_v26  ;;  %v3995_v51 = vsub.f32 1.0, %v3994_v25  ;;  %v12167_v9 = vmul.f32 %v7680_v57, %v12156_v26  ;;  %v3974_v41 = vand.u32 2147483648, %v12133_v18  ;;  %vm3984_vm5 = vweird.f32 %v7165_v46  ;;  %vm12179_vm8 = vmor %vm3998_vm9, %vm3999_vm13 }
 0x33f   : > { %v7167_v33 = vpop.eup %7166  ;;  %v3980_v29 = vsub.f32 1.0, %v3979_v35  ;;  %v1411_v20 = vsub.f32 %v16318_v13, %v9389_v37  ;;  %v4903_v24 = vsel %vm9206_vm14, %v7460_v45, 0.0  ;;  %v1235_v49 = vfloor.f32 %v1126_v39  ;;  %vm12190_vm3 = vmor %vm3983_vm6, %vm3984_vm5 }
 0x340   : > { %v3996_v61 = vmul.f32 %v7163_v38, %v3995_v51  ;;  %v5240_v25 = vmul.f32 %v7167_v33, %v2295_v56  ;;  %vm16319_vm1 = vcmp.ge.s32.totalorder %v7672_v53, 5  ;;  %vm12183_vm12 = vcmp.eq.f32.partialorder %v3972_v42, 8.507059e+37  ;;  %v5491_v33 = vpop.permute.xlu1 %5490 }
 0x341   : > { %v6004_v26 = vsel %vm16319_vm1, %v5895_v40, %v9933_v52  ;;  %v7169_v5 = vpop.eup %7168  ;;  %v3981_v35 = vmul.f32 %v7165_v46, %v3980_v29  ;;  %vm1629_vm15 = vcmp.lt.f32.partialorder %v1411_v20, 1.5  ;;  %v5049_v45 = vmul.f32 1.442695, %v4903_v24  ;;  %v7461_v52 = vld [vmem:[%s7632_s20 + $0x120] sm:$0xff] }
 0x342   : > { %v3997_v51 = vadd.f32 %v7163_v38, %v3996_v61  ;;  %v1234_v21 = vfloor.f32 %v12167_v9  ;;  %v3964_v56 = vmul.f32 %v7169_v5, %v12133_v18  ;;  %v3975_v40 = vor.u32 1.1754944e-38, %v3974_v41 }
 0x343   : > { %v3982_v39 = vadd.f32 %v7165_v46, %v3981_v35  ;;  %vm16326_vm0 = vcmp.lt.s32.totalorder %v7672_v53, 4  ;;  %vm1520_vm9 = vcmp.lt.f32.partialorder %v1411_v20, 0.5  ;;  %v1738_v61 = vsel %vm1629_vm15, 78.0, %v15732_v43 }
 0x344   : > { %v6115_v42 = vsel %vm16326_vm0, %v5240_v25, %v6004_v26  ;;  %v4001_v3 = vsel %vm12179_vm8, %v7163_v38, %v3997_v51  ;;  %v3965_v24 = vsub.f32 1.0, %v3964_v56  ;;  %vm3969_vm6 = vweird.f32 %v7169_v5  ;;  %vm16338_vm8 = vmmov %vm16326_vm0 }
 0x345   : > { %vm16327_vm13 = vcmp.lt.s32.totalorder %v7672_v53, 2  ;;  %v12207_v41 = vsel %vm12139_vm4, %v4005_v14, %v4001_v3  ;;  %v3986_v26 = vsel %vm12190_vm3, %v7165_v46, %v3982_v39  ;;  %vm16328_vm5 = vcmask 695296   ;;  %vm12229_vm4 = vmor %vm3968_vm11, %vm3969_vm6 }
 0x346   : > { %v6224_v9 = vsel %vm16327_vm13, %v10019_v58, %v6115_v42  ;;  %v1956_v63 = vsel %vm1629_vm15, 115.0, %v15733_v10  ;;  %7170 = vpow2.f32 %v5049_v45  ;;  %5705 = vperm.xlu2 %6761, %v12207_v41   ;;  %v12218_v58 = vsel %vm12146_vm7, %v3990_v7, %v3986_v26  ;;  %v16333_v7 = vld [vmem:[#allocation124_spill] sm:$0xff]  ;;  %vm16341_vm15 = vmmov %vm16328_vm5 }
 0x347   : > { %6334 = vst.msk [vmem:[%s9279_s23 + $0x178] sm:$0xff] %vm16328_vm5, %v6224_v9  ;;  %v3966_v38 = vmul.f32 %v7169_v5, %v3965_v24  ;;  %v1847_v2 = vsel %vm1520_vm9, 102.0, %v1738_v61  ;;  %v2065_v14 = vsel %vm1520_vm9, 74.0, %v1956_v63  ;;  %v4508_v46 = vmul.f32 1.05, %v12207_v41  ;;  %5700 = vperm.xlu1 %6760, %v12218_v58   ;;  %v239_v63 = vld [vmem:[%s7632_s20 + $0x298] sm:$0xff]  ;;  %vm16342_vm3 = vmmov %vm16319_vm1 }
 0x348   : > { %16329 = vst [vmem:[#allocation114_spill] sm:$0xff] %v12218_v58  ;;  %v12223_v29 = vmul.f32 3.0, %v1235_v49  ;;  %v5885_v54 = vmul.f32 %v5491_v33, %v9393_v19  ;;  %v1410_v25 = vsub.f32 %v16333_v7, %v9408_v28  ;;  %v16334_v20 = vfloor.f32 %v12099_v11  ;;  %v5486_v11 = vpop.permute.xlu0 %5485  ;;  %vm16345_vm6 = vmmov %vm16338_vm8 }
 0x349   : > { %v4507_v45 = vmul.f32 1.05, %v12218_v58  ;;  %v3967_v51 = vadd.f32 %v7169_v5, %v3966_v38  ;;  %v4902_v18 = vsel %vm9206_vm14, %v7461_v52, 0.0  ;;  %v12244_v56 = vmul.f32 3.0, %v1234_v21  ;;  %v238_v38 = vld [vmem:[%s7632_s20 + $0x290] sm:$0xff] }
 0x34a   : > { %16330 = vst [vmem:[#allocation117_spill] sm:$0xff] %v12223_v29  ;;  %v2217_v35 = vsel %vm2137_vm2, %v1235_v49, %v16334_v20  ;;  %v2285_v39 = vsel %vm2247_vm10, %v1847_v2, %v2065_v14  ;;  %vm1628_vm7 = vcmp.lt.f32.partialorder %v1410_v25, 1.5  ;;  %v5047_v28 = vmul.f32 1.442695, %v4902_v18 }
 0x34b   : > { %16335 = vst [vmem:[#allocation113_spill] sm:$0xff] %v12244_v56  ;;  %v3971_v49 = vsel %vm12229_vm4, %v7169_v5, %v3967_v51  ;;  %vm1519_vm11 = vcmp.lt.f32.partialorder %v1410_v25, 0.5  ;;  %v1737_v42 = vsel %vm1628_vm7, 78.0, %v15732_v43  ;;  %v1955_v61 = vsel %vm1628_vm7, 115.0, %v15733_v10  ;;  %v16340_v25 = vld [vmem:[#allocation7_spill] sm:$0xff]  ;;  %vm16352_vm7 = vmmov %vm16319_vm1 }
 0x34c   : > { %v7171_v3 = vpop.eup %7170  ;;  %v6682_v24 = vadd.f32 -0.025, %v4508_v46  ;;  %v16336_v9 = vfloor.f32 %v12116_v27  ;;  %v12258_v26 = vsel %vm12183_vm12, %v3975_v40, %v3971_v49  ;;  %v5994_v5 = vsel %vm16319_vm1, %v5885_v54, %v9393_v19  ;;  %vm16339_vm12 = vmmov %vm16327_vm13 }
 0x34d   : > { %16337 = vst [vmem:[#allocation119_spill] sm:$0xff] %v12258_v26  ;;  %v6681_v2 = vadd.f32 -0.025, %v4507_v45  ;;  %v4506_v14 = vmul.f32 1.05, %v12258_v26  ;;  %5695 = vperm.xlu0 %6759, %v12258_v26   ;;  %v5230_v46 = vmul.f32 %v7171_v3, %v2285_v39  ;;  %v5884_v27 = vmul.f32 %v5486_v11, %v9427_v48  ;;  %vm16347_vm13 = vmmov %vm16339_vm12 }
 0x34e   : > { %v2216_v33 = vsel %vm2137_vm2, %v1234_v21, %v16336_v9  ;;  %v237_v21 = vld [vmem:[%s7632_s20 + $0x288] sm:$0xff]  ;;  %v1846_v37 = vsel %vm1519_vm11, 102.0, %v1737_v42  ;;  %v2064_v40 = vsel %vm1519_vm11, 74.0, %v1955_v61  ;;  %7172 = vpow2.f32 %v5047_v28 }
 0x34f   : > { %v350_v13 = vadd.s32 664, %v7619_v4  ;;  %v6680_v19 = vadd.f32 -0.025, %v4506_v14  ;;  %v6105_v54 = vsel %vm16338_vm8, %v5230_v46, %v5994_v5  ;;  %v6576_v7 = vmul.f32 -1.442695, %v239_v63 }
 0x350   : > { %v6575_v20 = vmul.f32 -1.442695, %v238_v38  ;;  %v6214_v45 = vsel %vm16339_vm12, %v9477_v0, %v6105_v54  ;;  %v6574_v52 = vmul.f32 -1.442695, %v237_v21  ;;  %v1424_v18 = vsub.f32 %v16340_v25, %v10105_v23 }
 0x351   : > { %v460_v51 = vadd.s32 %v7625_v8, %v350_v13  ;;  %v4726_v39 = vadd.f32 %v6682_v24, %v12160_v34  ;;  %v4725_v28 = vadd.f32 %v6681_v2, %v2217_v35  ;;  %6324 = vst.msk [vmem:[%s9279_s23 + $0x128] sm:$0xff] %vm16341_vm15, %v6214_v45  ;;  %7174 = vpow2.f32 %v6576_v7  ;;  %v7462_v35 = vld [vmem:[%s7632_s20 + $0x190] sm:$0xff]  ;;  %v16346_v7 = vld [vmem:[#allocation127_spill] sm:$0xff] }
 0x352   : > { %v349_v11 = vadd.s32 656, %v7619_v4  ;;  %v2284_v49 = vsel %vm2247_vm10, %v1846_v37, %v2064_v40  ;;  %7176 = vpow2.f32 %v6575_v20  ;;  %v348_v0 = vadd.s32 648, %v7619_v4 }
 0x353   : > { %v571_v42 = vcvt.s32.f32 %v460_v51  ;;  %v4724_v61 = vadd.f32 %v6680_v19, %v2216_v33  ;;  %v5993_v23 = vsel %vm16342_vm3, %v5884_v27, %v9427_v48  ;;  %v4916_v3 = vsel %vm9206_vm14, %v7462_v35, 0.0  ;;  %v5556_v19 = vpop.permute.xlu2 %5555 }
 0x354   : > { %v459_v34 = vadd.s32 %v7625_v8, %v349_v11  ;;  %v7173_v24 = vpop.eup %7172  ;;  %v458_v5 = vadd.s32 %v7625_v8, %v348_v0  ;;  %7178 = vpow2.f32 %v6574_v52  ;;  %vm1642_vm0 = vcmp.lt.f32.partialorder %v1424_v18, 1.5 }
 0x355   : > { %v12295_v9 = vmul.f32 %v7647_v32, %v571_v42  ;;  %v12298_v63 = vmul.f32 16.0, %v4726_v39  ;;  %v12300_v33 = vmul.f32 16.0, %v4725_v28  ;;  %v5229_v38 = vmul.f32 %v7173_v24, %v2284_v49 }
 0x356   : > { %v570_v48 = vcvt.s32.f32 %v459_v34  ;;  %v569_v14 = vcvt.s32.f32 %v458_v5  ;;  %vm1533_vm9 = vcmp.lt.f32.partialorder %v1424_v18, 0.5  ;;  %v5075_v46 = vmul.f32 1.442695, %v4916_v3 }
 0x357   : > { %16343 = vst [vmem:[#allocation121_spill] sm:$0xff] %v12300_v33  ;;  %v15354_v2 = vfloor.f32 %v12295_v9  ;;  %v7175_v27 = vpop.eup %7174  ;;  %v12303_v21 = vmul.f32 16.0, %v4724_v61  ;;  %v6104_v37 = vsel %vm16345_vm6, %v5229_v38, %v5993_v23  ;;  %v1751_v13 = vsel %vm1642_vm0, 78.0, %v15732_v43  ;;  %v16348_v61 = vld [vmem:[#allocation13_spill] sm:$0xff] }
 0x358   : > { %v12308_v40 = vmul.f32 %v7647_v32, %v570_v48  ;;  %v7177_v54 = vpop.eup %7176  ;;  %v6213_v20 = vsel %vm16347_vm13, %v16346_v7, %v6104_v37  ;;  %v2767_v51 = vadd.f32 1.0, %v7175_v27  ;;  %v1969_v52 = vsel %vm1642_vm0, 115.0, %v15733_v10 }
 0x359   : > { %16344 = vst [vmem:[#allocation122_spill] sm:$0xff] %v12303_v21  ;;  %v905_v45 = vmul.f32 114.0, %v15354_v2  ;;  %v12322_v39 = vadd.f32 1.0, %v7177_v54  ;;  %v12325_v28 = vmul.f32 %v7647_v32, %v569_v14  ;;  %7180 = vpow2.f32 %v5075_v46 }
 0x35a   : > { %6323 = vst.msk [vmem:[%s9279_s23 + $0x120] sm:$0xff] %vm16328_vm5, %v6213_v20  ;;  %v15353_v25 = vfloor.f32 %v12308_v40  ;;  %v7179_v11 = vpop.eup %7178  ;;  %7182 = vrcp.f32 %v2767_v51  ;;  %v1860_v0 = vsel %vm1533_vm9, 102.0, %v1751_v13  ;;  %v5898_v23 = vmul.f32 %v5556_v19, %v16348_v61  ;;  %v16350_v13 = vld [vmem:[#allocation131_spill] sm:$0xff]  ;;  %v16351_v19 = vld [vmem:[#allocation126_spill] sm:$0xff] }
 0x35b   : > { %v12327_v49 = vsub.f32 %v571_v42, %v905_v45  ;;  %v4047_v34 = vand.u32 2147483647, %v2767_v51  ;;  %7184 = vrcp.f32 %v12322_v39  ;;  %v2078_v3 = vsel %vm1533_vm9, 74.0, %v1969_v52 }
 0x35c   : > { %v904_v35 = vmul.f32 114.0, %v15353_v25  ;;  %v4049_v5 = vand.u32 2147483648, %v2767_v51  ;;  %v4032_v42 = vand.u32 2147483647, %v12322_v39  ;;  %v4034_v38 = vand.u32 2147483648, %v12322_v39 }
 0x35d   : > { %v1130_v24 = vmul.f32 %v7680_v57, %v12327_v49  ;;  %v15352_v27 = vfloor.f32 %v12325_v28  ;;  %v12342_v37 = vadd.f32 1.0, %v7179_v11  ;;  %v12346_v54 = vsub.f32 %v16351_v19, %v16350_v13 }
 0x35e   : > { %v12339_v46 = vsub.f32 %v570_v48, %v904_v35  ;;  %vm4043_vm4 = vweird.f32 %v2767_v51  ;;  %v2298_v7 = vsel %vm2247_vm10, %v1860_v0, %v2078_v3  ;;  %v6007_v20 = vsel %vm16352_vm7, %v5898_v23, %v16348_v61 }
 0x35f   : > { %v1239_v18 = vfloor.f32 %v1130_v24  ;;  %v7181_v45 = vpop.eup %7180  ;;  %vm4028_vm11 = vweird.f32 %v12322_v39  ;;  %v903_v52 = vmul.f32 114.0, %v15352_v27  ;;  %7186 = vrcp.f32 %v12342_v37 }
 0x360   : > { %16349 = vst [vmem:[#allocation123_spill] sm:$0xff] %v12339_v46  ;;  %v12355_v48 = vmul.f32 %v7680_v57, %v12339_v46  ;;  %v7183_v11 = vpop.eup %7182  ;;  %vm12361_vm1 = vcmp.eq.f32.partialorder %v4047_v34, 8.507059e+37  ;;  %v4050_v0 = vor.u32 1.1754944e-38, %v4049_v5  ;;  %vm12365_vm8 = vcmp.eq.f32.partialorder %v4032_v42, 8.507059e+37 }
 0x361   : > { %v4035_v23 = vor.u32 1.1754944e-38, %v4034_v38  ;;  %v7185_v3 = vpop.eup %7184  ;;  %v4039_v24 = vmul.f32 %v7183_v11, %v2767_v51  ;;  %v12369_v13 = vsub.f32 %v569_v14, %v903_v52  ;;  %v4017_v19 = vand.u32 2147483647, %v12342_v37 }
 0x362   : > { %vm1523_vm12 = vcmp.lt.f32.partialorder %v12346_v54, 0.5  ;;  %v12373_v27 = vmul.f32 3.0, %v1239_v18  ;;  %v4024_v34 = vmul.f32 %v7185_v3, %v12322_v39  ;;  %vm4013_vm15 = vweird.f32 %v12342_v37 }
 0x363   : > { %16357 = vst [vmem:[#allocation124_spill] sm:$0xff] %v12369_v13  ;;  %v4019_v5 = vand.u32 2147483648, %v12342_v37  ;;  %v4040_v42 = vsub.f32 1.0, %v4039_v24  ;;  %vm4044_vm3 = vweird.f32 %v7183_v11  ;;  %v1238_v38 = vfloor.f32 %v12355_v48  ;;  %v7463_v48 = vld [vmem:[%s7632_s20 + $0x140] sm:$0xff] }
 0x364   : > { %vm4029_vm0 = vweird.f32 %v7185_v3  ;;  %v4025_v14 = vsub.f32 1.0, %v4024_v34  ;;  %v12381_v52 = vmul.f32 %v7680_v57, %v12369_v13  ;;  %v5243_v25 = vmul.f32 %v7181_v45, %v2298_v7  ;;  %vm12398_vm13 = vmor %vm4043_vm4, %vm4044_vm3 }
 0x365   : > { %vm1632_vm9 = vcmp.lt.f32.partialorder %v12346_v54, 1.5  ;;  %v7187_v2 = vpop.eup %7186  ;;  %v16358_v21 = vfloor.f32 %v12295_v9  ;;  %v4041_v24 = vmul.f32 %v7183_v11, %v4040_v42  ;;  %vm12390_vm6 = vcmp.eq.f32.partialorder %v4017_v19, 8.507059e+37  ;;  %vm12413_vm4 = vmor %vm4028_vm11, %vm4029_vm0 }
 0x366   : > { %v4906_v34 = vsel %vm9206_vm14, %v7463_v48, 0.0  ;;  %v4026_v9 = vmul.f32 %v7185_v3, %v4025_v14  ;;  %v4009_v45 = vmul.f32 %v7187_v2, %v12342_v37  ;;  %vm16363_vm5 = vcmp.lt.s32.totalorder %v7672_v53, 4  ;;  %v16367_v48 = vld [vmem:[#allocation47_spill] sm:$0xff] }
 0x367   : > { %v12388_v33 = vsel %vm2137_vm2, %v1239_v18, %v16358_v21  ;;  %v6118_v21 = vsel %vm16363_vm5, %v5243_v25, %v6007_v20  ;;  %v1741_v18 = vsel %vm1632_vm9, 78.0, %v15732_v43  ;;  %v4042_v19 = vadd.f32 %v7183_v11, %v4041_v24  ;;  %v5506_v24 = vpop.permute.xlu1 %5505 }
 0x368   : > { %v12408_v42 = vmul.f32 3.0, %v1238_v38  ;;  %v4020_v14 = vor.u32 1.1754944e-38, %v4019_v5  ;;  %vm16368_vm7 = vcmp.lt.s32.totalorder %v7672_v53, 2  ;;  %v4027_v25 = vadd.f32 %v7185_v3, %v4026_v9 }
 0x369   : > { %v6227_v13 = vsel %vm16368_vm7, %v16367_v48, %v6118_v21  ;;  %v15361_v20 = vfloor.f32 %v12381_v52  ;;  %v4010_v26 = vsub.f32 1.0, %v4009_v45  ;;  %vm4014_vm3 = vweird.f32 %v7187_v2  ;;  %v16371_v21 = vld [vmem:[#allocation133_spill] sm:$0xff]  ;;  %vm16384_vm0 = vmmov %vm16368_vm7 }
 0x36a   : > { %16364 = vst [vmem:[#allocation7_spill] sm:$0xff] %v12408_v42  ;;  %vm16369_vm5 = vcmask 695296   ;;  %v4046_v39 = vsel %vm12398_vm13, %v7183_v11, %v4042_v19  ;;  %v1850_v42 = vsel %vm1523_vm12, 102.0, %v1741_v18  ;;  %v1959_v5 = vsel %vm1632_vm9, 115.0, %v15733_v10  ;;  %v16372_v48 = vld [vmem:[#allocation129_spill] sm:$0xff]  ;;  %vm12446_vm11 = vmor %vm4013_vm15, %vm4014_vm3 }
 0x36b   : > { %6337 = vst.msk [vmem:[%s9279_s23 + $0x190] sm:$0xff] %vm16369_vm5, %v6227_v13  ;;  %v5055_v58 = vmul.f32 1.442695, %v4906_v34  ;;  %v12432_v9 = vsel %vm12361_vm1, %v4050_v0, %v4046_v39  ;;  %v4031_v45 = vsel %vm12413_vm4, %v7185_v3, %v4027_v25  ;;  %v4011_v13 = vmul.f32 %v7187_v2, %v4010_v26  ;;  %v16376_v26 = vld [vmem:[#allocation128_spill] sm:$0xff]  ;;  %v7464_v19 = vld [vmem:[%s7632_s20 + $0x138] sm:$0xff]  ;;  %vm16385_vm9 = vmmov %vm16369_vm5 }
 0x36c   : > { %16370 = vst [vmem:[#allocation127_spill] sm:$0xff] %v12432_v9  ;;  %v1413_v11 = vsub.f32 %v16372_v48, %v16371_v21  ;;  %v4511_v7 = vmul.f32 1.05, %v12432_v9  ;;  %5720 = vperm.xlu2 %6761, %v12432_v9   ;;  %v12442_v18 = vsel %vm12365_vm8, %v4035_v23, %v4031_v45  ;;  %v5888_v0 = vmul.f32 %v5506_v24, %v16376_v26  ;;  %v242_v39 = vld [vmem:[%s7632_s20 + $0x2b0] sm:$0xff]  ;;  %v5501_v48 = vpop.permute.xlu0 %5500  ;;  %vm16396_vm7 = vmmov %vm16384_vm0 }
 0x36d   : > { %16373 = vst [vmem:[#allocation13_spill] sm:$0xff] %v12442_v18  ;;  %7188 = vpow2.f32 %v5055_v58  ;;  %v4510_v3 = vmul.f32 1.05, %v12442_v18  ;;  %5715 = vperm.xlu1 %6760, %v12442_v18   ;;  %v4012_v34 = vadd.f32 %v7187_v2, %v4011_v13  ;;  %v2068_v61 = vsel %vm1523_vm12, 74.0, %v1959_v5  ;;  %v241_v5 = vld [vmem:[%s7632_s20 + $0x2a8] sm:$0xff]  ;;  %vm16397_vm3 = vmmov %vm16369_vm5 }
 0x36e   : > { %vm1631_vm1 = vcmp.lt.f32.partialorder %v1413_v11, 1.5  ;;  %v16377_v37 = vfloor.f32 %v12308_v40  ;;  %vm1522_vm8 = vcmp.lt.f32.partialorder %v1413_v11, 0.5  ;;  %v4905_v51 = vsel %vm9206_vm14, %v7464_v19, 0.0 }
 0x36f   : > { %v1740_v58 = vsel %vm1631_vm1, 78.0, %v15732_v43  ;;  %v6685_v25 = vadd.f32 -0.025, %v4511_v7  ;;  %v16378_v24 = vfloor.f32 %v12325_v28  ;;  %v4016_v40 = vsel %vm12446_vm11, %v7187_v2, %v4012_v34  ;;  %v240_v7 = vld [vmem:[%s7632_s20 + $0x2a0] sm:$0xff] }
 0x370   : > { %v2220_v23 = vsel %vm2137_vm2, %v1238_v38, %v16377_v37  ;;  %v1958_v38 = vsel %vm1631_vm1, 115.0, %v15733_v10  ;;  %v12476_v45 = vsel %vm12390_vm6, %v4020_v14, %v4016_v40  ;;  %v2288_v13 = vsel %vm2247_vm10, %v1850_v42, %v2068_v61 }
 0x371   : > { %v2219_v54 = vsel %vm2137_vm2, %v15361_v20, %v16378_v24  ;;  %16379 = vst [vmem:[#allocation131_spill] sm:$0xff] %v12476_v45  ;;  %vm16380_vm12 = vcmp.ge.s32.totalorder %v7672_v53, 5  ;;  %v5053_v21 = vmul.f32 1.442695, %v4905_v51  ;;  %v6684_v35 = vadd.f32 -0.025, %v4510_v3  ;;  %5710 = vperm.xlu0 %6759, %v12476_v45  }
 0x372   : > { %v5997_v28 = vsel %vm16380_vm12, %v5888_v0, %v16376_v26  ;;  %v4509_v2 = vmul.f32 1.05, %v12476_v45  ;;  %v1849_v34 = vsel %vm1522_vm8, 102.0, %v1740_v58  ;;  %v353_v46 = vadd.s32 688, %v7619_v4  ;;  %v16381_v3 = vld [vmem:[#allocation130_spill] sm:$0xff]  ;;  %vm16390_vm6 = vmmov %vm16380_vm12 }
 0x373   : > { %v7189_v14 = vpop.eup %7188  ;;  %v2067_v37 = vsel %vm1522_vm8, 74.0, %v1958_v38  ;;  %7190 = vpow2.f32 %v5053_v21  ;;  %v6579_v42 = vmul.f32 -1.442695, %v242_v39  ;;  %v6578_v61 = vmul.f32 -1.442695, %v241_v5  ;;  %v16383_v39 = vld [vmem:[#allocation132_spill] sm:$0xff] }
 0x374   : > { %v4729_v26 = vadd.f32 %v6685_v25, %v12388_v33  ;;  %v6683_v0 = vadd.f32 -0.025, %v4509_v2  ;;  %v5233_v19 = vmul.f32 %v7189_v14, %v2288_v13  ;;  %v5887_v51 = vmul.f32 %v5501_v48, %v16381_v3  ;;  %v16387_v48 = vld [vmem:[#allocation11_spill] sm:$0xff] }
 0x375   : > { %v463_v24 = vadd.s32 %v7625_v8, %v353_v46  ;;  %7192 = vpow2.f32 %v6579_v42  ;;  %v352_v58 = vadd.s32 680, %v7619_v4  ;;  %v6577_v40 = vmul.f32 -1.442695, %v240_v7 }
 0x376   : > { %v4728_v20 = vadd.f32 %v6684_v35, %v2220_v23  ;;  %vm16382_vm15 = vcmp.lt.s32.totalorder %v7672_v53, 4  ;;  %7194 = vpow2.f32 %v6578_v61  ;;  %v351_v38 = vadd.s32 672, %v7619_v4 }
 0x377   : > { %v6108_v11 = vsel %vm16382_vm15, %v5233_v19, %v5997_v28  ;;  %v2287_v25 = vsel %vm2247_vm10, %v1849_v34, %v2067_v37  ;;  %v574_v5 = vcvt.s32.f32 %v463_v24  ;;  %v462_v13 = vadd.s32 %v7625_v8, %v352_v58  ;;  %v16386_v28 = vld [vmem:[#allocation45_spill] sm:$0xff]  ;;  %vm16394_vm4 = vmmov %vm16382_vm15 }
 0x378   : > { %v6217_v33 = vsel %vm16384_vm0, %v16383_v39, %v6108_v11  ;;  %v4727_v21 = vadd.f32 %v6683_v0, %v2219_v54  ;;  %v12505_v23 = vadd.s32 %v7625_v8, %v351_v38  ;;  %7196 = vpow2.f32 %v6577_v40  ;;  %v16395_v38 = vld [vmem:[#allocation134_spill] sm:$0xff] }
 0x379   : > { %6327 = vst.msk [vmem:[%s9279_s23 + $0x140] sm:$0xff] %vm16385_vm9, %v6217_v33  ;;  %v1427_v7 = vsub.f32 %v16387_v48, %v16386_v28  ;;  %v7191_v35 = vpop.eup %7190  ;;  %v16388_v2 = vfloor.f32 %v12381_v52  ;;  %v5996_v34 = vsel %vm16390_vm6, %v5887_v51, %v16381_v3  ;;  %v12517_v54 = vmul.f32 %v7647_v32, %v574_v5  ;;  %v7465_v3 = vld [vmem:[%s7632_s20 + $0x1a8] sm:$0xff] }
 0x37a   : > { %v573_v14 = vcvt.s32.f32 %v462_v13  ;;  %v12519_v37 = vmul.f32 16.0, %v4729_v26  ;;  %v12521_v42 = vmul.f32 16.0, %v4728_v20  ;;  %v5232_v61 = vmul.f32 %v7191_v35, %v2287_v25 }
 0x37b   : > { %v12511_v46 = vmul.f32 3.0, %v16388_v2  ;;  %v15363_v0 = vcvt.s32.f32 %v12505_v23  ;;  %v7193_v19 = vpop.eup %7192  ;;  %v799_v52 = vfloor.f32 %v12517_v54  ;;  %vm1645_vm13 = vcmp.lt.f32.partialorder %v1427_v7, 1.5  ;;  %v5571_v54 = vpop.permute.xlu2 %5570 }
 0x37c   : > { %16391 = vst [vmem:[#allocation47_spill] sm:$0xff] %v12519_v37  ;;  %v12526_v24 = vmul.f32 %v7647_v32, %v573_v14  ;;  %v4919_v51 = vsel %vm9206_vm14, %v7465_v3, 0.0  ;;  %v7195_v58 = vpop.eup %7194  ;;  %v12531_v26 = vmul.f32 16.0, %v4727_v21  ;;  %v6107_v20 = vsel %vm16394_vm4, %v5232_v61, %v5996_v34 }
 0x37d   : > { %16389 = vst [vmem:[#allocation126_spill] sm:$0xff] %v12511_v46  ;;  %v2770_v40 = vadd.f32 1.0, %v7193_v19  ;;  %v12538_v11 = vmul.f32 %v7647_v32, %v15363_v0  ;;  %v6216_v39 = vsel %vm16396_vm7, %v16395_v38, %v6107_v20  ;;  %v908_v33 = vmul.f32 114.0, %v799_v52 }
 0x37e   : > { %16392 = vst [vmem:[#allocation133_spill] sm:$0xff] %v12521_v42  ;;  %v15362_v25 = vfloor.f32 %v12526_v24  ;;  %v12544_v13 = vadd.f32 1.0, %v7195_v58  ;;  %v7197_v21 = vpop.eup %7196  ;;  %vm1536_vm5 = vcmp.lt.f32.partialorder %v1427_v7, 0.5  ;;  %v1754_v28 = vsel %vm1645_vm13, 78.0, %v15732_v43 }
 0x37f   : > { %16393 = vst [vmem:[#allocation129_spill] sm:$0xff] %v12531_v26  ;;  %7198 = vrcp.f32 %v2770_v40  ;;  %v5081_v48 = vmul.f32 1.442695, %v4919_v51  ;;  %v12550_v35 = vsub.f32 %v574_v5, %v908_v33  ;;  %v1972_v34 = vsel %vm1645_vm13, 115.0, %v15733_v10  ;;  %v16400_v33 = vld [vmem:[#allocation16_spill] sm:$0xff] }
 0x380   : > { %6326 = vst.msk [vmem:[%s9279_s23 + $0x138] sm:$0xff] %vm16397_vm3, %v6216_v39  ;;  %v907_v2 = vmul.f32 114.0, %v15362_v25  ;;  %7200 = vrcp.f32 %v12544_v13  ;;  %v4092_v61 = vand.u32 2147483647, %v2770_v40  ;;  %v4094_v19 = vand.u32 2147483648, %v2770_v40 }
 0x381   : > { %16398 = vst [vmem:[#allocation128_spill] sm:$0xff] %v12550_v35  ;;  %v4077_v3 = vand.u32 2147483647, %v12544_v13  ;;  %v4079_v58 = vand.u32 2147483648, %v12544_v13  ;;  %v1133_v51 = vmul.f32 %v7680_v57, %v12550_v35  ;;  %v12564_v38 = vadd.f32 1.0, %v7197_v21  ;;  %v16410_v35 = vld [vmem:[#allocation135_spill] sm:$0xff] }
 0x382   : > { %v12561_v5 = vsub.f32 %v573_v14, %v907_v2  ;;  %vm4088_vm11 = vweird.f32 %v2770_v40  ;;  %v1863_v39 = vsel %vm1536_vm5, 102.0, %v1754_v28  ;;  %7202 = vpow2.f32 %v5081_v48 }
 0x383   : > { %v5901_v25 = vmul.f32 %v5571_v54, %v16400_v33  ;;  %v1242_v0 = vfloor.f32 %v1133_v51  ;;  %7204 = vrcp.f32 %v12564_v38  ;;  %v2081_v14 = vsel %vm1536_vm5, 74.0, %v1972_v34 }
 0x384   : > { %16399 = vst [vmem:[#allocation130_spill] sm:$0xff] %v12561_v5  ;;  %v12570_v26 = vmul.f32 %v7680_v57, %v12561_v5  ;;  %vm12574_vm1 = vcmp.eq.f32.partialorder %v4092_v61, 8.507059e+37  ;;  %v4095_v21 = vor.u32 1.1754944e-38, %v4094_v19  ;;  %vm4073_vm8 = vweird.f32 %v12544_v13 }
 0x385   : > { %v7199_v2 = vpop.eup %7198  ;;  %vm12579_vm12 = vcmp.eq.f32.partialorder %v4077_v3, 8.507059e+37  ;;  %v4080_v51 = vor.u32 1.1754944e-38, %v4079_v58  ;;  %v16405_v42 = vfloor.f32 %v12538_v11  ;;  %vm4058_vm15 = vweird.f32 %v12564_v38 }
 0x386   : > { %v7201_v48 = vpop.eup %7200  ;;  %v4084_v54 = vmul.f32 %v7199_v2, %v2770_v40  ;;  %v4062_v34 = vand.u32 2147483647, %v12564_v38  ;;  %v4064_v61 = vand.u32 2147483648, %v12564_v38  ;;  %v2301_v19 = vsel %vm2247_vm10, %v1863_v39, %v2081_v14 }
 0x387   : > { %v906_v5 = vmul.f32 114.0, %v16405_v42  ;;  %v4069_v7 = vmul.f32 %v7201_v48, %v12544_v13  ;;  %v12591_v3 = vmul.f32 3.0, %v1242_v0  ;;  %vm4089_vm0 = vweird.f32 %v7199_v2  ;;  %v16419_v13 = vld [vmem:[#allocation25_spill] sm:$0xff] }
 0x388   : > { %v4085_v45 = vsub.f32 1.0, %v4084_v54  ;;  %v1241_v58 = vfloor.f32 %v12570_v26  ;;  %v7203_v46 = vpop.eup %7202  ;;  %v12596_v42 = vsel %vm2137_vm2, %v1242_v0, %v799_v52  ;;  %vm4074_vm9 = vweird.f32 %v7201_v48  ;;  %v16409_v26 = vld [vmem:[#allocation138_spill] sm:$0xff]  ;;  %vm12608_vm13 = vmor %vm4088_vm11, %vm4089_vm0 }
 0x389   : > { %16406 = vst [vmem:[#allocation132_spill] sm:$0xff] %v12591_v3  ;;  %v4070_v18 = vsub.f32 1.0, %v4069_v7  ;;  %v6010_v56 = vsel %vm16390_vm6, %v5901_v25, %v16400_v33  ;;  %v7205_v29 = vpop.eup %7204  ;;  %v16407_v39 = vcvt.s32.f32 %v12505_v23  ;;  %v5246_v54 = vmul.f32 %v7203_v46, %v2301_v19  ;;  %vm12621_vm7 = vmor %vm4073_vm8, %vm4074_vm9  ;;  %v7466_v33 = vld [vmem:[%s7632_s20 + $0x158] sm:$0xff] }
 0x38a   : > { %v4086_v37 = vmul.f32 %v7199_v2, %v4085_v45  ;;  %v1417_v3 = vsub.f32 %v16410_v35, %v16409_v26  ;;  %v4054_v7 = vmul.f32 %v7205_v29, %v12564_v38  ;;  %vm12613_vm4 = vcmp.eq.f32.partialorder %v4062_v34, 8.507059e+37  ;;  %v5521_v26 = vpop.permute.xlu1 %5520  ;;  %v16427_v46 = vld [vmem:[#allocation137_spill] sm:$0xff] }
 0x38b   : > { %v12603_v14 = vsub.f32 %v16407_v39, %v906_v5  ;;  %v4071_v52 = vmul.f32 %v7201_v48, %v4070_v18  ;;  %v4065_v45 = vor.u32 1.1754944e-38, %v4064_v61  ;;  %v12617_v5 = vmul.f32 3.0, %v1241_v58 }
 0x38c   : > { %v4087_v23 = vadd.f32 %v7199_v2, %v4086_v37  ;;  %vm16418_vm3 = vcmp.lt.s32.totalorder %v7672_v53, 4  ;;  %vm1635_vm5 = vcmp.lt.f32.partialorder %v1417_v3, 1.5  ;;  %v4055_v35 = vsub.f32 1.0, %v4054_v7 }
 0x38d   : > { %16408 = vst [vmem:[#allocation45_spill] sm:$0xff] %v12603_v14  ;;  %v6121_v18 = vsel %vm16418_vm3, %v5246_v54, %v6010_v56  ;;  %v4072_v40 = vadd.f32 %v7201_v48, %v4071_v52  ;;  %vm4059_vm11 = vweird.f32 %v7205_v29  ;;  %v4909_v37 = vsel %vm9206_vm14, %v7466_v33, 0.0 }
 0x38e   : > { %16415 = vst [vmem:[#allocation11_spill] sm:$0xff] %v12617_v5  ;;  %v4091_v34 = vsel %vm12608_vm13, %v7199_v2, %v4087_v23  ;;  %vm16420_vm8 = vcmp.lt.s32.totalorder %v7672_v53, 2  ;;  %vm1526_vm0 = vcmp.lt.f32.partialorder %v1417_v3, 0.5  ;;  %v1744_v19 = vsel %vm1635_vm5, 78.0, %v15732_v43  ;;  %vm16435_vm13 = vmmov %vm16418_vm3 }
 0x38f   : > { %v6230_v61 = vsel %vm16420_vm8, %v16419_v13, %v6121_v18  ;;  %v12639_v56 = vsel %vm12574_vm1, %v4095_v21, %v4091_v34  ;;  %v4076_v39 = vsel %vm12621_vm7, %v7201_v48, %v4072_v40  ;;  %v12645_v54 = vmul.f32 %v7680_v57, %v12603_v14  ;;  %vm12658_vm1 = vmor %vm4058_vm15, %vm4059_vm11  ;;  %v16428_v40 = vld [vmem:[#allocation140_spill] sm:$0xff]  ;;  %v5516_v21 = vpop.permute.xlu0 %5515 }
 0x390   : > { %16421 = vst [vmem:[#allocation134_spill] sm:$0xff] %v12639_v56  ;;  %v4056_v2 = vmul.f32 %v7205_v29, %v4055_v35  ;;  %vm16422_vm9 = vcmask 695296   ;;  %v4514_v0 = vmul.f32 1.05, %v12639_v56  ;;  %5735 = vperm.xlu2 %6761, %v12639_v56   ;;  %v12653_v20 = vsel %vm12579_vm12, %v4080_v51, %v4076_v39  ;;  %v16429_v35 = vld [vmem:[#allocation136_spill] sm:$0xff]  ;;  %vm16438_vm7 = vmmov %vm16390_vm6 }
 0x391   : > { %6340 = vst.msk [vmem:[%s9279_s23 + $0x1a8] sm:$0xff] %vm16422_vm9, %v6230_v61  ;;  %v1962_v48 = vsel %vm1635_vm5, 115.0, %v15733_v10  ;;  %v5061_v52 = vmul.f32 1.442695, %v4909_v37  ;;  %v16426_v7 = vfloor.f32 %v12526_v24  ;;  %v4513_v28 = vmul.f32 1.05, %v12653_v20  ;;  %5730 = vperm.xlu1 %6760, %v12653_v20   ;;  %vm16439_vm3 = vmmov %vm16422_vm9 }
 0x392   : > { %16423 = vst [vmem:[#allocation16_spill] sm:$0xff] %v12653_v20  ;;  %v4057_v51 = vadd.f32 %v7205_v29, %v4056_v2  ;;  %v1853_v38 = vsel %vm1526_vm0, 102.0, %v1744_v19  ;;  %v5891_v18 = vmul.f32 %v5521_v26, %v16427_v46  ;;  %v1416_v33 = vsub.f32 %v16429_v35, %v16428_v40  ;;  %v7467_v37 = vld [vmem:[%s7632_s20 + $0x150] sm:$0xff]  ;;  %v245_v2 = vld [vmem:[%s7632_s20 + $0x2c8] sm:$0xff]  ;;  %v244_v26 = vld [vmem:[%s7632_s20 + $0x2c0] sm:$0xff] }
 0x393   : > { %v2223_v23 = vsel %vm2137_vm2, %v1241_v58, %v16426_v7  ;;  %7206 = vpow2.f32 %v5061_v52  ;;  %v4908_v24 = vsel %vm9206_vm14, %v7467_v37, 0.0  ;;  %v6688_v58 = vadd.f32 -0.025, %v4514_v0  ;;  %v243_v7 = vld [vmem:[%s7632_s20 + $0x2b8] sm:$0xff]  ;;  %v16432_v37 = vld [vmem:[#allocation139_spill] sm:$0xff]  ;;  %vm16447_vm9 = vmmov %vm16439_vm3 }
 0x394   : > { %v4061_v34 = vsel %vm12658_vm1, %v7205_v29, %v4057_v51  ;;  %v2071_v13 = vsel %vm1526_vm0, 74.0, %v1962_v48  ;;  %v5059_v61 = vmul.f32 1.442695, %v4908_v24  ;;  %v1240_v39 = vfloor.f32 %v12645_v54 }
 0x395   : > { %v12683_v19 = vsel %vm12613_vm4, %v4065_v45, %v4061_v34  ;;  %vm1525_vm12 = vcmp.lt.f32.partialorder %v1416_v33, 0.5  ;;  %vm1634_vm15 = vcmp.lt.f32.partialorder %v1416_v33, 1.5  ;;  %v6687_v52 = vadd.f32 -0.025, %v4513_v28  ;;  %vm16437_vm4 = vmmov %vm16420_vm8 }
 0x396   : > { %16430 = vst [vmem:[#allocation138_spill] sm:$0xff] %v12683_v19  ;;  %v4512_v0 = vmul.f32 1.05, %v12683_v19  ;;  %5725 = vperm.xlu0 %6759, %v12683_v19   ;;  %v1743_v29 = vsel %vm1634_vm15, 78.0, %v15732_v43  ;;  %v1961_v3 = vsel %vm1634_vm15, 115.0, %v15733_v10  ;;  %v16431_v54 = vfloor.f32 %v12538_v11  ;;  %vm16441_vm8 = vmmov %vm16435_vm13 }
 0x397   : > { %v2291_v45 = vsel %vm2247_vm10, %v1853_v38, %v2071_v13  ;;  %v6000_v48 = vsel %vm16390_vm6, %v5891_v18, %v16427_v46  ;;  %7208 = vpow2.f32 %v5059_v61  ;;  %v4732_v28 = vadd.f32 %v6688_v58, %v12596_v42  ;;  %v16433_v18 = vld [vmem:[#allocation57_spill] sm:$0xff]  ;;  %v16434_v61 = vld [vmem:[#allocation19_spill] sm:$0xff]  ;;  %vm16443_vm0 = vmmov %vm16437_vm4 }
 0x398   : > { %v2222_v25 = vsel %vm2137_vm2, %v1240_v39, %v16431_v54  ;;  %v6686_v51 = vadd.f32 -0.025, %v4512_v0  ;;  %v1852_v40 = vsel %vm1525_vm12, 102.0, %v1743_v29  ;;  %v2070_v35 = vsel %vm1525_vm12, 74.0, %v1961_v3 }
 0x399   : > { %v7207_v11 = vpop.eup %7206  ;;  %v5890_v24 = vmul.f32 %v5516_v21, %v16432_v37  ;;  %v356_v34 = vadd.s32 712, %v7619_v4  ;;  %v6582_v54 = vmul.f32 -1.442695, %v245_v2  ;;  %v6581_v38 = vmul.f32 -1.442695, %v244_v26 }
 0x39a   : > { %v4731_v13 = vadd.f32 %v6687_v52, %v2223_v23  ;;  %v5236_v19 = vmul.f32 %v7207_v11, %v2291_v45  ;;  %v6580_v46 = vmul.f32 -1.442695, %v243_v7  ;;  %v1430_v20 = vsub.f32 %v16434_v61, %v16433_v18  ;;  %v16436_v52 = vld [vmem:[#allocation23_spill] sm:$0xff] }
 0x39b   : > { %v2290_v42 = vsel %vm2247_vm10, %v1852_v40, %v2070_v35  ;;  %v466_v33 = vadd.s32 %v7625_v8, %v356_v34  ;;  %7210 = vpow2.f32 %v6582_v54  ;;  %v355_v58 = vadd.s32 704, %v7619_v4 }
 0x39c   : > { %v4730_v0 = vadd.f32 %v6686_v51, %v2222_v25  ;;  %v6111_v2 = vsel %vm16435_vm13, %v5236_v19, %v6000_v48  ;;  %7212 = vpow2.f32 %v6581_v38  ;;  %v354_v23 = vadd.s32 696, %v7619_v4 }
 0x39d   : > { %v7209_v26 = vpop.eup %7208  ;;  %v6220_v29 = vsel %vm16437_vm4, %v16436_v52, %v6111_v2  ;;  %v5999_v3 = vsel %vm16438_vm7, %v5890_v24, %v16432_v37  ;;  %v577_v21 = vcvt.s32.f32 %v466_v33  ;;  %v465_v45 = vadd.s32 %v7625_v8, %v355_v58  ;;  %v7468_v37 = vld [vmem:[%s7632_s20 + $0x1c0] sm:$0xff]  ;;  %vm16457_vm4 = vmmov %vm16438_vm7 }
 0x39e   : > { %6330 = vst.msk [vmem:[%s9279_s23 + $0x158] sm:$0xff] %vm16439_vm3, %v6220_v29  ;;  %v5235_v25 = vmul.f32 %v7209_v26, %v2290_v42  ;;  %v12725_v19 = vadd.s32 %v7625_v8, %v354_v23  ;;  %7214 = vpow2.f32 %v6580_v46  ;;  %vm1648_vm5 = vcmp.lt.f32.partialorder %v1430_v20, 1.5  ;;  %v5586_v23 = vpop.permute.xlu2 %5585 }
 0x39f   : > { %v12727_v48 = vmul.f32 3.0, %v1240_v39  ;;  %v12730_v7 = vmul.f32 %v7647_v32, %v577_v21  ;;  %v576_v51 = vcvt.s32.f32 %v465_v45  ;;  %vm1539_vm11 = vcmp.lt.f32.partialorder %v1430_v20, 0.5  ;;  %v16442_v39 = vld [vmem:[#allocation141_spill] sm:$0xff] }
 0x3a0   : > { %v6110_v40 = vsel %vm16441_vm8, %v5235_v25, %v5999_v3  ;;  %v575_v35 = vcvt.s32.f32 %v12725_v19  ;;  %v1757_v11 = vsel %vm1648_vm5, 78.0, %v15732_v43  ;;  %v4922_v24 = vsel %vm9206_vm14, %v7468_v37, 0.0 }
 0x3a1   : > { %16440 = vst [vmem:[#allocation135_spill] sm:$0xff] %v12727_v48  ;;  %v7211_v34 = vpop.eup %7210  ;;  %v6219_v54 = vsel %vm16443_vm0, %v16442_v39, %v6110_v40  ;;  %v15374_v38 = vfloor.f32 %v12730_v7  ;;  %v12744_v46 = vmul.f32 %v7647_v32, %v576_v51  ;;  %v1975_v18 = vsel %vm1648_vm5, 115.0, %v15733_v10  ;;  %v16449_v40 = vld [vmem:[#allocation26_spill] sm:$0xff] }
 0x3a2   : > { %v7213_v61 = vpop.eup %7212  ;;  %v12747_v42 = vmul.f32 16.0, %v4732_v28  ;;  %v12749_v33 = vmul.f32 16.0, %v4731_v13  ;;  %v12751_v58 = vmul.f32 16.0, %v4730_v0  ;;  %6329 = vst.msk [vmem:[%s9279_s23 + $0x150] sm:$0xff] %vm16447_vm9, %v6219_v54  ;;  %v2773_v2 = vadd.f32 1.0, %v7211_v34 }
 0x3a3   : > { %v911_v26 = vmul.f32 114.0, %v15374_v38  ;;  %v15375_v52 = vfloor.f32 %v12744_v46  ;;  %v2772_v29 = vadd.f32 1.0, %v7213_v61  ;;  %v12759_v3 = vmul.f32 %v7647_v32, %v575_v35 }
 0x3a4   : > { %16444 = vst [vmem:[#allocation25_spill] sm:$0xff] %v12747_v42  ;;  %v7215_v45 = vpop.eup %7214  ;;  %7216 = vrcp.f32 %v2773_v2  ;;  %v1866_v28 = vsel %vm1539_vm11, 102.0, %v1757_v11  ;;  %v2084_v13 = vsel %vm1539_vm11, 74.0, %v1975_v18  ;;  %v5087_v0 = vmul.f32 1.442695, %v4922_v24  ;;  %v16451_v24 = vld [vmem:[#allocation2_spill] sm:$0xff] }
 0x3a5   : > { %16445 = vst [vmem:[#allocation137_spill] sm:$0xff] %v12749_v33  ;;  %v12763_v25 = vsub.f32 %v577_v21, %v911_v26  ;;  %v910_v19 = vmul.f32 114.0, %v15375_v52  ;;  %7218 = vrcp.f32 %v2772_v29  ;;  %v5904_v37 = vmul.f32 %v5586_v23, %v16449_v40  ;;  %v16452_v18 = vld [vmem:[#allocation30_spill] sm:$0xff] }
 0x3a6   : > { %16446 = vst [vmem:[#allocation140_spill] sm:$0xff] %v12751_v58  ;;  %v4137_v34 = vand.u32 2147483647, %v2773_v2  ;;  %v4139_v39 = vand.u32 2147483648, %v2773_v2  ;;  %v4122_v54 = vand.u32 2147483647, %v2772_v29  ;;  %v15376_v20 = vfloor.f32 %v12759_v3 }
 0x3a7   : > { %16448 = vst [vmem:[#allocation136_spill] sm:$0xff] %v12763_v25  ;;  %v4124_v61 = vand.u32 2147483648, %v2772_v29  ;;  %v1136_v38 = vmul.f32 %v7680_v57, %v12763_v25  ;;  %v12770_v58 = vsub.f32 %v576_v51, %v910_v19  ;;  %v12773_v11 = vadd.f32 1.0, %v7215_v45  ;;  %v5536_v25 = vpop.permute.xlu1 %5535 }
 0x3a8   : > { %vm4133_vm1 = vweird.f32 %v2773_v2  ;;  %v2304_v21 = vsel %vm2247_vm10, %v1866_v28, %v2084_v13  ;;  %7220 = vpow2.f32 %v5087_v0  ;;  %v12779_v23 = vsub.f32 %v16452_v18, %v16451_v24 }
 0x3a9   : > { %16450 = vst [vmem:[#allocation139_spill] sm:$0xff] %v12770_v58  ;;  %v12783_v26 = vmul.f32 %v7680_v57, %v12770_v58  ;;  %vm4118_vm12 = vweird.f32 %v2772_v29  ;;  %v909_v51 = vmul.f32 114.0, %v15376_v20  ;;  %7222 = vrcp.f32 %v12773_v11 }
 0x3aa   : > { %v7217_v45 = vpop.eup %7216  ;;  %v1245_v19 = vfloor.f32 %v1136_v38  ;;  %vm12788_vm15 = vcmp.eq.f32.partialorder %v4137_v34, 8.507059e+37  ;;  %v4140_v28 = vor.u32 1.1754944e-38, %v4139_v39  ;;  %vm12792_vm6 = vcmp.eq.f32.partialorder %v4122_v54, 8.507059e+37 }
 0x3ab   : > { %v7219_v0 = vpop.eup %7218  ;;  %v4129_v24 = vmul.f32 %v7217_v45, %v2773_v2  ;;  %v4125_v18 = vor.u32 1.1754944e-38, %v4124_v61  ;;  %vm4103_vm13 = vweird.f32 %v12773_v11  ;;  %v6013_v20 = vsel %vm16457_vm4, %v5904_v37, %v16449_v40 }
 0x3ac   : > { %v4114_v33 = vmul.f32 %v7219_v0, %v2772_v29  ;;  %v12800_v38 = vsub.f32 %v575_v35, %v909_v51  ;;  %v4107_v34 = vand.u32 2147483647, %v12773_v11  ;;  %v4109_v39 = vand.u32 2147483648, %v12773_v11 }
 0x3ad   : > { %v4130_v54 = vsub.f32 1.0, %v4129_v24  ;;  %vm4134_vm7 = vweird.f32 %v7217_v45  ;;  %v1244_v58 = vfloor.f32 %v12783_v26  ;;  %vm1529_vm3 = vcmp.lt.f32.partialorder %v12779_v23, 0.5 }
 0x3ae   : > { %16458 = vst [vmem:[#allocation57_spill] sm:$0xff] %v12800_v38  ;;  %v7221_v61 = vpop.eup %7220  ;;  %v12806_v14 = vmul.f32 3.0, %v1245_v19  ;;  %v4115_v48 = vsub.f32 1.0, %v4114_v33  ;;  %vm4119_vm5 = vweird.f32 %v7219_v0  ;;  %vm1638_vm11 = vcmp.lt.f32.partialorder %v12779_v23, 1.5  ;;  %vm12818_vm8 = vmor %vm4133_vm1, %vm4134_vm7 }
 0x3af   : > { %v7223_v40 = vpop.eup %7222  ;;  %v16460_v35 = vfloor.f32 %v12730_v7  ;;  %v4131_v51 = vmul.f32 %v7217_v45, %v4130_v54  ;;  %v1134_v26 = vmul.f32 %v7680_v57, %v12800_v38  ;;  %v5249_v24 = vmul.f32 %v7221_v61, %v2304_v21  ;;  %vm12830_vm9 = vmor %vm4118_vm12, %vm4119_vm5  ;;  %v16469_v38 = vld [vmem:[#allocation70_spill] sm:$0xff]  ;;  %v5531_v7 = vpop.permute.xlu0 %5530 }
 0x3b0   : > { %16459 = vst [vmem:[#allocation19_spill] sm:$0xff] %v12806_v14  ;;  %v4116_v33 = vmul.f32 %v7219_v0, %v4115_v48  ;;  %v4099_v42 = vmul.f32 %v7223_v40, %v12773_v11  ;;  %vm12823_vm0 = vcmp.eq.f32.partialorder %v4107_v34, 8.507059e+37  ;;  %v12827_v54 = vmul.f32 3.0, %v1244_v58 }
 0x3b1   : > { %v12813_v37 = vsel %vm2137_vm2, %v1245_v19, %v16460_v35  ;;  %v4110_v19 = vor.u32 1.1754944e-38, %v4109_v39  ;;  %v4132_v35 = vadd.f32 %v7217_v45, %v4131_v51  ;;  %vm16468_vm1 = vcmp.lt.s32.totalorder %v7672_v53, 4 }
 0x3b2   : > { %16465 = vst [vmem:[#allocation23_spill] sm:$0xff] %v12827_v54  ;;  %v6124_v48 = vsel %vm16468_vm1, %v5249_v24, %v6013_v20  ;;  %v1747_v2 = vsel %vm1638_vm11, 78.0, %v15732_v43  ;;  %v4117_v34 = vadd.f32 %v7219_v0, %v4116_v33  ;;  %v4100_v61 = vsub.f32 1.0, %v4099_v42  ;;  %v7469_v20 = vld [vmem:[%s7632_s20 + $0x170] sm:$0xff]  ;;  %vm16485_vm5 = vmmov %vm16468_vm1 }
 0x3b3   : > { %vm4104_vm4 = vweird.f32 %v7223_v40  ;;  %v1965_v39 = vsel %vm1638_vm11, 115.0, %v15733_v10  ;;  %v4136_v29 = vsel %vm12818_vm8, %v7217_v45, %v4132_v35  ;;  %v1243_v51 = vfloor.f32 %v1134_v26  ;;  %v16477_v26 = vld [vmem:[#allocation5_spill] sm:$0xff] }
 0x3b4   : > { %vm16470_vm12 = vcmp.lt.s32.totalorder %v7672_v53, 2  ;;  %v4912_v24 = vsel %vm9206_vm14, %v7469_v20, 0.0  ;;  %v12852_v42 = vsel %vm12788_vm15, %v4140_v28, %v4136_v29  ;;  %v4121_v33 = vsel %vm12830_vm9, %v7219_v0, %v4117_v34  ;;  %vm12867_vm15 = vmor %vm4103_vm13, %vm4104_vm4  ;;  %v16476_v0 = vld [vmem:[#allocation3_spill] sm:$0xff] }
 0x3b5   : > { %v6233_v54 = vsel %vm16470_vm12, %v16469_v38, %v6124_v48  ;;  %16471 = vst [vmem:[#allocation141_spill] sm:$0xff] %v12852_v42  ;;  %v4101_v14 = vmul.f32 %v7223_v40, %v4100_v61  ;;  %vm16472_vm7 = vcmask 695296   ;;  %v5067_v5 = vmul.f32 1.442695, %v4912_v24  ;;  %5750 = vperm.xlu2 %6761, %v12852_v42   ;;  %v7470_v48 = vld [vmem:[%s7632_s20 + $0x168] sm:$0xff]  ;;  %vm16489_vm11 = vmmov %vm16470_vm12 }
 0x3b6   : > { %6343 = vst.msk [vmem:[%s9279_s23 + $0x1c0] sm:$0xff] %vm16472_vm7, %v6233_v54  ;;  %v4517_v45 = vmul.f32 1.05, %v12852_v42  ;;  %v12862_v38 = vsel %vm12792_vm6, %v4125_v18, %v4121_v33  ;;  %v1856_v28 = vsel %vm1529_vm3, 102.0, %v1747_v2  ;;  %v1419_v35 = vsub.f32 %v16477_v26, %v16476_v0  ;;  %v16478_v18 = vld [vmem:[#allocation6_spill] sm:$0xff]  ;;  %vm16490_vm8 = vmmov %vm16472_vm7 }
 0x3b7   : > { %16473 = vst [vmem:[#allocation26_spill] sm:$0xff] %v12862_v38  ;;  %5745 = vperm.xlu1 %6760, %v12862_v38   ;;  %v4102_v54 = vadd.f32 %v7223_v40, %v4101_v14  ;;  %v2074_v13 = vsel %vm1529_vm3, 74.0, %v1965_v39  ;;  %7224 = vpow2.f32 %v5067_v5  ;;  %v5894_v11 = vmul.f32 %v5536_v25, %v16478_v18  ;;  %v248_v39 = vld [vmem:[%s7632_s20 + $0x2e0] sm:$0xff]  ;;  %v247_v5 = vld [vmem:[%s7632_s20 + $0x2d8] sm:$0xff]  ;;  %vm16493_vm4 = vmmov %vm16485_vm5 }
 0x3b8   : > { %v4516_v21 = vmul.f32 1.05, %v12862_v38  ;;  %vm1528_vm6 = vcmp.lt.f32.partialorder %v1419_v35, 0.5  ;;  %vm1637_vm13 = vcmp.lt.f32.partialorder %v1419_v35, 1.5  ;;  %v4911_v2 = vsel %vm9206_vm14, %v7470_v48, 0.0  ;;  %vm16495_vm12 = vmmov %vm16489_vm11 }
 0x3b9   : > { %v6691_v34 = vadd.f32 -0.025, %v4517_v45  ;;  %v4106_v61 = vsel %vm12867_vm15, %v7223_v40, %v4102_v54  ;;  %v1746_v14 = vsel %vm1637_vm13, 78.0, %v15732_v43  ;;  %v1964_v23 = vsel %vm1637_vm13, 115.0, %v15733_v10 }
 0x3ba   : > { %v16479_v29 = vfloor.f32 %v12744_v46  ;;  %v12892_v20 = vmul.f32 3.0, %v1243_v51  ;;  %v16481_v24 = vfloor.f32 %v12759_v3  ;;  %v12900_v40 = vsel %vm12823_vm0, %v4110_v19, %v4106_v61 }
 0x3bb   : > { %16482 = vst [vmem:[#allocation30_spill] sm:$0xff] %v12900_v40  ;;  %5740 = vperm.xlu0 %6759, %v12900_v40   ;;  %v2294_v46 = vsel %vm2247_vm10, %v1856_v28, %v2074_v13  ;;  %v2073_v45 = vsel %vm1528_vm6, 74.0, %v1964_v23  ;;  %v5065_v52 = vmul.f32 1.442695, %v4911_v2  ;;  %v6690_v3 = vadd.f32 -0.025, %v4516_v21 }
 0x3bc   : > { %v2226_v25 = vsel %vm2137_vm2, %v1244_v58, %v16479_v29  ;;  %16480 = vst [vmem:[#allocation2_spill] sm:$0xff] %v12892_v20  ;;  %v2225_v33 = vsel %vm2137_vm2, %v1243_v51, %v16481_v24  ;;  %v1855_v58 = vsel %vm1528_vm6, 102.0, %v1746_v14  ;;  %vm16483_vm3 = vcmp.ge.s32.totalorder %v7672_v53, 5  ;;  %v246_v13 = vld [vmem:[%s7632_s20 + $0x2d0] sm:$0xff]  ;;  %v16487_v29 = vld [vmem:[#allocation34_spill] sm:$0xff] }
 0x3bd   : > { %v6003_v51 = vsel %vm16483_vm3, %v5894_v11, %v16478_v18  ;;  %v359_v19 = vadd.s32 736, %v7619_v4  ;;  %v6585_v0 = vmul.f32 -1.442695, %v248_v39  ;;  %v7225_v26 = vpop.eup %7224  ;;  %v4735_v54 = vadd.f32 %v6691_v34, %v12813_v37  ;;  %v16484_v18 = vld [vmem:[#allocation8_spill] sm:$0xff]  ;;  %v16486_v39 = vld [vmem:[#allocation69_spill] sm:$0xff]  ;;  %vm16491_vm9 = vmmov %vm16483_vm3 }
 0x3be   : > { %v4515_v48 = vmul.f32 1.05, %v12900_v40  ;;  %7226 = vpow2.f32 %v5065_v52  ;;  %v6584_v28 = vmul.f32 -1.442695, %v247_v5  ;;  %v5239_v35 = vmul.f32 %v7225_v26, %v2294_v46  ;;  %v16488_v46 = vld [vmem:[#allocation4_spill] sm:$0xff]  ;;  %v16505_v40 = vld [vmem:[#allocation42_spill] sm:$0xff] }
 0x3bf   : > { %v2293_v21 = vsel %vm2247_vm10, %v1855_v58, %v2073_v45  ;;  %v469_v2 = vadd.s32 %v7625_v8, %v359_v19  ;;  %7228 = vpow2.f32 %v6585_v0  ;;  %v5893_v11 = vmul.f32 %v5531_v7, %v16484_v18 }
 0x3c0   : > { %v358_v61 = vadd.s32 728, %v7619_v4  ;;  %7230 = vpow2.f32 %v6584_v28  ;;  %v357_v37 = vadd.s32 720, %v7619_v4  ;;  %v6114_v34 = vsel %vm16485_vm5, %v5239_v35, %v6003_v51 }
 0x3c1   : > { %v580_v14 = vcvt.s32.f32 %v469_v2  ;;  %v6583_v23 = vmul.f32 -1.442695, %v246_v13  ;;  %v1433_v24 = vsub.f32 %v16487_v29, %v16486_v39  ;;  %v6689_v5 = vadd.f32 -0.025, %v4515_v48 }
 0x3c2   : > { %v6223_v58 = vsel %vm16489_vm11, %v16488_v46, %v6114_v34  ;;  %v468_v45 = vadd.s32 %v7625_v8, %v358_v61  ;;  %v12930_v52 = vadd.s32 %v7625_v8, %v357_v37  ;;  %v4734_v7 = vadd.f32 %v6690_v3, %v2226_v25 }
 0x3c3   : > { %6333 = vst.msk [vmem:[%s9279_s23 + $0x170] sm:$0xff] %vm16490_vm8, %v6223_v58  ;;  %v12935_v51 = vmul.f32 %v7647_v32, %v580_v14  ;;  %7232 = vpow2.f32 %v6583_v23  ;;  %vm1651_vm0 = vcmp.lt.f32.partialorder %v1433_v24, 1.5  ;;  %v6002_v0 = vsel %vm16491_vm9, %v5893_v11, %v16484_v18 }
 0x3c4   : > { %v7227_v19 = vpop.eup %7226  ;;  %v579_v26 = vcvt.s32.f32 %v468_v45  ;;  %v578_v48 = vcvt.s32.f32 %v12930_v52  ;;  %vm1542_vm1 = vcmp.lt.f32.partialorder %v1433_v24, 0.5  ;;  %v1760_v3 = vsel %vm1651_vm0, 78.0, %v15732_v43 }
 0x3c5   : > { %v7229_v28 = vpop.eup %7228  ;;  %v5238_v13 = vmul.f32 %v7227_v19, %v2293_v21  ;;  %v15382_v25 = vfloor.f32 %v12935_v51  ;;  %v1978_v35 = vsel %vm1651_vm0, 115.0, %v15733_v10  ;;  %v12944_v61 = vmul.f32 16.0, %v4735_v54  ;;  %v16494_v54 = vld [vmem:[#allocation35_spill] sm:$0xff] }
 0x3c6   : > { %v7231_v2 = vpop.eup %7230  ;;  %v4733_v37 = vadd.f32 %v6689_v5, %v2225_v33  ;;  %v12946_v34 = vadd.f32 1.0, %v7229_v28  ;;  %v12949_v18 = vmul.f32 %v7647_v32, %v579_v26  ;;  %v12958_v39 = vmul.f32 %v7647_v32, %v578_v48 }
 0x3c7   : > { %16492 = vst [vmem:[#allocation70_spill] sm:$0xff] %v12944_v61  ;;  %v6113_v11 = vsel %vm16493_vm4, %v5238_v13, %v6002_v0  ;;  %v914_v21 = vmul.f32 114.0, %v15382_v25  ;;  %v12955_v23 = vadd.f32 1.0, %v7231_v2  ;;  %v1869_v29 = vsel %vm1542_vm1, 102.0, %v1760_v3  ;;  %v7471_v13 = vld [vmem:[%s7632_s20 + $0x1d8] sm:$0xff] }
 0x3c8   : > { %v6222_v33 = vsel %vm16495_vm12, %v16494_v54, %v6113_v11  ;;  %7234 = vrcp.f32 %v12946_v34  ;;  %v2087_v5 = vsel %vm1542_vm1, 74.0, %v1978_v35  ;;  %v4182_v45 = vand.u32 2147483647, %v12946_v34  ;;  %v16508_v61 = vld [vmem:[#allocation37_spill] sm:$0xff] }
 0x3c9   : > { %v7233_v46 = vpop.eup %7232  ;;  %6332 = vst.msk [vmem:[%s9279_s23 + $0x168] sm:$0xff] %vm16472_vm7, %v6222_v33  ;;  %v12968_v58 = vsub.f32 %v580_v14, %v914_v21  ;;  %v15381_v52 = vfloor.f32 %v12949_v18  ;;  %7236 = vrcp.f32 %v12955_v23  ;;  %v12973_v19 = vmul.f32 16.0, %v4734_v7 }
 0x3ca   : > { %v4184_v0 = vand.u32 2147483648, %v12946_v34  ;;  %v4167_v28 = vand.u32 2147483647, %v12955_v23  ;;  %v4925_v24 = vsel %vm9206_vm14, %v7471_v13, 0.0  ;;  %v4169_v35 = vand.u32 2147483648, %v12955_v23 }
 0x3cb   : > { %16496 = vst [vmem:[#allocation3_spill] sm:$0xff] %v12968_v58  ;;  %v1139_v14 = vmul.f32 %v7680_v57, %v12968_v58  ;;  %v913_v3 = vmul.f32 114.0, %v15381_v52  ;;  %v15383_v2 = vfloor.f32 %v12958_v39  ;;  %v12986_v7 = vmul.f32 16.0, %v4733_v37 }
 0x3cc   : > { %16497 = vst [vmem:[#allocation5_spill] sm:$0xff] %v12973_v19  ;;  %vm4178_vm15 = vweird.f32 %v12946_v34  ;;  %v12989_v11 = vadd.f32 1.0, %v7233_v46  ;;  %v2307_v21 = vsel %vm2247_vm10, %v1869_v29, %v2087_v5  ;;  %vm12993_vm6 = vcmp.eq.f32.partialorder %v4182_v45, 8.507059e+37  ;;  %v5601_v29 = vpop.permute.xlu2 %5600 }
 0x3cd   : > { %16498 = vst [vmem:[#allocation6_spill] sm:$0xff] %v12986_v7  ;;  %v12997_v33 = vsub.f32 %v579_v26, %v913_v3  ;;  %v912_v13 = vmul.f32 114.0, %v15383_v2  ;;  %v5093_v52 = vmul.f32 1.442695, %v4925_v24  ;;  %v4185_v37 = vor.u32 1.1754944e-38, %v4184_v0 }
 0x3ce   : > { %v7235_v25 = vpop.eup %7234  ;;  %vm4163_vm13 = vweird.f32 %v12955_v23  ;;  %vm13002_vm3 = vcmp.eq.f32.partialorder %v4167_v28, 8.507059e+37  ;;  %7238 = vrcp.f32 %v12989_v11  ;;  %v1248_v45 = vfloor.f32 %v1139_v14 }
 0x3cf   : > { %16501 = vst [vmem:[#allocation8_spill] sm:$0xff] %v12997_v33  ;;  %v7237_v5 = vpop.eup %7236  ;;  %v4174_v26 = vmul.f32 %v7235_v25, %v12946_v34  ;;  %v4170_v3 = vor.u32 1.1754944e-38, %v4169_v35  ;;  %v4152_v7 = vand.u32 2147483647, %v12989_v11  ;;  %v1138_v24 = vmul.f32 %v7680_v57, %v12997_v33 }
 0x3d0   : > { %v4159_v0 = vmul.f32 %v7237_v5, %v12955_v23  ;;  %v13012_v2 = vsub.f32 %v578_v48, %v912_v13  ;;  %v4154_v28 = vand.u32 2147483648, %v12989_v11  ;;  %vm4179_vm5 = vweird.f32 %v7235_v25  ;;  %v16507_v13 = vld [vmem:[#allocation9_spill] sm:$0xff] }
 0x3d1   : > { %v4175_v19 = vsub.f32 1.0, %v4174_v26  ;;  %7240 = vpow2.f32 %v5093_v52  ;;  %v5907_v20 = vmul.f32 %v5601_v29, %v16505_v40  ;;  %v1247_v14 = vfloor.f32 %v1138_v24  ;;  %v5551_v26 = vpop.permute.xlu1 %5550  ;;  %vm13031_vm0 = vmor %vm4178_vm15, %vm4179_vm5 }
 0x3d2   : > { %16504 = vst [vmem:[#allocation69_spill] sm:$0xff] %v13012_v2  ;;  %v4160_v38 = vsub.f32 1.0, %v4159_v0  ;;  %vm4164_vm11 = vweird.f32 %v7237_v5  ;;  %vm4148_vm8 = vweird.f32 %v12989_v11  ;;  %v13017_v35 = vmul.f32 3.0, %v1248_v45 }
 0x3d3   : > { %v4176_v33 = vmul.f32 %v7235_v25, %v4175_v19  ;;  %v1137_v48 = vmul.f32 %v7680_v57, %v13012_v2  ;;  %v1423_v58 = vsub.f32 %v16508_v61, %v16507_v13  ;;  %v16509_v52 = vfloor.f32 %v12935_v51  ;;  %vm13041_vm1 = vmor %vm4163_vm13, %vm4164_vm11  ;;  %v16528_v51 = vld [vmem:[#allocation14_spill] sm:$0xff] }
 0x3d4   : > { %16506 = vst [vmem:[#allocation34_spill] sm:$0xff] %v13017_v35  ;;  %v7239_v42 = vpop.eup %7238  ;;  %v4161_v19 = vmul.f32 %v7237_v5, %v4160_v38  ;;  %vm13035_vm9 = vcmp.eq.f32.partialorder %v4152_v7, 8.507059e+37  ;;  %v4155_v61 = vor.u32 1.1754944e-38, %v4154_v28  ;;  %vm16516_vm4 = vcmp.ge.s32.totalorder %v7672_v53, 5 }
 0x3d5   : > { %v13027_v29 = vsel %vm2137_vm2, %v1248_v45, %v16509_v52  ;;  %v4177_v13 = vadd.f32 %v7235_v25, %v4176_v33  ;;  %v4144_v45 = vmul.f32 %v7239_v42, %v12989_v11  ;;  %v6016_v34 = vsel %vm16516_vm4, %v5907_v20, %v16505_v40  ;;  %v7472_v52 = vld [vmem:[%s7632_s20 + $0x188] sm:$0xff]  ;;  %v16518_v33 = vld [vmem:[#allocation41_spill] sm:$0xff]  ;;  %v16525_v11 = vld [vmem:[#allocation82_spill] sm:$0xff] }
 0x3d6   : > { %v4915_v38 = vsel %vm9206_vm14, %v7472_v52, 0.0  ;;  %v13052_v7 = vmul.f32 3.0, %v1247_v14  ;;  %v4162_v28 = vadd.f32 %v7237_v5, %v4161_v19  ;;  %vm1641_vm12 = vcmp.lt.f32.partialorder %v1423_v58, 1.5 }
 0x3d7   : > { %v5897_v23 = vmul.f32 %v5551_v26, %v16518_v33  ;;  %v7241_v2 = vpop.eup %7240  ;;  %v4181_v35 = vsel %vm13031_vm0, %v7235_v25, %v4177_v13  ;;  %v1246_v56 = vfloor.f32 %v1137_v48  ;;  %v4145_v9 = vsub.f32 1.0, %v4144_v45  ;;  %v16529_v45 = vld [vmem:[#allocation31_spill] sm:$0xff]  ;;  %vm16532_vm0 = vmmov %vm16516_vm4 }
 0x3d8   : > { %16517 = vst [vmem:[#allocation4_spill] sm:$0xff] %v13052_v7  ;;  %vm4149_vm7 = vweird.f32 %v7239_v42  ;;  %v13059_v20 = vsel %vm12993_vm6, %v4185_v37, %v4181_v35  ;;  %v4166_v40 = vsel %vm13041_vm1, %v7237_v5, %v4162_v28  ;;  %v5252_v52 = vmul.f32 %v7241_v2, %v2307_v21 }
 0x3d9   : > { %vm1532_vm15 = vcmp.lt.f32.partialorder %v1423_v58, 0.5  ;;  %v4520_v19 = vmul.f32 1.05, %v13059_v20  ;;  %5765 = vperm.xlu2 %6761, %v13059_v20   ;;  %v13067_v25 = vsel %vm13002_vm3, %v4170_v3, %v4166_v40  ;;  %v4146_v48 = vmul.f32 %v7239_v42, %v4145_v9  ;;  %vm13075_vm6 = vmor %vm4148_vm8, %vm4149_vm7 }
 0x3da   : > { %16519 = vst [vmem:[#allocation35_spill] sm:$0xff] %v13067_v25  ;;  %v1750_v54 = vsel %vm1641_vm12, 78.0, %v15732_v43  ;;  %v4519_v37 = vmul.f32 1.05, %v13067_v25  ;;  %5760 = vperm.xlu1 %6760, %v13067_v25   ;;  %vm16522_vm13 = vcmp.lt.s32.totalorder %v7672_v53, 4  ;;  %v1968_v9 = vsel %vm1641_vm12, 115.0, %v15733_v10 }
 0x3db   : > { %v6127_v21 = vsel %vm16522_vm13, %v5252_v52, %v6016_v34  ;;  %v5073_v46 = vmul.f32 1.442695, %v4915_v38  ;;  %v16523_v5 = vfloor.f32 %v12949_v18  ;;  %v13087_v35 = vmul.f32 3.0, %v1246_v56  ;;  %v7473_v38 = vld [vmem:[%s7632_s20 + $0x180] sm:$0xff]  ;;  %vm16537_vm1 = vmmov %vm16522_vm13 }
 0x3dc   : > { %v4147_v26 = vadd.f32 %v7239_v42, %v4146_v48  ;;  %vm16526_vm3 = vcmp.lt.s32.totalorder %v7672_v53, 2  ;;  %vm16527_vm5 = vcmask 695296   ;;  %v1859_v13 = vsel %vm1532_vm15, 102.0, %v1750_v54  ;;  %v5546_v48 = vpop.permute.xlu0 %5545 }
 0x3dd   : > { %v2229_v3 = vsel %vm2137_vm2, %v1247_v14, %v16523_v5  ;;  %16524 = vst [vmem:[#allocation42_spill] sm:$0xff] %v13087_v35  ;;  %v6236_v24 = vsel %vm16526_vm3, %v16525_v11, %v6127_v21  ;;  %7242 = vpow2.f32 %v5073_v46  ;;  %v1422_v34 = vsub.f32 %v16529_v45, %v16528_v51  ;;  %v249_v5 = vld [vmem:[%s7632_s20 + $0x2e8] sm:$0xff]  ;;  %vm16539_vm4 = vmmov %vm16526_vm3 }
 0x3de   : > { %6346 = vst.msk [vmem:[%s9279_s23 + $0x1d8] sm:$0xff] %vm16527_vm5, %v6236_v24  ;;  %v4914_v18 = vsel %vm9206_vm14, %v7473_v38, 0.0  ;;  %v6694_v14 = vadd.f32 -0.025, %v4520_v19  ;;  %v4151_v28 = vsel %vm13075_vm6, %v7239_v42, %v4147_v26  ;;  %v2077_v40 = vsel %vm1532_vm15, 74.0, %v1968_v9  ;;  %v250_v9 = vld [vmem:[%s7632_s20 + $0x2f0] sm:$0xff]  ;;  %vm16540_vm12 = vmmov %vm16527_vm5 }
 0x3df   : > { %v5071_v52 = vmul.f32 1.442695, %v4914_v18  ;;  %v6693_v54 = vadd.f32 -0.025, %v4519_v37  ;;  %v13105_v21 = vsel %vm13035_vm9, %v4155_v61, %v4151_v28  ;;  %vm1531_vm11 = vcmp.lt.f32.partialorder %v1422_v34, 0.5  ;;  %v251_v37 = vld [vmem:[%s7632_s20 + $0x2f8] sm:$0xff]  ;;  %vm16536_vm9 = vmmov %vm16532_vm0 }
 0x3e0   : > { %16530 = vst [vmem:[#allocation9_spill] sm:$0xff] %v13105_v21  ;;  %vm1640_vm8 = vcmp.lt.f32.partialorder %v1422_v34, 1.5  ;;  %v16531_v46 = vfloor.f32 %v12958_v39  ;;  %v4518_v2 = vmul.f32 1.05, %v13105_v21  ;;  %5755 = vperm.xlu0 %6759, %v13105_v21   ;;  %v2297_v0 = vsel %vm2247_vm10, %v1859_v13, %v2077_v40  ;;  %v16533_v61 = vld [vmem:[#allocation10_spill] sm:$0xff]  ;;  %vm16543_vm15 = vmmov %vm16537_vm1 }
 0x3e1   : > { %v1749_v42 = vsel %vm1640_vm8, 78.0, %v15732_v43  ;;  %v1967_v58 = vsel %vm1640_vm8, 115.0, %v15733_v10  ;;  %v6006_v39 = vsel %vm16532_vm0, %v5897_v23, %v16518_v33  ;;  %7244 = vpow2.f32 %v5071_v52  ;;  %v16534_v52 = vld [vmem:[#allocation88_spill] sm:$0xff]  ;;  %vm16545_vm13 = vmmov %vm16526_vm3 }
 0x3e2   : > { %v2228_v19 = vsel %vm2137_vm2, %v1246_v56, %v16531_v46  ;;  %v5896_v56 = vmul.f32 %v5546_v48, %v16533_v61  ;;  %v6692_v26 = vadd.f32 -0.025, %v4518_v2  ;;  %v1858_v11 = vsel %vm1531_vm11, 102.0, %v1749_v42  ;;  %v16535_v48 = vld [vmem:[#allocation44_spill] sm:$0xff]  ;;  %vm16547_vm3 = vmmov %vm16527_vm5 }
 0x3e3   : > { %v2076_v24 = vsel %vm1531_vm11, 74.0, %v1967_v58  ;;  %v362_v51 = vadd.s32 760, %v7619_v4  ;;  %v7243_v45 = vpop.eup %7242  ;;  %v4738_v38 = vadd.f32 %v6694_v14, %v13027_v29  ;;  %v4737_v18 = vadd.f32 %v6693_v54, %v2229_v3  ;;  %v16538_v58 = vld [vmem:[#allocation15_spill] sm:$0xff]  ;;  %vm16553_vm11 = vmmov %vm16532_vm0 }
 0x3e4   : > { %v6588_v13 = vmul.f32 -1.442695, %v251_v37  ;;  %v6587_v28 = vmul.f32 -1.442695, %v250_v9  ;;  %v5242_v40 = vmul.f32 %v7243_v45, %v2297_v0  ;;  %v6586_v23 = vmul.f32 -1.442695, %v249_v5 }
 0x3e5   : > { %v472_v33 = vadd.s32 %v7625_v8, %v362_v51  ;;  %v1436_v46 = vsub.f32 %v16535_v48, %v16534_v52  ;;  %v2296_v34 = vsel %vm2247_vm10, %v1858_v11, %v2076_v24  ;;  %v6005_v2 = vsel %vm16536_vm9, %v5896_v56, %v16533_v61  ;;  %v7474_v5 = vld [vmem:[%s7632_s20 + $0x1f0] sm:$0xff]  ;;  %v5616_v52 = vpop.permute.xlu2 %5615 }
 0x3e6   : > { %7246 = vpow2.f32 %v6588_v13  ;;  %v361_v29 = vadd.s32 752, %v7619_v4  ;;  %v4736_v3 = vadd.f32 %v6692_v26, %v2228_v19  ;;  %v6117_v14 = vsel %vm16537_vm1, %v5242_v40, %v6006_v39  ;;  %v16544_v40 = vld [vmem:[#allocation12_spill] sm:$0xff] }
 0x3e7   : > { %v583_v54 = vcvt.s32.f32 %v472_v33  ;;  %7248 = vpow2.f32 %v6587_v28  ;;  %v7245_v42 = vpop.eup %7244  ;;  %v6226_v37 = vsel %vm16539_vm4, %v16538_v58, %v6117_v14  ;;  %v360_v0 = vadd.s32 744, %v7619_v4 }
 0x3e8   : > { %v471_v9 = vadd.s32 %v7625_v8, %v361_v29  ;;  %v4928_v61 = vsel %vm9206_vm14, %v7474_v5, 0.0  ;;  %6336 = vst.msk [vmem:[%s9279_s23 + $0x188] sm:$0xff] %vm16540_vm12, %v6226_v37  ;;  %v5241_v19 = vmul.f32 %v7245_v42, %v2296_v34  ;;  %7250 = vpow2.f32 %v6586_v23  ;;  %v16549_v5 = vld [vmem:[#allocation54_spill] sm:$0xff] }
 0x3e9   : > { %v13150_v39 = vmul.f32 %v7647_v32, %v583_v54  ;;  %vm1654_vm7 = vcmp.lt.f32.partialorder %v1436_v46, 1.5  ;;  %v13152_v56 = vmul.f32 16.0, %v4738_v38  ;;  %v13154_v26 = vmul.f32 16.0, %v4737_v18 }
 0x3ea   : > { %v582_v11 = vcvt.s32.f32 %v471_v9  ;;  %v470_v24 = vadd.s32 %v7625_v8, %v360_v0  ;;  %v6116_v51 = vsel %vm16543_vm15, %v5241_v19, %v6005_v2  ;;  %vm1545_vm6 = vcmp.lt.f32.partialorder %v1436_v46, 0.5 }
 0x3eb   : > { %16541 = vst [vmem:[#allocation37_spill] sm:$0xff] %v13152_v56  ;;  %v15398_v45 = vfloor.f32 %v13150_v39  ;;  %v5099_v13 = vmul.f32 1.442695, %v4928_v61  ;;  %v6225_v33 = vsel %vm16545_vm13, %v16544_v40, %v6116_v51  ;;  %v1763_v23 = vsel %vm1654_vm7, 78.0, %v15732_v43 }
 0x3ec   : > { %16542 = vst [vmem:[#allocation41_spill] sm:$0xff] %v13154_v26  ;;  %v7247_v28 = vpop.eup %7246  ;;  %v13164_v38 = vmul.f32 %v7647_v32, %v582_v11  ;;  %v581_v18 = vcvt.s32.f32 %v470_v24  ;;  %v13168_v34 = vmul.f32 16.0, %v4736_v3  ;;  %v1981_v14 = vsel %vm1654_vm7, 115.0, %v15733_v10 }
 0x3ed   : > { %v7249_v48 = vpop.eup %7248  ;;  %6335 = vst.msk [vmem:[%s9279_s23 + $0x180] sm:$0xff] %vm16547_vm3, %v6225_v33  ;;  %v917_v2 = vmul.f32 114.0, %v15398_v45  ;;  %v2779_v29 = vadd.f32 1.0, %v7247_v28  ;;  %7252 = vpow2.f32 %v5099_v13  ;;  %v1872_v0 = vsel %vm1545_vm6, 102.0, %v1763_v23 }
 0x3ee   : > { %16546 = vst [vmem:[#allocation82_spill] sm:$0xff] %v13168_v34  ;;  %v15397_v42 = vfloor.f32 %v13164_v38  ;;  %v13177_v58 = vadd.f32 1.0, %v7249_v48  ;;  %v13180_v37 = vmul.f32 %v7647_v32, %v581_v18  ;;  %v7251_v9 = vpop.eup %7250  ;;  %v5910_v61 = vmul.f32 %v5616_v52, %v16549_v5  ;;  %v16551_v48 = vld [vmem:[#allocation51_spill] sm:$0xff] }
 0x3ef   : > { %v13182_v3 = vsub.f32 %v583_v54, %v917_v2  ;;  %7254 = vrcp.f32 %v2779_v29  ;;  %v4227_v19 = vand.u32 2147483647, %v2779_v29  ;;  %v2090_v51 = vsel %vm1545_vm6, 74.0, %v1981_v14  ;;  %v16552_v2 = vld [vmem:[#allocation18_spill] sm:$0xff] }
 0x3f0   : > { %v916_v24 = vmul.f32 114.0, %v15397_v42  ;;  %7256 = vrcp.f32 %v13177_v58  ;;  %v4229_v13 = vand.u32 2147483648, %v2779_v29  ;;  %v4212_v54 = vand.u32 2147483647, %v13177_v58 }
 0x3f1   : > { %16548 = vst [vmem:[#allocation14_spill] sm:$0xff] %v13182_v3  ;;  %v1142_v28 = vmul.f32 %v7680_v57, %v13182_v3  ;;  %v4214_v40 = vand.u32 2147483648, %v13177_v58  ;;  %v15399_v23 = vfloor.f32 %v13180_v37  ;;  %v13197_v52 = vadd.f32 1.0, %v7251_v9 }
 0x3f2   : > { %v13194_v33 = vsub.f32 %v582_v11, %v916_v24  ;;  %v13201_v42 = vsub.f32 %v16552_v2, %v16551_v48  ;;  %vm4223_vm5 = vweird.f32 %v2779_v29  ;;  %v2310_v14 = vsel %vm2247_vm10, %v1872_v0, %v2090_v51 }
 0x3f3   : > { %v1251_v46 = vfloor.f32 %v1142_v28  ;;  %v6019_v45 = vsel %vm16553_vm11, %v5910_v61, %v16549_v5  ;;  %v7253_v34 = vpop.eup %7252  ;;  %vm4208_vm8 = vweird.f32 %v13177_v58  ;;  %v915_v9 = vmul.f32 114.0, %v15399_v23 }
 0x3f4   : > { %16550 = vst [vmem:[#allocation31_spill] sm:$0xff] %v13194_v33  ;;  %v13210_v11 = vmul.f32 %v7680_v57, %v13194_v33  ;;  %7258 = vrcp.f32 %v13197_v52  ;;  %vm13216_vm0 = vcmp.eq.f32.partialorder %v4227_v19, 8.507059e+37  ;;  %v4230_v0 = vor.u32 1.1754944e-38, %v4229_v13 }
 0x3f5   : > { %v7255_v24 = vpop.eup %7254  ;;  %vm13220_vm9 = vcmp.eq.f32.partialorder %v4212_v54, 8.507059e+37  ;;  %v4215_v61 = vor.u32 1.1754944e-38, %v4214_v40  ;;  %v13224_v2 = vsub.f32 %v581_v18, %v915_v9  ;;  %v4197_v26 = vand.u32 2147483647, %v13197_v52 }
 0x3f6   : > { %v7257_v51 = vpop.eup %7256  ;;  %v4219_v48 = vmul.f32 %v7255_v24, %v2779_v29  ;;  %vm1535_vm1 = vcmp.lt.f32.partialorder %v13201_v42, 0.5  ;;  %v13228_v23 = vmul.f32 3.0, %v1251_v46  ;;  %vm4193_vm4 = vweird.f32 %v13197_v52 }
 0x3f7   : > { %16558 = vst [vmem:[#allocation10_spill] sm:$0xff] %v13224_v2  ;;  %v4204_v19 = vmul.f32 %v7257_v51, %v13177_v58  ;;  %v4199_v13 = vand.u32 2147483648, %v13197_v52  ;;  %vm4224_vm12 = vweird.f32 %v7255_v24  ;;  %v1250_v40 = vfloor.f32 %v13210_v11  ;;  %v7475_v11 = vld [vmem:[%s7632_s20 + $0x1a0] sm:$0xff] }
 0x3f8   : > { %v4220_v54 = vsub.f32 1.0, %v4219_v48  ;;  %vm4209_vm7 = vweird.f32 %v7257_v51  ;;  %v13236_v9 = vmul.f32 %v7680_v57, %v13224_v2  ;;  %v5255_v33 = vmul.f32 %v7253_v34, %v2310_v14  ;;  %vm13253_vm13 = vmor %vm4223_vm5, %vm4224_vm12 }
 0x3f9   : > { %v4205_v18 = vsub.f32 1.0, %v4204_v19  ;;  %vm1644_vm15 = vcmp.lt.f32.partialorder %v13201_v42, 1.5  ;;  %v16559_v25 = vfloor.f32 %v13150_v39  ;;  %vm13245_vm6 = vcmp.eq.f32.partialorder %v4197_v26, 8.507059e+37  ;;  %vm13268_vm5 = vmor %vm4208_vm8, %vm4209_vm7 }
 0x3fa   : > { %v7259_v21 = vpop.eup %7258  ;;  %v4221_v48 = vmul.f32 %v7255_v24, %v4220_v54  ;;  %v4918_v19 = vsel %vm9206_vm14, %v7475_v11, 0.0  ;;  %vm16564_vm3 = vcmp.lt.s32.totalorder %v7672_v53, 4  ;;  %v1753_v26 = vsel %vm1644_vm15, 78.0, %v15732_v43  ;;  %v16568_v11 = vld [vmem:[#allocation87_spill] sm:$0xff] }
 0x3fb   : > { %v13243_v35 = vsel %vm2137_vm2, %v1251_v46, %v16559_v25  ;;  %v4206_v39 = vmul.f32 %v7257_v51, %v4205_v18  ;;  %v4189_v14 = vmul.f32 %v7259_v21, %v13197_v52  ;;  %v6130_v25 = vsel %vm16564_vm3, %v5255_v33, %v6019_v45 }
 0x3fc   : > { %v4222_v46 = vadd.f32 %v7255_v24, %v4221_v48  ;;  %v13263_v54 = vmul.f32 3.0, %v1250_v40  ;;  %v4200_v18 = vor.u32 1.1754944e-38, %v4199_v13  ;;  %vm16569_vm11 = vcmp.lt.s32.totalorder %v7672_v53, 2  ;;  %v5566_v48 = vpop.permute.xlu1 %5565 }
 0x3fd   : > { %v6239_v2 = vsel %vm16569_vm11, %v16568_v11, %v6130_v25  ;;  %v4207_v45 = vadd.f32 %v7257_v51, %v4206_v39  ;;  %v15407_v33 = vfloor.f32 %v13236_v9  ;;  %v4190_v56 = vsub.f32 1.0, %v4189_v14  ;;  %v16572_v25 = vld [vmem:[#allocation20_spill] sm:$0xff]  ;;  %vm16585_vm7 = vmmov %vm16569_vm11 }
 0x3fe   : > { %16565 = vst [vmem:[#allocation88_spill] sm:$0xff] %v13263_v54  ;;  %vm4194_vm12 = vweird.f32 %v7259_v21  ;;  %vm16570_vm3 = vcmask 695296   ;;  %v4226_v58 = vsel %vm13253_vm13, %v7255_v24, %v4222_v46  ;;  %v1862_v54 = vsel %vm1535_vm1, 102.0, %v1753_v26  ;;  %v16573_v11 = vld [vmem:[#allocation52_spill] sm:$0xff]  ;;  %v7476_v46 = vld [vmem:[%s7632_s20 + $0x198] sm:$0xff]  ;;  %vm16597_vm11 = vmmov %vm16585_vm7 }
 0x3ff   : > { %6349 = vst.msk [vmem:[%s9279_s23 + $0x1f0] sm:$0xff] %vm16570_vm3, %v6239_v2  ;;  %v1971_v13 = vsel %vm1644_vm15, 115.0, %v15733_v10  ;;  %v5079_v3 = vmul.f32 1.442695, %v4918_v19  ;;  %v13287_v39 = vsel %vm13216_vm0, %v4230_v0, %v4226_v58  ;;  %v4211_v14 = vsel %vm13268_vm5, %v7257_v51, %v4207_v45  ;;  %vm13301_vm8 = vmor %vm4193_vm4, %vm4194_vm12  ;;  %v254_v58 = vld [vmem:[%s7632_s20 + $0x310] sm:$0xff] }
 0x400   : > { %16571 = vst [vmem:[#allocation44_spill] sm:$0xff] %v13287_v39  ;;  %v4191_v2 = vmul.f32 %v7259_v21, %v4190_v56  ;;  %v1425_v24 = vsub.f32 %v16573_v11, %v16572_v25  ;;  %v4523_v34 = vmul.f32 1.05, %v13287_v39  ;;  %5780 = vperm.xlu2 %6761, %v13287_v39   ;;  %v13297_v26 = vsel %vm13220_vm9, %v4215_v61, %v4211_v14  ;;  %v16577_v56 = vld [vmem:[#allocation22_spill] sm:$0xff]  ;;  %v5561_v11 = vpop.permute.xlu0 %5560  ;;  %vm16586_vm15 = vmmov %vm16570_vm3 }
 0x401   : > { %16574 = vst [vmem:[#allocation15_spill] sm:$0xff] %v13297_v26  ;;  %7260 = vpow2.f32 %v5079_v3  ;;  %v5900_v0 = vmul.f32 %v5566_v48, %v16577_v56  ;;  %v4522_v51 = vmul.f32 1.05, %v13297_v26  ;;  %5775 = vperm.xlu1 %6760, %v13297_v26   ;;  %v2080_v5 = vsel %vm1535_vm1, 74.0, %v1971_v13  ;;  %v253_v13 = vld [vmem:[%s7632_s20 + $0x308] sm:$0xff]  ;;  %vm16598_vm12 = vmmov %vm16570_vm3 }
 0x402   : > { %v4192_v19 = vadd.f32 %v7259_v21, %v4191_v2  ;;  %vm1643_vm0 = vcmp.lt.f32.partialorder %v1425_v24, 1.5  ;;  %v16578_v52 = vfloor.f32 %v13164_v38  ;;  %vm1534_vm9 = vcmp.lt.f32.partialorder %v1425_v24, 0.5 }
 0x403   : > { %v1752_v3 = vsel %vm1643_vm0, 78.0, %v15732_v43  ;;  %v4917_v29 = vsel %vm9206_vm14, %v7476_v46, 0.0  ;;  %v6697_v45 = vadd.f32 -0.025, %v4523_v34  ;;  %v16579_v48 = vfloor.f32 %v13180_v37  ;;  %v252_v34 = vld [vmem:[%s7632_s20 + $0x300] sm:$0xff] }
 0x404   : > { %v2232_v61 = vsel %vm2137_vm2, %v1250_v40, %v16578_v52  ;;  %v4196_v38 = vsel %vm13301_vm8, %v7259_v21, %v4192_v19  ;;  %v1970_v40 = vsel %vm1643_vm0, 115.0, %v15733_v10  ;;  %v2300_v2 = vsel %vm2247_vm10, %v1862_v54, %v2080_v5 }
 0x405   : > { %v2231_v42 = vsel %vm2137_vm2, %v15407_v33, %v16579_v48  ;;  %v13331_v14 = vsel %vm13245_vm6, %v4200_v18, %v4196_v38  ;;  %vm16581_vm1 = vcmp.ge.s32.totalorder %v7672_v53, 5  ;;  %v5077_v25 = vmul.f32 1.442695, %v4917_v29 }
 0x406   : > { %16580 = vst [vmem:[#allocation12_spill] sm:$0xff] %v13331_v14  ;;  %v6009_v37 = vsel %vm16581_vm1, %v5900_v0, %v16577_v56  ;;  %v6696_v28 = vadd.f32 -0.025, %v4522_v51  ;;  %v4521_v21 = vmul.f32 1.05, %v13331_v14  ;;  %5770 = vperm.xlu0 %6759, %v13331_v14   ;;  %v1861_v19 = vsel %vm1534_vm9, 102.0, %v1752_v3  ;;  %vm16591_vm6 = vmmov %vm16581_vm1 }
 0x407   : > { %v365_v7 = vadd.s32 784, %v7619_v4  ;;  %v7261_v18 = vpop.eup %7260  ;;  %v2079_v52 = vsel %vm1534_vm9, 74.0, %v1970_v40  ;;  %7262 = vpow2.f32 %v5077_v25  ;;  %v6591_v54 = vmul.f32 -1.442695, %v254_v58  ;;  %v16582_v51 = vld [vmem:[#allocation17_spill] sm:$0xff]  ;;  %v16584_v58 = vld [vmem:[#allocation58_spill] sm:$0xff] }
 0x408   : > { %v6590_v5 = vmul.f32 -1.442695, %v253_v13  ;;  %v4741_v56 = vadd.f32 %v6697_v45, %v13243_v35  ;;  %v6695_v0 = vadd.f32 -0.025, %v4521_v21  ;;  %v5245_v46 = vmul.f32 %v7261_v18, %v2300_v2 }
 0x409   : > { %v5899_v29 = vmul.f32 %v5561_v11, %v16582_v51  ;;  %v475_v48 = vadd.s32 %v7625_v8, %v365_v7  ;;  %7264 = vpow2.f32 %v6591_v54  ;;  %v364_v3 = vadd.s32 776, %v7619_v4  ;;  %v16588_v11 = vld [vmem:[#allocation53_spill] sm:$0xff] }
 0x40a   : > { %v6589_v38 = vmul.f32 -1.442695, %v252_v34  ;;  %v4740_v33 = vadd.f32 %v6696_v28, %v2232_v61  ;;  %vm16583_vm4 = vcmp.lt.s32.totalorder %v7672_v53, 4  ;;  %7266 = vpow2.f32 %v6590_v5 }
 0x40b   : > { %v6120_v24 = vsel %vm16583_vm4, %v5245_v46, %v6009_v37  ;;  %v363_v40 = vadd.s32 768, %v7619_v4  ;;  %v2299_v45 = vsel %vm2247_vm10, %v1861_v19, %v2079_v52  ;;  %v586_v13 = vcvt.s32.f32 %v475_v48  ;;  %v16587_v37 = vld [vmem:[#allocation60_spill] sm:$0xff]  ;;  %vm16595_vm5 = vmmov %vm16583_vm4 }
 0x40c   : > { %v6229_v35 = vsel %vm16585_vm7, %v16584_v58, %v6120_v24  ;;  %v474_v2 = vadd.s32 %v7625_v8, %v364_v3  ;;  %v4739_v25 = vadd.f32 %v6695_v0, %v2231_v42  ;;  %7268 = vpow2.f32 %v6589_v38 }
 0x40d   : > { %6339 = vst.msk [vmem:[%s9279_s23 + $0x1a0] sm:$0xff] %vm16586_vm15, %v6229_v35  ;;  %v13360_v61 = vadd.s32 %v7625_v8, %v363_v40  ;;  %v1439_v34 = vsub.f32 %v16588_v11, %v16587_v37  ;;  %v7263_v28 = vpop.eup %7262  ;;  %v16589_v21 = vfloor.f32 %v13236_v9  ;;  %v6008_v19 = vsel %vm16591_vm6, %v5899_v29, %v16582_v51  ;;  %v7477_v51 = vld [vmem:[%s7632_s20 + $0x208] sm:$0xff]  ;;  %v16596_v40 = vld [vmem:[#allocation21_spill] sm:$0xff] }
 0x40e   : > { %v13372_v42 = vmul.f32 %v7647_v32, %v586_v13  ;;  %v585_v18 = vcvt.s32.f32 %v474_v2  ;;  %v13374_v52 = vmul.f32 16.0, %v4741_v56  ;;  %v13376_v54 = vmul.f32 16.0, %v4740_v33 }
 0x40f   : > { %v13366_v7 = vmul.f32 3.0, %v16589_v21  ;;  %v5244_v5 = vmul.f32 %v7263_v28, %v2299_v45  ;;  %v15409_v0 = vcvt.s32.f32 %v13360_v61  ;;  %v7265_v46 = vpop.eup %7264  ;;  %vm1657_vm13 = vcmp.lt.f32.partialorder %v1439_v34, 1.5 }
 0x410   : > { %16592 = vst [vmem:[#allocation51_spill] sm:$0xff] %v13374_v52  ;;  %v811_v9 = vfloor.f32 %v13372_v42  ;;  %v13381_v48 = vmul.f32 %v7647_v32, %v585_v18  ;;  %v4931_v29 = vsel %vm9206_vm14, %v7477_v51, 0.0  ;;  %v7267_v3 = vpop.eup %7266  ;;  %v13386_v56 = vmul.f32 16.0, %v4739_v25  ;;  %v5631_v42 = vpop.permute.xlu2 %5630 }
 0x411   : > { %16590 = vst [vmem:[#allocation54_spill] sm:$0xff] %v13366_v7  ;;  %v6119_v33 = vsel %vm16595_vm5, %v5244_v5, %v6008_v19  ;;  %v2782_v38 = vadd.f32 1.0, %v7265_v46  ;;  %v13393_v24 = vmul.f32 %v7647_v32, %v15409_v0  ;;  %v13399_v2 = vadd.f32 1.0, %v7267_v3 }
 0x412   : > { %16593 = vst [vmem:[#allocation18_spill] sm:$0xff] %v13376_v54  ;;  %v6228_v58 = vsel %vm16597_vm11, %v16596_v40, %v6119_v33  ;;  %v920_v35 = vmul.f32 114.0, %v811_v9  ;;  %v15408_v45 = vfloor.f32 %v13381_v48  ;;  %v7269_v25 = vpop.eup %7268  ;;  %vm1548_vm3 = vcmp.lt.f32.partialorder %v1439_v34, 0.5 }
 0x413   : > { %16594 = vst [vmem:[#allocation87_spill] sm:$0xff] %v13386_v56  ;;  %7270 = vrcp.f32 %v2782_v38  ;;  %v1766_v37 = vsel %vm1657_vm13, 78.0, %v15732_v43  ;;  %v5105_v11 = vmul.f32 1.442695, %v4931_v29  ;;  %v1984_v19 = vsel %vm1657_vm13, 115.0, %v15733_v10 }
 0x414   : > { %6338 = vst.msk [vmem:[%s9279_s23 + $0x198] sm:$0xff] %vm16598_vm12, %v6228_v58  ;;  %v13405_v28 = vsub.f32 %v586_v13, %v920_v35  ;;  %v919_v21 = vmul.f32 114.0, %v15408_v45  ;;  %7272 = vrcp.f32 %v13399_v2  ;;  %v4272_v5 = vand.u32 2147483647, %v2782_v38 }
 0x415   : > { %v4274_v46 = vand.u32 2147483648, %v2782_v38  ;;  %v4257_v51 = vand.u32 2147483647, %v13399_v2  ;;  %v4259_v3 = vand.u32 2147483648, %v13399_v2  ;;  %v13419_v40 = vadd.f32 1.0, %v7269_v25 }
 0x416   : > { %16599 = vst [vmem:[#allocation20_spill] sm:$0xff] %v13405_v28  ;;  %v1145_v29 = vmul.f32 %v7680_v57, %v13405_v28  ;;  %v13416_v13 = vsub.f32 %v585_v18, %v919_v21  ;;  %vm4268_vm8 = vweird.f32 %v2782_v38  ;;  %v1875_v58 = vsel %vm1548_vm3, 102.0, %v1766_v37 }
 0x417   : > { %7274 = vpow2.f32 %v5105_v11  ;;  %v5913_v35 = vmul.f32 %v5631_v42, %v11187_v31  ;;  %v2093_v18 = vsel %vm1548_vm3, 74.0, %v1984_v19  ;;  %vm13429_vm0 = vcmp.eq.f32.partialorder %v4272_v5, 8.507059e+37 }
 0x418   : > { %16600 = vst [vmem:[#allocation52_spill] sm:$0xff] %v13416_v13  ;;  %v1254_v45 = vfloor.f32 %v1145_v29  ;;  %v13425_v0 = vmul.f32 %v7680_v57, %v13416_v13  ;;  %7276 = vrcp.f32 %v13419_v40  ;;  %v4275_v25 = vor.u32 1.1754944e-38, %v4274_v46 }
 0x419   : > { %v7271_v21 = vpop.eup %7270  ;;  %vm4253_vm9 = vweird.f32 %v13399_v2  ;;  %vm13434_vm1 = vcmp.eq.f32.partialorder %v4257_v51, 8.507059e+37  ;;  %v4260_v29 = vor.u32 1.1754944e-38, %v4259_v3  ;;  %v16605_v56 = vfloor.f32 %v13393_v24 }
 0x41a   : > { %v7273_v11 = vpop.eup %7272  ;;  %v4264_v42 = vmul.f32 %v7271_v21, %v2782_v38  ;;  %vm4238_vm4 = vweird.f32 %v13419_v40  ;;  %v4242_v19 = vand.u32 2147483647, %v13419_v40  ;;  %v4244_v5 = vand.u32 2147483648, %v13419_v40 }
 0x41b   : > { %v918_v54 = vmul.f32 114.0, %v16605_v56  ;;  %v4249_v34 = vmul.f32 %v7273_v11, %v13399_v2  ;;  %v2313_v46 = vsel %vm2247_vm10, %v1875_v58, %v2093_v18  ;;  %v13446_v51 = vmul.f32 3.0, %v1254_v45 }
 0x41c   : > { %v4265_v13 = vsub.f32 1.0, %v4264_v42  ;;  %vm4269_vm7 = vweird.f32 %v7271_v21  ;;  %v1253_v3 = vfloor.f32 %v13425_v0  ;;  %v13451_v56 = vsel %vm2137_vm2, %v1254_v45, %v811_v9  ;;  %v16609_v0 = vld [vmem:[#allocation64_spill] sm:$0xff] }
 0x41d   : > { %16606 = vst [vmem:[#allocation22_spill] sm:$0xff] %v13446_v51  ;;  %v7275_v14 = vpop.eup %7274  ;;  %v4250_v26 = vsub.f32 1.0, %v4249_v34  ;;  %vm4254_vm15 = vweird.f32 %v7273_v11  ;;  %v6022_v7 = vsel %vm16591_vm6, %v5913_v35, %v11187_v31  ;;  %v16607_v58 = vcvt.s32.f32 %v13360_v61  ;;  %v16610_v51 = vld [vmem:[#allocation24_spill] sm:$0xff]  ;;  %vm13463_vm13 = vmor %vm4268_vm8, %vm4269_vm7 }
 0x41e   : > { %v7277_v52 = vpop.eup %7276  ;;  %v4266_v28 = vmul.f32 %v7271_v21, %v4265_v13  ;;  %v5258_v42 = vmul.f32 %v7275_v14, %v2313_v46  ;;  %v1429_v39 = vsub.f32 %v16610_v51, %v16609_v0  ;;  %vm13468_vm5 = vcmp.eq.f32.partialorder %v4242_v19, 8.507059e+37  ;;  %vm13476_vm11 = vmor %vm4253_vm9, %vm4254_vm15  ;;  %v7478_v19 = vld [vmem:[%s7632_s20 + $0x1b8] sm:$0xff] }
 0x41f   : > { %v13458_v18 = vsub.f32 %v16607_v58, %v918_v54  ;;  %v4251_v45 = vmul.f32 %v7273_v11, %v4250_v26  ;;  %v4234_v34 = vmul.f32 %v7277_v52, %v13419_v40  ;;  %v4245_v61 = vor.u32 1.1754944e-38, %v4244_v5  ;;  %v16626_v14 = vld [vmem:[#allocation33_spill] sm:$0xff] }
 0x420   : > { %v4267_v54 = vadd.f32 %v7271_v21, %v4266_v28  ;;  %v13472_v13 = vmul.f32 3.0, %v1253_v3  ;;  %vm16618_vm12 = vcmp.lt.s32.totalorder %v7672_v53, 4  ;;  %vm1647_vm3 = vcmp.lt.f32.partialorder %v1429_v39, 1.5 }
 0x421   : > { %16608 = vst [vmem:[#allocation17_spill] sm:$0xff] %v13458_v18  ;;  %v6133_v26 = vsel %vm16618_vm12, %v5258_v42, %v6022_v7  ;;  %v4252_v38 = vadd.f32 %v7273_v11, %v4251_v45  ;;  %v4235_v35 = vsub.f32 1.0, %v4234_v34  ;;  %vm4239_vm8 = vweird.f32 %v7277_v52  ;;  %v16625_v34 = vld [vmem:[#allocation29_spill] sm:$0xff] }
 0x422   : > { %16615 = vst [vmem:[#allocation58_spill] sm:$0xff] %v13472_v13  ;;  %v4921_v28 = vsel %vm9206_vm14, %v7478_v19, 0.0  ;;  %v4271_v5 = vsel %vm13463_vm13, %v7271_v21, %v4267_v54  ;;  %vm16619_vm9 = vcmp.lt.s32.totalorder %v7672_v53, 2  ;;  %vm1538_vm7 = vcmp.lt.f32.partialorder %v1429_v39, 0.5  ;;  %vm16633_vm13 = vmmov %vm16618_vm12 }
 0x423   : > { %v6242_v2 = vsel %vm16619_vm9, %v11296_v22, %v6133_v26  ;;  %v1756_v46 = vsel %vm1647_vm3, 78.0, %v15732_v43  ;;  %v13494_v7 = vsel %vm13429_vm0, %v4275_v25, %v4271_v5  ;;  %v4256_v51 = vsel %vm13476_vm11, %v7273_v11, %v4252_v38  ;;  %v5581_v22 = vpop.permute.xlu1 %5580  ;;  %vm13513_vm0 = vmor %vm4238_vm4, %vm4239_vm8  ;;  %v16627_v26 = vld [vmem:[#allocation62_spill] sm:$0xff]  ;;  %v5576_v25 = vpop.permute.xlu0 %5575 }
 0x424   : > { %v13500_v58 = vmul.f32 %v7680_v57, %v13458_v18  ;;  %v4236_v21 = vmul.f32 %v7277_v52, %v4235_v35  ;;  %vm16620_vm15 = vcmask 695296   ;;  %v4526_v42 = vmul.f32 1.05, %v13494_v7  ;;  %5795 = vperm.xlu2 %6761, %v13494_v7   ;;  %v7479_v35 = vld [vmem:[%s7632_s20 + $0x1b0] sm:$0xff]  ;;  %vm16636_vm11 = vmmov %vm16591_vm6 }
 0x425   : > { %6352 = vst.msk [vmem:[%s9279_s23 + $0x208] sm:$0xff] %vm16620_vm15, %v6242_v2  ;;  %v13508_v33 = vsel %vm13434_vm1, %v4260_v29, %v4256_v51  ;;  %v1974_v11 = vsel %vm1647_vm3, 115.0, %v15733_v10  ;;  %v5085_v0 = vmul.f32 1.442695, %v4921_v28  ;;  %v16624_v9 = vfloor.f32 %v13381_v48  ;;  %v257_v51 = vld [vmem:[%s7632_s20 + $0x328] sm:$0xff]  ;;  %vm16637_vm12 = vmmov %vm16620_vm15 }
 0x426   : > { %16621 = vst [vmem:[#allocation60_spill] sm:$0xff] %v13508_v33  ;;  %v4525_v37 = vmul.f32 1.05, %v13508_v33  ;;  %5790 = vperm.xlu1 %6760, %v13508_v33   ;;  %v4237_v29 = vadd.f32 %v7277_v52, %v4236_v21  ;;  %v1865_v40 = vsel %vm1538_vm7, 102.0, %v1756_v46  ;;  %v5903_v54 = vmul.f32 %v5581_v22, %v16625_v34  ;;  %v256_v21 = vld [vmem:[%s7632_s20 + $0x320] sm:$0xff]  ;;  %vm16644_vm15 = vmmov %vm16637_vm12 }
 0x427   : > { %v2235_v45 = vsel %vm2137_vm2, %v1253_v3, %v16624_v9  ;;  %7278 = vpow2.f32 %v5085_v0  ;;  %v1428_v38 = vsub.f32 %v16627_v26, %v16626_v14  ;;  %v4920_v48 = vsel %vm9206_vm14, %v7479_v35, 0.0  ;;  %v255_v0 = vld [vmem:[%s7632_s20 + $0x318] sm:$0xff]  ;;  %v16630_v26 = vld [vmem:[#allocation27_spill] sm:$0xff] }
 0x428   : > { %v6700_v3 = vadd.f32 -0.025, %v4526_v42  ;;  %v4241_v19 = vsel %vm13513_vm0, %v7277_v52, %v4237_v29  ;;  %v2083_v28 = vsel %vm1538_vm7, 74.0, %v1974_v11  ;;  %v5083_v5 = vmul.f32 1.442695, %v4920_v48 }
 0x429   : > { %v1252_v2 = vfloor.f32 %v13500_v58  ;;  %v13538_v46 = vsel %vm13468_vm5, %v4245_v61, %v4241_v19  ;;  %vm1537_vm1 = vcmp.lt.f32.partialorder %v1428_v38, 0.5  ;;  %vm1646_vm4 = vcmp.lt.f32.partialorder %v1428_v38, 1.5  ;;  %vm16635_vm5 = vmmov %vm16619_vm9 }
 0x42a   : > { %16628 = vst [vmem:[#allocation53_spill] sm:$0xff] %v13538_v46  ;;  %v6699_v22 = vadd.f32 -0.025, %v4525_v37  ;;  %v4524_v42 = vmul.f32 1.05, %v13538_v46  ;;  %5785 = vperm.xlu0 %6759, %v13538_v46   ;;  %v1755_v39 = vsel %vm1646_vm4, 78.0, %v15732_v43  ;;  %v16629_v58 = vfloor.f32 %v13393_v24  ;;  %vm16639_vm9 = vmmov %vm16633_vm13 }
 0x42b   : > { %v1973_v52 = vsel %vm1646_vm4, 115.0, %v15733_v10  ;;  %v2303_v61 = vsel %vm2247_vm10, %v1865_v40, %v2083_v28  ;;  %v6012_v11 = vsel %vm16591_vm6, %v5903_v54, %v16625_v34  ;;  %7280 = vpow2.f32 %v5083_v5  ;;  %v16631_v54 = vld [vmem:[#allocation74_spill] sm:$0xff]  ;;  %v16632_v5 = vld [vmem:[#allocation105_spill] sm:$0xff]  ;;  %vm16641_vm7 = vmmov %vm16635_vm5 }
 0x42c   : > { %v2234_v31 = vsel %vm2137_vm2, %v1252_v2, %v16629_v58  ;;  %v4744_v9 = vadd.f32 %v6700_v3, %v13451_v56  ;;  %v6698_v37 = vadd.f32 -0.025, %v4524_v42  ;;  %v1864_v29 = vsel %vm1537_vm1, 102.0, %v1755_v39 }
 0x42d   : > { %v2082_v14 = vsel %vm1537_vm1, 74.0, %v1973_v52  ;;  %v7279_v24 = vpop.eup %7278  ;;  %v5902_v35 = vmul.f32 %v5576_v25, %v16630_v26  ;;  %v368_v48 = vadd.s32 808, %v7619_v4  ;;  %v6594_v19 = vmul.f32 -1.442695, %v257_v51 }
 0x42e   : > { %v6593_v40 = vmul.f32 -1.442695, %v256_v21  ;;  %v4743_v28 = vadd.f32 %v6699_v22, %v2235_v45  ;;  %v5248_v58 = vmul.f32 %v7279_v24, %v2303_v61  ;;  %v6592_v34 = vmul.f32 -1.442695, %v255_v0  ;;  %v16634_v22 = vld [vmem:[#allocation32_spill] sm:$0xff] }
 0x42f   : > { %v1442_v46 = vsub.f32 %v16632_v5, %v16631_v54  ;;  %v2302_v56 = vsel %vm2247_vm10, %v1864_v29, %v2082_v14  ;;  %v478_v38 = vadd.s32 %v7625_v8, %v368_v48  ;;  %7282 = vpow2.f32 %v6594_v19 }
 0x430   : > { %v367_v3 = vadd.s32 800, %v7619_v4  ;;  %v4742_v42 = vadd.f32 %v6698_v37, %v2234_v31  ;;  %v6123_v51 = vsel %vm16633_vm13, %v5248_v58, %v6012_v11  ;;  %7284 = vpow2.f32 %v6593_v40 }
 0x431   : > { %v366_v45 = vadd.s32 792, %v7619_v4  ;;  %v7281_v21 = vpop.eup %7280  ;;  %v6232_v39 = vsel %vm16635_vm5, %v16634_v22, %v6123_v51  ;;  %v6011_v52 = vsel %vm16636_vm11, %v5902_v35, %v16630_v26  ;;  %v589_v25 = vcvt.s32.f32 %v478_v38  ;;  %v7480_v35 = vld [vmem:[%s7632_s20 + $0x220] sm:$0xff]  ;;  %vm16652_vm5 = vmmov %vm16636_vm11 }
 0x432   : > { %v477_v61 = vadd.s32 %v7625_v8, %v367_v3  ;;  %6342 = vst.msk [vmem:[%s9279_s23 + $0x1b8] sm:$0xff] %vm16637_vm12, %v6232_v39  ;;  %v5247_v31 = vmul.f32 %v7281_v21, %v2302_v56  ;;  %7286 = vpow2.f32 %v6592_v34  ;;  %vm1660_vm3 = vcmp.lt.f32.partialorder %v1442_v46, 1.5 }
 0x433   : > { %v13580_v11 = vadd.s32 %v7625_v8, %v366_v45  ;;  %v13582_v0 = vmul.f32 3.0, %v1252_v2  ;;  %v13585_v37 = vmul.f32 %v7647_v32, %v589_v25  ;;  %vm1551_vm8 = vcmp.lt.f32.partialorder %v1442_v46, 0.5  ;;  %v16640_v2 = vld [vmem:[#allocation36_spill] sm:$0xff]  ;;  %v5646_v45 = vpop.permute.xlu2 %5645 }
 0x434   : > { %v588_v29 = vcvt.s32.f32 %v477_v61  ;;  %v6122_v14 = vsel %vm16639_vm9, %v5247_v31, %v6011_v52  ;;  %v1769_v26 = vsel %vm1660_vm3, 78.0, %v15732_v43  ;;  %v4934_v48 = vsel %vm9206_vm14, %v7480_v35, 0.0 }
 0x435   : > { %16638 = vst [vmem:[#allocation21_spill] sm:$0xff] %v13582_v0  ;;  %v587_v24 = vcvt.s32.f32 %v13580_v11  ;;  %v7283_v19 = vpop.eup %7282  ;;  %v6231_v40 = vsel %vm16641_vm7, %v16640_v2, %v6122_v14  ;;  %v15420_v58 = vfloor.f32 %v13585_v37  ;;  %v1987_v54 = vsel %vm1660_vm3, 115.0, %v15733_v10 }
 0x436   : > { %v13599_v34 = vmul.f32 %v7647_v32, %v588_v29  ;;  %v7285_v5 = vpop.eup %7284  ;;  %v13602_v56 = vmul.f32 16.0, %v4744_v9  ;;  %v13604_v38 = vmul.f32 16.0, %v4743_v28  ;;  %v13606_v3 = vmul.f32 16.0, %v4742_v42  ;;  %6341 = vst.msk [vmem:[%s9279_s23 + $0x1b0] sm:$0xff] %vm16644_vm15, %v6231_v40 }
 0x437   : > { %v2785_v51 = vadd.f32 1.0, %v7283_v19  ;;  %v923_v21 = vmul.f32 114.0, %v15420_v58  ;;  %v2784_v39 = vadd.f32 1.0, %v7285_v5  ;;  %v13614_v52 = vmul.f32 %v7647_v32, %v587_v24 }
 0x438   : > { %16642 = vst [vmem:[#allocation64_spill] sm:$0xff] %v13604_v38  ;;  %v15421_v22 = vfloor.f32 %v13599_v34  ;;  %v7287_v61 = vpop.eup %7286  ;;  %v1878_v9 = vsel %vm1551_vm8, 102.0, %v1769_v26  ;;  %v2096_v28 = vsel %vm1551_vm8, 74.0, %v1987_v54  ;;  %v5111_v42 = vmul.f32 1.442695, %v4934_v48  ;;  %v16646_v48 = vld [vmem:[#allocation39_spill] sm:$0xff] }
 0x439   : > { %16643 = vst [vmem:[#allocation24_spill] sm:$0xff] %v13606_v3  ;;  %7288 = vrcp.f32 %v2785_v51  ;;  %v13618_v31 = vsub.f32 %v589_v25, %v923_v21  ;;  %v5916_v14 = vmul.f32 %v5646_v45, %v11385_v59  ;;  %v4317_v35 = vand.u32 2147483647, %v2785_v51  ;;  %v16647_v54 = vld [vmem:[#allocation28_spill] sm:$0xff] }
 0x43a   : > { %v922_v11 = vmul.f32 114.0, %v15421_v22  ;;  %7290 = vrcp.f32 %v2784_v39  ;;  %v4319_v19 = vand.u32 2147483648, %v2785_v51  ;;  %v4302_v2 = vand.u32 2147483647, %v2784_v39 }
 0x43b   : > { %v4304_v40 = vand.u32 2147483648, %v2784_v39  ;;  %v1148_v5 = vmul.f32 %v7680_v57, %v13618_v31  ;;  %v15422_v46 = vfloor.f32 %v13614_v52  ;;  %v13628_v26 = vadd.f32 1.0, %v7287_v61 }
 0x43c   : > { %v13625_v58 = vsub.f32 %v588_v29, %v922_v11  ;;  %vm4313_vm0 = vweird.f32 %v2785_v51  ;;  %v2316_v25 = vsel %vm2247_vm10, %v1878_v9, %v2096_v28  ;;  %7292 = vpow2.f32 %v5111_v42 }
 0x43d   : > { %v13634_v45 = vsub.f32 %v16647_v54, %v16646_v48  ;;  %vm4298_vm1 = vweird.f32 %v2784_v39  ;;  %v921_v29 = vmul.f32 114.0, %v15422_v46  ;;  %7294 = vrcp.f32 %v13628_v26 }
 0x43e   : > { %16645 = vst [vmem:[#allocation29_spill] sm:$0xff] %v13625_v58  ;;  %v13638_v21 = vmul.f32 %v7680_v57, %v13625_v58  ;;  %v1257_v11 = vfloor.f32 %v1148_v5  ;;  %vm13643_vm4 = vcmp.eq.f32.partialorder %v4317_v35, 8.507059e+37  ;;  %v4320_v9 = vor.u32 1.1754944e-38, %v4319_v19 }
 0x43f   : > { %v7289_v61 = vpop.eup %7288  ;;  %vm13647_vm6 = vcmp.eq.f32.partialorder %v4302_v2, 8.507059e+37  ;;  %v4305_v54 = vor.u32 1.1754944e-38, %v4304_v40  ;;  %vm4283_vm13 = vweird.f32 %v13628_v26  ;;  %v6025_v46 = vsel %vm16652_vm5, %v5916_v14, %v11385_v59 }
 0x440   : > { %v7291_v42 = vpop.eup %7290  ;;  %v4309_v48 = vmul.f32 %v7289_v61, %v2785_v51  ;;  %v13655_v5 = vsub.f32 %v587_v24, %v921_v29  ;;  %v4287_v35 = vand.u32 2147483647, %v13628_v26  ;;  %v4289_v19 = vand.u32 2147483648, %v13628_v26 }
 0x441   : > { %v4294_v3 = vmul.f32 %v7291_v42, %v2784_v39  ;;  %vm4314_vm11 = vweird.f32 %v7289_v61  ;;  %v1256_v38 = vfloor.f32 %v13638_v21  ;;  %vm1541_vm12 = vcmp.lt.f32.partialorder %v13634_v45, 0.5 }
 0x442   : > { %16653 = vst [vmem:[#allocation33_spill] sm:$0xff] %v13655_v5  ;;  %v4310_v2 = vsub.f32 1.0, %v4309_v48  ;;  %v7293_v40 = vpop.eup %7292  ;;  %v13661_v58 = vmul.f32 3.0, %v1257_v11  ;;  %vm4299_vm3 = vweird.f32 %v7291_v42  ;;  %vm1650_vm8 = vcmp.lt.f32.partialorder %v13634_v45, 1.5  ;;  %vm13673_vm9 = vmor %vm4313_vm0, %vm4314_vm11 }
 0x443   : > { %v4295_v33 = vsub.f32 1.0, %v4294_v3  ;;  %v7295_v59 = vpop.eup %7294  ;;  %v16654_v24 = vfloor.f32 %v13585_v37  ;;  %v1146_v21 = vmul.f32 %v7680_v57, %v13655_v5  ;;  %v5261_v48 = vmul.f32 %v7293_v40, %v2316_v25  ;;  %vm13685_vm15 = vmor %vm4298_vm1, %vm4299_vm3  ;;  %v5591_v37 = vpop.permute.xlu0 %5590 }
 0x444   : > { %v4311_v29 = vmul.f32 %v7289_v61, %v4310_v2  ;;  %v4279_v0 = vmul.f32 %v7295_v59, %v13628_v26  ;;  %vm13678_vm7 = vcmp.eq.f32.partialorder %v4287_v35, 8.507059e+37  ;;  %v13682_v2 = vmul.f32 3.0, %v1256_v38 }
 0x445   : > { %v13668_v14 = vsel %vm2137_vm2, %v1257_v11, %v16654_v24  ;;  %v4296_v3 = vmul.f32 %v7291_v42, %v4295_v33  ;;  %v4290_v11 = vor.u32 1.1754944e-38, %v4289_v19  ;;  %vm16662_vm0 = vcmp.lt.s32.totalorder %v7672_v53, 4 }
 0x446   : > { %v4312_v24 = vadd.f32 %v7289_v61, %v4311_v29  ;;  %16659 = vst [vmem:[#allocation62_spill] sm:$0xff] %v13682_v2  ;;  %v6136_v33 = vsel %vm16662_vm0, %v5261_v48, %v6025_v46  ;;  %v1759_v51 = vsel %vm1650_vm8, 78.0, %v15732_v43  ;;  %v4280_v40 = vsub.f32 1.0, %v4279_v0  ;;  %v7481_v46 = vld [vmem:[%s7632_s20 + $0x1d0] sm:$0xff]  ;;  %v5596_v2 = vpop.permute.xlu1 %5595  ;;  %vm16678_vm3 = vmmov %vm16662_vm0 }
 0x447   : > { %v4297_v35 = vadd.f32 %v7291_v42, %v4296_v3  ;;  %vm4284_vm5 = vweird.f32 %v7295_v59  ;;  %v1977_v19 = vsel %vm1650_vm8, 115.0, %v15733_v10  ;;  %v1255_v29 = vfloor.f32 %v1146_v21 }
 0x448   : > { %v4316_v39 = vsel %vm13673_vm9, %v7289_v61, %v4312_v24  ;;  %vm16663_vm1 = vcmp.lt.s32.totalorder %v7672_v53, 2  ;;  %v4924_v48 = vsel %vm9206_vm14, %v7481_v46, 0.0  ;;  %v4281_v13 = vmul.f32 %v7295_v59, %v4280_v40 }
 0x449   : > { %v6245_v5 = vsel %vm16663_vm1, %v11468_v30, %v6136_v33  ;;  %v13707_v0 = vsel %vm13643_vm4, %v4320_v9, %v4316_v39  ;;  %v4301_v3 = vsel %vm13685_vm15, %v7291_v42, %v4297_v35  ;;  %vm16665_vm11 = vcmask 695296   ;;  %vm13722_vm4 = vmor %vm4283_vm13, %vm4284_vm5  ;;  %v16669_v42 = vld [vmem:[#allocation43_spill] sm:$0xff] }
 0x44a   : > { %16664 = vst [vmem:[#allocation27_spill] sm:$0xff] %v13707_v0  ;;  %v5091_v18 = vmul.f32 1.442695, %v4924_v48  ;;  %v4529_v61 = vmul.f32 1.05, %v13707_v0  ;;  %5810 = vperm.xlu2 %6761, %v13707_v0   ;;  %v13717_v30 = vsel %vm13647_vm6, %v4305_v54, %v4301_v3  ;;  %v1868_v9 = vsel %vm1541_vm12, 102.0, %v1759_v51  ;;  %vm16681_vm8 = vmmov %vm16663_vm1 }
 0x44b   : > { %6355 = vst.msk [vmem:[%s9279_s23 + $0x220] sm:$0xff] %vm16665_vm11, %v6245_v5  ;;  %v16670_v5 = vld [vmem:[#allocation75_spill] sm:$0xff]  ;;  %5805 = vperm.xlu1 %6760, %v13717_v30   ;;  %v4282_v24 = vadd.f32 %v7295_v59, %v4281_v13  ;;  %v2086_v28 = vsel %vm1541_vm12, 74.0, %v1977_v19  ;;  %v16671_v54 = vld [vmem:[#allocation76_spill] sm:$0xff]  ;;  %v4528_v25 = vmul.f32 1.05, %v13717_v30  ;;  %v16672_v39 = vfloor.f32 %v13599_v34  ;;  %vm16682_vm9 = vmmov %vm16665_vm11 }
 0x44c   : > { %16666 = vst [vmem:[#allocation74_spill] sm:$0xff] %v13717_v30  ;;  %v1431_v21 = vsub.f32 %v16670_v5, %v16669_v42  ;;  %7296 = vpow2.f32 %v5091_v18  ;;  %v5906_v26 = vmul.f32 %v5596_v2, %v16671_v54  ;;  %v7482_v33 = vld [vmem:[%s7632_s20 + $0x1c8] sm:$0xff]  ;;  %v6703_v35 = vadd.f32 -0.025, %v4529_v61  ;;  %v260_v19 = vld [vmem:[%s7632_s20 + $0x340] sm:$0xff]  ;;  %v259_v18 = vld [vmem:[%s7632_s20 + $0x338] sm:$0xff] }
 0x44d   : > { %v4923_v51 = vsel %vm9206_vm14, %v7482_v33, 0.0  ;;  %v4286_v40 = vsel %vm13722_vm4, %v7295_v59, %v4282_v24  ;;  %v2238_v2 = vsel %vm2137_vm2, %v1256_v38, %v16672_v39  ;;  %v13747_v46 = vmul.f32 3.0, %v1255_v29  ;;  %vm16685_vm5 = vmmov %vm16678_vm3  ;;  %v16699_v30 = vld [vmem:[#allocation49_spill] sm:$0xff] }
 0x44e   : > { %vm1540_vm6 = vcmp.lt.f32.partialorder %v1431_v21, 0.5  ;;  %vm1649_vm13 = vcmp.lt.f32.partialorder %v1431_v21, 1.5  ;;  %v16674_v48 = vfloor.f32 %v13614_v52  ;;  %v13755_v59 = vsel %vm13678_vm7, %v4290_v11, %v4286_v40  ;;  %vm16687_vm11 = vmmov %vm16682_vm9 }
 0x44f   : > { %v1758_v13 = vsel %vm1649_vm13, 78.0, %v15732_v43  ;;  %v1976_v45 = vsel %vm1649_vm13, 115.0, %v15733_v10  ;;  %16673 = vst [vmem:[#allocation105_spill] sm:$0xff] %v13747_v46  ;;  %5800 = vperm.xlu0 %6759, %v13755_v59   ;;  %v2306_v34 = vsel %vm2247_vm10, %v1868_v9, %v2086_v28  ;;  %v5089_v22 = vmul.f32 1.442695, %v4923_v51  ;;  %v258_v28 = vld [vmem:[%s7632_s20 + $0x330] sm:$0xff] }
 0x450   : > { %v2237_v3 = vsel %vm2137_vm2, %v1255_v29, %v16674_v48  ;;  %16675 = vst [vmem:[#allocation32_spill] sm:$0xff] %v13755_v59  ;;  %v1867_v38 = vsel %vm1540_vm6, 102.0, %v1758_v13  ;;  %v2085_v61 = vsel %vm1540_vm6, 74.0, %v1976_v45  ;;  %v6702_v52 = vadd.f32 -0.025, %v4528_v25 }
 0x451   : > { %vm16676_vm12 = vcmp.ge.s32.totalorder %v7672_v53, 5  ;;  %v371_v11 = vadd.s32 832, %v7619_v4  ;;  %v6597_v42 = vmul.f32 -1.442695, %v260_v19  ;;  %v4747_v24 = vadd.f32 %v6703_v35, %v13668_v14  ;;  %v16679_v19 = vld [vmem:[#allocation78_spill] sm:$0xff] }
 0x452   : > { %v6015_v29 = vsel %vm16676_vm12, %v5906_v26, %v16671_v54  ;;  %v7297_v5 = vpop.eup %7296  ;;  %v4527_v33 = vmul.f32 1.05, %v13755_v59  ;;  %7298 = vpow2.f32 %v5089_v22  ;;  %v6596_v9 = vmul.f32 -1.442695, %v259_v18  ;;  %v16677_v54 = vld [vmem:[#allocation38_spill] sm:$0xff]  ;;  %vm16683_vm15 = vmmov %vm16676_vm12 }
 0x453   : > { %v5251_v21 = vmul.f32 %v7297_v5, %v2306_v34  ;;  %v2305_v25 = vsel %vm2247_vm10, %v1867_v38, %v2085_v61  ;;  %v481_v51 = vadd.s32 %v7625_v8, %v371_v11  ;;  %7300 = vpow2.f32 %v6597_v42  ;;  %v16680_v18 = vld [vmem:[#allocation46_spill] sm:$0xff] }
 0x454   : > { %v5905_v26 = vmul.f32 %v5591_v37, %v16677_v54  ;;  %v370_v40 = vadd.s32 824, %v7619_v4  ;;  %7302 = vpow2.f32 %v6596_v9  ;;  %v369_v14 = vadd.s32 816, %v7619_v4 }
 0x455   : > { %v6126_v35 = vsel %vm16678_vm3, %v5251_v21, %v6015_v29  ;;  %v592_v13 = vcvt.s32.f32 %v481_v51  ;;  %v6595_v45 = vmul.f32 -1.442695, %v258_v28  ;;  %v1445_v39 = vsub.f32 %v16679_v19, %v11538_v55 }
 0x456   : > { %v6701_v48 = vadd.f32 -0.025, %v4527_v33  ;;  %v6235_v34 = vsel %vm16681_vm8, %v16680_v18, %v6126_v35  ;;  %v480_v38 = vadd.s32 %v7625_v8, %v370_v40  ;;  %v13785_v61 = vadd.s32 %v7625_v8, %v369_v14 }
 0x457   : > { %v4746_v22 = vadd.f32 %v6702_v52, %v2238_v2  ;;  %6345 = vst.msk [vmem:[%s9279_s23 + $0x1d0] sm:$0xff] %vm16682_vm9, %v6235_v34  ;;  %v13790_v29 = vmul.f32 %v7647_v32, %v592_v13  ;;  %7304 = vpow2.f32 %v6595_v45  ;;  %vm1663_vm7 = vcmp.lt.f32.partialorder %v1445_v39, 1.5  ;;  %v16686_v45 = vld [vmem:[#allocation40_spill] sm:$0xff] }
 0x458   : > { %v7299_v37 = vpop.eup %7298  ;;  %v6014_v55 = vsel %vm16683_vm15, %v5905_v26, %v16677_v54  ;;  %v591_v11 = vcvt.s32.f32 %v480_v38  ;;  %v590_v42 = vcvt.s32.f32 %v13785_v61  ;;  %vm1554_vm0 = vcmp.lt.f32.partialorder %v1445_v39, 0.5 }
 0x459   : > { %v7301_v5 = vpop.eup %7300  ;;  %v5250_v33 = vmul.f32 %v7299_v37, %v2305_v25  ;;  %v15429_v2 = vfloor.f32 %v13790_v29  ;;  %v1772_v52 = vsel %vm1663_vm7, 78.0, %v15732_v43  ;;  %v1990_v9 = vsel %vm1663_vm7, 115.0, %v15733_v10 }
 0x45a   : > { %v7303_v28 = vpop.eup %7302  ;;  %v13799_v21 = vmul.f32 16.0, %v4747_v24  ;;  %v4745_v51 = vadd.f32 %v6701_v48, %v2237_v3  ;;  %v2788_v40 = vadd.f32 1.0, %v7301_v5  ;;  %v13802_v54 = vmul.f32 %v7647_v32, %v591_v11  ;;  %v7483_v5 = vld [vmem:[%s7632_s20 + $0x238] sm:$0xff] }
 0x45b   : > { %v6125_v26 = vsel %vm16685_vm5, %v5250_v33, %v6014_v55  ;;  %v926_v25 = vmul.f32 114.0, %v15429_v2  ;;  %v13808_v14 = vadd.f32 1.0, %v7303_v28  ;;  %v13811_v35 = vmul.f32 %v7647_v32, %v590_v42 }
 0x45c   : > { %16684 = vst [vmem:[#allocation36_spill] sm:$0xff] %v13799_v21  ;;  %v6234_v3 = vsel %vm16663_vm1, %v16686_v45, %v6125_v26  ;;  %7306 = vrcp.f32 %v2788_v40  ;;  %v1881_v24 = vsel %vm1554_vm0, 102.0, %v1772_v52  ;;  %v2099_v19 = vsel %vm1554_vm0, 74.0, %v1990_v9 }
 0x45d   : > { %v7305_v48 = vpop.eup %7304  ;;  %6344 = vst.msk [vmem:[%s9279_s23 + $0x1c8] sm:$0xff] %vm16687_vm11, %v6234_v3  ;;  %v13820_v18 = vsub.f32 %v592_v13, %v926_v25  ;;  %v4362_v34 = vand.u32 2147483647, %v2788_v40  ;;  %v15428_v38 = vfloor.f32 %v13802_v54  ;;  %7308 = vrcp.f32 %v13808_v14 }
 0x45e   : > { %v13824_v61 = vmul.f32 16.0, %v4746_v22  ;;  %v4364_v37 = vand.u32 2147483648, %v2788_v40  ;;  %v4347_v55 = vand.u32 2147483647, %v13808_v14  ;;  %v4937_v39 = vsel %vm9206_vm14, %v7483_v5, 0.0 }
 0x45f   : > { %16688 = vst [vmem:[#allocation39_spill] sm:$0xff] %v13820_v18  ;;  %v1151_v33 = vmul.f32 %v7680_v57, %v13820_v18  ;;  %v925_v13 = vmul.f32 114.0, %v15428_v38  ;;  %v4349_v52 = vand.u32 2147483648, %v13808_v14  ;;  %v15430_v9 = vfloor.f32 %v13811_v35 }
 0x460   : > { %16689 = vst [vmem:[#allocation28_spill] sm:$0xff] %v13824_v61  ;;  %v13836_v28 = vmul.f32 16.0, %v4745_v51  ;;  %vm4358_vm4 = vweird.f32 %v2788_v40  ;;  %v13838_v22 = vadd.f32 1.0, %v7305_v48  ;;  %v2319_v26 = vsel %vm2247_vm10, %v1881_v24, %v2099_v19  ;;  %v5661_v24 = vpop.permute.xlu2 %5660 }
 0x461   : > { %vm13842_vm6 = vcmp.eq.f32.partialorder %v4362_v34, 8.507059e+37  ;;  %v13846_v45 = vsub.f32 %v591_v11, %v925_v13  ;;  %v924_v3 = vmul.f32 114.0, %v15430_v9  ;;  %v5117_v5 = vmul.f32 1.442695, %v4937_v39 }
 0x462   : > { %16690 = vst [vmem:[#allocation43_spill] sm:$0xff] %v13836_v28  ;;  %v7307_v38 = vpop.eup %7306  ;;  %v4365_v2 = vor.u32 1.1754944e-38, %v4364_v37  ;;  %vm4343_vm13 = vweird.f32 %v13808_v14  ;;  %vm13851_vm12 = vcmp.eq.f32.partialorder %v4347_v55, 8.507059e+37  ;;  %7310 = vrcp.f32 %v13838_v22 }
 0x463   : > { %16693 = vst [vmem:[#allocation75_spill] sm:$0xff] %v13846_v45  ;;  %v7309_v19 = vpop.eup %7308  ;;  %v1260_v48 = vfloor.f32 %v1151_v33  ;;  %v4354_v34 = vmul.f32 %v7307_v38, %v2788_v40  ;;  %v4350_v11 = vor.u32 1.1754944e-38, %v4349_v52  ;;  %v4332_v13 = vand.u32 2147483647, %v13838_v22 }
 0x464   : > { %v1150_v39 = vmul.f32 %v7680_v57, %v13846_v45  ;;  %v4339_v37 = vmul.f32 %v7309_v19, %v13808_v14  ;;  %v13860_v9 = vsub.f32 %v590_v42, %v924_v3  ;;  %v4334_v55 = vand.u32 2147483648, %v13838_v22 }
 0x465   : > { %v4355_v28 = vsub.f32 1.0, %v4354_v34  ;;  %vm4359_vm3 = vweird.f32 %v7307_v38  ;;  %7312 = vpow2.f32 %v5117_v5  ;;  %v5919_v61 = vmul.f32 %v5661_v24, %v11581_v47  ;;  %v16700_v34 = vld [vmem:[#allocation48_spill] sm:$0xff]  ;;  %v5611_v5 = vpop.permute.xlu1 %5610  ;;  %v16716_v24 = vld [vmem:[#allocation94_spill] sm:$0xff] }
 0x466   : > { %16696 = vst [vmem:[#allocation76_spill] sm:$0xff] %v13860_v9  ;;  %v1259_v59 = vfloor.f32 %v1150_v39  ;;  %v4340_v33 = vsub.f32 1.0, %v4339_v37  ;;  %vm4344_vm8 = vweird.f32 %v7309_v19  ;;  %vm4328_vm9 = vweird.f32 %v13838_v22  ;;  %vm13874_vm7 = vmor %vm4358_vm4, %vm4359_vm3 }
 0x467   : > { %v13865_v52 = vmul.f32 3.0, %v1260_v48  ;;  %v16698_v45 = vfloor.f32 %v13790_v29  ;;  %v4356_v3 = vmul.f32 %v7307_v38, %v4355_v28  ;;  %v1435_v46 = vsub.f32 %v16700_v34, %v16699_v30  ;;  %vm13886_vm0 = vmor %vm4343_vm13, %vm4344_vm8 }
 0x468   : > { %v7311_v21 = vpop.eup %7310  ;;  %v4341_v39 = vmul.f32 %v7309_v19, %v4340_v33  ;;  %v1149_v37 = vmul.f32 %v7680_v57, %v13860_v9  ;;  %vm13880_vm15 = vcmp.eq.f32.partialorder %v4332_v13, 8.507059e+37  ;;  %vm16707_vm5 = vcmp.ge.s32.totalorder %v7672_v53, 5  ;;  %v7484_v33 = vld [vmem:[%s7632_s20 + $0x1e8] sm:$0xff] }
 0x469   : > { %16697 = vst [vmem:[#allocation38_spill] sm:$0xff] %v13865_v52  ;;  %v2242_v42 = vsel %vm2137_vm2, %v1260_v48, %v16698_v45  ;;  %v4335_v45 = vor.u32 1.1754944e-38, %v4334_v55  ;;  %v4357_v28 = vadd.f32 %v7307_v38, %v4356_v3  ;;  %v4324_v40 = vmul.f32 %v7311_v21, %v13838_v22  ;;  %v16708_v3 = vld [vmem:[#allocation56_spill] sm:$0xff] }
 0x46a   : > { %v6028_v48 = vsel %vm16707_vm5, %v5919_v61, %v11581_v47  ;;  %v4927_v13 = vsel %vm9206_vm14, %v7484_v33, 0.0  ;;  %v13897_v34 = vmul.f32 3.0, %v1259_v59  ;;  %v4342_v55 = vadd.f32 %v7309_v19, %v4341_v39 }
 0x46b   : > { %vm1653_vm1 = vcmp.lt.f32.partialorder %v1435_v46, 1.5  ;;  %v5909_v14 = vmul.f32 %v5611_v5, %v16708_v3  ;;  %v7313_v9 = vpop.eup %7312  ;;  %v4361_v18 = vsel %vm13874_vm7, %v7307_v38, %v4357_v28  ;;  %v16709_v52 = vfloor.f32 %v13802_v54  ;;  %v16717_v28 = vld [vmem:[#allocation81_spill] sm:$0xff]  ;;  %vm16721_vm7 = vmmov %vm16707_vm5 }
 0x46c   : > { %v4325_v47 = vsub.f32 1.0, %v4324_v40  ;;  %vm4329_vm11 = vweird.f32 %v7311_v21  ;;  %v13908_v61 = vsel %vm13842_vm6, %v4365_v2, %v4361_v18  ;;  %v4346_v39 = vsel %vm13886_vm0, %v7309_v19, %v4342_v55  ;;  %v7485_v40 = vld [vmem:[%s7632_s20 + $0x1e0] sm:$0xff] }
 0x46d   : > { %v2241_v0 = vsel %vm2137_vm2, %v1259_v59, %v16709_v52  ;;  %v5264_v33 = vmul.f32 %v7313_v9, %v2319_v26  ;;  %vm1544_vm4 = vcmp.lt.f32.partialorder %v1435_v46, 0.5  ;;  %v4532_v5 = vmul.f32 1.05, %v13908_v61  ;;  %5825 = vperm.xlu2 %6761, %v13908_v61   ;;  %vm13924_vm6 = vmor %vm4328_vm9, %vm4329_vm11 }
 0x46e   : > { %v13916_v54 = vsel %vm13851_vm12, %v4350_v11, %v4346_v39  ;;  %v4326_v59 = vmul.f32 %v7311_v21, %v4325_v47  ;;  %v1762_v2 = vsel %vm1653_vm1, 78.0, %v15732_v43  ;;  %vm16713_vm13 = vcmp.lt.s32.totalorder %v7672_v53, 4  ;;  %v5606_v47 = vpop.permute.xlu0 %5605 }
 0x46f   : > { %16710 = vst [vmem:[#allocation78_spill] sm:$0xff] %v13916_v54  ;;  %v4531_v18 = vmul.f32 1.05, %v13916_v54  ;;  %5820 = vperm.xlu1 %6760, %v13916_v54   ;;  %v6139_v9 = vsel %vm16713_vm13, %v5264_v33, %v6028_v48  ;;  %v1980_v26 = vsel %vm1653_vm1, 115.0, %v15733_v10  ;;  %v5097_v25 = vmul.f32 1.442695, %v4927_v13  ;;  %vm16725_vm0 = vmmov %vm16713_vm13 }
 0x470   : > { %v6706_v51 = vadd.f32 -0.025, %v4532_v5  ;;  %v1258_v19 = vfloor.f32 %v1149_v37  ;;  %v4327_v11 = vadd.f32 %v7311_v21, %v4326_v59  ;;  %vm16714_vm12 = vcmp.lt.s32.totalorder %v7672_v53, 2 }
 0x471   : > { %v6248_v52 = vsel %vm16714_vm12, %v11665_v36, %v6139_v9  ;;  %vm16715_vm3 = vcmask 695296   ;;  %v1871_v22 = vsel %vm1544_vm4, 102.0, %v1762_v2  ;;  %7314 = vpow2.f32 %v5097_v25  ;;  %v261_v9 = vld [vmem:[%s7632_s20 + $0x348] sm:$0xff]  ;;  %vm16727_vm1 = vmmov %vm16714_vm12 }
 0x472   : > { %6358 = vst.msk [vmem:[%s9279_s23 + $0x238] sm:$0xff] %vm16715_vm3, %v6248_v52  ;;  %v1434_v30 = vsub.f32 %v16717_v28, %v16716_v24  ;;  %v4926_v48 = vsel %vm9206_vm14, %v7485_v40, 0.0  ;;  %v6705_v37 = vadd.f32 -0.025, %v4531_v18  ;;  %v4331_v13 = vsel %vm13924_vm6, %v7311_v21, %v4327_v11  ;;  %v262_v18 = vld [vmem:[%s7632_s20 + $0x350] sm:$0xff]  ;;  %v16723_v28 = vld [vmem:[#allocation85_spill] sm:$0xff]  ;;  %vm16728_vm11 = vmmov %vm16715_vm3 }
 0x473   : > { %v2089_v36 = vsel %vm1544_vm4, 74.0, %v1980_v26  ;;  %v5095_v55 = vmul.f32 1.442695, %v4926_v48  ;;  %v4750_v39 = vadd.f32 %v6706_v51, %v2242_v42  ;;  %v13948_v33 = vsel %vm13880_vm15, %v4335_v45, %v4331_v13  ;;  %v263_v42 = vld [vmem:[%s7632_s20 + $0x358] sm:$0xff]  ;;  %vm16724_vm15 = vmmov %vm16707_vm5 }
 0x474   : > { %16718 = vst [vmem:[#allocation46_spill] sm:$0xff] %v13948_v33  ;;  %vm1543_vm8 = vcmp.lt.f32.partialorder %v1434_v30, 0.5  ;;  %vm1652_vm9 = vcmp.lt.f32.partialorder %v1434_v30, 1.5  ;;  %v13950_v5 = vmul.f32 3.0, %v1258_v19  ;;  %v16720_v59 = vfloor.f32 %v13811_v35  ;;  %5815 = vperm.xlu0 %6759, %v13948_v33   ;;  %v16722_v35 = vld [vmem:[#allocation50_spill] sm:$0xff]  ;;  %vm16730_vm6 = vmmov %vm16725_vm0 }
 0x475   : > { %v1761_v46 = vsel %vm1652_vm9, 78.0, %v15732_v43  ;;  %v1979_v21 = vsel %vm1652_vm9, 115.0, %v15733_v10  ;;  %v2309_v29 = vsel %vm2247_vm10, %v1871_v22, %v2089_v36  ;;  %v6018_v45 = vsel %vm16721_vm7, %v5909_v14, %v16708_v3  ;;  %vm16732_vm13 = vmmov %vm16727_vm1 }
 0x476   : > { %16719 = vst [vmem:[#allocation40_spill] sm:$0xff] %v13950_v5  ;;  %v2240_v2 = vsel %vm2137_vm2, %v1258_v19, %v16720_v59  ;;  %7316 = vpow2.f32 %v5095_v55  ;;  %v5908_v38 = vmul.f32 %v5606_v47, %v16722_v35  ;;  %v4749_v26 = vadd.f32 %v6705_v37, %v2241_v0  ;;  %v16726_v47 = vld [vmem:[#allocation59_spill] sm:$0xff]  ;;  %vm16733_vm12 = vmmov %vm16715_vm3 }
 0x477   : > { %v1870_v25 = vsel %vm1543_vm8, 102.0, %v1761_v46  ;;  %v2088_v51 = vsel %vm1543_vm8, 74.0, %v1979_v21  ;;  %v374_v19 = vadd.s32 856, %v7619_v4  ;;  %v7315_v11 = vpop.eup %7314  ;;  %v13971_v52 = vmul.f32 16.0, %v4750_v39  ;;  %v7486_v21 = vld [vmem:[%s7632_s20 + $0x250] sm:$0xff]  ;;  %vm16738_vm8 = vmmov %vm16721_vm7 }
 0x478   : > { %v6600_v24 = vmul.f32 -1.442695, %v263_v42  ;;  %v6599_v22 = vmul.f32 -1.442695, %v262_v18  ;;  %v1448_v40 = vsub.f32 %v16723_v28, %v11735_v6  ;;  %v4530_v3 = vmul.f32 1.05, %v13948_v33 }
 0x479   : > { %v5254_v14 = vmul.f32 %v7315_v11, %v2309_v29  ;;  %v484_v0 = vadd.s32 %v7625_v8, %v374_v19  ;;  %v6598_v48 = vmul.f32 -1.442695, %v261_v9  ;;  %v2308_v30 = vsel %vm2247_vm10, %v1870_v25, %v2088_v51  ;;  %v7487_v33 = vld [vmem:[%s7632_s20 + $0x200] sm:$0xff] }
 0x47a   : > { %v6017_v37 = vsel %vm16724_vm15, %v5908_v38, %v16722_v35  ;;  %7318 = vpow2.f32 %v6600_v24  ;;  %v373_v13 = vadd.s32 848, %v7619_v4  ;;  %vm1666_vm5 = vcmp.lt.f32.partialorder %v1448_v40, 1.5 }
 0x47b   : > { %v6129_v6 = vsel %vm16725_vm0, %v5254_v14, %v6018_v45  ;;  %v595_v36 = vcvt.s32.f32 %v484_v0  ;;  %7320 = vpow2.f32 %v6599_v22  ;;  %v372_v46 = vadd.s32 840, %v7619_v4  ;;  %v16731_v22 = vld [vmem:[#allocation63_spill] sm:$0xff] }
 0x47c   : > { %v7317_v55 = vpop.eup %7316  ;;  %v6238_v39 = vsel %vm16727_vm1, %v16726_v47, %v6129_v6  ;;  %v483_v59 = vadd.s32 %v7625_v8, %v373_v13  ;;  %v4940_v42 = vsel %vm9206_vm14, %v7486_v21, 0.0  ;;  %v6704_v18 = vadd.f32 -0.025, %v4530_v3 }
 0x47d   : > { %6348 = vst.msk [vmem:[%s9279_s23 + $0x1e8] sm:$0xff] %vm16728_vm11, %v6238_v39  ;;  %v5253_v29 = vmul.f32 %v7317_v55, %v2308_v30  ;;  %v13996_v45 = vmul.f32 %v7647_v32, %v595_v36  ;;  %7322 = vpow2.f32 %v6598_v48  ;;  %v482_v38 = vadd.s32 %v7625_v8, %v372_v46 }
 0x47e   : > { %v594_v35 = vcvt.s32.f32 %v483_v59  ;;  %vm1557_vm4 = vcmp.lt.f32.partialorder %v1448_v40, 0.5  ;;  %v1775_v9 = vsel %vm1666_vm5, 78.0, %v15732_v43  ;;  %v14001_v25 = vmul.f32 16.0, %v4749_v26  ;;  %v5676_v26 = vpop.permute.xlu2 %5675 }
 0x47f   : > { %v6128_v51 = vsel %vm16730_vm6, %v5253_v29, %v6017_v37  ;;  %v820_v19 = vfloor.f32 %v13996_v45  ;;  %v5123_v11 = vmul.f32 1.442695, %v4940_v42  ;;  %v593_v14 = vcvt.s32.f32 %v482_v38  ;;  %v16734_v29 = vld [vmem:[#allocation93_spill] sm:$0xff]  ;;  %v16735_v45 = vld [vmem:[#allocation55_spill] sm:$0xff] }
 0x480   : > { %16729 = vst [vmem:[#allocation49_spill] sm:$0xff] %v14001_v25  ;;  %v7319_v24 = vpop.eup %7318  ;;  %v6237_v28 = vsel %vm16732_vm13, %v16731_v22, %v6128_v51  ;;  %v14010_v3 = vmul.f32 %v7647_v32, %v594_v35  ;;  %v1993_v0 = vsel %vm1666_vm5, 115.0, %v15733_v10  ;;  %v4748_v30 = vadd.f32 %v6704_v18, %v2240_v2 }
 0x481   : > { %v7321_v48 = vpop.eup %7320  ;;  %6347 = vst.msk [vmem:[%s9279_s23 + $0x1e0] sm:$0xff] %vm16733_vm12, %v6237_v28  ;;  %v929_v37 = vmul.f32 114.0, %v820_v19  ;;  %v2791_v13 = vadd.f32 1.0, %v7319_v24  ;;  %v1884_v6 = vsel %vm1557_vm4, 102.0, %v1775_v9  ;;  %v14021_v39 = vmul.f32 %v7647_v32, %v593_v14 }
 0x482   : > { %v15441_v55 = vfloor.f32 %v14010_v3  ;;  %v14018_v47 = vadd.f32 1.0, %v7321_v48  ;;  %7324 = vpow2.f32 %v5123_v11  ;;  %v2102_v2 = vsel %vm1557_vm4, 74.0, %v1993_v0 }
 0x483   : > { %v7323_v59 = vpop.eup %7322  ;;  %v14023_v46 = vsub.f32 %v595_v36, %v929_v37  ;;  %7326 = vrcp.f32 %v2791_v13  ;;  %v5922_v21 = vmul.f32 %v5676_v26, %v11779_v50  ;;  %v4407_v42 = vand.u32 2147483647, %v2791_v13 }
 0x484   : > { %v928_v18 = vmul.f32 114.0, %v15441_v55  ;;  %7328 = vrcp.f32 %v14018_v47  ;;  %v14032_v38 = vsub.f32 %v16735_v45, %v16734_v29  ;;  %v4409_v36 = vand.u32 2147483648, %v2791_v13 }
 0x485   : > { %v1154_v9 = vmul.f32 %v7680_v57, %v14023_v46  ;;  %v4392_v51 = vand.u32 2147483647, %v14018_v47  ;;  %v4394_v40 = vand.u32 2147483648, %v14018_v47  ;;  %v14038_v11 = vmul.f32 16.0, %v4748_v30 }
 0x486   : > { %v14040_v24 = vsub.f32 %v594_v35, %v928_v18  ;;  %v15440_v22 = vfloor.f32 %v14021_v39  ;;  %v14043_v28 = vadd.f32 1.0, %v7323_v59  ;;  %vm4403_vm3 = vweird.f32 %v2791_v13 }
 0x487   : > { %16736 = vst [vmem:[#allocation48_spill] sm:$0xff] %v14038_v11  ;;  %v1263_v0 = vfloor.f32 %v1154_v9  ;;  %v2322_v26 = vsel %vm2247_vm10, %v1884_v6, %v2102_v2  ;;  %v6031_v48 = vsel %vm16738_vm8, %v5922_v21, %v11779_v50  ;;  %vm14050_vm9 = vcmp.eq.f32.partialorder %v4407_v42, 8.507059e+37 }
 0x488   : > { %16737 = vst [vmem:[#allocation56_spill] sm:$0xff] %v14040_v24  ;;  %v7325_v37 = vpop.eup %7324  ;;  %vm4388_vm7 = vweird.f32 %v14018_v47  ;;  %v927_v35 = vmul.f32 114.0, %v15440_v22  ;;  %7330 = vrcp.f32 %v14043_v28  ;;  %v4410_v59 = vor.u32 1.1754944e-38, %v4409_v36 }
 0x489   : > { %v7327_v30 = vpop.eup %7326  ;;  %vm14058_vm15 = vcmp.eq.f32.partialorder %v4392_v51, 8.507059e+37  ;;  %v4395_v2 = vor.u32 1.1754944e-38, %v4394_v40  ;;  %vm1547_vm0 = vcmp.lt.f32.partialorder %v14032_v38, 0.5  ;;  %v14065_v42 = vmul.f32 %v7680_v57, %v14040_v24 }
 0x48a   : > { %v7329_v50 = vpop.eup %7328  ;;  %v4399_v21 = vmul.f32 %v7327_v30, %v2791_v13  ;;  %v14067_v18 = vsub.f32 %v593_v14, %v927_v35  ;;  %vm4373_vm5 = vweird.f32 %v14043_v28  ;;  %v14070_v45 = vmul.f32 3.0, %v1263_v0 }
 0x48b   : > { %v14074_v9 = vsel %vm2137_vm2, %v1263_v0, %v820_v19  ;;  %v4384_v36 = vmul.f32 %v7329_v50, %v14018_v47  ;;  %v4377_v51 = vand.u32 2147483647, %v14043_v28  ;;  %vm4404_vm1 = vweird.f32 %v7327_v30  ;;  %v5626_v47 = vpop.permute.xlu1 %5625 }
 0x48c   : > { %16743 = vst [vmem:[#allocation94_spill] sm:$0xff] %v14067_v18  ;;  %v4400_v40 = vsub.f32 1.0, %v4399_v21  ;;  %vm4389_vm11 = vweird.f32 %v7329_v50  ;;  %v4379_v22 = vand.u32 2147483648, %v14043_v28  ;;  %v14081_v35 = vmul.f32 %v7680_v57, %v14067_v18  ;;  %vm14090_vm6 = vmor %vm4403_vm3, %vm4404_vm1 }
 0x48d   : > { %v4385_v14 = vsub.f32 1.0, %v4384_v36  ;;  %v5267_v55 = vmul.f32 %v7325_v37, %v2322_v26  ;;  %vm1656_vm4 = vcmp.lt.f32.partialorder %v14032_v38, 1.5  ;;  %v1262_v0 = vfloor.f32 %v14065_v42  ;;  %vm14101_vm12 = vmor %vm4388_vm7, %vm4389_vm11  ;;  %v16757_v38 = vld [vmem:[#allocation68_spill] sm:$0xff] }
 0x48e   : > { %v7331_v11 = vpop.eup %7330  ;;  %v4401_v19 = vmul.f32 %v7327_v30, %v4400_v40  ;;  %v1765_v25 = vsel %vm1656_vm4, 78.0, %v15732_v43  ;;  %v4930_v21 = vsel %vm9206_vm14, %v7487_v33, 0.0  ;;  %vm16746_vm13 = vcmp.lt.s32.totalorder %v7672_v53, 4 }
 0x48f   : > { %v4386_v18 = vmul.f32 %v7329_v50, %v4385_v14  ;;  %v4369_v26 = vmul.f32 %v7331_v11, %v14043_v28  ;;  %v6142_v37 = vsel %vm16746_vm13, %v5267_v55, %v6031_v48  ;;  %v1983_v42 = vsel %vm1656_vm4, 115.0, %v15733_v10 }
 0x490   : > { %v4402_v40 = vadd.f32 %v7327_v30, %v4401_v19  ;;  %vm14105_vm3 = vcmp.eq.f32.partialorder %v4377_v51, 8.507059e+37  ;;  %v4380_v13 = vor.u32 1.1754944e-38, %v4379_v22  ;;  %vm16751_vm8 = vcmp.lt.s32.totalorder %v7672_v53, 2 }
 0x491   : > { %v6251_v14 = vsel %vm16751_vm8, %v11878_v12, %v6142_v37  ;;  %v4387_v55 = vadd.f32 %v7329_v50, %v4386_v18  ;;  %v1261_v48 = vfloor.f32 %v14081_v35  ;;  %v4370_v19 = vsub.f32 1.0, %v4369_v26  ;;  %v16753_v26 = vld [vmem:[#allocation67_spill] sm:$0xff]  ;;  %v16754_v37 = vld [vmem:[#allocation101_spill] sm:$0xff] }
 0x492   : > { %vm4374_vm1 = vweird.f32 %v7331_v11  ;;  %vm16752_vm4 = vcmask 695296   ;;  %v4406_v54 = vsel %vm14090_vm6, %v7327_v30, %v4402_v40  ;;  %v1874_v51 = vsel %vm1547_vm0, 102.0, %v1765_v25  ;;  %vm16762_vm6 = vmmov %vm16746_vm13 }
 0x493   : > { %6361 = vst.msk [vmem:[%s9279_s23 + $0x250] sm:$0xff] %vm16752_vm4, %v6251_v14  ;;  %v2092_v22 = vsel %vm1547_vm0, 74.0, %v1983_v42  ;;  %v5103_v5 = vmul.f32 1.442695, %v4930_v21  ;;  %v14123_v12 = vsel %vm14050_vm9, %v4410_v59, %v4406_v54  ;;  %v4391_v18 = vsel %vm14101_vm12, %v7329_v50, %v4387_v55  ;;  %vm14137_vm9 = vmor %vm4373_vm5, %vm4374_vm1  ;;  %v7488_v50 = vld [vmem:[%s7632_s20 + $0x1f8] sm:$0xff] }
 0x494   : > { %v4371_v35 = vmul.f32 %v7331_v11, %v4370_v19  ;;  %v1437_v36 = vsub.f32 %v16754_v37, %v16753_v26  ;;  %v4535_v30 = vmul.f32 1.05, %v14123_v12  ;;  %5840 = vperm.xlu2 %6761, %v14123_v12   ;;  %v14133_v25 = vsel %vm14058_vm15, %v4395_v2, %v4391_v18  ;;  %v264_v19 = vld [vmem:[%s7632_s20 + $0x360] sm:$0xff]  ;;  %v5621_v26 = vpop.permute.xlu0 %5620  ;;  %vm16764_vm13 = vmmov %vm16751_vm8 }
 0x495   : > { %7332 = vpow2.f32 %v5103_v5  ;;  %v5912_v24 = vmul.f32 %v5626_v47, %v16757_v38  ;;  %v4534_v29 = vmul.f32 1.05, %v14133_v25  ;;  %5835 = vperm.xlu1 %6760, %v14133_v25   ;;  %v4929_v21 = vsel %vm9206_vm14, %v7488_v50, 0.0  ;;  %v5691_v50 = vpop.permute.xlu2 %5690  ;;  %vm16765_vm12 = vmmov %vm16752_vm4 }
 0x496   : > { %v4372_v59 = vadd.f32 %v7331_v11, %v4371_v35  ;;  %vm1546_vm7 = vcmp.lt.f32.partialorder %v1437_v36, 0.5  ;;  %vm1655_vm0 = vcmp.lt.f32.partialorder %v1437_v36, 1.5  ;;  %v6709_v6 = vadd.f32 -0.025, %v4535_v30  ;;  %v16761_v36 = vld [vmem:[#allocation99_spill] sm:$0xff]  ;;  %vm16769_vm4 = vmmov %vm16762_vm6 }
 0x497   : > { %v1764_v2 = vsel %vm1655_vm0, 78.0, %v15732_v43  ;;  %v1982_v28 = vsel %vm1655_vm0, 115.0, %v15733_v10  ;;  %v14149_v5 = vmul.f32 3.0, %v1262_v0  ;;  %v16758_v42 = vfloor.f32 %v14010_v3 }
 0x498   : > { %v14155_v14 = vmul.f32 3.0, %v1261_v48  ;;  %v4376_v55 = vsel %vm14137_vm9, %v7331_v11, %v4372_v59  ;;  %v2312_v18 = vsel %vm2247_vm10, %v1874_v51, %v2092_v22  ;;  %vm16759_vm15 = vcmp.ge.s32.totalorder %v7672_v53, 5  ;;  %vm16771_vm9 = vmmov %vm16764_vm13 }
 0x499   : > { %v2244_v40 = vsel %vm2137_vm2, %v1262_v0, %v16758_v42  ;;  %v14162_v47 = vsel %vm14105_vm3, %v4380_v13, %v4376_v55  ;;  %v6021_v3 = vsel %vm16759_vm15, %v5912_v24, %v16757_v38  ;;  %v5101_v35 = vmul.f32 1.442695, %v4929_v21  ;;  %vm16766_vm3 = vmmov %vm16759_vm15  ;;  %v7489_v55 = vld [vmem:[%s7632_s20 + $0x268] sm:$0xff] }
 0x49a   : > { %v6708_v0 = vadd.f32 -0.025, %v4534_v29  ;;  %5830 = vperm.xlu0 %6759, %v14162_v47   ;;  %v1873_v37 = vsel %vm1546_vm7, 102.0, %v1764_v2  ;;  %v2091_v11 = vsel %vm1546_vm7, 74.0, %v1982_v28  ;;  %v375_v33 = vadd.s32 864, %v7619_v4  ;;  %vm16772_vm7 = vmmov %vm16765_vm12 }
 0x49b   : > { %v7333_v13 = vpop.eup %7332  ;;  %v4753_v30 = vadd.f32 %v6709_v6, %v14074_v9  ;;  %7334 = vpow2.f32 %v5101_v35  ;;  %v6601_v51 = vmul.f32 -1.442695, %v264_v19  ;;  %v1451_v22 = vsub.f32 %v11905_v62, %v11960_v15  ;;  %v16763_v6 = vld [vmem:[#allocation61_spill] sm:$0xff]  ;;  %vm16774_vm15 = vmmov %vm16766_vm3 }
 0x49c   : > { %v16760_v54 = vfloor.f32 %v14021_v39  ;;  %v4533_v24 = vmul.f32 1.05, %v14162_v47  ;;  %v5257_v29 = vmul.f32 %v7333_v13, %v2312_v18  ;;  %v5911_v59 = vmul.f32 %v5621_v26, %v16761_v36  ;;  %v16767_v26 = vld [vmem:[#allocation106_spill] sm:$0xff] }
 0x49d   : > { %v485_v4 = vadd.s32 %v7625_v8, %v375_v33  ;;  %7336 = vpow2.f32 %v6601_v51  ;;  %vm1560_vm5 = vcmp.lt.f32.partialorder %v1451_v22, 0.5  ;;  %vm1669_vm11 = vcmp.lt.f32.partialorder %v1451_v22, 1.5 }
 0x49e   : > { %v2243_v38 = vsel %vm2137_vm2, %v1261_v48, %v16760_v54  ;;  %v4752_v9 = vadd.f32 %v6708_v0, %v2244_v40  ;;  %v6132_v62 = vsel %vm16762_vm6, %v5257_v29, %v6021_v3  ;;  %v2311_v15 = vsel %vm2247_vm10, %v1873_v37, %v2091_v11  ;;  %v16768_v0 = vld [vmem:[#allocation71_spill] sm:$0xff]  ;;  %v7490_v11 = vld [vmem:[%s7632_s20 + $0x218] sm:$0xff] }
 0x49f   : > { %v1778_v39 = vsel %vm1669_vm11, 78.0, %v15732_v43  ;;  %v14188_v48 = vmul.f32 16.0, %v4753_v30  ;;  %v6241_v8 = vsel %vm16764_vm13, %v16763_v6, %v6132_v62  ;;  %v596_v2 = vcvt.s32.f32 %v485_v4 }
 0x4a0   : > { %v1996_v28 = vsel %vm1669_vm11, 115.0, %v15733_v10  ;;  %v6707_v21 = vadd.f32 -0.025, %v4533_v24  ;;  %6351 = vst.msk [vmem:[%s9279_s23 + $0x200] sm:$0xff] %vm16765_vm12, %v6241_v8  ;;  %v6020_v42 = vsel %vm16766_vm3, %v5911_v59, %v16761_v36  ;;  %v1887_v40 = vsel %vm1560_vm5, 102.0, %v1778_v39  ;;  %v16770_v39 = vld [vmem:[#allocation66_spill] sm:$0xff]  ;;  %vm16780_vm12 = vmmov %vm16769_vm4 }
 0x4a1   : > { %v4943_v19 = vsel %vm9206_vm14, %v7489_v55, 0.0  ;;  %v7335_v18 = vpop.eup %7334  ;;  %v14204_v3 = vmul.f32 %v7647_v32, %v596_v2  ;;  %v1441_v37 = vsub.f32 %v16768_v0, %v16767_v26  ;;  %v4933_v33 = vsel %vm9206_vm14, %v7490_v11, 0.0  ;;  %v5641_v32 = vpop.permute.xlu1 %5640  ;;  %v7491_v0 = vld [vmem:[%s7632_s20 + $0x210] sm:$0xff] }
 0x4a2   : > { %v5129_v35 = vmul.f32 1.442695, %v4943_v19  ;;  %v5256_v13 = vmul.f32 %v7335_v18, %v2311_v15  ;;  %v2105_v30 = vsel %vm1560_vm5, 74.0, %v1996_v28  ;;  %v5925_v51 = vmul.f32 %v5691_v50, %v12001_v17  ;;  %v16775_v18 = vld [vmem:[#allocation79_spill] sm:$0xff]  ;;  %vm16777_vm5 = vmmov %vm16766_vm3 }
 0x4a3   : > { %v5109_v54 = vmul.f32 1.442695, %v4933_v33  ;;  %v7337_v24 = vpop.eup %7336  ;;  %v821_v29 = vfloor.f32 %v14204_v3  ;;  %vm1550_vm8 = vcmp.lt.f32.partialorder %v1441_v37, 0.5  ;;  %vm1659_vm1 = vcmp.lt.f32.partialorder %v1441_v37, 1.5 }
 0x4a4   : > { %7338 = vpow2.f32 %v5129_v35  ;;  %v6131_v36 = vsel %vm16769_vm4, %v5256_v13, %v6020_v42  ;;  %v14216_v59 = vadd.f32 1.0, %v7337_v24  ;;  %v1768_v4 = vsel %vm1659_vm1, 78.0, %v15732_v43  ;;  %v16773_v42 = vld [vmem:[#allocation110_spill] sm:$0xff]  ;;  %v16776_v35 = vld [vmem:[#allocation65_spill] sm:$0xff] }
 0x4a5   : > { %v1986_v22 = vsel %vm1659_vm1, 115.0, %v15733_v10  ;;  %v14220_v62 = vmul.f32 16.0, %v4752_v9  ;;  %v14222_v15 = vadd.f32 %v6707_v21, %v2243_v38  ;;  %v6240_v6 = vsel %vm16771_vm9, %v16770_v39, %v6131_v36  ;;  %vm16783_vm1 = vmmov %vm16772_vm7 }
 0x4a6   : > { %v930_v8 = vmul.f32 114.0, %v821_v29  ;;  %6350 = vst.msk [vmem:[%s9279_s23 + $0x1f8] sm:$0xff] %vm16772_vm7, %v6240_v6  ;;  %7340 = vrcp.f32 %v14216_v59  ;;  %v1877_v28 = vsel %vm1550_vm8, 102.0, %v1768_v4  ;;  %v2095_v50 = vsel %vm1550_vm8, 74.0, %v1986_v22  ;;  %v7492_v6 = vld [vmem:[%s7632_s20 + $0x280] sm:$0xff]  ;;  %vm16782_vm8 = vmmov %vm16771_vm9 }
 0x4a7   : > { %v5915_v55 = vmul.f32 %v5641_v32, %v16773_v42  ;;  %v4422_v38 = vand.u32 2147483647, %v14216_v59  ;;  %v2325_v21 = vsel %vm2247_vm10, %v1887_v40, %v2105_v30  ;;  %7342 = vpow2.f32 %v5109_v54  ;;  %vm16784_vm7 = vmmov %vm16780_vm12 }
 0x4a8   : > { %v14233_v9 = vsub.f32 %v596_v2, %v930_v8  ;;  %vm4418_vm0 = vweird.f32 %v14216_v59  ;;  %v6034_v19 = vsel %vm16774_vm15, %v5925_v51, %v12001_v17  ;;  %v1440_v26 = vsub.f32 %v16776_v35, %v16775_v18  ;;  %v5636_v51 = vpop.permute.xlu0 %5635  ;;  %v5706_v18 = vpop.permute.xlu2 %5705  ;;  %vm16788_vm15 = vmmov %vm16782_vm8 }
 0x4a9   : > { %v4932_v2 = vsel %vm9206_vm14, %v7491_v0, 0.0  ;;  %v4424_v40 = vand.u32 2147483648, %v14216_v59  ;;  %v2315_v33 = vsel %vm2247_vm10, %v1877_v28, %v2095_v50  ;;  %v6024_v30 = vsel %vm16777_vm5, %v5915_v55, %v16773_v42 }
 0x4aa   : > { %v7339_v37 = vpop.eup %7338  ;;  %v14249_v11 = vmul.f32 %v7680_v57, %v14233_v9  ;;  %v5107_v13 = vmul.f32 1.442695, %v4932_v2  ;;  %vm1549_vm11 = vcmp.lt.f32.partialorder %v1440_v26, 0.5  ;;  %vm1658_vm6 = vcmp.lt.f32.partialorder %v1440_v26, 1.5 }
 0x4ab   : > { %v5270_v17 = vmul.f32 %v7339_v37, %v2325_v21  ;;  %vm14257_vm13 = vcmp.eq.f32.partialorder %v4422_v38, 8.507059e+37  ;;  %v1767_v57 = vsel %vm1658_vm6, 78.0, %v15732_v43  ;;  %v1985_v24 = vsel %vm1658_vm6, 115.0, %v15733_v10  ;;  %v16781_v38 = vld [vmem:[#allocation72_spill] sm:$0xff]  ;;  %vm16791_vm6 = vmmov %vm16783_vm1 }
 0x4ac   : > { %7344 = vpow2.f32 %v5107_v13  ;;  %v1454_v32 = vsub.f32 %v12110_v44, %v12152_v60  ;;  %v7341_v36 = vpop.eup %7340  ;;  %v1876_v22 = vsel %vm1549_vm11, 102.0, %v1767_v57  ;;  %v2094_v39 = vsel %vm1549_vm11, 74.0, %v1985_v24 }
 0x4ad   : > { %v6145_v4 = vsel %vm16780_vm12, %v5270_v17, %v6034_v19  ;;  %v4946_v8 = vsel %vm9206_vm14, %v7492_v6, 0.0  ;;  %v7343_v28 = vpop.eup %7342  ;;  %v1264_v50 = vfloor.f32 %v14249_v11  ;;  %v4414_v42 = vmul.f32 %v7341_v36, %v14216_v59  ;;  %v16786_v11 = vld [vmem:[#allocation118_spill] sm:$0xff]  ;;  %v16787_v17 = vld [vmem:[#allocation112_spill] sm:$0xff] }
 0x4ae   : > { %v4425_v55 = vor.u32 1.1754944e-38, %v4424_v40  ;;  %v5914_v21 = vmul.f32 %v5636_v51, %v16781_v38  ;;  %vm4419_vm3 = vweird.f32 %v7341_v36  ;;  %v6254_v44 = vsel %vm16782_vm8, %v12124_v1, %v6145_v4  ;;  %v16785_v1 = vld [vmem:[#allocation80_spill] sm:$0xff] }
 0x4af   : > { %v5260_v60 = vmul.f32 %v7343_v28, %v2315_v33  ;;  %v2314_v19 = vsel %vm2247_vm10, %v1876_v22, %v2094_v39  ;;  %v4415_v35 = vsub.f32 1.0, %v4414_v42  ;;  %6364 = vst.msk [vmem:[%s9279_s23 + $0x268] sm:$0xff] %vm16783_vm1, %v6254_v44  ;;  %vm1563_vm4 = vcmp.lt.f32.partialorder %v1454_v32, 0.5  ;;  %vm14296_vm11 = vmor %vm4418_vm0, %vm4419_vm3 }
 0x4b0   : > { %vm1672_vm9 = vcmp.lt.f32.partialorder %v1454_v32, 1.5  ;;  %v5135_v26 = vmul.f32 1.442695, %v4946_v8  ;;  %v1444_v40 = vsub.f32 %v16786_v11, %v16785_v1  ;;  %v6023_v57 = vsel %vm16777_vm5, %v5914_v21, %v16781_v38  ;;  %v7493_v8 = vld [vmem:[%s7632_s20 + $0x230] sm:$0xff]  ;;  %vm16792_vm0 = vmmov %vm16784_vm7  ;;  %v5656_v32 = vpop.permute.xlu1 %5655  ;;  %v16797_v1 = vld [vmem:[#allocation83_spill] sm:$0xff] }
 0x4b1   : > { %v6135_v0 = vsel %vm16784_vm7, %v5260_v60, %v6024_v30  ;;  %v1781_v2 = vsel %vm1672_vm9, 78.0, %v15732_v43  ;;  %v1999_v37 = vsel %vm1672_vm9, 115.0, %v15733_v10  ;;  %v4416_v13 = vmul.f32 %v7341_v36, %v4415_v35  ;;  %v16793_v60 = vld [vmem:[#allocation73_spill] sm:$0xff]  ;;  %vm16794_vm3 = vmmov %vm16788_vm15 }
 0x4b2   : > { %v7345_v33 = vpop.eup %7344  ;;  %v6244_v51 = vsel %vm16788_vm15, %v16787_v17, %v6135_v0  ;;  %v5928_v30 = vmul.f32 %v5706_v18, %v12207_v41  ;;  %v1890_v22 = vsel %vm1563_vm4, 102.0, %v1781_v2  ;;  %v2108_v39 = vsel %vm1563_vm4, 74.0, %v1999_v37  ;;  %v5651_v37 = vpop.permute.xlu0 %5650  ;;  %vm16795_vm4 = vmmov %vm16777_vm5 }
 0x4b3   : > { %6354 = vst.msk [vmem:[%s9279_s23 + $0x218] sm:$0xff] %vm16791_vm6, %v6244_v51  ;;  %v5259_v4 = vmul.f32 %v7345_v33, %v2314_v19  ;;  %7346 = vpow2.f32 %v5135_v26  ;;  %v4417_v6 = vadd.f32 %v7341_v36, %v4416_v13  ;;  %vm1553_vm12 = vcmp.lt.f32.partialorder %v1444_v40, 0.5  ;;  %vm16800_vm9 = vmmov %vm16792_vm0 }
 0x4b4   : > { %vm1662_vm8 = vcmp.lt.f32.partialorder %v1444_v40, 1.5  ;;  %v4936_v59 = vsel %vm9206_vm14, %v7493_v8, 0.0  ;;  %v14316_v26 = vmul.f32 3.0, %v1264_v50  ;;  %v2328_v2 = vsel %vm2247_vm10, %v1890_v22, %v2108_v39  ;;  %v7494_v40 = vld [vmem:[%s7632_s20 + $0x228] sm:$0xff]  ;;  %vm16801_vm7 = vmmov %vm16794_vm3 }
 0x4b5   : > { %v6134_v28 = vsel %vm16792_vm0, %v5259_v4, %v6023_v57  ;;  %v1771_v42 = vsel %vm1662_vm8, 78.0, %v15732_v43  ;;  %v1989_v38 = vsel %vm1662_vm8, 115.0, %v15733_v10  ;;  %v5115_v21 = vmul.f32 1.442695, %v4936_v59  ;;  %vm16802_vm15 = vmmov %vm16795_vm4 }
 0x4b6   : > { %v4421_v44 = vsel %vm14296_vm11, %v7341_v36, %v4417_v6  ;;  %v6243_v19 = vsel %vm16794_vm3, %v16793_v60, %v6134_v28  ;;  %v1880_v18 = vsel %vm1553_vm12, 102.0, %v1771_v42  ;;  %v2098_v35 = vsel %vm1553_vm12, 74.0, %v1989_v38  ;;  %v5721_v38 = vpop.permute.xlu2 %5720  ;;  %vm16803_vm6 = vmmov %vm16783_vm1 }
 0x4b7   : > { %v14320_v0 = vsel %vm14257_vm13, %v4425_v55, %v4421_v44  ;;  %6353 = vst.msk [vmem:[%s9279_s23 + $0x210] sm:$0xff] %vm16783_vm1, %v6243_v19  ;;  %7348 = vpow2.f32 %v5115_v21  ;;  %v14330_v36 = vsel %vm2137_vm2, %v1264_v50, %v821_v29  ;;  %v6037_v54 = vsel %vm16795_vm4, %v5928_v30, %v12207_v41  ;;  %v16796_v55 = vld [vmem:[#allocation86_spill] sm:$0xff]  ;;  %v16798_v29 = vld [vmem:[#allocation77_spill] sm:$0xff]  ;;  %vm16804_vm12 = vmmov %vm16795_vm4 }
 0x4b8   : > { %5845 = vperm.xlu0 %6759, %v14320_v0   ;;  %v1443_v11 = vsub.f32 %v16797_v1, %v16796_v55  ;;  %v4935_v33 = vsel %vm9206_vm14, %v7494_v40, 0.0  ;;  %v2318_v3 = vsel %vm2247_vm10, %v1880_v18, %v2098_v35  ;;  %v5918_v50 = vmul.f32 %v5656_v32, %v16798_v29  ;;  %v16799_v41 = vld [vmem:[#allocation125_spill] sm:$0xff]  ;;  %vm16805_vm8 = vmmov %vm16792_vm0  ;;  %v16807_v1 = vld [vmem:[#allocation96_spill] sm:$0xff] }
 0x4b9   : > { %v7347_v13 = vpop.eup %7346  ;;  %v5113_v17 = vmul.f32 1.442695, %v4935_v33  ;;  %v1457_v51 = vsub.f32 %v12327_v49, %v12373_v27  ;;  %v5917_v30 = vmul.f32 %v5651_v37, %v16799_v41  ;;  %v14348_v24 = vmul.f32 1.05, %v14320_v0  ;;  %v7495_v49 = vld [vmem:[%s7632_s20 + $0x298] sm:$0xff]  ;;  %v7496_v33 = vld [vmem:[%s7632_s20 + $0x248] sm:$0xff]  ;;  %vm16810_vm0 = vmmov %vm16794_vm3 }
 0x4ba   : > { %v5273_v57 = vmul.f32 %v7347_v13, %v2328_v2  ;;  %vm1552_vm2 = vcmp.lt.f32.partialorder %v1443_v11, 0.5  ;;  %vm1661_vm13 = vcmp.lt.f32.partialorder %v1443_v11, 1.5  ;;  %v4949_v27 = vsel %vm9206_vm14, %v7495_v49, 0.0  ;;  %v5671_v2 = vpop.permute.xlu1 %5670  ;;  %v16808_v11 = vld [vmem:[#allocation90_spill] sm:$0xff]  ;;  %vm16811_vm3 = vmmov %vm16783_vm1 }
 0x4bb   : > { %v1770_v4 = vsel %vm1661_vm13, 78.0, %v15732_v43  ;;  %v1988_v22 = vsel %vm1661_vm13, 115.0, %v15733_v10  ;;  %7350 = vpow2.f32 %v5113_v17  ;;  %v6027_v42 = vsel %vm16802_vm15, %v5918_v50, %v16798_v29  ;;  %v16809_v29 = vld [vmem:[#allocation120_spill] sm:$0xff]  ;;  %vm16816_vm13 = vmmov %vm16804_vm12 }
 0x4bc   : > { %v6148_v39 = vsel %vm16800_vm9, %v5273_v57, %v6037_v54  ;;  %v1879_v6 = vsel %vm1552_vm2, 102.0, %v1770_v4  ;;  %v2097_v8 = vsel %vm1552_vm2, 74.0, %v1988_v22  ;;  %vm1566_vm5 = vcmp.lt.f32.partialorder %v1457_v51, 0.5  ;;  %v16806_v54 = vld [vmem:[#allocation127_spill] sm:$0xff]  ;;  %vm16815_vm2 = vmmov %vm16805_vm8 }
 0x4bd   : > { %v7349_v59 = vpop.eup %7348  ;;  %v6257_v28 = vsel %vm16801_vm7, %v12298_v63, %v6148_v39  ;;  %vm1675_vm11 = vcmp.lt.f32.partialorder %v1457_v51, 1.5  ;;  %v6026_v32 = vsel %vm16804_vm12, %v5917_v30, %v16799_v41  ;;  %v2317_v63 = vsel %vm2247_vm10, %v1879_v6, %v2097_v8  ;;  %v16812_v41 = vld [vmem:[#allocation91_spill] sm:$0xff]  ;;  %v16813_v39 = vld [vmem:[#allocation89_spill] sm:$0xff]  ;;  %v16814_v6 = vld [vmem:[#allocation84_spill] sm:$0xff] }
 0x4be   : > { %6367 = vst.msk [vmem:[%s9279_s23 + $0x280] sm:$0xff] %vm16803_vm6, %v6257_v28  ;;  %v5263_v21 = vmul.f32 %v7349_v59, %v2318_v3  ;;  %v1784_v44 = vsel %vm1675_vm11, 78.0, %v15732_v43  ;;  %v2002_v60 = vsel %vm1675_vm11, 115.0, %v15733_v10  ;;  %v5141_v35 = vmul.f32 1.442695, %v4949_v27  ;;  %vm16818_vm9 = vmmov %vm16810_vm0 }
 0x4bf   : > { %v1893_v19 = vsel %vm1566_vm5, 102.0, %v1784_v44  ;;  %v2111_v18 = vsel %vm1566_vm5, 74.0, %v2002_v60  ;;  %v5931_v55 = vmul.f32 %v5721_v38, %v16806_v54  ;;  %v1447_v40 = vsub.f32 %v16808_v11, %v16807_v1  ;;  %v16817_v38 = vld [vmem:[#allocation92_spill] sm:$0xff]  ;;  %vm16819_vm7 = vmmov %vm16804_vm12 }
 0x4c0   : > { %v6138_v37 = vsel %vm16805_vm8, %v5263_v21, %v6027_v42  ;;  %v4939_v13 = vsel %vm9206_vm14, %v7496_v33, 0.0  ;;  %v2331_v17 = vsel %vm2247_vm10, %v1893_v19, %v2111_v18  ;;  %7352 = vpow2.f32 %v5141_v35  ;;  %v5666_v42 = vpop.permute.xlu0 %5665  ;;  %vm16820_vm11 = vmmov %vm16811_vm3  ;;  %v7497_v19 = vld [vmem:[%s7632_s20 + $0x240] sm:$0xff]  ;;  %v16822_v1 = vld [vmem:[#allocation128_spill] sm:$0xff] }
 0x4c1   : > { %v7351_v3 = vpop.eup %7350  ;;  %v6247_v50 = vsel %vm16810_vm0, %v16809_v29, %v6138_v37  ;;  %v5121_v51 = vmul.f32 1.442695, %v4939_v13  ;;  %vm1556_vm1 = vcmp.lt.f32.partialorder %v1447_v40, 0.5  ;;  %vm1665_vm4 = vcmp.lt.f32.partialorder %v1447_v40, 1.5  ;;  %v16823_v13 = vld [vmem:[#allocation98_spill] sm:$0xff]  ;;  %v7498_v29 = vld [vmem:[%s7632_s20 + $0x2b0] sm:$0xff]  ;;  %vm16824_vm8 = vmmov %vm16815_vm2 }
 0x4c2   : > { %6357 = vst.msk [vmem:[%s9279_s23 + $0x230] sm:$0xff] %vm16811_vm3, %v6247_v50  ;;  %v5262_v57 = vmul.f32 %v7351_v3, %v2317_v63  ;;  %v5921_v30 = vmul.f32 %v5671_v2, %v16812_v41  ;;  %v1774_v4 = vsel %vm1665_vm4, 78.0, %v15732_v43  ;;  %v1992_v22 = vsel %vm1665_vm4, 115.0, %v15733_v10  ;;  %vm16827_vm4 = vmmov %vm16819_vm7 }
 0x4c3   : > { %7354 = vpow2.f32 %v5121_v51  ;;  %v1446_v8 = vsub.f32 %v16814_v6, %v16813_v39  ;;  %v6040_v27 = vsel %vm16816_vm13, %v5931_v55, %v16806_v54  ;;  %v1883_v59 = vsel %vm1556_vm1, 102.0, %v1774_v4  ;;  %v16821_v55 = vld [vmem:[#allocation132_spill] sm:$0xff]  ;;  %v5736_v51 = vpop.permute.xlu2 %5735  ;;  %v5686_v39 = vpop.permute.xlu1 %5685  ;;  %v16825_v6 = vld [vmem:[#allocation47_spill] sm:$0xff]  ;;  %vm16836_vm13 = vmmov %vm16811_vm3 }
 0x4c4   : > { %v6137_v49 = vsel %vm16815_vm2, %v5262_v57, %v6026_v32  ;;  %v2101_v28 = vsel %vm1556_vm1, 74.0, %v1992_v22  ;;  %v6030_v44 = vsel %vm16819_vm7, %v5921_v30, %v16812_v41  ;;  %v4938_v18 = vsel %vm9206_vm14, %v7497_v19, 0.0  ;;  %vm16826_vm1 = vmmov %vm16815_vm2 }
 0x4c5   : > { %v6246_v21 = vsel %vm16818_vm9, %v16817_v38, %v6137_v49  ;;  %vm1555_vm15 = vcmp.lt.f32.partialorder %v1446_v8, 0.5  ;;  %vm1664_vm5 = vcmp.lt.f32.partialorder %v1446_v8, 1.5  ;;  %v2321_v32 = vsel %vm2247_vm10, %v1883_v59, %v2101_v28  ;;  %vm16832_vm2 = vmmov %vm16810_vm0 }
 0x4c6   : > { %6356 = vst.msk [vmem:[%s9279_s23 + $0x228] sm:$0xff] %vm16820_vm11, %v6246_v21  ;;  %v1773_v60 = vsel %vm1664_vm5, 78.0, %v15732_v43  ;;  %v1991_v63 = vsel %vm1664_vm5, 115.0, %v15733_v10  ;;  %v7353_v35 = vpop.eup %7352  ;;  %v5119_v54 = vmul.f32 1.442695, %v4938_v18  ;;  %v1460_v11 = vsub.f32 %v16822_v1, %v16821_v55  ;;  %v16829_v21 = vld [vmem:[#allocation107_spill] sm:$0xff]  ;;  %vm16838_vm5 = vmmov %vm16827_vm4 }
 0x4c7   : > { %v1882_v2 = vsel %vm1555_vm15, 102.0, %v1773_v60  ;;  %v2100_v37 = vsel %vm1555_vm15, 74.0, %v1991_v63  ;;  %v5276_v40 = vmul.f32 %v7353_v35, %v2331_v17  ;;  %v5920_v3 = vmul.f32 %v5666_v42, %v16823_v13  ;;  %v16828_v42 = vld [vmem:[#allocation134_spill] sm:$0xff]  ;;  %v16831_v63 = vld [vmem:[#allocation95_spill] sm:$0xff]  ;;  %vm16837_vm15 = vmmov %vm16827_vm4 }
 0x4c8   : > { %v2320_v33 = vsel %vm2247_vm10, %v1882_v2, %v2100_v37  ;;  %v4952_v50 = vsel %vm9206_vm14, %v7498_v29, 0.0  ;;  %7356 = vpow2.f32 %v5119_v54  ;;  %vm1569_vm6 = vcmp.lt.f32.partialorder %v1460_v11, 0.5  ;;  %v7499_v18 = vld [vmem:[%s7632_s20 + $0x260] sm:$0xff]  ;;  %v16833_v2 = vld [vmem:[#allocation100_spill] sm:$0xff]  ;;  %v16835_v54 = vld [vmem:[#allocation97_spill] sm:$0xff] }
 0x4c9   : > { %v7355_v57 = vpop.eup %7354  ;;  %vm1678_vm12 = vcmp.lt.f32.partialorder %v1460_v11, 1.5  ;;  %v5147_v41 = vmul.f32 1.442695, %v4952_v50  ;;  %v6151_v17 = vsel %vm16824_vm8, %v5276_v40, %v6040_v27  ;;  %v6029_v27 = vsel %vm16827_vm4, %v5920_v3, %v16823_v13  ;;  %v5681_v40 = vpop.permute.xlu0 %5680  ;;  %vm16842_vm8 = vmmov %vm16810_vm0 }
 0x4ca   : > { %v5266_v30 = vmul.f32 %v7355_v57, %v2321_v32  ;;  %v1787_v4 = vsel %vm1678_vm12, 78.0, %v15732_v43  ;;  %v2005_v22 = vsel %vm1678_vm12, 115.0, %v15733_v10  ;;  %v6260_v8 = vsel %vm16810_vm0, %v16825_v6, %v6151_v17  ;;  %v16830_v32 = vld [vmem:[#allocation103_spill] sm:$0xff]  ;;  %vm16840_vm12 = vmmov %vm16826_vm1 }
 0x4cb   : > { %v1896_v49 = vsel %vm1569_vm6, 102.0, %v1787_v4  ;;  %v2114_v59 = vsel %vm1569_vm6, 74.0, %v2005_v22  ;;  %7358 = vpow2.f32 %v5147_v41  ;;  %6370 = vst.msk [vmem:[%s9279_s23 + $0x298] sm:$0xff] %vm16811_vm3, %v6260_v8  ;;  %v5934_v38 = vmul.f32 %v5736_v51, %v16828_v42  ;;  %v7500_v4 = vld [vmem:[%s7632_s20 + $0x258] sm:$0xff]  ;;  %vm16843_vm0 = vmmov %vm16811_vm3 }
 0x4cc   : > { %v6141_v28 = vsel %vm16826_vm1, %v5266_v30, %v6030_v44  ;;  %v1450_v60 = vsub.f32 %v16830_v32, %v16829_v21  ;;  %v4942_v35 = vsel %vm9206_vm14, %v7499_v18, 0.0  ;;  %v5924_v37 = vmul.f32 %v5686_v39, %v16833_v2  ;;  %v16834_v44 = vld [vmem:[#allocation102_spill] sm:$0xff]  ;;  %v16839_v39 = vld [vmem:[#allocation111_spill] sm:$0xff]  ;;  %vm16844_vm3 = vmmov %vm16826_vm1 }
 0x4cd   : > { %v6250_v19 = vsel %vm16832_vm2, %v16831_v63, %v6141_v28  ;;  %v1449_v55 = vsub.f32 %v16835_v54, %v16834_v44  ;;  %v2334_v1 = vsel %vm2247_vm10, %v1896_v49, %v2114_v59  ;;  %v5127_v11 = vmul.f32 1.442695, %v4942_v35  ;;  %v5751_v28 = vpop.permute.xlu2 %5750  ;;  %v16845_v18 = vld [vmem:[#allocation19_spill] sm:$0xff]  ;;  %v16846_v35 = vld [vmem:[#allocation136_spill] sm:$0xff]  ;;  %vm16848_vm1 = vmmov %vm16832_vm2 }
 0x4ce   : > { %6360 = vst.msk [vmem:[%s9279_s23 + $0x248] sm:$0xff] %vm16836_vm13, %v6250_v19  ;;  %vm1559_vm9 = vcmp.lt.f32.partialorder %v1450_v60, 0.5  ;;  %vm1668_vm7 = vcmp.lt.f32.partialorder %v1450_v60, 1.5  ;;  %v7357_v13 = vpop.eup %7356  ;;  %v6043_v3 = vsel %vm16837_vm15, %v5934_v38, %v16828_v42  ;;  %v6033_v51 = vsel %vm16838_vm5, %v5924_v37, %v16833_v2  ;;  %v16841_v42 = vld [vmem:[#allocation104_spill] sm:$0xff]  ;;  %v16847_v37 = vld [vmem:[#allocation25_spill] sm:$0xff]  ;;  %v7501_v54 = vld [vmem:[%s7632_s20 + $0x2c8] sm:$0xff] }
 0x4cf   : > { %v1777_v29 = vsel %vm1668_vm7, 78.0, %v15732_v43  ;;  %v1995_v50 = vsel %vm1668_vm7, 115.0, %v15733_v10  ;;  %v5265_v57 = vmul.f32 %v7357_v13, %v2320_v33  ;;  %7360 = vpow2.f32 %v5127_v11  ;;  %vm16850_vm4 = vmmov %vm16843_vm0 }
 0x4d0   : > { %v1886_v41 = vsel %vm1559_vm9, 102.0, %v1777_v29  ;;  %vm1558_vm11 = vcmp.lt.f32.partialorder %v1449_v55, 0.5  ;;  %v2104_v30 = vsel %vm1559_vm9, 74.0, %v1995_v50  ;;  %vm1667_vm6 = vcmp.lt.f32.partialorder %v1449_v55, 1.5  ;;  %v16852_v29 = vld [vmem:[#allocation116_spill] sm:$0xff]  ;;  %vm16853_vm9 = vmmov %vm16838_vm5 }
 0x4d1   : > { %v7359_v17 = vpop.eup %7358  ;;  %v4941_v22 = vsel %vm9206_vm14, %v7500_v4, 0.0  ;;  %v5923_v6 = vmul.f32 %v5681_v40, %v16839_v39  ;;  %v6140_v8 = vsel %vm16840_vm12, %v5265_v57, %v6029_v27  ;;  %v1776_v33 = vsel %vm1667_vm6, 78.0, %v15732_v43  ;;  %vm16854_vm15 = vmmov %vm16844_vm3 }
 0x4d2   : > { %v5279_v49 = vmul.f32 %v7359_v17, %v2334_v1  ;;  %v1994_v59 = vsel %vm1667_vm6, 115.0, %v15733_v10  ;;  %v6249_v38 = vsel %vm16842_vm8, %v16841_v42, %v6140_v8  ;;  %v1885_v21 = vsel %vm1558_vm11, 102.0, %v1776_v33  ;;  %v16849_v1 = vld [vmem:[#allocation141_spill] sm:$0xff]  ;;  %vm16856_vm6 = vmmov %vm16848_vm1 }
 0x4d3   : > { %v2103_v32 = vsel %vm1558_vm11, 74.0, %v1994_v59  ;;  %v5125_v60 = vmul.f32 1.442695, %v4941_v22  ;;  %6359 = vst.msk [vmem:[%s9279_s23 + $0x240] sm:$0xff] %vm16843_vm0, %v6249_v38  ;;  %v2324_v63 = vsel %vm2247_vm10, %v1886_v41, %v2104_v30  ;;  %v1463_v2 = vsub.f32 %v16846_v35, %v16845_v18  ;;  %v7502_v33 = vld [vmem:[%s7632_s20 + $0x278] sm:$0xff]  ;;  %v16855_v59 = vld [vmem:[#allocation108_spill] sm:$0xff]  ;;  %vm16857_vm12 = vmmov %vm16843_vm0 }
 0x4d4   : > { %v6154_v27 = vsel %vm16844_vm3, %v5279_v49, %v6043_v3  ;;  %v2323_v19 = vsel %vm2247_vm10, %v1885_v21, %v2103_v32  ;;  %v4955_v55 = vsel %vm9206_vm14, %v7501_v54, 0.0  ;;  %v5937_v11 = vmul.f32 %v5751_v28, %v16849_v1  ;;  %v16851_v3 = vld [vmem:[#allocation117_spill] sm:$0xff] }
 0x4d5   : > { %v6263_v44 = vsel %vm16848_vm1, %v16847_v37, %v6154_v27  ;;  %7362 = vpow2.f32 %v5125_v60  ;;  %v7361_v40 = vpop.eup %7360  ;;  %vm1572_vm2 = vcmp.lt.f32.partialorder %v1463_v2, 0.5  ;;  %vm1681_vm13 = vcmp.lt.f32.partialorder %v1463_v2, 1.5  ;;  %v16859_v18 = vld [vmem:[#allocation109_spill] sm:$0xff]  ;;  %v5696_v2 = vpop.permute.xlu0 %5695 }
 0x4d6   : > { %6373 = vst.msk [vmem:[%s9279_s23 + $0x2b0] sm:$0xff] %vm16850_vm4, %v6263_v44  ;;  %v5153_v13 = vmul.f32 1.442695, %v4955_v55  ;;  %v1453_v50 = vsub.f32 %v16852_v29, %v16851_v3  ;;  %v5269_v57 = vmul.f32 %v7361_v40, %v2324_v63  ;;  %v6032_v41 = vsel %vm16853_vm9, %v5923_v6, %v16839_v39  ;;  %v5701_v6 = vpop.permute.xlu1 %5700  ;;  %v16858_v63 = vld [vmem:[#allocation113_spill] sm:$0xff]  ;;  %v16860_v44 = vld [vmem:[#allocation114_spill] sm:$0xff]  ;;  %v7503_v55 = vld [vmem:[%s7632_s20 + $0x270] sm:$0xff] }
 0x4d7   : > { %v1790_v17 = vsel %vm1681_vm13, 78.0, %v15732_v43  ;;  %v2008_v30 = vsel %vm1681_vm13, 115.0, %v15733_v10  ;;  %v6046_v49 = vsel %vm16838_vm5, %v5937_v11, %v16849_v1  ;;  %v4945_v39 = vsel %vm9206_vm14, %v7502_v33, 0.0  ;;  %vm16866_vm13 = vmmov %vm16844_vm3 }
 0x4d8   : > { %v1899_v4 = vsel %vm1572_vm2, 102.0, %v1790_v17  ;;  %v2117_v22 = vsel %vm1572_vm2, 74.0, %v2008_v30  ;;  %7364 = vpow2.f32 %v5153_v13  ;;  %vm1562_vm7 = vcmp.lt.f32.partialorder %v1453_v50, 0.5  ;;  %v5766_v17 = vpop.permute.xlu2 %5765  ;;  %v16862_v30 = vld [vmem:[#allocation115_spill] sm:$0xff]  ;;  %vm16863_vm2 = vmmov %vm16838_vm5 }
 0x4d9   : > { %v6144_v8 = vsel %vm16854_vm15, %v5269_v57, %v6033_v51  ;;  %vm1671_vm11 = vcmp.lt.f32.partialorder %v1453_v50, 1.5  ;;  %v5133_v51 = vmul.f32 1.442695, %v4945_v39  ;;  %v2337_v32 = vsel %vm2247_vm10, %v1899_v4, %v2117_v22  ;;  %v16861_v50 = vld [vmem:[#allocation119_spill] sm:$0xff]  ;;  %vm16870_vm9 = vmmov %vm16848_vm1 }
 0x4da   : > { %v6253_v28 = vsel %vm16856_vm6, %v16855_v59, %v6144_v8  ;;  %v1780_v42 = vsel %vm1671_vm11, 78.0, %v15732_v43  ;;  %v1998_v38 = vsel %vm1671_vm11, 115.0, %v15733_v10  ;;  %v1452_v35 = vsub.f32 %v16859_v18, %v16858_v63  ;;  %v16865_v59 = vld [vmem:[#allocation3_spill] sm:$0xff]  ;;  %v16869_v18 = vld [vmem:[#allocation70_spill] sm:$0xff]  ;;  %vm16871_vm5 = vmmov %vm16850_vm4 }
 0x4db   : > { %v7363_v21 = vpop.eup %7362  ;;  %6363 = vst.msk [vmem:[%s9279_s23 + $0x260] sm:$0xff] %vm16857_vm12, %v6253_v28  ;;  %v1889_v60 = vsel %vm1562_vm7, 102.0, %v1780_v42  ;;  %v2107_v27 = vsel %vm1562_vm7, 74.0, %v1998_v38  ;;  %7366 = vpow2.f32 %v5133_v51  ;;  %v5927_v54 = vmul.f32 %v5701_v6, %v16860_v44  ;;  %v16864_v6 = vld [vmem:[#allocation34_spill] sm:$0xff]  ;;  %vm16872_vm11 = vmmov %vm16863_vm2 }
 0x4dc   : > { %v5268_v37 = vmul.f32 %v7363_v21, %v2323_v19  ;;  %v4944_v1 = vsel %vm9206_vm14, %v7503_v55, 0.0  ;;  %v2327_v11 = vsel %vm2247_vm10, %v1889_v60, %v2107_v27  ;;  %vm1561_vm8 = vcmp.lt.f32.partialorder %v1452_v35, 0.5  ;;  %v7504_v38 = vld [vmem:[%s7632_s20 + $0x2e0] sm:$0xff]  ;;  %v16868_v60 = vld [vmem:[#allocation123_spill] sm:$0xff]  ;;  %vm16873_vm6 = vmmov %vm16863_vm2 }
 0x4dd   : > { %vm1670_vm0 = vcmp.lt.f32.partialorder %v1452_v35, 1.5  ;;  %v5131_v40 = vmul.f32 1.442695, %v4944_v1  ;;  %v5926_v57 = vmul.f32 %v5696_v2, %v16861_v50  ;;  %v1466_v28 = vsub.f32 %v16865_v59, %v16864_v6  ;;  %v16879_v59 = vld [vmem:[#allocation126_spill] sm:$0xff] }
 0x4de   : > { %v7365_v13 = vpop.eup %7364  ;;  %v6143_v3 = vsel %vm16844_vm3, %v5268_v37, %v6032_v41  ;;  %v1779_v19 = vsel %vm1670_vm0, 78.0, %v15732_v43  ;;  %v1997_v29 = vsel %vm1670_vm0, 115.0, %v15733_v10  ;;  %v6036_v41 = vsel %vm16863_vm2, %v5927_v54, %v16860_v44 }
 0x4df   : > { %v6252_v4 = vsel %vm16848_vm1, %v16862_v30, %v6143_v3  ;;  %v5282_v22 = vmul.f32 %v7365_v13, %v2337_v32  ;;  %v1888_v8 = vsel %vm1561_vm8, 102.0, %v1779_v19  ;;  %v2106_v33 = vsel %vm1561_vm8, 74.0, %v1997_v29  ;;  %v16867_v32 = vld [vmem:[#allocation7_spill] sm:$0xff]  ;;  %vm16874_vm8 = vmmov %vm16844_vm3  ;;  %v7505_v3 = vld [vmem:[%s7632_s20 + $0x290] sm:$0xff] }
 0x4e0   : > { %6362 = vst.msk [vmem:[%s9279_s23 + $0x258] sm:$0xff] %vm16850_vm4, %v6252_v4  ;;  %v2326_v39 = vsel %vm2247_vm10, %v1888_v8, %v2106_v33  ;;  %7368 = vpow2.f32 %v5131_v40  ;;  %v4958_v51 = vsel %vm9206_vm14, %v7504_v38, 0.0  ;;  %v5940_v21 = vmul.f32 %v5766_v17, %v13059_v20  ;;  %v5716_v40 = vpop.permute.xlu1 %5715  ;;  %vm16876_vm3 = vmmov %vm16848_vm1  ;;  %v16878_v33 = vld [vmem:[#allocation13_spill] sm:$0xff]  ;;  %v7506_v38 = vld [vmem:[%s7632_s20 + $0x288] sm:$0xff] }
 0x4e1   : > { %v6157_v42 = vsel %vm16866_vm13, %v5282_v22, %v6046_v49  ;;  %v1456_v27 = vsub.f32 %v16868_v60, %v16867_v32  ;;  %v7367_v63 = vpop.eup %7366  ;;  %vm1575_vm7 = vcmp.lt.f32.partialorder %v1466_v28, 0.5  ;;  %vm1684_vm15 = vcmp.lt.f32.partialorder %v1466_v28, 1.5  ;;  %vm16877_vm1 = vmmov %vm16850_vm4  ;;  %v16880_v28 = vld [vmem:[#allocation124_spill] sm:$0xff] }
 0x4e2   : > { %v6266_v35 = vsel %vm16870_vm9, %v16869_v18, %v6157_v42  ;;  %v5159_v2 = vmul.f32 1.442695, %v4958_v51  ;;  %v5272_v49 = vmul.f32 %v7367_v63, %v2327_v11  ;;  %v6035_v37 = vsel %vm16872_vm11, %v5926_v57, %v16861_v50  ;;  %v16875_v50 = vld [vmem:[#allocation121_spill] sm:$0xff]  ;;  %vm16881_vm4 = vmmov %vm16874_vm8  ;;  %v16882_v18 = vld [vmem:[#allocation122_spill] sm:$0xff] }
 0x4e3   : > { %6376 = vst.msk [vmem:[%s9279_s23 + $0x2c8] sm:$0xff] %vm16871_vm5, %v6266_v35  ;;  %v1793_v44 = vsel %vm1684_vm15, 78.0, %v15732_v43  ;;  %v2011_v54 = vsel %vm1684_vm15, 115.0, %v15733_v10  ;;  %v6049_v1 = vsel %vm16873_vm6, %v5940_v21, %v13059_v20  ;;  %vm1565_vm12 = vcmp.lt.f32.partialorder %v1456_v27, 0.5  ;;  %v5711_v21 = vpop.permute.xlu0 %5710  ;;  %vm16883_vm13 = vmmov %vm16876_vm3 }
 0x4e4   : > { %v1902_v55 = vsel %vm1575_vm7, 102.0, %v1793_v44  ;;  %7370 = vpow2.f32 %v5159_v2  ;;  %v6147_v11 = vsel %vm16874_vm8, %v5272_v49, %v6036_v41  ;;  %v2120_v13 = vsel %vm1575_vm7, 74.0, %v2011_v54  ;;  %v16884_v2 = vld [vmem:[#allocation14_spill] sm:$0xff]  ;;  %vm16885_vm15 = vmmov %vm16877_vm1 }
 0x4e5   : > { %vm1674_vm0 = vcmp.lt.f32.partialorder %v1456_v27, 1.5  ;;  %v4948_v19 = vsel %vm9206_vm14, %v7505_v3, 0.0  ;;  %v6256_v57 = vsel %vm16876_vm3, %v16875_v50, %v6147_v11  ;;  %v5930_v41 = vmul.f32 %v5716_v40, %v16878_v33  ;;  %v16886_v11 = vld [vmem:[#allocation131_spill] sm:$0xff]  ;;  %v5781_v3 = vpop.permute.xlu2 %5780  ;;  %vm16887_vm11 = vmmov %vm16881_vm4 }
 0x4e6   : > { %v7369_v29 = vpop.eup %7368  ;;  %v1783_v17 = vsel %vm1674_vm0, 78.0, %v15732_v43  ;;  %v2001_v20 = vsel %vm1674_vm0, 115.0, %v15733_v10  ;;  %v5139_v30 = vmul.f32 1.442695, %v4948_v19  ;;  %6366 = vst.msk [vmem:[%s9279_s23 + $0x278] sm:$0xff] %vm16877_vm1, %v6256_v57  ;;  %v2340_v6 = vsel %vm2247_vm10, %v1902_v55, %v2120_v13  ;;  %vm16890_vm8 = vmmov %vm16877_vm1 }
 0x4e7   : > { %v5271_v4 = vmul.f32 %v7369_v29, %v2326_v39  ;;  %v1892_v22 = vsel %vm1565_vm12, 102.0, %v1783_v17  ;;  %v2110_v8 = vsel %vm1565_vm12, 74.0, %v2001_v20  ;;  %v1455_v42 = vsub.f32 %v16880_v28, %v16879_v59  ;;  %v7507_v29 = vld [vmem:[%s7632_s20 + $0x2f8] sm:$0xff]  ;;  %vm16889_vm12 = vmmov %vm16876_vm3  ;;  %v16892_v28 = vld [vmem:[#allocation11_spill] sm:$0xff] }
 0x4e8   : > { %7372 = vpow2.f32 %v5139_v30  ;;  %v4947_v51 = vsel %vm9206_vm14, %v7506_v38, 0.0  ;;  %v2330_v32 = vsel %vm2247_vm10, %v1892_v22, %v2110_v8  ;;  %v6039_v60 = vsel %vm16863_vm2, %v5930_v41, %v16878_v33  ;;  %v16888_v17 = vld [vmem:[#allocation37_spill] sm:$0xff]  ;;  %v16891_v41 = vld [vmem:[#allocation44_spill] sm:$0xff]  ;;  %vm16894_vm0 = vmmov %vm16881_vm4 }
 0x4e9   : > { %v6146_v39 = vsel %vm16881_vm4, %v5271_v4, %v6035_v37  ;;  %v5137_v27 = vmul.f32 1.442695, %v4947_v51  ;;  %vm1564_vm9 = vcmp.lt.f32.partialorder %v1455_v42, 0.5  ;;  %vm1673_vm7 = vcmp.lt.f32.partialorder %v1455_v42, 1.5  ;;  %v16893_v42 = vld [vmem:[#allocation130_spill] sm:$0xff]  ;;  %v7508_v51 = vld [vmem:[%s7632_s20 + $0x2a8] sm:$0xff]  ;;  %vm16895_vm3 = vmmov %vm16863_vm2 }
 0x4ea   : > { %v7371_v63 = vpop.eup %7370  ;;  %v6255_v35 = vsel %vm16883_vm13, %v16882_v18, %v6146_v39  ;;  %v1469_v49 = vsub.f32 %v16884_v2, %v13228_v23  ;;  %v1782_v44 = vsel %vm1673_vm7, 78.0, %v15732_v43  ;;  %v2000_v54 = vsel %vm1673_vm7, 115.0, %v15733_v10  ;;  %v5731_v18 = vpop.permute.xlu1 %5730  ;;  %vm16897_vm1 = vmmov %vm16889_vm12 }
 0x4eb   : > { %6365 = vst.msk [vmem:[%s9279_s23 + $0x270] sm:$0xff] %vm16885_vm15, %v6255_v35  ;;  %v5285_v37 = vmul.f32 %v7371_v63, %v2340_v6  ;;  %7374 = vpow2.f32 %v5137_v27  ;;  %v1891_v55 = vsel %vm1564_vm9, 102.0, %v1782_v44  ;;  %v2109_v40 = vsel %vm1564_vm9, 74.0, %v2000_v54  ;;  %v16896_v35 = vld [vmem:[#allocation133_spill] sm:$0xff]  ;;  %vm16898_vm13 = vmmov %vm16890_vm8 }
 0x4ec   : > { %v5929_v13 = vmul.f32 %v5711_v21, %v16886_v11  ;;  %vm1578_vm5 = vcmp.lt.f32.partialorder %v1469_v49, 0.5  ;;  %v2329_v23 = vsel %vm2247_vm10, %v1891_v55, %v2109_v40  ;;  %vm1687_vm6 = vcmp.lt.f32.partialorder %v1469_v49, 1.5  ;;  %vm16899_vm9 = vmmov %vm16895_vm3 }
 0x4ed   : > { %v6160_v19 = vsel %vm16887_vm11, %v5285_v37, %v6049_v1  ;;  %v4961_v50 = vsel %vm9206_vm14, %v7507_v29, 0.0  ;;  %v1796_v30 = vsel %vm1687_vm6, 78.0, %v15732_v43  ;;  %v2014_v4 = vsel %vm1687_vm6, 115.0, %v15733_v10  ;;  %v5726_v37 = vpop.permute.xlu0 %5725  ;;  %vm16900_vm7 = vmmov %vm16894_vm0 }
 0x4ee   : > { %v7373_v57 = vpop.eup %7372  ;;  %v6269_v20 = vsel %vm16889_vm12, %v16888_v17, %v6160_v19  ;;  %v5165_v22 = vmul.f32 1.442695, %v4961_v50  ;;  %v1905_v8 = vsel %vm1578_vm5, 102.0, %v1796_v30  ;;  %v2123_v33 = vsel %vm1578_vm5, 74.0, %v2014_v4  ;;  %vm16904_vm15 = vmmov %vm16897_vm1 }
 0x4ef   : > { %6379 = vst.msk [vmem:[%s9279_s23 + $0x2e0] sm:$0xff] %vm16890_vm8, %v6269_v20  ;;  %v5275_v1 = vmul.f32 %v7373_v57, %v2330_v32  ;;  %v5943_v6 = vmul.f32 %v5781_v3, %v16891_v41  ;;  %v14611_v59 = vadd.f32 -0.025, %v14348_v24  ;;  %v1459_v38 = vsub.f32 %v16893_v42, %v16892_v28  ;;  %v16902_v3 = vld [vmem:[#allocation45_spill] sm:$0xff]  ;;  %v16905_v57 = vld [vmem:[#allocation16_spill] sm:$0xff]  ;;  %v7509_v20 = vld [vmem:[%s7632_s20 + $0x2a0] sm:$0xff] }
 0x4f0   : > { %7376 = vpow2.f32 %v5165_v22  ;;  %v4951_v21 = vsel %vm9206_vm14, %v7508_v51, 0.0  ;;  %v6038_v27 = vsel %vm16895_vm3, %v5929_v13, %v16886_v11  ;;  %v2343_v24 = vsel %vm2247_vm10, %v1905_v8, %v2123_v33  ;;  %v16901_v13 = vld [vmem:[#allocation135_spill] sm:$0xff]  ;;  %vm16906_vm5 = vmmov %vm16890_vm8  ;;  %v16908_v8 = vld [vmem:[#allocation20_spill] sm:$0xff] }
 0x4f1   : > { %v7375_v39 = vpop.eup %7374  ;;  %v6150_v32 = vsel %vm16894_vm0, %v5275_v1, %v6039_v60  ;;  %v5145_v63 = vmul.f32 1.442695, %v4951_v21  ;;  %vm1568_vm4 = vcmp.lt.f32.partialorder %v1459_v38, 0.5  ;;  %vm1677_vm2 = vcmp.lt.f32.partialorder %v1459_v38, 1.5  ;;  %v16907_v1 = vld [vmem:[#allocation22_spill] sm:$0xff]  ;;  %vm16910_vm8 = vmmov %vm16894_vm0 }
 0x4f2   : > { %v6259_v2 = vsel %vm16897_vm1, %v16896_v35, %v6150_v32  ;;  %v5274_v49 = vmul.f32 %v7375_v39, %v2329_v23  ;;  %v6052_v60 = vsel %vm16899_vm9, %v5943_v6, %v16891_v41  ;;  %v1786_v44 = vsel %vm1677_vm2, 78.0, %v15732_v43  ;;  %v16903_v23 = vld [vmem:[#allocation129_spill] sm:$0xff]  ;;  %v16909_v42 = vld [vmem:[#allocation138_spill] sm:$0xff]  ;;  %vm16911_vm0 = vmmov %vm16895_vm3 }
 0x4f3   : > { %6369 = vst.msk [vmem:[%s9279_s23 + $0x290] sm:$0xff] %vm16898_vm13, %v6259_v2  ;;  %v2004_v54 = vsel %vm1677_vm2, 115.0, %v15733_v10  ;;  %7378 = vpow2.f32 %v5145_v63  ;;  %v1895_v40 = vsel %vm1568_vm4, 102.0, %v1786_v44  ;;  %v1458_v19 = vsub.f32 %v16902_v3, %v16901_v13  ;;  %vm16914_vm2 = vmmov %vm16911_vm0 }
 0x4f4   : > { %v6149_v55 = vsel %vm16900_vm7, %v5274_v49, %v6038_v27  ;;  %v2113_v11 = vsel %vm1568_vm4, 74.0, %v2004_v54  ;;  %v5933_v17 = vmul.f32 %v5731_v18, %v16905_v57  ;;  %v4950_v30 = vsel %vm9206_vm14, %v7509_v20, 0.0  ;;  %v16912_v18 = vld [vmem:[#allocation51_spill] sm:$0xff]  ;;  %vm16913_vm4 = vmmov %vm16906_vm5  ;;  %v16918_v20 = vld [vmem:[#allocation137_spill] sm:$0xff] }
 0x4f5   : > { %v6258_v29 = vsel %vm16904_vm15, %v16903_v23, %v6149_v55  ;;  %v2333_v50 = vsel %vm2247_vm10, %v1895_v40, %v2113_v11  ;;  %vm1567_vm11 = vcmp.lt.f32.partialorder %v1458_v19, 0.5  ;;  %vm1676_vm6 = vcmp.lt.f32.partialorder %v1458_v19, 1.5  ;;  %v5746_v11 = vpop.permute.xlu1 %5745  ;;  %vm16915_vm13 = vmmov %vm16900_vm7  ;;  %v16916_v19 = vld [vmem:[#allocation23_spill] sm:$0xff] }
 0x4f6   : > { %v7377_v4 = vpop.eup %7376  ;;  %6368 = vst.msk [vmem:[%s9279_s23 + $0x288] sm:$0xff] %vm16906_vm5, %v6258_v29  ;;  %v5143_v22 = vmul.f32 1.442695, %v4950_v30  ;;  %v1472_v33 = vsub.f32 %v16908_v8, %v16907_v1  ;;  %v1785_v6 = vsel %vm1676_vm6, 78.0, %v15732_v43  ;;  %v2003_v28 = vsel %vm1676_vm6, 115.0, %v15733_v10  ;;  %v16917_v23 = vld [vmem:[#allocation139_spill] sm:$0xff]  ;;  %vm16919_vm9 = vmmov %vm16897_vm1 }
 0x4f7   : > { %v5288_v41 = vmul.f32 %v7377_v4, %v2343_v24  ;;  %v5932_v38 = vmul.f32 %v5726_v37, %v16909_v42  ;;  %v1894_v51 = vsel %vm1567_vm11, 102.0, %v1785_v6  ;;  %v2112_v21 = vsel %vm1567_vm11, 74.0, %v2003_v28  ;;  %v7510_v24 = vld [vmem:[%s7632_s20 + $0x310] sm:$0xff]  ;;  %vm16920_vm7 = vmmov %vm16913_vm4  ;;  %v16921_v8 = vld [vmem:[#allocation26_spill] sm:$0xff] }
 0x4f8   : > { %7380 = vpow2.f32 %v5143_v22  ;;  %vm1581_vm12 = vcmp.lt.f32.partialorder %v1472_v33, 0.5  ;;  %v6042_v27 = vsel %vm16911_vm0, %v5933_v17, %v16905_v57  ;;  %vm1690_vm3 = vcmp.lt.f32.partialorder %v1472_v33, 1.5  ;;  %v5741_v17 = vpop.permute.xlu0 %5740  ;;  %v16923_v6 = vld [vmem:[#allocation57_spill] sm:$0xff]  ;;  %vm16924_vm6 = vmmov %vm16910_vm8 }
 0x4f9   : > { %v7379_v39 = vpop.eup %7378  ;;  %v6163_v32 = vsel %vm16910_vm8, %v5288_v41, %v6052_v60  ;;  %v4964_v63 = vsel %vm9206_vm14, %v7510_v24, 0.0  ;;  %v1799_v49 = vsel %vm1690_vm3, 78.0, %v15732_v43  ;;  %v2017_v37 = vsel %vm1690_vm3, 115.0, %v15733_v10  ;;  %v5796_v60 = vpop.permute.xlu2 %5795  ;;  %v16922_v41 = vld [vmem:[#allocation2_spill] sm:$0xff]  ;;  %vm16928_vm3 = vmmov %vm16913_vm4 }
 0x4fa   : > { %v6272_v35 = vsel %vm16897_vm1, %v16912_v18, %v6163_v32  ;;  %v5278_v2 = vmul.f32 %v7379_v39, %v2333_v50  ;;  %v2332_v44 = vsel %vm2247_vm10, %v1894_v51, %v2112_v21  ;;  %v6041_v54 = vsel %vm16914_vm2, %v5932_v38, %v16909_v42  ;;  %v7511_v50 = vld [vmem:[%s7632_s20 + $0x2c0] sm:$0xff] }
 0x4fb   : > { %6382 = vst.msk [vmem:[%s9279_s23 + $0x2f8] sm:$0xff] %vm16913_vm4, %v6272_v35  ;;  %v1908_v55 = vsel %vm1581_vm12, 102.0, %v1799_v49  ;;  %v5171_v40 = vmul.f32 1.442695, %v4964_v63  ;;  %v2126_v3 = vsel %vm1581_vm12, 74.0, %v2017_v37  ;;  %v1462_v29 = vsub.f32 %v16917_v23, %v16916_v19  ;;  %vm16925_vm12 = vmmov %vm16911_vm0  ;;  %v7512_v63 = vld [vmem:[%s7632_s20 + $0x2b8] sm:$0xff] }
 0x4fc   : > { %v6153_v13 = vsel %vm16915_vm13, %v5278_v2, %v6042_v27  ;;  %v4954_v57 = vsel %vm9206_vm14, %v7511_v50, 0.0  ;;  %v5946_v4 = vmul.f32 %v5796_v60, %v13494_v7  ;;  %v5936_v33 = vmul.f32 %v5746_v11, %v16921_v8  ;;  %v16926_v35 = vld [vmem:[#allocation140_spill] sm:$0xff]  ;;  %vm16927_vm0 = vmmov %vm16897_vm1  ;;  %v7513_v19 = vld [vmem:[%s7632_s20 + $0x328] sm:$0xff] }
 0x4fd   : > { %v6262_v30 = vsel %vm16919_vm9, %v16918_v20, %v6153_v13  ;;  %7382 = vpow2.f32 %v5171_v40  ;;  %v5151_v22 = vmul.f32 1.442695, %v4954_v57  ;;  %vm1571_vm15 = vcmp.lt.f32.partialorder %v1462_v29, 0.5  ;;  %vm16929_vm1 = vmmov %vm16914_vm2  ;;  %v16930_v13 = vld [vmem:[#allocation30_spill] sm:$0xff] }
 0x4fe   : > { %v7381_v1 = vpop.eup %7380  ;;  %6372 = vst.msk [vmem:[%s9279_s23 + $0x2a8] sm:$0xff] %vm16920_vm7, %v6262_v30  ;;  %vm1680_vm5 = vcmp.lt.f32.partialorder %v1462_v29, 1.5  ;;  %v1461_v28 = vsub.f32 %v16923_v6, %v16922_v41  ;;  %v2346_v21 = vsel %vm2247_vm10, %v1908_v55, %v2126_v3  ;;  %v6055_v24 = vsel %vm16925_vm12, %v5946_v4, %v13494_v7  ;;  %v5761_v30 = vpop.permute.xlu1 %5760  ;;  %vm16931_vm13 = vmmov %vm16924_vm6 }
 0x4ff   : > { %v5277_v42 = vmul.f32 %v7381_v1, %v2332_v44  ;;  %v1789_v38 = vsel %vm1680_vm5, 78.0, %v15732_v43  ;;  %v2007_v51 = vsel %vm1680_vm5, 115.0, %v15733_v10  ;;  %7384 = vpow2.f32 %v5151_v22  ;;  %vm16932_vm9 = vmmov %vm16927_vm0 }
 0x500   : > { %v1898_v39 = vsel %vm1571_vm15, 102.0, %v1789_v38  ;;  %v2116_v32 = vsel %vm1571_vm15, 74.0, %v2007_v51  ;;  %vm1570_vm11 = vcmp.lt.f32.partialorder %v1461_v28, 0.5  ;;  %vm1679_vm8 = vcmp.lt.f32.partialorder %v1461_v28, 1.5  ;;  %v5756_v22 = vpop.permute.xlu0 %5755  ;;  %vm16933_vm7 = vmmov %vm16928_vm3  ;;  %v16937_v38 = vld [vmem:[#allocation8_spill] sm:$0xff] }
 0x501   : > { %v6152_v27 = vsel %vm16924_vm6, %v5277_v42, %v6041_v54  ;;  %v4953_v18 = vsel %vm9206_vm14, %v7512_v63, 0.0  ;;  %v1788_v49 = vsel %vm1679_vm8, 78.0, %v15732_v43  ;;  %v2006_v37 = vsel %vm1679_vm8, 115.0, %v15733_v10  ;;  %v5811_v20 = vpop.permute.xlu2 %5810  ;;  %vm16934_vm15 = vmmov %vm16924_vm6  ;;  %v16936_v42 = vld [vmem:[#allocation4_spill] sm:$0xff]  ;;  %v16941_v63 = vld [vmem:[#allocation42_spill] sm:$0xff] }
 0x502   : > { %v6261_v2 = vsel %vm16927_vm0, %v16926_v35, %v6152_v27  ;;  %v5149_v60 = vmul.f32 1.442695, %v4953_v18  ;;  %v2336_v7 = vsel %vm2247_vm10, %v1898_v39, %v2116_v32  ;;  %v6045_v54 = vsel %vm16929_vm1, %v5936_v33, %v16921_v8  ;;  %vm16935_vm5 = vmmov %vm16929_vm1  ;;  %v16940_v39 = vld [vmem:[#allocation27_spill] sm:$0xff]  ;;  %v7514_v27 = vld [vmem:[%s7632_s20 + $0x2d8] sm:$0xff] }
 0x503   : > { %v7383_v44 = vpop.eup %7382  ;;  %6371 = vst.msk [vmem:[%s9279_s23 + $0x2a0] sm:$0xff] %vm16928_vm3, %v6261_v2  ;;  %v1897_v55 = vsel %vm1570_vm11, 102.0, %v1788_v49  ;;  %v1475_v40 = vsub.f32 %v13618_v31, %v13661_v58  ;;  %v5935_v3 = vmul.f32 %v5741_v17, %v16930_v13  ;;  %v4967_v23 = vsel %vm9206_vm14, %v7513_v19, 0.0  ;;  %v16942_v18 = vld [vmem:[#allocation69_spill] sm:$0xff]  ;;  %vm16943_vm6 = vmmov %vm16928_vm3 }
 0x504   : > { %v5291_v11 = vmul.f32 %v7383_v44, %v2346_v21  ;;  %7386 = vpow2.f32 %v5149_v60  ;;  %v2115_v50 = vsel %vm1570_vm11, 74.0, %v2006_v37  ;;  %v5177_v57 = vmul.f32 1.442695, %v4967_v23  ;;  %v16938_v21 = vld [vmem:[#allocation5_spill] sm:$0xff]  ;;  %vm16939_vm11 = vmmov %vm16927_vm0  ;;  %v7515_v23 = vld [vmem:[%s7632_s20 + $0x2d0] sm:$0xff] }
 0x505   : > { %v7385_v29 = vpop.eup %7384  ;;  %vm1584_vm4 = vcmp.lt.f32.partialorder %v1475_v40, 0.5  ;;  %vm1693_vm2 = vcmp.lt.f32.partialorder %v1475_v40, 1.5  ;;  %v2335_v6 = vsel %vm2247_vm10, %v1897_v55, %v2115_v50  ;;  %v6044_v28 = vsel %vm16935_vm5, %v5935_v3, %v16930_v13  ;;  %vm16945_vm3 = vmmov %vm16931_vm13  ;;  %v16946_v50 = vld [vmem:[#allocation6_spill] sm:$0xff] }
 0x506   : > { %v6166_v58 = vsel %vm16931_vm13, %v5291_v11, %v6055_v24  ;;  %v5281_v31 = vmul.f32 %v7385_v29, %v2336_v7  ;;  %v1802_v17 = vsel %vm1693_vm2, 78.0, %v15732_v43  ;;  %v2020_v4 = vsel %vm1693_vm2, 115.0, %v15733_v10  ;;  %vm16947_vm2 = vmmov %vm16932_vm9 }
 0x507   : > { %v6275_v1 = vsel %vm16932_vm9, %v13602_v56, %v6166_v58  ;;  %v1911_v8 = vsel %vm1584_vm4, 102.0, %v1802_v17  ;;  %v2129_v33 = vsel %vm1584_vm4, 74.0, %v2020_v4  ;;  %7388 = vpow2.f32 %v5177_v57  ;;  %vm16948_vm13 = vmmov %vm16943_vm6 }
 0x508   : > { %6385 = vst.msk [vmem:[%s9279_s23 + $0x310] sm:$0xff] %vm16933_vm7, %v6275_v1  ;;  %v6156_v41 = vsel %vm16934_vm15, %v5281_v31, %v6045_v54  ;;  %v1465_v51 = vsub.f32 %v16937_v38, %v16936_v42  ;;  %v5949_v32 = vmul.f32 %v5811_v20, %v16940_v39  ;;  %v4957_v24 = vsel %vm9206_vm14, %v7514_v27, 0.0  ;;  %v16944_v54 = vld [vmem:[#allocation35_spill] sm:$0xff]  ;;  %vm16949_vm9 = vmmov %vm16929_vm1  ;;  %v16955_v27 = vld [vmem:[#allocation9_spill] sm:$0xff] }
 0x509   : > { %v6265_v56 = vsel %vm16939_vm11, %v16938_v21, %v6156_v41  ;;  %v1464_v35 = vsub.f32 %v16942_v18, %v16941_v63  ;;  %v2349_v49 = vsel %vm2247_vm10, %v1911_v8, %v2129_v33  ;;  %v5157_v37 = vmul.f32 1.442695, %v4957_v24  ;;  %v5826_v8 = vpop.permute.xlu2 %5825  ;;  %v5776_v33 = vpop.permute.xlu1 %5775  ;;  %vm16950_vm7 = vmmov %vm16945_vm3  ;;  %v16952_v42 = vld [vmem:[#allocation39_spill] sm:$0xff] }
 0x50a   : > { %v7387_v2 = vpop.eup %7386  ;;  %6375 = vst.msk [vmem:[%s9279_s23 + $0x2c0] sm:$0xff] %vm16943_vm6, %v6265_v56  ;;  %vm1574_vm12 = vcmp.lt.f32.partialorder %v1465_v51, 0.5  ;;  %vm1683_vm8 = vcmp.lt.f32.partialorder %v1465_v51, 1.5  ;;  %v5939_v55 = vmul.f32 %v5761_v30, %v16944_v54  ;;  %v6058_v19 = vsel %vm16929_vm1, %v5949_v32, %v16940_v39  ;;  %v7516_v51 = vld [vmem:[%s7632_s20 + $0x340] sm:$0xff]  ;;  %v5771_v56 = vpop.permute.xlu0 %5770  ;;  %v16953_v39 = vld [vmem:[#allocation36_spill] sm:$0xff]  ;;  %vm16954_vm15 = vmmov %vm16947_vm2 }
 0x50b   : > { %v5280_v60 = vmul.f32 %v7387_v2, %v2335_v6  ;;  %v1792_v44 = vsel %vm1683_vm8, 78.0, %v15732_v43  ;;  %v2010_v7 = vsel %vm1683_vm8, 115.0, %v15733_v10  ;;  %7390 = vpow2.f32 %v5157_v37  ;;  %vm16956_vm5 = vmmov %vm16943_vm6  ;;  %v16957_v2 = vld [vmem:[#allocation88_spill] sm:$0xff] }
 0x50c   : > { %v1901_v40 = vsel %vm1574_vm12, 102.0, %v1792_v44  ;;  %v2119_v11 = vsel %vm1574_vm12, 74.0, %v2010_v7  ;;  %vm1573_vm0 = vcmp.lt.f32.partialorder %v1464_v35, 0.5  ;;  %vm1682_vm4 = vcmp.lt.f32.partialorder %v1464_v35, 1.5  ;;  %vm16959_vm8 = vmmov %vm16945_vm3 }
 0x50d   : > { %v7389_v13 = vpop.eup %7388  ;;  %v6155_v3 = vsel %vm16945_vm3, %v5280_v60, %v6044_v28  ;;  %v4956_v29 = vsel %vm9206_vm14, %v7515_v23, 0.0  ;;  %v1791_v30 = vsel %vm1682_vm4, 78.0, %v15732_v43  ;;  %v2009_v58 = vsel %vm1682_vm4, 115.0, %v15733_v10  ;;  %v16951_v28 = vld [vmem:[#allocation38_spill] sm:$0xff]  ;;  %vm16963_vm4 = vmmov %vm16956_vm5 }
 0x50e   : > { %v6264_v57 = vsel %vm16947_vm2, %v16946_v50, %v6155_v3  ;;  %v5294_v20 = vmul.f32 %v7389_v13, %v2349_v49  ;;  %v2339_v31 = vsel %vm2247_vm10, %v1901_v40, %v2119_v11  ;;  %v6048_v17 = vsel %vm16949_vm9, %v5939_v55, %v16944_v54  ;;  %v16958_v49 = vld [vmem:[#allocation31_spill] sm:$0xff]  ;;  %v7517_v13 = vld [vmem:[%s7632_s20 + $0x2f0] sm:$0xff] }
 0x50f   : > { %6374 = vst.msk [vmem:[%s9279_s23 + $0x2b8] sm:$0xff] %vm16948_vm13, %v6264_v57  ;;  %v1900_v4 = vsel %vm1573_vm0, 102.0, %v1791_v30  ;;  %v5155_v1 = vmul.f32 1.442695, %v4956_v29  ;;  %v2118_v6 = vsel %vm1573_vm0, 74.0, %v2009_v58  ;;  %v1478_v38 = vsub.f32 %v16952_v42, %v16951_v28  ;;  %vm16960_vm0 = vmmov %vm16929_vm1  ;;  %v7518_v28 = vld [vmem:[%s7632_s20 + $0x2e8] sm:$0xff] }
 0x510   : > { %v6169_v41 = vsel %vm16950_vm7, %v5294_v20, %v6058_v19  ;;  %v4970_v21 = vsel %vm9206_vm14, %v7516_v51, 0.0  ;;  %v5938_v24 = vmul.f32 %v5756_v22, %v16955_v27  ;;  %v5952_v35 = vmul.f32 %v5826_v8, %v13908_v61  ;;  %v16961_v19 = vld [vmem:[#allocation41_spill] sm:$0xff]  ;;  %vm16962_vm1 = vmmov %vm16947_vm2 }
 0x511   : > { %v6278_v32 = vsel %vm16954_vm15, %v16953_v39, %v6169_v41  ;;  %7392 = vpow2.f32 %v5155_v1  ;;  %v5183_v63 = vmul.f32 1.442695, %v4970_v21  ;;  %v7391_v18 = vpop.eup %7390  ;;  %vm1587_vm11 = vcmp.lt.f32.partialorder %v1478_v38, 0.5  ;;  %vm16964_vm2 = vmmov %vm16960_vm0  ;;  %v16967_v41 = vld [vmem:[#allocation15_spill] sm:$0xff]  ;;  %v5791_v21 = vpop.permute.xlu1 %5790 }
 0x512   : > { %6388 = vst.msk [vmem:[%s9279_s23 + $0x328] sm:$0xff] %vm16956_vm5, %v6278_v32  ;;  %vm1696_vm6 = vcmp.lt.f32.partialorder %v1478_v38, 1.5  ;;  %v1468_v37 = vsub.f32 %v16958_v49, %v16957_v2  ;;  %v5284_v60 = vmul.f32 %v7391_v18, %v2339_v31  ;;  %v2338_v22 = vsel %vm2247_vm10, %v1900_v4, %v2118_v6  ;;  %v16966_v4 = vld [vmem:[#allocation10_spill] sm:$0xff]  ;;  %vm16969_vm15 = vmmov %vm16962_vm1 }
 0x513   : > { %v1805_v44 = vsel %vm1696_vm6, 78.0, %v15732_v43  ;;  %v2023_v7 = vsel %vm1696_vm6, 115.0, %v15733_v10  ;;  %7394 = vpow2.f32 %v5183_v63  ;;  %v6047_v11 = vsel %vm16960_vm0, %v5938_v24, %v16955_v27  ;;  %v5786_v24 = vpop.permute.xlu0 %5785  ;;  %v16968_v63 = vld [vmem:[#allocation82_spill] sm:$0xff]  ;;  %vm16970_vm5 = vmmov %vm16963_vm4 }
 0x514   : > { %v1914_v54 = vsel %vm1587_vm11, 102.0, %v1805_v44  ;;  %v2132_v55 = vsel %vm1587_vm11, 74.0, %v2023_v7  ;;  %vm1577_vm12 = vcmp.lt.f32.partialorder %v1468_v37, 0.5  ;;  %v6159_v40 = vsel %vm16959_vm8, %v5284_v60, %v6048_v17  ;;  %v16965_v17 = vld [vmem:[#allocation54_spill] sm:$0xff]  ;;  %vm16971_vm11 = vmmov %vm16950_vm7  ;;  %v5841_v7 = vpop.permute.xlu2 %5840 }
 0x515   : > { %vm1686_vm3 = vcmp.lt.f32.partialorder %v1468_v37, 1.5  ;;  %v4960_v3 = vsel %vm9206_vm14, %v7517_v13, 0.0  ;;  %v6268_v23 = vsel %vm16962_vm1, %v16961_v19, %v6159_v40  ;;  %v2352_v30 = vsel %vm2247_vm10, %v1914_v54, %v2132_v55  ;;  %vm16972_vm6 = vmmov %vm16960_vm0  ;;  %v16974_v54 = vld [vmem:[#allocation12_spill] sm:$0xff]  ;;  %v7519_v40 = vld [vmem:[%s7632_s20 + $0x358] sm:$0xff] }
 0x516   : > { %v1795_v29 = vsel %vm1686_vm3, 78.0, %v15732_v43  ;;  %v2013_v50 = vsel %vm1686_vm3, 115.0, %v15733_v10  ;;  %v5163_v57 = vmul.f32 1.442695, %v4960_v3  ;;  %6378 = vst.msk [vmem:[%s9279_s23 + $0x2d8] sm:$0xff] %vm16963_vm4, %v6268_v23  ;;  %v6061_v58 = vsel %vm16964_vm2, %v5952_v35, %v13908_v61  ;;  %v16975_v13 = vld [vmem:[#allocation58_spill] sm:$0xff]  ;;  %vm16977_vm8 = vmmov %vm16963_vm4 }
 0x517   : > { %v7393_v20 = vpop.eup %7392  ;;  %v1904_v31 = vsel %vm1577_vm12, 102.0, %v1795_v29  ;;  %v1467_v1 = vsub.f32 %v16966_v4, %v16965_v17  ;;  %v5942_v6 = vmul.f32 %v5776_v33, %v16967_v41  ;;  %v4959_v42 = vsel %vm9206_vm14, %v7518_v28, 0.0  ;;  %v16976_v3 = vld [vmem:[#allocation52_spill] sm:$0xff]  ;;  %vm16978_vm4 = vmmov %vm16950_vm7  ;;  %v7520_v17 = vld [vmem:[%s7632_s20 + $0x308] sm:$0xff] }
 0x518   : > { %v5283_v8 = vmul.f32 %v7393_v20, %v2338_v22  ;;  %7396 = vpow2.f32 %v5163_v57  ;;  %v2122_v51 = vsel %vm1577_vm12, 74.0, %v2013_v50  ;;  %v5161_v61 = vmul.f32 1.442695, %v4959_v42  ;;  %vm16973_vm12 = vmmov %vm16962_vm1 }
 0x519   : > { %v7395_v38 = vpop.eup %7394  ;;  %vm1576_vm13 = vcmp.lt.f32.partialorder %v1467_v1, 0.5  ;;  %vm1685_vm9 = vcmp.lt.f32.partialorder %v1467_v1, 1.5  ;;  %v2342_v37 = vsel %vm2247_vm10, %v1904_v31, %v2122_v51  ;;  %v6051_v60 = vsel %vm16972_vm6, %v5942_v6, %v16967_v41  ;;  %v16979_v1 = vld [vmem:[#allocation18_spill] sm:$0xff] }
 0x51a   : > { %v6158_v39 = vsel %vm16950_vm7, %v5283_v8, %v6047_v11  ;;  %v5297_v32 = vmul.f32 %v7395_v38, %v2352_v30  ;;  %v1794_v27 = vsel %vm1685_vm9, 78.0, %v15732_v43  ;;  %v2012_v33 = vsel %vm1685_vm9, 115.0, %v15733_v10  ;;  %vm16980_vm9 = vmmov %vm16973_vm12 }
 0x51b   : > { %v6267_v18 = vsel %vm16969_vm15, %v16968_v63, %v6158_v39  ;;  %v1903_v35 = vsel %vm1576_vm13, 102.0, %v1794_v27  ;;  %v2121_v2 = vsel %vm1576_vm13, 74.0, %v2012_v33  ;;  %7398 = vpow2.f32 %v5161_v61  ;;  %vm16981_vm7 = vmmov %vm16970_vm5  ;;  %v5806_v39 = vpop.permute.xlu1 %5805  ;;  %v16984_v33 = vld [vmem:[#allocation21_spill] sm:$0xff] }
 0x51c   : > { %6377 = vst.msk [vmem:[%s9279_s23 + $0x2d0] sm:$0xff] %vm16970_vm5, %v6267_v18  ;;  %v6172_v49 = vsel %vm16971_vm11, %v5297_v32, %v6061_v58  ;;  %v1481_v44 = vsub.f32 %v14023_v46, %v14070_v45  ;;  %v5941_v55 = vmul.f32 %v5771_v56, %v16974_v54  ;;  %v4973_v11 = vsel %vm9206_vm14, %v7519_v40, 0.0  ;;  %vm16982_vm15 = vmmov %vm16964_vm2  ;;  %v16985_v63 = vld [vmem:[#allocation17_spill] sm:$0xff]  ;;  %v16991_v40 = vld [vmem:[#allocation62_spill] sm:$0xff] }
 0x51d   : > { %v6281_v22 = vsel %vm16973_vm12, %v13971_v52, %v6172_v49  ;;  %v1471_v19 = vsub.f32 %v16976_v3, %v16975_v13  ;;  %v2341_v46 = vsel %vm2247_vm10, %v1903_v35, %v2121_v2  ;;  %v5189_v45 = vmul.f32 1.442695, %v4973_v11  ;;  %vm16983_vm5 = vmmov %vm16978_vm4  ;;  %v7521_v35 = vld [vmem:[%s7632_s20 + $0x300] sm:$0xff]  ;;  %v5801_v49 = vpop.permute.xlu0 %5800  ;;  %v16992_v11 = vld [vmem:[#allocation29_spill] sm:$0xff] }
 0x51e   : > { %v7397_v23 = vpop.eup %7396  ;;  %6391 = vst.msk [vmem:[%s9279_s23 + $0x340] sm:$0xff] %vm16977_vm8, %v6281_v22  ;;  %vm1590_vm0 = vcmp.lt.f32.partialorder %v1481_v44, 0.5  ;;  %vm1699_vm3 = vcmp.lt.f32.partialorder %v1481_v44, 1.5  ;;  %v5955_v50 = vmul.f32 %v5841_v7, %v14123_v12  ;;  %v6050_v31 = vsel %vm16964_vm2, %v5941_v55, %v16974_v54  ;;  %vm16987_vm11 = vmmov %vm16980_vm9  ;;  %v16990_v54 = vld [vmem:[#allocation53_spill] sm:$0xff] }
 0x51f   : > { %v5287_v52 = vmul.f32 %v7397_v23, %v2342_v37  ;;  %v1808_v56 = vsel %vm1699_vm3, 78.0, %v15732_v43  ;;  %v2026_v29 = vsel %vm1699_vm3, 115.0, %v15733_v10  ;;  %7400 = vpow2.f32 %v5189_v45  ;;  %v16986_v37 = vld [vmem:[#allocation87_spill] sm:$0xff]  ;;  %vm16989_vm6 = vmmov %vm16981_vm7 }
 0x520   : > { %v1917_v57 = vsel %vm1590_vm0, 102.0, %v1808_v56  ;;  %v2135_v20 = vsel %vm1590_vm0, 74.0, %v2026_v29  ;;  %vm1580_vm1 = vcmp.lt.f32.partialorder %v1471_v19, 0.5  ;;  %vm1689_vm13 = vcmp.lt.f32.partialorder %v1471_v19, 1.5  ;;  %vm16993_vm3 = vmmov %vm16978_vm4  ;;  %v7522_v56 = vld [vmem:[%s7632_s20 + $0x320] sm:$0xff] }
 0x521   : > { %v7399_v30 = vpop.eup %7398  ;;  %v6162_v58 = vsel %vm16978_vm4, %v5287_v52, %v6051_v60  ;;  %v4963_v4 = vsel %vm9206_vm14, %v7520_v17, 0.0  ;;  %v1798_v6 = vsel %vm1689_vm13, 78.0, %v15732_v43  ;;  %v2016_v28 = vsel %vm1689_vm13, 115.0, %v15733_v10  ;;  %v16988_v60 = vld [vmem:[#allocation60_spill] sm:$0xff]  ;;  %vm16996_vm13 = vmmov %vm16989_vm6 }
 0x522   : > { %v6271_v8 = vsel %vm16980_vm9, %v16979_v1, %v6162_v58  ;;  %v5286_v41 = vmul.f32 %v7399_v30, %v2341_v46  ;;  %v2355_v42 = vsel %vm2247_vm10, %v1917_v57, %v2135_v20  ;;  %v6064_v38 = vsel %vm16982_vm15, %v5955_v50, %v14123_v12  ;;  %v16998_v1 = vld [vmem:[#allocation105_spill] sm:$0xff] }
 0x523   : > { %6381 = vst.msk [vmem:[%s9279_s23 + $0x2f0] sm:$0xff] %vm16981_vm7, %v6271_v8  ;;  %v1907_v51 = vsel %vm1580_vm1, 102.0, %v1798_v6  ;;  %v5169_v61 = vmul.f32 1.442695, %v4963_v4  ;;  %v2125_v27 = vsel %vm1580_vm1, 74.0, %v2016_v28  ;;  %v1470_v18 = vsub.f32 %v16985_v63, %v16984_v33  ;;  %vm16994_vm1 = vmmov %vm16964_vm2  ;;  %v16999_v8 = vld [vmem:[#allocation33_spill] sm:$0xff] }
 0x524   : > { %v6161_v32 = vsel %vm16983_vm5, %v5286_v41, %v6050_v31  ;;  %v4962_v2 = vsel %vm9206_vm14, %v7521_v35, 0.0  ;;  %v5945_v44 = vmul.f32 %v5791_v21, %v16988_v60  ;;  %v5944_v55 = vmul.f32 %v5786_v24, %v16990_v54  ;;  %vm16995_vm2 = vmmov %vm16980_vm9  ;;  %v17000_v6 = vld [vmem:[#allocation74_spill] sm:$0xff] }
 0x525   : > { %v6270_v12 = vsel %vm16987_vm11, %v16986_v37, %v6161_v32  ;;  %7402 = vpow2.f32 %v5169_v61  ;;  %v5167_v7 = vmul.f32 1.442695, %v4962_v2  ;;  %v7401_v22 = vpop.eup %7400  ;;  %vm1579_vm12 = vcmp.lt.f32.partialorder %v1470_v18, 0.5  ;;  %vm16997_vm9 = vmmov %vm16994_vm1  ;;  %v5816_v35 = vpop.permute.xlu0 %5815  ;;  %v17002_v2 = vld [vmem:[#allocation64_spill] sm:$0xff] }
 0x526   : > { %6380 = vst.msk [vmem:[%s9279_s23 + $0x2e8] sm:$0xff] %vm16989_vm6, %v6270_v12  ;;  %vm1688_vm8 = vcmp.lt.f32.partialorder %v1470_v18, 1.5  ;;  %v1474_v13 = vsub.f32 %v16992_v11, %v16991_v40  ;;  %v5300_v3 = vmul.f32 %v7401_v22, %v2355_v42  ;;  %v2345_v21 = vsel %vm2247_vm10, %v1907_v51, %v2125_v27  ;;  %v7523_v42 = vld [vmem:[%s7632_s20 + $0x318] sm:$0xff]  ;;  %v5821_v27 = vpop.permute.xlu1 %5820  ;;  %vm17001_vm5 = vmmov %vm16993_vm3  ;;  %v17007_v40 = vld [vmem:[#allocation24_spill] sm:$0xff] }
 0x527   : > { %v1797_v19 = vsel %vm1688_vm8, 78.0, %v15732_v43  ;;  %v2015_v23 = vsel %vm1688_vm8, 115.0, %v15733_v10  ;;  %7404 = vpow2.f32 %v5167_v7  ;;  %v6054_v24 = vsel %vm16994_vm1, %v5945_v44, %v16988_v60  ;;  %vm17003_vm11 = vmmov %vm16995_vm2 }
 0x528   : > { %v1906_v46 = vsel %vm1579_vm12, 102.0, %v1797_v19  ;;  %v2124_v45 = vsel %vm1579_vm12, 74.0, %v2015_v23  ;;  %vm1583_vm0 = vcmp.lt.f32.partialorder %v1474_v13, 0.5  ;;  %v6175_v52 = vsel %vm16993_vm3, %v5300_v3, %v6064_v38  ;;  %vm17004_vm12 = vmmov %vm16993_vm3  ;;  %v7524_v19 = vld [vmem:[%s7632_s20 + $0x338] sm:$0xff] }
 0x529   : > { %vm1692_vm4 = vcmp.lt.f32.partialorder %v1474_v13, 1.5  ;;  %v4966_v29 = vsel %vm9206_vm14, %v7522_v56, 0.0  ;;  %v6284_v50 = vsel %vm16995_vm2, %v14188_v48, %v6175_v52  ;;  %v2344_v31 = vsel %vm2247_vm10, %v1906_v46, %v2124_v45  ;;  %vm17005_vm8 = vmmov %vm16994_vm1  ;;  %v17009_v13 = vld [vmem:[#allocation32_spill] sm:$0xff] }
 0x52a   : > { %v1801_v57 = vsel %vm1692_vm4, 78.0, %v15732_v43  ;;  %v2019_v20 = vsel %vm1692_vm4, 115.0, %v15733_v10  ;;  %v5175_v30 = vmul.f32 1.442695, %v4966_v29  ;;  %6394 = vst.msk [vmem:[%s9279_s23 + $0x358] sm:$0xff] %vm16996_vm13, %v6284_v50  ;;  %v6053_v17 = vsel %vm16997_vm9, %v5944_v55, %v16990_v54  ;;  %v17006_v54 = vld [vmem:[#allocation75_spill] sm:$0xff]  ;;  %vm17012_vm3 = vmmov %vm16989_vm6 }
 0x52b   : > { %v7403_v58 = vpop.eup %7402  ;;  %v1910_v4 = vsel %vm1583_vm0, 102.0, %v1801_v57  ;;  %v1473_v48 = vsub.f32 %v16999_v8, %v16998_v1  ;;  %v5948_v28 = vmul.f32 %v5806_v39, %v17000_v6  ;;  %v4965_v38 = vsel %vm9206_vm14, %v7523_v42, 0.0  ;;  %v17011_v46 = vld [vmem:[#allocation76_spill] sm:$0xff]  ;;  %v17013_v50 = vld [vmem:[#allocation78_spill] sm:$0xff]  ;;  %vm17014_vm13 = vmmov %vm17001_vm5 }
 0x52c   : > { %v5290_v41 = vmul.f32 %v7403_v58, %v2345_v21  ;;  %7406 = vpow2.f32 %v5175_v30  ;;  %v2128_v61 = vsel %vm1583_vm0, 74.0, %v2019_v20  ;;  %v5173_v32 = vmul.f32 1.442695, %v4965_v38  ;;  %vm17008_vm0 = vmmov %vm16995_vm2  ;;  %v17010_v21 = vld [vmem:[#allocation40_spill] sm:$0xff] }
 0x52d   : > { %v7405_v51 = vpop.eup %7404  ;;  %vm1582_vm7 = vcmp.lt.f32.partialorder %v1473_v48, 0.5  ;;  %vm1691_vm15 = vcmp.lt.f32.partialorder %v1473_v48, 1.5  ;;  %v2348_v7 = vsel %vm2247_vm10, %v1910_v4, %v2128_v61  ;;  %v6057_v22 = vsel %vm17005_vm8, %v5948_v28, %v17000_v6  ;;  %vm17015_vm9 = vmmov %vm17005_vm8  ;;  %v7525_v4 = vld [vmem:[%s7632_s20 + $0x330] sm:$0xff] }
 0x52e   : > { %v6165_v33 = vsel %vm17001_vm5, %v5290_v41, %v6054_v24  ;;  %v5289_v63 = vmul.f32 %v7405_v51, %v2344_v31  ;;  %v1800_v18 = vsel %vm1691_vm15, 78.0, %v15732_v43  ;;  %v2018_v39 = vsel %vm1691_vm15, 115.0, %v15733_v10  ;;  %v17016_v8 = vld [vmem:[#allocation28_spill] sm:$0xff]  ;;  %vm17017_vm15 = vmmov %vm17008_vm0 }
 0x52f   : > { %v6274_v37 = vsel %vm17003_vm11, %v17002_v2, %v6165_v33  ;;  %v1909_v12 = vsel %vm1582_vm7, 102.0, %v1800_v18  ;;  %v2127_v60 = vsel %vm1582_vm7, 74.0, %v2018_v39  ;;  %7408 = vpow2.f32 %v5173_v32  ;;  %vm17018_vm5 = vmmov %vm17012_vm3  ;;  %v5836_v32 = vpop.permute.xlu1 %5835  ;;  %v7526_v39 = vld [vmem:[%s7632_s20 + $0x350] sm:$0xff] }
 0x530   : > { %6384 = vst.msk [vmem:[%s9279_s23 + $0x308] sm:$0xff] %vm16989_vm6, %v6274_v37  ;;  %v6164_v44 = vsel %vm17004_vm12, %v5289_v63, %v6053_v17  ;;  %v1477_v55 = vsub.f32 %v17006_v54, %v13897_v34  ;;  %v5947_v3 = vmul.f32 %v5801_v49, %v17009_v13  ;;  %v4969_v23 = vsel %vm9206_vm14, %v7524_v19, 0.0  ;;  %vm17019_vm11 = vmmov %vm17005_vm8  ;;  %v17021_v63 = vld [vmem:[#allocation56_spill] sm:$0xff]  ;;  %v5831_v37 = vpop.permute.xlu0 %5830 }
 0x531   : > { %v6273_v11 = vsel %vm17008_vm0, %v17007_v40, %v6164_v44  ;;  %v1476_v45 = vsub.f32 %v17011_v46, %v17010_v21  ;;  %v2347_v24 = vsel %vm2247_vm10, %v1909_v12, %v2127_v60  ;;  %v5181_v34 = vmul.f32 1.442695, %v4969_v23  ;;  %vm17020_vm6 = vmmov %vm17004_vm12  ;;  %v17022_v12 = vld [vmem:[#allocation43_spill] sm:$0xff]  ;;  %v17024_v44 = vld [vmem:[#allocation46_spill] sm:$0xff] }
 0x532   : > { %v7407_v52 = vpop.eup %7406  ;;  %6383 = vst.msk [vmem:[%s9279_s23 + $0x300] sm:$0xff] %vm17012_vm3, %v6273_v11  ;;  %vm1586_vm1 = vcmp.lt.f32.partialorder %v1477_v55, 0.5  ;;  %vm1695_vm4 = vcmp.lt.f32.partialorder %v1477_v55, 1.5  ;;  %v5951_v57 = vmul.f32 %v5821_v27, %v17013_v50  ;;  %v6056_v17 = vsel %vm17015_vm9, %v5947_v3, %v17009_v13  ;;  %vm17023_vm12 = vmmov %vm17008_vm0  ;;  %v17026_v55 = vld [vmem:[#allocation94_spill] sm:$0xff]  ;;  %v7527_v46 = vld [vmem:[%s7632_s20 + $0x348] sm:$0xff] }
 0x533   : > { %v5293_v56 = vmul.f32 %v7407_v52, %v2348_v7  ;;  %v1804_v49 = vsel %vm1695_vm4, 78.0, %v15732_v43  ;;  %v2022_v29 = vsel %vm1695_vm4, 115.0, %v15733_v10  ;;  %7410 = vpow2.f32 %v5181_v34  ;;  %vm17025_vm8 = vmmov %vm17012_vm3  ;;  %v17029_v52 = vld [vmem:[#allocation49_spill] sm:$0xff] }
 0x534   : > { %v1913_v20 = vsel %vm1586_vm1, 102.0, %v1804_v49  ;;  %v2131_v30 = vsel %vm1586_vm1, 74.0, %v2022_v29  ;;  %vm1585_vm2 = vcmp.lt.f32.partialorder %v1476_v45, 0.5  ;;  %vm1694_vm7 = vcmp.lt.f32.partialorder %v1476_v45, 1.5  ;;  %vm17027_vm4 = vmmov %vm17020_vm6 }
 0x535   : > { %v7409_v58 = vpop.eup %7408  ;;  %v6168_v31 = vsel %vm17014_vm13, %v5293_v56, %v6057_v22  ;;  %v4968_v1 = vsel %vm9206_vm14, %v7525_v4, 0.0  ;;  %v1803_v6 = vsel %vm1694_vm7, 78.0, %v15732_v43  ;;  %v2021_v28 = vsel %vm1694_vm7, 115.0, %v15733_v10  ;;  %vm17031_vm7 = vmmov %vm17018_vm5 }
 0x536   : > { %v6277_v48 = vsel %vm17017_vm15, %v17016_v8, %v6168_v31  ;;  %v5292_v41 = vmul.f32 %v7409_v58, %v2347_v24  ;;  %v2351_v42 = vsel %vm2247_vm10, %v1913_v20, %v2131_v30  ;;  %v6060_v38 = vsel %vm17019_vm11, %v5951_v57, %v17013_v50 }
 0x537   : > { %6387 = vst.msk [vmem:[%s9279_s23 + $0x320] sm:$0xff] %vm17018_vm5, %v6277_v48  ;;  %v1912_v51 = vsel %vm1585_vm2, 102.0, %v1803_v6  ;;  %v5179_v61 = vmul.f32 1.442695, %v4968_v1  ;;  %v2130_v33 = vsel %vm1585_vm2, 74.0, %v2021_v28  ;;  %v1480_v18 = vsub.f32 %v17021_v63, %v14149_v5  ;;  %vm17028_vm2 = vmmov %vm17015_vm9  ;;  %v17034_v28 = vld [vmem:[#allocation48_spill] sm:$0xff] }
 0x538   : > { %v6167_v27 = vsel %vm17020_vm6, %v5292_v41, %v6056_v17  ;;  %v4972_v2 = vsel %vm9206_vm14, %v7526_v39, 0.0  ;;  %v5950_v7 = vmul.f32 %v5816_v35, %v17024_v44  ;;  %v5954_v5 = vmul.f32 %v5836_v32, %v14133_v25  ;;  %vm17030_vm9 = vmmov %vm17023_vm12  ;;  %v7528_v17 = vld [vmem:[%s7632_s20 + $0x360] sm:$0xff]  ;;  %v5846_v6 = vpop.permute.xlu0 %5845 }
 0x539   : > { %v6276_v60 = vsel %vm17023_vm12, %v17022_v12, %v6167_v27  ;;  %7412 = vpow2.f32 %v5179_v61  ;;  %v5187_v22 = vmul.f32 1.442695, %v4972_v2  ;;  %v7411_v54 = vpop.eup %7410  ;;  %vm1589_vm0 = vcmp.lt.f32.partialorder %v1480_v18, 0.5  ;;  %vm17032_vm15 = vmmov %vm17028_vm2 }
 0x53a   : > { %6386 = vst.msk [vmem:[%s9279_s23 + $0x318] sm:$0xff] %vm17025_vm8, %v6276_v60  ;;  %vm1698_vm3 = vcmp.lt.f32.partialorder %v1480_v18, 1.5  ;;  %v1479_v40 = vsub.f32 %v17026_v55, %v14155_v14  ;;  %v5296_v11 = vmul.f32 %v7411_v54, %v2351_v42  ;;  %v2350_v35 = vsel %vm2247_vm10, %v1912_v51, %v2130_v33  ;;  %vm17033_vm6 = vmmov %vm17027_vm4 }
 0x53b   : > { %v1807_v13 = vsel %vm1698_vm3, 78.0, %v15732_v43  ;;  %v2025_v3 = vsel %vm1698_vm3, 115.0, %v15733_v10  ;;  %7414 = vpow2.f32 %v5187_v22  ;;  %v6059_v14 = vsel %vm17028_vm2, %v5950_v7, %v17024_v44  ;;  %vm17035_vm12 = vmmov %vm17030_vm9 }
 0x53c   : > { %v1916_v19 = vsel %vm1589_vm0, 102.0, %v1807_v13  ;;  %v2134_v23 = vsel %vm1589_vm0, 74.0, %v2025_v3  ;;  %vm1588_vm1 = vcmp.lt.f32.partialorder %v1479_v40, 0.5  ;;  %v6171_v21 = vsel %vm17027_vm4, %v5296_v11, %v6060_v38  ;;  %vm17037_vm8 = vmmov %vm17027_vm4 }
 0x53d   : > { %vm1697_vm13 = vcmp.lt.f32.partialorder %v1479_v40, 1.5  ;;  %v4971_v45 = vsel %vm9206_vm14, %v7527_v46, 0.0  ;;  %v6280_v24 = vsel %vm17030_vm9, %v17029_v52, %v6171_v21  ;;  %v2354_v50 = vsel %vm2247_vm10, %v1916_v19, %v2134_v23  ;;  %vm17038_vm0 = vmmov %vm17030_vm9 }
 0x53e   : > { %v1806_v34 = vsel %vm1697_vm13, 78.0, %v15732_v43  ;;  %v2024_v56 = vsel %vm1697_vm13, 115.0, %v15733_v10  ;;  %v5185_v49 = vmul.f32 1.442695, %v4971_v45  ;;  %6390 = vst.msk [vmem:[%s9279_s23 + $0x338] sm:$0xff] %vm17031_vm7, %v6280_v24  ;;  %v6063_v57 = vsel %vm17032_vm15, %v5954_v5, %v14133_v25  ;;  %vm17039_vm3 = vmmov %vm17031_vm7 }
 0x53f   : > { %v7413_v29 = vpop.eup %7412  ;;  %v1915_v20 = vsel %vm1588_vm1, 102.0, %v1806_v34  ;;  %v1482_v30 = vsub.f32 %v14233_v9, %v14316_v26  ;;  %v2133_v31 = vsel %vm1588_vm1, 74.0, %v2024_v56  ;;  %v4974_v4 = vsel %vm9206_vm14, %v7528_v17, 0.0  ;;  %vm17036_vm14 = vmmov %vm17031_vm7 }
 0x540   : > { %v5295_v58 = vmul.f32 %v7413_v29, %v2350_v35  ;;  %7416 = vpow2.f32 %v5185_v49  ;;  %v5953_v8 = vmul.f32 %v5831_v37, %v14162_v47  ;;  %v5191_v25 = vmul.f32 1.442695, %v4974_v4  ;;  %vm17040_vm1 = vmmov %vm17028_vm2 }
 0x541   : > { %v7415_v1 = vpop.eup %7414  ;;  %vm1591_vm5 = vcmp.lt.f32.partialorder %v1482_v30, 0.5  ;;  %vm1700_vm11 = vcmp.lt.f32.partialorder %v1482_v30, 1.5  ;;  %v2353_v38 = vsel %vm2247_vm10, %v1915_v20, %v2133_v31  ;;  %v5956_v32 = vmul.f32 %v5846_v6, %v14320_v0  ;;  %vm17041_vm2 = vmmov %vm17040_vm1 }
 0x542   : > { %v6170_v48 = vsel %vm17033_vm6, %v5295_v58, %v6059_v14  ;;  %v5299_v41 = vmul.f32 %v7415_v1, %v2354_v50  ;;  %v1809_v9 = vsel %vm1700_vm11, 78.0, %v15732_v43  ;;  %v2027_v26 = vsel %vm1700_vm11, 115.0, %v15733_v10  ;;  %vm17042_vm13 = vmmov %vm17038_vm0 }
 0x543   : > { %v6279_v16 = vsel %vm17035_vm12, %v17034_v28, %v6170_v48  ;;  %7418 = vpow2.f32 %v5191_v25  ;;  %v1918_v51 = vsel %vm1591_vm5, 102.0, %v1809_v9  ;;  %v2136_v61 = vsel %vm1591_vm5, 74.0, %v2027_v26  ;;  %vm17043_vm9 = vmmov %vm17039_vm3 }
 0x544   : > { %6389 = vst.msk [vmem:[%s9279_s23 + $0x330] sm:$0xff] %vm17036_vm14, %v6279_v16  ;;  %v6174_v42 = vsel %vm17037_vm8, %v5299_v41, %v6063_v57  ;;  %v4754_v10 = vadd.f32 %v14611_v59, %v14330_v36  ;;  %v4860_v33 = vmul.f32 16.0, %v14222_v15  ;;  %v6062_v63 = vsel %vm17040_vm1, %v5953_v8, %v14162_v47  ;;  %vm17044_vm7 = vmmov %vm17027_vm4 }
 0x545   : > { %v6283_v43 = vsel %vm17038_vm0, %v14220_v62, %v6174_v42  ;;  %v2356_v36 = vsel %vm2247_vm10, %v1918_v51, %v2136_v61  ;;  %v6065_v2 = vsel %vm17041_vm2, %v5956_v32, %v14320_v0  ;;  %vm17045_vm10 = vmmov %vm17038_vm0 }
 0x546   : > { %v7417_v27 = vpop.eup %7416  ;;  %6393 = vst.msk [vmem:[%s9279_s23 + $0x350] sm:$0xff] %vm17039_vm3, %v6283_v43  ;;  %v4863_v39 = vmul.f32 16.0, %v4754_v10  ;;  %vm17046_vm15 = vmmov %vm17039_vm3 }
 0x547   : > { %v5298_v18 = vmul.f32 %v7417_v27, %v2353_v38 }
 0x549   : > { %v7419_v59 = vpop.eup %7418  ;;  %v6173_v62 = vsel %vm17027_vm4, %v5298_v18, %v6062_v63 }
 0x54a   : > { %v6282_v15 = vsel %vm17042_vm13, %v4860_v33, %v6173_v62  ;;  %v5301_v37 = vmul.f32 %v7419_v59, %v2356_v36 }
 0x54b   : > { %6392 = vst.msk [vmem:[%s9279_s23 + $0x348] sm:$0xff] %vm17043_vm9, %v6282_v15 }
 0x54c   : > { %v6176_v47 = vsel %vm17044_vm7, %v5301_v37, %v6065_v2 }
 0x54d   : > { %v6285_v12 = vsel %vm17045_vm10, %v4863_v39, %v6176_v47 }
 0x54e   : > { %6395 = vst.msk [vmem:[%s9279_s23 + $0x360] sm:$0xff] %vm17046_vm15, %v6285_v12 }
 0x54f PF: > { %s11_s10 = sadd.s32 1, %s7567_s10   ;;  %s17047_s6 = smov %s7559_s8 }
 0x550   : > { %p8_p7 = scmp.ge.s32.totalorder %s11_s10, 12   ;;  %s17048_s7 = smov %s7563_s9 }
 0x551   : > { %s17049_s8 = smov %s17052_s11  ;;  %s17050_s9 = smov %s17056_s12 }
 0x552   :  { %10 = sbr.rel (!%p8_p7) target bundleno = 3 (0x3), region = 54 }

</bundles_post_ra>
